<compile_context>
chip_gen: v6e
topology: v6e:2x2x1
jax: 0.10.0
libtpu: 0.0.40
codegen_flags: <defaults>
</compile_context>

<pallas_src>
import jax
import jax.numpy as jnp
from jax.experimental import pallas as pl
from jax.experimental.pallas import tpu as pltpu

LRELU_SLOPE = 0.2
BN_EPS = 1e-5


def _round_up(x, m):
    return (x + m - 1) // m * m


def _cdiv(a, b):
    return (a + b - 1) // b


# ---------------------------------------------------------------------------
# Generation-aware knobs
# ---------------------------------------------------------------------------
def _tpu_generation():
    try:
        kind = jax.devices()[0].device_kind.lower()
    except Exception:
        return 6
    for g in (7, 6, 5, 4):
        if "v%d" % g in kind:
            return g
    return 6


def _vmem_limit_bytes():
    try:
        cap = pltpu.get_tpu_info().vmem_capacity_bytes
    except Exception:
        cap = (64 if _tpu_generation() >= 7 else 128) * 1024 * 1024
    if cap >= 100 * 1024 * 1024:      # v5e / v6e: 128 MiB physical VMEM
        return 64 * 1024 * 1024
    return int(cap * 3 // 4)          # v7x: ~48 MiB of the 64 MiB physical


def _pick_tn(N, gen):
    # v6e/v7x MXUs are 256 wide; v5e is 128 wide.
    if gen >= 6 and N % 256 == 0:
        return 256
    if N % 128 == 0:
        return 128
    return N  # 32/64-channel layers: full-width (masked) stores; see TODO above.


def _pick_tk(K, cap=2048):
    """Largest divisor of K that is a multiple of 128 and <= cap; else full K."""
    if K % 128 != 0:
        return K
    best = 128
    d = K // 128
    for f in range(1, d + 1):
        if d % f == 0 and 128 * f <= cap:
            best = 128 * f
    return best


def _pick_m_tiles(M, gen):
    """Return (num_m, tm, m_pad) with tm a multiple of 8, tm <= cap, num_m*tm >= M."""
    cap = 512 if gen >= 7 else 1024   # v7x has half the VMEM of v5e/v6e
    m8 = _round_up(max(M, 8), 8)
    num_m = max(_cdiv(m8, cap), 1)
    # Give the megacore >= 2 parallel M tiles when it costs no padding rows.
    if num_m == 1 and m8 == M and m8 >= 256 and m8 % 16 == 0:
        num_m = 2
    tm = _round_up(_cdiv(m8, num_m), 8)
    return num_m, tm, num_m * tm


# ---------------------------------------------------------------------------
# Phase-1 kernel: tiled matmul (+ bias + LeakyReLU) or (pre-act + BN partial stats)
# ---------------------------------------------------------------------------
def pallas_matmul(a, b, bias=None, *, emit_stats=False, apply_lrelu=False,
                  out_dtype=jnp.bfloat16):
    """out = act(A @ B (+ bias)); optionally also emit per-M-tile per-channel
    (sum, sum_sq) partial statistics computed from the exact f32 accumulator.

    Returns (out[m_pad, N], psum|None, psumsq|None, (num_m, tm, tn)).
    psum/psumsq have shape [num_m, 8, N]; only row 0 of the middle axis is
    meaningful (padded to 8 sublanes for a clean (8,128)-tiled store).
    """
    M, K = a.shape
    K2, N = b.shape
    assert K == K2
    gen = _tpu_generation()

    tn = _pick_tn(N, gen)
    tk = _pick_tk(K)
    num_m, tm, m_pad = _pick_m_tiles(M, gen)
    nk = K // tk
    nn = N // tn
    multi_k = nk > 1
    has_bias = bias is not None

    a = a.astype(jnp.bfloat16)
    b = b.astype(jnp.bfloat16)
    if m_pad != M:
        # Zero rows contribute 0 to both stats sums -> mean/var stay exact.
        a = jnp.pad(a, ((0, m_pad - M), (0, 0)))
    if has_bias:
        bias = bias.reshape(1, N).astype(jnp.float32)

    def kernel(*refs):
        refs = list(refs)
        acc_ref = refs.pop() if multi_k else None
        a_ref, b_ref = refs[0], refs[1]
        idx = 2
        bias_ref = None
        if has_bias:
            bias_ref = refs[idx]
            idx += 1
        o_ref = refs[idx]
        idx += 1
        psum_ref = psq_ref = None
        if emit_stats:
            psum_ref, psq_ref = refs[idx], refs[idx + 1]

        def finalize(acc):
            y = (acc + bias_ref[...]) if has_bias else acc
            if apply_lrelu:
                y = jnp.where(y >= 0, y, LRELU_SLOPE * y)
            o_ref[...] = y.astype(o_ref.dtype)
            if emit_stats:
                # Per-tile per-channel partial sums from the f32 accumulator.
                s = jnp.sum(acc, axis=0, keepdims=True)        # (1, tn)
                sq = jnp.sum(acc * acc, axis=0, keepdims=True)  # (1, tn)
                psum_ref[...] = jnp.broadcast_to(s[:, None, :], (1, 8, tn))
                psq_ref[...] = jnp.broadcast_to(sq[:, None, :], (1, 8, tn))

        if multi_k:
            @pl.when(pl.program_id(2) == 0)
            def _init():
                acc_ref[...] = jnp.zeros_like(acc_ref)

            acc_ref[...] += jnp.dot(a_ref[...], b_ref[...],
                                    preferred_element_type=jnp.float32)

            @pl.when(pl.program_id(2) == nk - 1)
            def _fin():
                finalize(acc_ref[...])
        else:
            # Single K step: no accumulator scratch, no zero-init / reload passes.
            finalize(jnp.dot(a_ref[...], b_ref[...],
                             preferred_element_type=jnp.float32))

    if multi_k:
        grid = (num_m, nn, nk)
        a_spec = pl.BlockSpec((tm, tk), lambda i, j, k: (i, k))
        b_spec = pl.BlockSpec((tk, tn), lambda i, j, k: (k, j))
        vec_spec = pl.BlockSpec((1, tn), lambda i, j, k: (0, j))
        o_spec = pl.BlockSpec((tm, tn), lambda i, j, k: (i, j))
        stat_spec = pl.BlockSpec((1, 8, tn), lambda i, j, k: (i, 0, j))
        scratch = [pltpu.VMEM((tm, tn), jnp.float32)]
        semantics = ("parallel", "parallel", "arbitrary")
    else:
        grid = (num_m, nn)
        a_spec = pl.BlockSpec((tm, tk), lambda i, j: (i, 0))
        b_spec = pl.BlockSpec((tk, tn), lambda i, j: (0, j))
        vec_spec = pl.BlockSpec((1, tn), lambda i, j: (0, j))
        o_spec = pl.BlockSpec((tm, tn), lambda i, j: (i, j))
        stat_spec = pl.BlockSpec((1, 8, tn), lambda i, j: (i, 0, j))
        scratch = []
        semantics = ("parallel", "parallel")

    in_arrays = [a, b]
    in_specs = [a_spec, b_spec]
    if has_bias:
        in_arrays.append(bias)
        in_specs.append(vec_spec)

    out_shapes = [jax.ShapeDtypeStruct((m_pad, N), out_dtype)]
    out_specs = [o_spec]
    if emit_stats:
        out_shapes += [jax.ShapeDtypeStruct((num_m, 8, N), jnp.float32)] * 2
        out_specs += [stat_spec, stat_spec]

    itemsize_out = jnp.dtype(out_dtype).itemsize
    flops = 2 * m_pad * K * N
    bytes_accessed = (nn * m_pad * K * 2           # A is re-read once per N tile
                      + num_m * K * N * 2          # B is re-read once per M tile
                      + m_pad * N * itemsize_out   # main output
                      + (N * 4 if has_bias else 0)
                      + (2 * num_m * 8 * N * 4 if emit_stats else 0))

    outs = pl.pallas_call(
        kernel,
        out_shape=tuple(out_shapes),
        grid=grid,
        in_specs=in_specs,
        out_specs=tuple(out_specs),
        scratch_shapes=scratch,
        compiler_params=pltpu.CompilerParams(
            dimension_semantics=semantics,
            vmem_limit_bytes=_vmem_limit_bytes()),
        cost_estimate=pl.CostEstimate(flops=flops, transcendentals=0,
                                      bytes_accessed=bytes_accessed),
    )(*in_arrays)

    if emit_stats:
        out, psum, psq = outs
        return out, psum, psq, (num_m, tm, tn)
    return outs[0], None, None, (num_m, tm, tn)


# ---------------------------------------------------------------------------
# Phase-2 kernel: per-channel affine (BN) + LeakyReLU, lane-dense tiles
# ---------------------------------------------------------------------------
def _bn_act_kernel(y_ref, scale_ref, shift_ref, o_ref):
    y = y_ref[...].astype(jnp.float32) * scale_ref[...] + shift_ref[...]
    o_ref[...] = jnp.where(y >= 0, y, LRELU_SLOPE * y).astype(o_ref.dtype)


def bn_act_apply(y, scale, shift, tiling):
    num_m, tm, tn = tiling
    m_pad, N = y.shape
    nn = N // tn
    scale = scale.reshape(1, N).astype(jnp.float32)
    shift = shift.reshape(1, N).astype(jnp.float32)
    bytes_accessed = 2 * m_pad * N * 2 + 2 * N * 4
    return pl.pallas_call(
        _bn_act_kernel,
        out_shape=jax.ShapeDtypeStruct((m_pad, N), jnp.bfloat16),
        grid=(num_m, nn),
        in_specs=[pl.BlockSpec((tm, tn), lambda i, j: (i, j)),
                  pl.BlockSpec((1, tn), lambda i, j: (0, j)),
                  pl.BlockSpec((1, tn), lambda i, j: (0, j))],
        out_specs=pl.BlockSpec((tm, tn), lambda i, j: (i, j)),
        compiler_params=pltpu.CompilerParams(
            dimension_semantics=("parallel", "parallel"),
            vmem_limit_bytes=_vmem_limit_bytes()),
        cost_estimate=pl.CostEstimate(flops=3 * m_pad * N, transcendentals=0,
                                      bytes_accessed=bytes_accessed),
    )(y, scale, shift)


def _bn_scale_shift(psum, psq, gamma, beta, true_m):
    """Tiny [N]-vector reduction of the per-tile partial sums (done in XLA)."""
    s = psum[:, 0, :].sum(axis=0)
    sq = psq[:, 0, :].sum(axis=0)
    mean = s / true_m
    # NOTE: E[x^2] - mean^2 in f32 (guarded); a shifted two-pass form would be
    # closer to PyTorch at very tight tolerances.
    var = jnp.maximum(sq / true_m - mean * mean, 0.0)
    inv_std = jax.lax.rsqrt(var + BN_EPS)
    scale = gamma.astype(jnp.float32) * inv_std
    shift = beta.astype(jnp.float32) - mean * scale
    return scale, shift


# ---------------------------------------------------------------------------
# Glue: im2col (patch extraction) in plain JAX on bf16 activations
# ---------------------------------------------------------------------------
def im2col(x_nhwc, kh, kw, stride, pad):
    """x: [N, H, W, C] -> patches [N*Ho*Wo, kh*kw*C] (K order: kh, kw, C)."""
    N, H, W, C = x_nhwc.shape
    xp = jnp.pad(x_nhwc, ((0, 0), (pad, pad), (pad, pad), (0, 0)))
    Ho = (H + 2 * pad - kh) // stride + 1
    Wo = (W + 2 * pad - kw) // stride + 1
    cols = []
    for i in range(kh):
        for j in range(kw):
            cols.append(xp[:, i:i + stride * Ho:stride, j:j + stride * Wo:stride, :])
    patches = jnp.concatenate(cols, axis=-1)          # [N, Ho, Wo, kh*kw*C]
    return patches.reshape(N * Ho * Wo, kh * kw * C), Ho, Wo


def conv_lrelu(x_nhwc, w2d, bias, *, ksize, stride, pad, cout):
    """Conv + bias + LeakyReLU (no BN)."""
    B = x_nhwc.shape[0]
    patches, Ho, Wo = im2col(x_nhwc, ksize, ksize, stride, pad)
    M = patches.shape[0]
    out, _, _, _ = pallas_matmul(patches, w2d, bias, apply_lrelu=True,
                                 out_dtype=jnp.bfloat16)
    out = out[:M] if out.shape[0] != M else out
    return out.reshape(B, Ho, Wo, cout)


def conv_bn_lrelu(x_nhwc, w2d, gamma, beta, *, ksize, stride, pad, cout):
    """Conv + training-mode BatchNorm (batch stats) + LeakyReLU, two Pallas phases.
    The conv bias cancels exactly under batch-stat BN, so it is never added."""
    B = x_nhwc.shape[0]
    patches, Ho, Wo = im2col(x_nhwc, ksize, ksize, stride, pad)
    M = patches.shape[0]
    y, psum, psq, tiling = pallas_matmul(patches, w2d, None, emit_stats=True,
                                         apply_lrelu=False, out_dtype=jnp.bfloat16)
    scale, shift = _bn_scale_shift(psum, psq, gamma, beta, float(M))
    out = bn_act_apply(y, scale, shift, tiling)
    out = out[:M] if out.shape[0] != M else out
    return out.reshape(B, Ho, Wo, cout)


# ---------------------------------------------------------------------------
# Parameter init (deterministic, synthetic) + one-time preprocessing
# ---------------------------------------------------------------------------
def init_params(channels, key):
    ks = jax.random.split(key, 10)

    def conv_w(k, kh, kw, cin, cout):
        fan_in = kh * kw * cin
        return jax.random.normal(k, (kh, kw, cin, cout), jnp.float32) * (1.0 / jnp.sqrt(fan_in))

    # Conv weights are (kh, kw, Cin, Cout); importing real PyTorch weights
    # (Cout, Cin, kh, kw) would need a (2, 3, 1, 0) transpose.
    # wfc rows are in PyTorch (C, H, W)-flatten order, shape [7*7*256, 1].
    return {
        "w1": conv_w(ks[0], 4, 4, channels, 32), "b1": jnp.zeros((32,), jnp.float32),
        "w2": conv_w(ks[1], 4, 4, 32, 64),       "b2": jnp.zeros((64,), jnp.float32),
        "g2": jnp.ones((64,), jnp.float32),       "beta2": jnp.zeros((64,), jnp.float32),
        "w3": conv_w(ks[2], 3, 3, 64, 128),       "b3": jnp.zeros((128,), jnp.float32),
        "g3": jnp.ones((128,), jnp.float32),      "beta3": jnp.zeros((128,), jnp.float32),
        "w4": conv_w(ks[3], 3, 3, 128, 256),      "b4": jnp.zeros((256,), jnp.float32),
        "g4": jnp.ones((256,), jnp.float32),      "beta4": jnp.zeros((256,), jnp.float32),
        "wfc": jax.random.normal(ks[4], (7 * 7 * 256, 1), jnp.float32) * (1.0 / jnp.sqrt(7 * 7 * 256)),
        "bfc": jnp.zeros((1,), jnp.float32),
    }


def preprocess_params(params):
    """One-time layout work: 2-D bf16 conv weights, FC weight permuted to
    NHWC-flatten order and zero-padded to 128 lane-dense output columns."""
    prep = {}
    for name in ("w1", "w2", "w3", "w4"):
        kh, kw, cin, cout = params[name].shape
        prep[name] = params[name].reshape(kh * kw * cin, cout).astype(jnp.bfloat16)
    for name in ("b1", "g2", "beta2", "g3", "beta3", "g4", "beta4"):
        prep[name] = params[name].astype(jnp.float32)
    # (C,H,W)-flatten order -> (H,W,C)-flatten order, then pad Cout 1 -> 128.
    wfc = params["wfc"].reshape(256, 7, 7, 1).transpose(1, 2, 0, 3).reshape(7 * 7 * 256, 1)
    prep["wfc"] = jnp.pad(wfc, ((0, 0), (0, 127))).astype(jnp.bfloat16)
    prep["bfc"] = jnp.pad(params["bfc"], (0, 127)).astype(jnp.float32)
    return prep


# ---------------------------------------------------------------------------
# Forward pass
# ---------------------------------------------------------------------------
def discriminator_forward(params, x_nchw):
    # NCHW (PyTorch) -> NHWC once; bf16 activations feed the MXU kernels.
    x = jnp.transpose(x_nchw, (0, 2, 3, 1)).astype(jnp.bfloat16)   # [B, 28, 28, C]
    B = x.shape[0]

    h = conv_lrelu(x, params["w1"], params["b1"],
                   ksize=4, stride=2, pad=1, cout=32)               # [B, 14, 14, 32]
    h = conv_bn_lrelu(h, params["w2"], params["g2"], params["beta2"],
                      ksize=4, stride=2, pad=1, cout=64)            # [B, 7, 7, 64]
    h = conv_bn_lrelu(h, params["w3"], params["g3"], params["beta3"],
                      ksize=3, stride=1, pad=1, cout=128)           # [B, 7, 7, 128]
    h = conv_bn_lrelu(h, params["w4"], params["g4"], params["beta4"],
                      ksize=3, stride=1, pad=1, cout=256)           # [B, 7, 7, 256]

    # Flatten directly in NHWC order (FC weight rows were permuted once at
    # preprocessing time) and run a lane-dense 128-wide matmul; keep column 0.
    hf = h.reshape(B, 7 * 7 * 256)
    logits, _, _, _ = pallas_matmul(hf, params["wfc"], params["bfc"],
                                    apply_lrelu=False, out_dtype=jnp.float32)
    logits = logits[:B] if logits.shape[0] != B else logits
    return logits[:, :1]                                            # [B, 1]


if __name__ == "__main__":
    key = jax.random.PRNGKey(0)
    k_param, k_input = jax.random.split(key)

    channels = 1
    # batch multiple of 8 keeps every layer's row count 8-aligned (no pad rows,
    # no out[:M] slice copies).  Spatial size is fixed at 28x28 by Linear(7*7*256, 1).
    batch = 8
    x = jax.random.normal(k_input, (batch, channels, 28, 28), jnp.float32)

    params = preprocess_params(init_params(channels, k_param))

    fwd = jax.jit(discriminator_forward)
    out = jax.block_until_ready(fwd(params, x))

    assert out.shape == (batch, 1), out.shape
    assert bool(jnp.all(jnp.isfinite(out)))
    print("KERNEL_OK")
</pallas_src>

<mosaic_0001>
module attributes {stable_mosaic.version = 11 : i64} {
  func.func @kernel(%arg0: i32, %arg1: i32, %arg2: memref<784x16xbf16, #tpu.memory_space<vmem>>, %arg3: memref<16x32xbf16, #tpu.memory_space<vmem>>, %arg4: memref<1x32xf32, #tpu.memory_space<vmem>>, %arg5: memref<784x32xbf16, #tpu.memory_space<vmem>>) attributes {dimension_semantics = [#tpu.dimension_semantics<parallel>, #tpu.dimension_semantics<parallel>], iteration_bounds = array<i64: 2, 1>, scalar_prefetch = 0 : i64, scratch_operands = 0 : i64, tpu.core_type = #tpu.core_type<tc>, window_params = [{transform_indices = @transform_0, window_bounds = array<i64: 784, 16>}, {transform_indices = @transform_1, window_bounds = array<i64: 16, 32>}, {transform_indices = @transform_2, window_bounds = array<i64: 1, 32>}, {transform_indices = @transform_3, window_bounds = array<i64: 784, 32>}]} {
    %c0 = arith.constant 0 : index
    %c0_0 = arith.constant 0 : index
    %0 = vector.load %arg2[%c0, %c0_0] : memref<784x16xbf16, #tpu.memory_space<vmem>>, vector<784x16xbf16>
    %c0_1 = arith.constant 0 : index
    %c0_2 = arith.constant 0 : index
    %1 = vector.load %arg3[%c0_1, %c0_2] : memref<16x32xbf16, #tpu.memory_space<vmem>>, vector<16x32xbf16>
    %cst = arith.constant dense<0.000000e+00> : vector<784x32xf32>
    %2 = tpu.matmul %0, %1, %cst {dimension_numbers = #tpu.dot_dimension_numbers<[1], [0], [0], [1], [0, 0, 1, 1], [], []>} : vector<784x16xbf16>, vector<16x32xbf16>, vector<784x32xf32> -> vector<784x32xf32>
    %c0_3 = arith.constant 0 : index
    %c0_4 = arith.constant 0 : index
    %3 = vector.load %arg4[%c0_3, %c0_4] : memref<1x32xf32, #tpu.memory_space<vmem>>, vector<1x32xf32>
    %4 = vector.broadcast %3 : vector<1x32xf32> to vector<784x32xf32>
    %5 = arith.addf %2, %4 : vector<784x32xf32>
    %cst_5 = arith.constant 0.000000e+00 : f32
    %6 = vector.broadcast %cst_5 : f32 to vector<784x32xf32>
    %7 = arith.cmpf oge, %5, %6 : vector<784x32xf32>
    %cst_6 = arith.constant 2.000000e-01 : f32
    %8 = vector.broadcast %cst_6 : f32 to vector<784x32xf32>
    %9 = arith.mulf %8, %5 : vector<784x32xf32>
    %10 = arith.select %7, %5, %9 : vector<784x32xi1>, vector<784x32xf32>
    %11 = arith.truncf %10 : vector<784x32xf32> to vector<784x32xbf16>
    %c0_7 = arith.constant 0 : index
    %c0_8 = arith.constant 0 : index
    %12 = vector.load %arg5[%c0_7, %c0_8] : memref<784x32xbf16, #tpu.memory_space<vmem>>, vector<784x32xbf16>
    tpu.vector_store %arg5[%c0_7, %c0_8], %11 {strides = array<i32>} : memref<784x32xbf16, #tpu.memory_space<vmem>>, vector<784x32xbf16>,
    return
  }
  func.func @transform_0(%arg0: i32, %arg1: i32) -> (i32, i32) {
    %c0_i32 = arith.constant 0 : i32
    %c0_i32_0 = arith.constant 0 : i32
    return %arg0, %c0_i32 : i32, i32
  }
  func.func @transform_1(%arg0: i32, %arg1: i32) -> (i32, i32) {
    %c0_i32 = arith.constant 0 : i32
    %c0_i32_0 = arith.constant 0 : i32
    return %c0_i32, %arg1 : i32, i32
  }
  func.func @transform_2(%arg0: i32, %arg1: i32) -> (i32, i32) {
    %c0_i32 = arith.constant 0 : i32
    %c0_i32_0 = arith.constant 0 : i32
    return %c0_i32, %arg1 : i32, i32
  }
  func.func @transform_3(%arg0: i32, %arg1: i32) -> (i32, i32) {
    %c0_i32 = arith.constant 0 : i32
    return %arg0, %arg1 : i32, i32
  }
}

module attributes {stable_mosaic.version = 11 : i64} {
  func.func @kernel(%arg0: i32, %arg1: i32, %arg2: memref<392x512xbf16, #tpu.memory_space<vmem>>, %arg3: memref<512x64xbf16, #tpu.memory_space<vmem>>, %arg4: memref<392x64xbf16, #tpu.memory_space<vmem>>, %arg5: memref<1x8x64xf32, #tpu.memory_space<vmem>>, %arg6: memref<1x8x64xf32, #tpu.memory_space<vmem>>) attributes {dimension_semantics = [#tpu.dimension_semantics<parallel>, #tpu.dimension_semantics<parallel>], iteration_bounds = array<i64: 1, 1>, scalar_prefetch = 0 : i64, scratch_operands = 0 : i64, tpu.core_type = #tpu.core_type<tc>, window_params = [{transform_indices = @transform_0, window_bounds = array<i64: 392, 512>}, {transform_indices = @transform_1, window_bounds = array<i64: 512, 64>}, {transform_indices = @transform_2, window_bounds = array<i64: 392, 64>}, {transform_indices = @transform_3, window_bounds = array<i64: 1, 8, 64>}, {transform_indices = @transform_4, window_bounds = array<i64: 1, 8, 64>}]} {
    %c0 = arith.constant 0 : index
    %c0_0 = arith.constant 0 : index
    %0 = vector.load %arg2[%c0, %c0_0] : memref<392x512xbf16, #tpu.memory_space<vmem>>, vector<392x512xbf16>
    %c0_1 = arith.constant 0 : index
    %c0_2 = arith.constant 0 : index
    %1 = vector.load %arg3[%c0_1, %c0_2] : memref<512x64xbf16, #tpu.memory_space<vmem>>, vector<512x64xbf16>
    %cst = arith.constant dense<0.000000e+00> : vector<392x64xf32>
    %2 = tpu.matmul %0, %1, %cst {dimension_numbers = #tpu.dot_dimension_numbers<[1], [0], [0], [1], [0, 0, 1, 1], [], []>} : vector<392x512xbf16>, vector<512x64xbf16>, vector<392x64xf32> -> vector<392x64xf32>
    %3 = arith.truncf %2 : vector<392x64xf32> to vector<392x64xbf16>
    %c0_3 = arith.constant 0 : index
    %c0_4 = arith.constant 0 : index
    %4 = vector.load %arg4[%c0_3, %c0_4] : memref<392x64xbf16, #tpu.memory_space<vmem>>, vector<392x64xbf16>
    tpu.vector_store %arg4[%c0_3, %c0_4], %3 {strides = array<i32>} : memref<392x64xbf16, #tpu.memory_space<vmem>>, vector<392x64xbf16>,
    %cst_5 = arith.constant dense<0.000000e+00> : vector<64xf32>
    %5 = vector.multi_reduction <add>, %2, %cst_5 [0] : vector<392x64xf32> to vector<64xf32>
    %6 = vector.shape_cast %5 : vector<64xf32> to vector<1x64xf32>
    %7 = arith.mulf %2, %2 : vector<392x64xf32>
    %cst_6 = arith.constant dense<0.000000e+00> : vector<64xf32>
    %8 = vector.multi_reduction <add>, %7, %cst_6 [0] : vector<392x64xf32> to vector<64xf32>
    %9 = vector.shape_cast %8 : vector<64xf32> to vector<1x64xf32>
    %10 = vector.shape_cast %6 : vector<1x64xf32> to vector<1x1x64xf32>
    %11 = vector.shape_cast %10 : vector<1x1x64xf32> to vector<1x1x64xf32>
    %12 = vector.broadcast %11 : vector<1x1x64xf32> to vector<1x8x64xf32>
    %c0_7 = arith.constant 0 : index
    %c0_8 = arith.constant 0 : index
    %c0_9 = arith.constant 0 : index
    %13 = vector.load %arg5[%c0_7, %c0_8, %c0_9] : memref<1x8x64xf32, #tpu.memory_space<vmem>>, vector<1x8x64xf32>
    tpu.vector_store %arg5[%c0_7, %c0_8, %c0_9], %12 {strides = array<i32>} : memref<1x8x64xf32, #tpu.memory_space<vmem>>, vector<1x8x64xf32>,
    %14 = vector.shape_cast %9 : vector<1x64xf32> to vector<1x1x64xf32>
    %15 = vector.shape_cast %14 : vector<1x1x64xf32> to vector<1x1x64xf32>
    %16 = vector.broadcast %15 : vector<1x1x64xf32> to vector<1x8x64xf32>
    %c0_10 = arith.constant 0 : index
    %c0_11 = arith.constant 0 : index
    %c0_12 = arith.constant 0 : index
    %17 = vector.load %arg6[%c0_10, %c0_11, %c0_12] : memref<1x8x64xf32, #tpu.memory_space<vmem>>, vector<1x8x64xf32>
    tpu.vector_store %arg6[%c0_10, %c0_11, %c0_12], %16 {strides = array<i32>} : memref<1x8x64xf32, #tpu.memory_space<vmem>>, vector<1x8x64xf32>,
    return
  }
  func.func @transform_0(%arg0: i32, %arg1: i32) -> (i32, i32) {
    %c0_i32 = arith.constant 0 : i32
    %c0_i32_0 = arith.constant 0 : i32
    return %arg0, %c0_i32 : i32, i32
  }
  func.func @transform_1(%arg0: i32, %arg1: i32) -> (i32, i32) {
    %c0_i32 = arith.constant 0 : i32
    %c0_i32_0 = arith.constant 0 : i32
    return %c0_i32, %arg1 : i32, i32
  }
  func.func @transform_2(%arg0: i32, %arg1: i32) -> (i32, i32) {
    %c0_i32 = arith.constant 0 : i32
    return %arg0, %arg1 : i32, i32
  }
  func.func @transform_3(%arg0: i32, %arg1: i32) -> (i32, i32, i32) {
    %c0_i32 = arith.constant 0 : i32
    %c0_i32_0 = arith.constant 0 : i32
    return %arg0, %c0_i32, %arg1 : i32, i32, i32
  }
  func.func @transform_4(%arg0: i32, %arg1: i32) -> (i32, i32, i32) {
    %c0_i32 = arith.constant 0 : i32
    %c0_i32_0 = arith.constant 0 : i32
    return %arg0, %c0_i32, %arg1 : i32, i32, i32
  }
}

module attributes {stable_mosaic.version = 11 : i64} {
  func.func @_bn_act_kernel(%arg0: i32, %arg1: i32, %arg2: memref<392x64xbf16, #tpu.memory_space<vmem>>, %arg3: memref<1x64xf32, #tpu.memory_space<vmem>>, %arg4: memref<1x64xf32, #tpu.memory_space<vmem>>, %arg5: memref<392x64xbf16, #tpu.memory_space<vmem>>) attributes {dimension_semantics = [#tpu.dimension_semantics<parallel>, #tpu.dimension_semantics<parallel>], iteration_bounds = array<i64: 1, 1>, scalar_prefetch = 0 : i64, scratch_operands = 0 : i64, tpu.core_type = #tpu.core_type<tc>, window_params = [{transform_indices = @transform_0, window_bounds = array<i64: 392, 64>}, {transform_indices = @transform_1, window_bounds = array<i64: 1, 64>}, {transform_indices = @transform_2, window_bounds = array<i64: 1, 64>}, {transform_indices = @transform_3, window_bounds = array<i64: 392, 64>}]} {
    %c0 = arith.constant 0 : index
    %c0_0 = arith.constant 0 : index
    %0 = vector.load %arg2[%c0, %c0_0] : memref<392x64xbf16, #tpu.memory_space<vmem>>, vector<392x64xbf16>
    %1 = arith.extf %0 : vector<392x64xbf16> to vector<392x64xf32>
    %c0_1 = arith.constant 0 : index
    %c0_2 = arith.constant 0 : index
    %2 = vector.load %arg3[%c0_1, %c0_2] : memref<1x64xf32, #tpu.memory_space<vmem>>, vector<1x64xf32>
    %3 = vector.broadcast %2 : vector<1x64xf32> to vector<392x64xf32>
    %4 = arith.mulf %1, %3 : vector<392x64xf32>
    %c0_3 = arith.constant 0 : index
    %c0_4 = arith.constant 0 : index
    %5 = vector.load %arg4[%c0_3, %c0_4] : memref<1x64xf32, #tpu.memory_space<vmem>>, vector<1x64xf32>
    %6 = vector.broadcast %5 : vector<1x64xf32> to vector<392x64xf32>
    %7 = arith.addf %4, %6 : vector<392x64xf32>
    %cst = arith.constant 0.000000e+00 : f32
    %8 = vector.broadcast %cst : f32 to vector<392x64xf32>
    %9 = arith.cmpf oge, %7, %8 : vector<392x64xf32>
    %cst_5 = arith.constant 2.000000e-01 : f32
    %10 = vector.broadcast %cst_5 : f32 to vector<392x64xf32>
    %11 = arith.mulf %10, %7 : vector<392x64xf32>
    %12 = arith.select %9, %7, %11 : vector<392x64xi1>, vector<392x64xf32>
    %13 = arith.truncf %12 : vector<392x64xf32> to vector<392x64xbf16>
    %c0_6 = arith.constant 0 : index
    %c0_7 = arith.constant 0 : index
    %14 = vector.load %arg5[%c0_6, %c0_7] : memref<392x64xbf16, #tpu.memory_space<vmem>>, vector<392x64xbf16>
    tpu.vector_store %arg5[%c0_6, %c0_7], %13 {strides = array<i32>} : memref<392x64xbf16, #tpu.memory_space<vmem>>, vector<392x64xbf16>,
    return
  }
  func.func @transform_0(%arg0: i32, %arg1: i32) -> (i32, i32) {
    %c0_i32 = arith.constant 0 : i32
    return %arg0, %arg1 : i32, i32
  }
  func.func @transform_1(%arg0: i32, %arg1: i32) -> (i32, i32) {
    %c0_i32 = arith.constant 0 : i32
    %c0_i32_0 = arith.constant 0 : i32
    return %c0_i32, %arg1 : i32, i32
  }
  func.func @transform_2(%arg0: i32, %arg1: i32) -> (i32, i32) {
    %c0_i32 = arith.constant 0 : i32
    %c0_i32_0 = arith.constant 0 : i32
    return %c0_i32, %arg1 : i32, i32
  }
  func.func @transform_3(%arg0: i32, %arg1: i32) -> (i32, i32) {
    %c0_i32 = arith.constant 0 : i32
    return %arg0, %arg1 : i32, i32
  }
}

module attributes {stable_mosaic.version = 11 : i64} {
  func.func @kernel(%arg0: i32, %arg1: i32, %arg2: memref<392x576xbf16, #tpu.memory_space<vmem>>, %arg3: memref<576x128xbf16, #tpu.memory_space<vmem>>, %arg4: memref<392x128xbf16, #tpu.memory_space<vmem>>, %arg5: memref<1x8x128xf32, #tpu.memory_space<vmem>>, %arg6: memref<1x8x128xf32, #tpu.memory_space<vmem>>) attributes {dimension_semantics = [#tpu.dimension_semantics<parallel>, #tpu.dimension_semantics<parallel>], iteration_bounds = array<i64: 1, 1>, scalar_prefetch = 0 : i64, scratch_operands = 0 : i64, tpu.core_type = #tpu.core_type<tc>, window_params = [{transform_indices = @transform_0, window_bounds = array<i64: 392, 576>}, {transform_indices = @transform_1, window_bounds = array<i64: 576, 128>}, {transform_indices = @transform_2, window_bounds = array<i64: 392, 128>}, {transform_indices = @transform_3, window_bounds = array<i64: 1, 8, 128>}, {transform_indices = @transform_4, window_bounds = array<i64: 1, 8, 128>}]} {
    %c0 = arith.constant 0 : index
    %c0_0 = arith.constant 0 : index
    %0 = vector.load %arg2[%c0, %c0_0] : memref<392x576xbf16, #tpu.memory_space<vmem>>, vector<392x576xbf16>
    %c0_1 = arith.constant 0 : index
    %c0_2 = arith.constant 0 : index
    %1 = vector.load %arg3[%c0_1, %c0_2] : memref<576x128xbf16, #tpu.memory_space<vmem>>, vector<576x128xbf16>
    %cst = arith.constant dense<0.000000e+00> : vector<392x128xf32>
    %2 = tpu.matmul %0, %1, %cst {dimension_numbers = #tpu.dot_dimension_numbers<[1], [0], [0], [1], [0, 0, 1, 1], [], []>} : vector<392x576xbf16>, vector<576x128xbf16>, vector<392x128xf32> -> vector<392x128xf32>
    %3 = arith.truncf %2 : vector<392x128xf32> to vector<392x128xbf16>
    %c0_3 = arith.constant 0 : index
    %c0_4 = arith.constant 0 : index
    %4 = vector.load %arg4[%c0_3, %c0_4] : memref<392x128xbf16, #tpu.memory_space<vmem>>, vector<392x128xbf16>
    tpu.vector_store %arg4[%c0_3, %c0_4], %3 {strides = array<i32>} : memref<392x128xbf16, #tpu.memory_space<vmem>>, vector<392x128xbf16>,
    %cst_5 = arith.constant dense<0.000000e+00> : vector<128xf32>
    %5 = vector.multi_reduction <add>, %2, %cst_5 [0] : vector<392x128xf32> to vector<128xf32>
    %6 = vector.shape_cast %5 : vector<128xf32> to vector<1x128xf32>
    %7 = arith.mulf %2, %2 : vector<392x128xf32>
    %cst_6 = arith.constant dense<0.000000e+00> : vector<128xf32>
    %8 = vector.multi_reduction <add>, %7, %cst_6 [0] : vector<392x128xf32> to vector<128xf32>
    %9 = vector.shape_cast %8 : vector<128xf32> to vector<1x128xf32>
    %10 = vector.shape_cast %6 : vector<1x128xf32> to vector<1x1x128xf32>
    %11 = vector.shape_cast %10 : vector<1x1x128xf32> to vector<1x1x128xf32>
    %12 = vector.broadcast %11 : vector<1x1x128xf32> to vector<1x8x128xf32>
    %c0_7 = arith.constant 0 : index
    %c0_8 = arith.constant 0 : index
    %c0_9 = arith.constant 0 : index
    %13 = vector.load %arg5[%c0_7, %c0_8, %c0_9] : memref<1x8x128xf32, #tpu.memory_space<vmem>>, vector<1x8x128xf32>
    tpu.vector_store %arg5[%c0_7, %c0_8, %c0_9], %12 {strides = array<i32>} : memref<1x8x128xf32, #tpu.memory_space<vmem>>, vector<1x8x128xf32>,
    %14 = vector.shape_cast %9 : vector<1x128xf32> to vector<1x1x128xf32>
    %15 = vector.shape_cast %14 : vector<1x1x128xf32> to vector<1x1x128xf32>
    %16 = vector.broadcast %15 : vector<1x1x128xf32> to vector<1x8x128xf32>
    %c0_10 = arith.constant 0 : index
    %c0_11 = arith.constant 0 : index
    %c0_12 = arith.constant 0 : index
    %17 = vector.load %arg6[%c0_10, %c0_11, %c0_12] : memref<1x8x128xf32, #tpu.memory_space<vmem>>, vector<1x8x128xf32>
    tpu.vector_store %arg6[%c0_10, %c0_11, %c0_12], %16 {strides = array<i32>} : memref<1x8x128xf32, #tpu.memory_space<vmem>>, vector<1x8x128xf32>,
    return
  }
  func.func @transform_0(%arg0: i32, %arg1: i32) -> (i32, i32) {
    %c0_i32 = arith.constant 0 : i32
    %c0_i32_0 = arith.constant 0 : i32
    return %arg0, %c0_i32 : i32, i32
  }
  func.func @transform_1(%arg0: i32, %arg1: i32) -> (i32, i32) {
    %c0_i32 = arith.constant 0 : i32
    %c0_i32_0 = arith.constant 0 : i32
    return %c0_i32, %arg1 : i32, i32
  }
  func.func @transform_2(%arg0: i32, %arg1: i32) -> (i32, i32) {
    %c0_i32 = arith.constant 0 : i32
    return %arg0, %arg1 : i32, i32
  }
  func.func @transform_3(%arg0: i32, %arg1: i32) -> (i32, i32, i32) {
    %c0_i32 = arith.constant 0 : i32
    %c0_i32_0 = arith.constant 0 : i32
    return %arg0, %c0_i32, %arg1 : i32, i32, i32
  }
  func.func @transform_4(%arg0: i32, %arg1: i32) -> (i32, i32, i32) {
    %c0_i32 = arith.constant 0 : i32
    %c0_i32_0 = arith.constant 0 : i32
    return %arg0, %c0_i32, %arg1 : i32, i32, i32
  }
}

module attributes {stable_mosaic.version = 11 : i64} {
  func.func @_bn_act_kernel(%arg0: i32, %arg1: i32, %arg2: memref<392x128xbf16, #tpu.memory_space<vmem>>, %arg3: memref<1x128xf32, #tpu.memory_space<vmem>>, %arg4: memref<1x128xf32, #tpu.memory_space<vmem>>, %arg5: memref<392x128xbf16, #tpu.memory_space<vmem>>) attributes {dimension_semantics = [#tpu.dimension_semantics<parallel>, #tpu.dimension_semantics<parallel>], iteration_bounds = array<i64: 1, 1>, scalar_prefetch = 0 : i64, scratch_operands = 0 : i64, tpu.core_type = #tpu.core_type<tc>, window_params = [{transform_indices = @transform_0, window_bounds = array<i64: 392, 128>}, {transform_indices = @transform_1, window_bounds = array<i64: 1, 128>}, {transform_indices = @transform_2, window_bounds = array<i64: 1, 128>}, {transform_indices = @transform_3, window_bounds = array<i64: 392, 128>}]} {
    %c0 = arith.constant 0 : index
    %c0_0 = arith.constant 0 : index
    %0 = vector.load %arg2[%c0, %c0_0] : memref<392x128xbf16, #tpu.memory_space<vmem>>, vector<392x128xbf16>
    %1 = arith.extf %0 : vector<392x128xbf16> to vector<392x128xf32>
    %c0_1 = arith.constant 0 : index
    %c0_2 = arith.constant 0 : index
    %2 = vector.load %arg3[%c0_1, %c0_2] : memref<1x128xf32, #tpu.memory_space<vmem>>, vector<1x128xf32>
    %3 = vector.broadcast %2 : vector<1x128xf32> to vector<392x128xf32>
    %4 = arith.mulf %1, %3 : vector<392x128xf32>
    %c0_3 = arith.constant 0 : index
    %c0_4 = arith.constant 0 : index
    %5 = vector.load %arg4[%c0_3, %c0_4] : memref<1x128xf32, #tpu.memory_space<vmem>>, vector<1x128xf32>
    %6 = vector.broadcast %5 : vector<1x128xf32> to vector<392x128xf32>
    %7 = arith.addf %4, %6 : vector<392x128xf32>
    %cst = arith.constant 0.000000e+00 : f32
    %8 = vector.broadcast %cst : f32 to vector<392x128xf32>
    %9 = arith.cmpf oge, %7, %8 : vector<392x128xf32>
    %cst_5 = arith.constant 2.000000e-01 : f32
    %10 = vector.broadcast %cst_5 : f32 to vector<392x128xf32>
    %11 = arith.mulf %10, %7 : vector<392x128xf32>
    %12 = arith.select %9, %7, %11 : vector<392x128xi1>, vector<392x128xf32>
    %13 = arith.truncf %12 : vector<392x128xf32> to vector<392x128xbf16>
    %c0_6 = arith.constant 0 : index
    %c0_7 = arith.constant 0 : index
    %14 = vector.load %arg5[%c0_6, %c0_7] : memref<392x128xbf16, #tpu.memory_space<vmem>>, vector<392x128xbf16>
    tpu.vector_store %arg5[%c0_6, %c0_7], %13 {strides = array<i32>} : memref<392x128xbf16, #tpu.memory_space<vmem>>, vector<392x128xbf16>,
    return
  }
  func.func @transform_0(%arg0: i32, %arg1: i32) -> (i32, i32) {
    %c0_i32 = arith.constant 0 : i32
    return %arg0, %arg1 : i32, i32
  }
  func.func @transform_1(%arg0: i32, %arg1: i32) -> (i32, i32) {
    %c0_i32 = arith.constant 0 : i32
    %c0_i32_0 = arith.constant 0 : i32
    return %c0_i32, %arg1 : i32, i32
  }
  func.func @transform_2(%arg0: i32, %arg1: i32) -> (i32, i32) {
    %c0_i32 = arith.constant 0 : i32
    %c0_i32_0 = arith.constant 0 : i32
    return %c0_i32, %arg1 : i32, i32
  }
  func.func @transform_3(%arg0: i32, %arg1: i32) -> (i32, i32) {
    %c0_i32 = arith.constant 0 : i32
    return %arg0, %arg1 : i32, i32
  }
}

module attributes {stable_mosaic.version = 11 : i64} {
  func.func @_bn_act_kernel(%arg0: i32, %arg1: i32, %arg2: memref<392x256xbf16, #tpu.memory_space<vmem>>, %arg3: memref<1x256xf32, #tpu.memory_space<vmem>>, %arg4: memref<1x256xf32, #tpu.memory_space<vmem>>, %arg5: memref<392x256xbf16, #tpu.memory_space<vmem>>) attributes {dimension_semantics = [#tpu.dimension_semantics<parallel>, #tpu.dimension_semantics<parallel>], iteration_bounds = array<i64: 1, 1>, scalar_prefetch = 0 : i64, scratch_operands = 0 : i64, tpu.core_type = #tpu.core_type<tc>, window_params = [{transform_indices = @transform_0, window_bounds = array<i64: 392, 256>}, {transform_indices = @transform_1, window_bounds = array<i64: 1, 256>}, {transform_indices = @transform_2, window_bounds = array<i64: 1, 256>}, {transform_indices = @transform_3, window_bounds = array<i64: 392, 256>}]} {
    %c0 = arith.constant 0 : index
    %c0_0 = arith.constant 0 : index
    %0 = vector.load %arg2[%c0, %c0_0] : memref<392x256xbf16, #tpu.memory_space<vmem>>, vector<392x256xbf16>
    %1 = arith.extf %0 : vector<392x256xbf16> to vector<392x256xf32>
    %c0_1 = arith.constant 0 : index
    %c0_2 = arith.constant 0 : index
    %2 = vector.load %arg3[%c0_1, %c0_2] : memref<1x256xf32, #tpu.memory_space<vmem>>, vector<1x256xf32>
    %3 = vector.broadcast %2 : vector<1x256xf32> to vector<392x256xf32>
    %4 = arith.mulf %1, %3 : vector<392x256xf32>
    %c0_3 = arith.constant 0 : index
    %c0_4 = arith.constant 0 : index
    %5 = vector.load %arg4[%c0_3, %c0_4] : memref<1x256xf32, #tpu.memory_space<vmem>>, vector<1x256xf32>
    %6 = vector.broadcast %5 : vector<1x256xf32> to vector<392x256xf32>
    %7 = arith.addf %4, %6 : vector<392x256xf32>
    %cst = arith.constant 0.000000e+00 : f32
    %8 = vector.broadcast %cst : f32 to vector<392x256xf32>
    %9 = arith.cmpf oge, %7, %8 : vector<392x256xf32>
    %cst_5 = arith.constant 2.000000e-01 : f32
    %10 = vector.broadcast %cst_5 : f32 to vector<392x256xf32>
    %11 = arith.mulf %10, %7 : vector<392x256xf32>
    %12 = arith.select %9, %7, %11 : vector<392x256xi1>, vector<392x256xf32>
    %13 = arith.truncf %12 : vector<392x256xf32> to vector<392x256xbf16>
    %c0_6 = arith.constant 0 : index
    %c0_7 = arith.constant 0 : index
    %14 = vector.load %arg5[%c0_6, %c0_7] : memref<392x256xbf16, #tpu.memory_space<vmem>>, vector<392x256xbf16>
    tpu.vector_store %arg5[%c0_6, %c0_7], %13 {strides = array<i32>} : memref<392x256xbf16, #tpu.memory_space<vmem>>, vector<392x256xbf16>,
    return
  }
  func.func @transform_0(%arg0: i32, %arg1: i32) -> (i32, i32) {
    %c0_i32 = arith.constant 0 : i32
    return %arg0, %arg1 : i32, i32
  }
  func.func @transform_1(%arg0: i32, %arg1: i32) -> (i32, i32) {
    %c0_i32 = arith.constant 0 : i32
    %c0_i32_0 = arith.constant 0 : i32
    return %c0_i32, %arg1 : i32, i32
  }
  func.func @transform_2(%arg0: i32, %arg1: i32) -> (i32, i32) {
    %c0_i32 = arith.constant 0 : i32
    %c0_i32_0 = arith.constant 0 : i32
    return %c0_i32, %arg1 : i32, i32
  }
  func.func @transform_3(%arg0: i32, %arg1: i32) -> (i32, i32) {
    %c0_i32 = arith.constant 0 : i32
    return %arg0, %arg1 : i32, i32
  }
}

module attributes {stable_mosaic.version = 11 : i64} {
  func.func @kernel(%arg0: i32, %arg1: i32, %arg2: memref<392x1152xbf16, #tpu.memory_space<vmem>>, %arg3: memref<1152x256xbf16, #tpu.memory_space<vmem>>, %arg4: memref<392x256xbf16, #tpu.memory_space<vmem>>, %arg5: memref<1x8x256xf32, #tpu.memory_space<vmem>>, %arg6: memref<1x8x256xf32, #tpu.memory_space<vmem>>) attributes {dimension_semantics = [#tpu.dimension_semantics<parallel>, #tpu.dimension_semantics<parallel>], iteration_bounds = array<i64: 1, 1>, scalar_prefetch = 0 : i64, scratch_operands = 0 : i64, tpu.core_type = #tpu.core_type<tc>, window_params = [{transform_indices = @transform_0, window_bounds = array<i64: 392, 1152>}, {transform_indices = @transform_1, window_bounds = array<i64: 1152, 256>}, {transform_indices = @transform_2, window_bounds = array<i64: 392, 256>}, {transform_indices = @transform_3, window_bounds = array<i64: 1, 8, 256>}, {transform_indices = @transform_4, window_bounds = array<i64: 1, 8, 256>}]} {
    %c0 = arith.constant 0 : index
    %c0_0 = arith.constant 0 : index
    %0 = vector.load %arg2[%c0, %c0_0] : memref<392x1152xbf16, #tpu.memory_space<vmem>>, vector<392x1152xbf16>
    %c0_1 = arith.constant 0 : index
    %c0_2 = arith.constant 0 : index
    %1 = vector.load %arg3[%c0_1, %c0_2] : memref<1152x256xbf16, #tpu.memory_space<vmem>>, vector<1152x256xbf16>
    %cst = arith.constant dense<0.000000e+00> : vector<392x256xf32>
    %2 = tpu.matmul %0, %1, %cst {dimension_numbers = #tpu.dot_dimension_numbers<[1], [0], [0], [1], [0, 0, 1, 1], [], []>} : vector<392x1152xbf16>, vector<1152x256xbf16>, vector<392x256xf32> -> vector<392x256xf32>
    %3 = arith.truncf %2 : vector<392x256xf32> to vector<392x256xbf16>
    %c0_3 = arith.constant 0 : index
    %c0_4 = arith.constant 0 : index
    %4 = vector.load %arg4[%c0_3, %c0_4] : memref<392x256xbf16, #tpu.memory_space<vmem>>, vector<392x256xbf16>
    tpu.vector_store %arg4[%c0_3, %c0_4], %3 {strides = array<i32>} : memref<392x256xbf16, #tpu.memory_space<vmem>>, vector<392x256xbf16>,
    %cst_5 = arith.constant dense<0.000000e+00> : vector<256xf32>
    %5 = vector.multi_reduction <add>, %2, %cst_5 [0] : vector<392x256xf32> to vector<256xf32>
    %6 = vector.shape_cast %5 : vector<256xf32> to vector<1x256xf32>
    %7 = arith.mulf %2, %2 : vector<392x256xf32>
    %cst_6 = arith.constant dense<0.000000e+00> : vector<256xf32>
    %8 = vector.multi_reduction <add>, %7, %cst_6 [0] : vector<392x256xf32> to vector<256xf32>
    %9 = vector.shape_cast %8 : vector<256xf32> to vector<1x256xf32>
    %10 = vector.shape_cast %6 : vector<1x256xf32> to vector<1x1x256xf32>
    %11 = vector.shape_cast %10 : vector<1x1x256xf32> to vector<1x1x256xf32>
    %12 = vector.broadcast %11 : vector<1x1x256xf32> to vector<1x8x256xf32>
    %c0_7 = arith.constant 0 : index
    %c0_8 = arith.constant 0 : index
    %c0_9 = arith.constant 0 : index
    %13 = vector.load %arg5[%c0_7, %c0_8, %c0_9] : memref<1x8x256xf32, #tpu.memory_space<vmem>>, vector<1x8x256xf32>
    tpu.vector_store %arg5[%c0_7, %c0_8, %c0_9], %12 {strides = array<i32>} : memref<1x8x256xf32, #tpu.memory_space<vmem>>, vector<1x8x256xf32>,
    %14 = vector.shape_cast %9 : vector<1x256xf32> to vector<1x1x256xf32>
    %15 = vector.shape_cast %14 : vector<1x1x256xf32> to vector<1x1x256xf32>
    %16 = vector.broadcast %15 : vector<1x1x256xf32> to vector<1x8x256xf32>
    %c0_10 = arith.constant 0 : index
    %c0_11 = arith.constant 0 : index
    %c0_12 = arith.constant 0 : index
    %17 = vector.load %arg6[%c0_10, %c0_11, %c0_12] : memref<1x8x256xf32, #tpu.memory_space<vmem>>, vector<1x8x256xf32>
    tpu.vector_store %arg6[%c0_10, %c0_11, %c0_12], %16 {strides = array<i32>} : memref<1x8x256xf32, #tpu.memory_space<vmem>>, vector<1x8x256xf32>,
    return
  }
  func.func @transform_0(%arg0: i32, %arg1: i32) -> (i32, i32) {
    %c0_i32 = arith.constant 0 : i32
    %c0_i32_0 = arith.constant 0 : i32
    return %arg0, %c0_i32 : i32, i32
  }
  func.func @transform_1(%arg0: i32, %arg1: i32) -> (i32, i32) {
    %c0_i32 = arith.constant 0 : i32
    %c0_i32_0 = arith.constant 0 : i32
    return %c0_i32, %arg1 : i32, i32
  }
  func.func @transform_2(%arg0: i32, %arg1: i32) -> (i32, i32) {
    %c0_i32 = arith.constant 0 : i32
    return %arg0, %arg1 : i32, i32
  }
  func.func @transform_3(%arg0: i32, %arg1: i32) -> (i32, i32, i32) {
    %c0_i32 = arith.constant 0 : i32
    %c0_i32_0 = arith.constant 0 : i32
    return %arg0, %c0_i32, %arg1 : i32, i32, i32
  }
  func.func @transform_4(%arg0: i32, %arg1: i32) -> (i32, i32, i32) {
    %c0_i32 = arith.constant 0 : i32
    %c0_i32_0 = arith.constant 0 : i32
    return %arg0, %c0_i32, %arg1 : i32, i32, i32
  }
}

module attributes {stable_mosaic.version = 11 : i64} {
  func.func @kernel(%arg0: i32, %arg1: i32, %arg2: i32, %arg3: memref<8x1792xbf16, #tpu.memory_space<vmem>>, %arg4: memref<1792x128xbf16, #tpu.memory_space<vmem>>, %arg5: memref<1x128xf32, #tpu.memory_space<vmem>>, %arg6: memref<8x128xf32, #tpu.memory_space<vmem>>, %arg7: memref<8x128xf32, #tpu.memory_space<vmem>>) attributes {dimension_semantics = [#tpu.dimension_semantics<parallel>, #tpu.dimension_semantics<parallel>, #tpu.dimension_semantics<arbitrary>], iteration_bounds = array<i64: 1, 1, 7>, scalar_prefetch = 0 : i64, scratch_operands = 1 : i64, tpu.core_type = #tpu.core_type<tc>, window_params = [{transform_indices = @transform_0, window_bounds = array<i64: 8, 1792>}, {transform_indices = @transform_1, window_bounds = array<i64: 1792, 128>}, {transform_indices = @transform_2, window_bounds = array<i64: 1, 128>}, {transform_indices = @transform_3, window_bounds = array<i64: 8, 128>}]} {
    %c0_i32 = arith.constant 0 : i32
    %0 = arith.cmpi eq, %arg2, %c0_i32 : i32
    %1 = arith.extui %0 : i1 to i32
    %c0_i32_0 = arith.constant 0 : i32
    %2 = arith.cmpi ne, %1, %c0_i32_0 : i32
    scf.if %2 {
      %cst_9 = arith.constant 0.000000e+00 : f32
      %12 = vector.broadcast %cst_9 : f32 to vector<8x128xf32>
      %c0_10 = arith.constant 0 : index
      %c0_11 = arith.constant 0 : index
      %13 = vector.load %arg7[%c0_10, %c0_11] : memref<8x128xf32, #tpu.memory_space<vmem>>, vector<8x128xf32>
      tpu.vector_store %arg7[%c0_10, %c0_11], %12 {strides = array<i32>} : memref<8x128xf32, #tpu.memory_space<vmem>>, vector<8x128xf32>,
    } else {
    }
    %c0 = arith.constant 0 : index
    %c0_1 = arith.constant 0 : index
    %3 = vector.load %arg7[%c0, %c0_1] : memref<8x128xf32, #tpu.memory_space<vmem>>, vector<8x128xf32>
    %c0_2 = arith.constant 0 : index
    %c0_3 = arith.constant 0 : index
    %4 = vector.load %arg3[%c0_2, %c0_3] : memref<8x1792xbf16, #tpu.memory_space<vmem>>, vector<8x1792xbf16>
    %c0_4 = arith.constant 0 : index
    %c0_5 = arith.constant 0 : index
    %5 = vector.load %arg4[%c0_4, %c0_5] : memref<1792x128xbf16, #tpu.memory_space<vmem>>, vector<1792x128xbf16>
    %cst = arith.constant dense<0.000000e+00> : vector<8x128xf32>
    %6 = tpu.matmul %4, %5, %cst {dimension_numbers = #tpu.dot_dimension_numbers<[1], [0], [0], [1], [0, 0, 1, 1], [], []>} : vector<8x1792xbf16>, vector<1792x128xbf16>, vector<8x128xf32> -> vector<8x128xf32>
    %7 = arith.addf %3, %6 : vector<8x128xf32>
    %c0_6 = arith.constant 0 : index
    %c0_7 = arith.constant 0 : index
    %8 = vector.load %arg7[%c0_6, %c0_7] : memref<8x128xf32, #tpu.memory_space<vmem>>, vector<8x128xf32>
    tpu.vector_store %arg7[%c0_6, %c0_7], %7 {strides = array<i32>} : memref<8x128xf32, #tpu.memory_space<vmem>>, vector<8x128xf32>,
    %c6_i32 = arith.constant 6 : i32
    %9 = arith.cmpi eq, %arg2, %c6_i32 : i32
    %10 = arith.extui %9 : i1 to i32
    %c0_i32_8 = arith.constant 0 : i32
    %11 = arith.cmpi ne, %10, %c0_i32_8 : i32
    scf.if %11 {
      %c0_9 = arith.constant 0 : index
      %c0_10 = arith.constant 0 : index
      %12 = vector.load %arg7[%c0_9, %c0_10] : memref<8x128xf32, #tpu.memory_space<vmem>>, vector<8x128xf32>
      %c0_11 = arith.constant 0 : index
      %c0_12 = arith.constant 0 : index
      %13 = vector.load %arg5[%c0_11, %c0_12] : memref<1x128xf32, #tpu.memory_space<vmem>>, vector<1x128xf32>
      %14 = vector.broadcast %13 : vector<1x128xf32> to vector<8x128xf32>
      %15 = arith.addf %12, %14 : vector<8x128xf32>
      %c0_13 = arith.constant 0 : index
      %c0_14 = arith.constant 0 : index
      %16 = vector.load %arg6[%c0_13, %c0_14] : memref<8x128xf32, #tpu.memory_space<vmem>>, vector<8x128xf32>
      tpu.vector_store %arg6[%c0_13, %c0_14], %15 {strides = array<i32>} : memref<8x128xf32, #tpu.memory_space<vmem>>, vector<8x128xf32>,
    } else {
    }
    return
  }
  func.func @transform_0(%arg0: i32, %arg1: i32, %arg2: i32) -> (i32, i32) {
    %c0_i32 = arith.constant 0 : i32
    return %arg0, %arg2 : i32, i32
  }
  func.func @transform_1(%arg0: i32, %arg1: i32, %arg2: i32) -> (i32, i32) {
    %c0_i32 = arith.constant 0 : i32
    return %arg2, %arg1 : i32, i32
  }
  func.func @transform_2(%arg0: i32, %arg1: i32, %arg2: i32) -> (i32, i32) {
    %c0_i32 = arith.constant 0 : i32
    %c0_i32_0 = arith.constant 0 : i32
    return %c0_i32, %arg1 : i32, i32
  }
  func.func @transform_3(%arg0: i32, %arg1: i32, %arg2: i32) -> (i32, i32) {
    %c0_i32 = arith.constant 0 : i32
    return %arg0, %arg1 : i32, i32
  }
}

</mosaic_0001>

<bundles_post_ra>
// kernel: discriminator_forward.8
= control target key start
LH: loop header
LB: loop body
LE: loop exit
PB: predicated region body
PF: predicated region fallthrough
CT: control target
= control target key end

     0   :  { %s2724_s12 = smov 0   ;;  %s2726_s13 = smov 0   ;;  %s3273_s0 = inlined_call_operand.vmem [shape: bf16[1568,16], index: 0, kind: input, shape index: {}]   ;;  %s3274_s1 = inlined_call_operand.vmem [shape: bf16[16,32], index: 1, kind: input, shape index: {}]   ;;  %s3275_s2 = inlined_call_operand.vmem [shape: f32[1,32], index: 2, kind: input, shape index: {}]   ;;  %s3276_s3 = inlined_call_operand.vmem [shape: bf16[1568,32], index: 3, kind: output, shape index: {}]  }
   0x1   :  { %s2728_s14 = smov 0  }
   0x2 LB: > { %s25_s15 = sadd.s32 1, %s2696_s13  ;;  %p2050_p0 = scmp.ge.s32.totalorder %s2700_s14, 1  ;;  %s2700_s14 = sphi %s2728_s14, %s13_s14   ;;  %s2696_s13 = sphi %s2726_s13, %s3278_s13   ;;  %s2692_s12 = sphi %s2724_s12, %s3277_s12  }
   0x3   : > { %p27_p1 = scmp.ge.s32.totalorder %s25_s15, 2  ;;  %p169_p2 = scmp.lt.s32.totalorder %s2700_s14, 3 }
   0x5   : > { %s3280_s15 = smov (%p27_p1, %s25_s15), 0  ;;  %p170_p3 = pnand %p2050_p0, %p169_p2 }
   0x6   : > { %s203_s18 = smul.u32 (!%p170_p3), 98, %s2692_s12 }
   0x7   : > { %173 = sbr.rel (%p170_p3) target bundleno = 414 (0x19e), region = 32 }
   0x8   : > { %p204_p4 = scmp.lt.s32.totalorder (!%p170_p3), %s203_s18, 195 }
   0xc   : > { %v2627_v0 = vld [vmem:[%s3274_s1] sm:$0xff]   ;;  %v2702_v1 = vmov 0.0   ;;  %vm2703_vm0 = vmmov 0   ;;  %s3282_s18 = smov (!%p204_p4, %s203_s18), 195  ;;  %vm584_vm1 = vcmask 130048   ;;  %vm1843_vm4 = vcmask 257024  }
   0xd   : > { %2401 = vmatprep.subr.bf16.mxu0 %v2702_v1  ;;  %2599 = vmatprep.subr.bf16.mxu1 %v2702_v1  ;;  %s2051_s19 = sshll.u32 %s3282_s18, 2  ;;  %v2955_v51 = vld [vmem:[%s3275_s2] ss:$0 sm:$0xff] }
   0xe   : > { %2402 = vmatpush3.bf16.msra.mxu0 %v2627_v0  ;;  %2600 = vmatpush3.bf16.msra.mxu1 %v2627_v0  ;;  %s2759_s22 = scalar_lea.vmem %s3273_s0, %s2051_s19  ;;  %s2965_s27 = scalar_lea.vmem %s3276_s3, %s2051_s19 }
   0xf   : > { %2403 = vmatprep.mubr.msk.bf16.mxu0 %vm2703_vm0, %v2702_v1  ;;  %2503 = vmatprep.mubr.msk.bf16.mxu1 %vm2703_vm0, %v2702_v1  ;;  %v2628_v2 = vld [vmem:[%s2759_s22] sm:$0xff]   ;;  %v2629_v3 = vld [vmem:[%s2759_s22 + $0xc8] sm:$0xff]   ;;  %v2631_v5 = vld [vmem:[%s2759_s22 + $0xd0] sm:$0xff]  }
  0x10   : > { %v2630_v4 = vld [vmem:[%s2759_s22 + $0x8] sm:$0xff]   ;;  %v2632_v6 = vld [vmem:[%s2759_s22 + $0x10] sm:$0xff]   ;;  %v2633_v7 = vld [vmem:[%s2759_s22 + $0xd8] sm:$0xff]  }
  0x11   : > { %2404 = vmatmul.mubr.msk.bf16.vlgmr.msra.gmra.mxu0 %vm584_vm1, %v2628_v2  ;;  %2504 = vmatmul.mubr.msk.bf16.vlgmr.msra.gmra.mxu1 %vm584_vm1, %v2629_v3  ;;  %v2634_v8 = vld [vmem:[%s2759_s22 + $0x18] sm:$0xff]   ;;  %v2635_v9 = vld [vmem:[%s2759_s22 + $0xe0] sm:$0xff]   ;;  %v2637_v11 = vld [vmem:[%s2759_s22 + $0xe8] sm:$0xff]  }
  0x12   : > { %2407 = vmatprep.mubr.msk.bf16.mxu0 %vm2703_vm0, %v2702_v1  ;;  %2507 = vmatprep.mubr.msk.bf16.mxu1 %vm2703_vm0, %v2702_v1  ;;  %v2636_v10 = vld [vmem:[%s2759_s22 + $0x20] sm:$0xff]   ;;  %v2638_v12 = vld [vmem:[%s2759_s22 + $0x28] sm:$0xff]   ;;  %v2639_v13 = vld [vmem:[%s2759_s22 + $0xf0] sm:$0xff]  }
  0x13   : > { %v2640_v14 = vld [vmem:[%s2759_s22 + $0x30] sm:$0xff]   ;;  %v2641_v15 = vld [vmem:[%s2759_s22 + $0xf8] sm:$0xff]   ;;  %v2643_v17 = vld [vmem:[%s2759_s22 + $0x100] sm:$0xff]  }
  0x14   : > { %v2642_v16 = vld [vmem:[%s2759_s22 + $0x38] sm:$0xff]   ;;  %v2644_v18 = vld [vmem:[%s2759_s22 + $0x40] sm:$0xff]   ;;  %v2645_v19 = vld [vmem:[%s2759_s22 + $0x108] sm:$0xff]  }
  0x15   : > { %v2646_v20 = vld [vmem:[%s2759_s22 + $0x48] sm:$0xff]   ;;  %v2647_v21 = vld [vmem:[%s2759_s22 + $0x110] sm:$0xff]   ;;  %v2649_v23 = vld [vmem:[%s2759_s22 + $0x118] sm:$0xff]  }
  0x16   : > { %v2648_v22 = vld [vmem:[%s2759_s22 + $0x50] sm:$0xff]   ;;  %v2650_v24 = vld [vmem:[%s2759_s22 + $0x58] sm:$0xff]   ;;  %v2651_v25 = vld [vmem:[%s2759_s22 + $0x120] sm:$0xff]  }
  0x17   : > { %v2652_v26 = vld [vmem:[%s2759_s22 + $0x60] sm:$0xff]   ;;  %v2653_v27 = vld [vmem:[%s2759_s22 + $0x128] sm:$0xff]   ;;  %v2655_v29 = vld [vmem:[%s2759_s22 + $0x130] sm:$0xff]  }
  0x18   : > { %v2654_v28 = vld [vmem:[%s2759_s22 + $0x68] sm:$0xff]   ;;  %v2656_v30 = vld [vmem:[%s2759_s22 + $0x70] sm:$0xff]   ;;  %v2657_v31 = vld [vmem:[%s2759_s22 + $0x138] sm:$0xff]  }
  0x19   : > { %2408 = vmatmul.mubr.msk.bf16.gmra.mxu0 %vm584_vm1, %v2630_v4  ;;  %2508 = vmatmul.mubr.msk.bf16.gmra.mxu1 %vm584_vm1, %v2631_v5  ;;  %v2658_v32 = vld [vmem:[%s2759_s22 + $0x78] sm:$0xff]   ;;  %v2659_v33 = vld [vmem:[%s2759_s22 + $0x140] sm:$0xff]   ;;  %v2661_v35 = vld [vmem:[%s2759_s22 + $0x148] sm:$0xff]  }
  0x1a   : > { %2411 = vmatprep.mubr.msk.bf16.mxu0 %vm2703_vm0, %v2702_v1  ;;  %2511 = vmatprep.mubr.msk.bf16.mxu1 %vm2703_vm0, %v2702_v1  ;;  %v2660_v34 = vld [vmem:[%s2759_s22 + $0x80] sm:$0xff]   ;;  %v2662_v36 = vld [vmem:[%s2759_s22 + $0x88] sm:$0xff]   ;;  %v2663_v37 = vld [vmem:[%s2759_s22 + $0x150] sm:$0xff]  }
  0x1b   : > { %v2664_v38 = vld [vmem:[%s2759_s22 + $0x90] sm:$0xff]   ;;  %v2665_v39 = vld [vmem:[%s2759_s22 + $0x158] sm:$0xff]   ;;  %v2667_v41 = vld [vmem:[%s2759_s22 + $0x160] sm:$0xff]  }
  0x1c   : > { %v2666_v40 = vld [vmem:[%s2759_s22 + $0x98] sm:$0xff]   ;;  %v2668_v42 = vld [vmem:[%s2759_s22 + $0xa0] sm:$0xff]   ;;  %v2669_v43 = vld [vmem:[%s2759_s22 + $0x168] sm:$0xff]  }
  0x1d   : > { %v2670_v44 = vld [vmem:[%s2759_s22 + $0xa8] sm:$0xff]   ;;  %v2671_v45 = vld [vmem:[%s2759_s22 + $0x170] sm:$0xff]   ;;  %v2673_v47 = vld [vmem:[%s2759_s22 + $0x178] sm:$0xff]  }
  0x1e   : > { %v2672_v46 = vld [vmem:[%s2759_s22 + $0xb0] sm:$0xff]   ;;  %v2674_v48 = vld [vmem:[%s2759_s22 + $0xb8] sm:$0xff]   ;;  %v2675_v49 = vld [vmem:[%s2759_s22 + $0x180] sm:$0xff]  }
  0x1f   : > { %v2676_v50 = vld [vmem:[%s2759_s22 + $0xc0] sm:$0xff]  }
  0x21   : > { %2412 = vmatmul.mubr.msk.bf16.gmra.mxu0 %vm584_vm1, %v2632_v6  ;;  %2512 = vmatmul.mubr.msk.bf16.gmra.mxu1 %vm584_vm1, %v2633_v7 }
  0x22   : > { %2415 = vmatprep.mubr.msk.bf16.mxu0 %vm2703_vm0, %v2702_v1  ;;  %2515 = vmatprep.mubr.msk.bf16.mxu1 %vm2703_vm0, %v2702_v1 }
  0x29   : > { %2416 = vmatmul.mubr.msk.bf16.gmra.mxu0 %vm584_vm1, %v2634_v8  ;;  %2516 = vmatmul.mubr.msk.bf16.gmra.mxu1 %vm584_vm1, %v2635_v9 }
  0x2a   : > { %2419 = vmatprep.mubr.msk.bf16.mxu0 %vm2703_vm0, %v2702_v1  ;;  %2519 = vmatprep.mubr.msk.bf16.mxu1 %vm2703_vm0, %v2702_v1 }
  0x31   : > { %2420 = vmatmul.mubr.msk.bf16.gmra.mxu0 %vm584_vm1, %v2636_v10  ;;  %2520 = vmatmul.mubr.msk.bf16.gmra.mxu1 %vm584_vm1, %v2637_v11 }
  0x32   : > { %2423 = vmatprep.mubr.msk.bf16.mxu0 %vm2703_vm0, %v2702_v1  ;;  %2523 = vmatprep.mubr.msk.bf16.mxu1 %vm2703_vm0, %v2702_v1 }
  0x39   : > { %2424 = vmatmul.mubr.msk.bf16.gmra.mxu0 %vm584_vm1, %v2638_v12  ;;  %2524 = vmatmul.mubr.msk.bf16.gmra.mxu1 %vm584_vm1, %v2639_v13 }
  0x3a   : > { %2427 = vmatprep.mubr.msk.bf16.mxu0 %vm2703_vm0, %v2702_v1  ;;  %2527 = vmatprep.mubr.msk.bf16.mxu1 %vm2703_vm0, %v2702_v1 }
  0x41   : > { %2428 = vmatmul.mubr.msk.bf16.gmra.mxu0 %vm584_vm1, %v2640_v14  ;;  %2528 = vmatmul.mubr.msk.bf16.gmra.mxu1 %vm584_vm1, %v2641_v15 }
  0x42   : > { %2431 = vmatprep.mubr.msk.bf16.mxu0 %vm2703_vm0, %v2702_v1  ;;  %2531 = vmatprep.mubr.msk.bf16.mxu1 %vm2703_vm0, %v2702_v1 }
  0x49   : > { %2432 = vmatmul.mubr.msk.bf16.gmra.mxu0 %vm584_vm1, %v2642_v16  ;;  %2532 = vmatmul.mubr.msk.bf16.gmra.mxu1 %vm584_vm1, %v2643_v17 }
  0x4a   : > { %2435 = vmatprep.mubr.msk.bf16.mxu0 %vm2703_vm0, %v2702_v1  ;;  %2535 = vmatprep.mubr.msk.bf16.mxu1 %vm2703_vm0, %v2702_v1 }
  0x51   : > { %2436 = vmatmul.mubr.msk.bf16.gmra.mxu0 %vm584_vm1, %v2644_v18  ;;  %2536 = vmatmul.mubr.msk.bf16.gmra.mxu1 %vm584_vm1, %v2645_v19 }
  0x52   : > { %2439 = vmatprep.mubr.msk.bf16.mxu0 %vm2703_vm0, %v2702_v1  ;;  %2539 = vmatprep.mubr.msk.bf16.mxu1 %vm2703_vm0, %v2702_v1 }
  0x59   : > { %2440 = vmatmul.mubr.msk.bf16.gmra.mxu0 %vm584_vm1, %v2646_v20  ;;  %2540 = vmatmul.mubr.msk.bf16.gmra.mxu1 %vm584_vm1, %v2647_v21 }
  0x5a   : > { %2443 = vmatprep.mubr.msk.bf16.mxu0 %vm2703_vm0, %v2702_v1  ;;  %2543 = vmatprep.mubr.msk.bf16.mxu1 %vm2703_vm0, %v2702_v1 }
  0x61   : > { %2444 = vmatmul.mubr.msk.bf16.gmra.mxu0 %vm584_vm1, %v2648_v22  ;;  %2544 = vmatmul.mubr.msk.bf16.gmra.mxu1 %vm584_vm1, %v2649_v23 }
  0x62   : > { %2447 = vmatprep.mubr.msk.bf16.mxu0 %vm2703_vm0, %v2702_v1  ;;  %2547 = vmatprep.mubr.msk.bf16.mxu1 %vm2703_vm0, %v2702_v1 }
  0x69   : > { %2448 = vmatmul.mubr.msk.bf16.gmra.mxu0 %vm584_vm1, %v2650_v24  ;;  %2548 = vmatmul.mubr.msk.bf16.gmra.mxu1 %vm584_vm1, %v2651_v25 }
  0x6a   : > { %2451 = vmatprep.mubr.msk.bf16.mxu0 %vm2703_vm0, %v2702_v1  ;;  %2551 = vmatprep.mubr.msk.bf16.mxu1 %vm2703_vm0, %v2702_v1 }
  0x71   : > { %2452 = vmatmul.mubr.msk.bf16.gmra.mxu0 %vm584_vm1, %v2652_v26  ;;  %2552 = vmatmul.mubr.msk.bf16.gmra.mxu1 %vm584_vm1, %v2653_v27 }
  0x72   : > { %2455 = vmatprep.mubr.msk.bf16.mxu0 %vm2703_vm0, %v2702_v1  ;;  %2555 = vmatprep.mubr.msk.bf16.mxu1 %vm2703_vm0, %v2702_v1 }
  0x79   : > { %2456 = vmatmul.mubr.msk.bf16.gmra.mxu0 %vm584_vm1, %v2654_v28  ;;  %2556 = vmatmul.mubr.msk.bf16.gmra.mxu1 %vm584_vm1, %v2655_v29 }
  0x7a   : > { %2459 = vmatprep.mubr.msk.bf16.mxu0 %vm2703_vm0, %v2702_v1  ;;  %2559 = vmatprep.mubr.msk.bf16.mxu1 %vm2703_vm0, %v2702_v1 }
  0x81   : > { %2460 = vmatmul.mubr.msk.bf16.gmra.mxu0 %vm584_vm1, %v2656_v30  ;;  %2560 = vmatmul.mubr.msk.bf16.gmra.mxu1 %vm584_vm1, %v2657_v31 }
  0x82   : > { %2463 = vmatprep.mubr.msk.bf16.mxu0 %vm2703_vm0, %v2702_v1  ;;  %2563 = vmatprep.mubr.msk.bf16.mxu1 %vm2703_vm0, %v2702_v1 }
  0x89   : > { %2464 = vmatmul.mubr.msk.bf16.gmra.mxu0 %vm584_vm1, %v2658_v32  ;;  %2564 = vmatmul.mubr.msk.bf16.gmra.mxu1 %vm584_vm1, %v2659_v33 }
  0x8a   : > { %2467 = vmatprep.mubr.msk.bf16.mxu0 %vm2703_vm0, %v2702_v1  ;;  %2567 = vmatprep.mubr.msk.bf16.mxu1 %vm2703_vm0, %v2702_v1 }
  0x91   : > { %2468 = vmatmul.mubr.msk.bf16.gmra.mxu0 %vm584_vm1, %v2660_v34  ;;  %2568 = vmatmul.mubr.msk.bf16.gmra.mxu1 %vm584_vm1, %v2661_v35 }
  0x92   : > { %2471 = vmatprep.mubr.msk.bf16.mxu0 %vm2703_vm0, %v2702_v1  ;;  %2571 = vmatprep.mubr.msk.bf16.mxu1 %vm2703_vm0, %v2702_v1 }
  0x99   : > { %2472 = vmatmul.mubr.msk.bf16.gmra.mxu0 %vm584_vm1, %v2662_v36  ;;  %2572 = vmatmul.mubr.msk.bf16.gmra.mxu1 %vm584_vm1, %v2663_v37 }
  0x9a   : > { %2475 = vmatprep.mubr.msk.bf16.mxu0 %vm2703_vm0, %v2702_v1  ;;  %2575 = vmatprep.mubr.msk.bf16.mxu1 %vm2703_vm0, %v2702_v1 }
  0xa1   : > { %2476 = vmatmul.mubr.msk.bf16.gmra.mxu0 %vm584_vm1, %v2664_v38  ;;  %2576 = vmatmul.mubr.msk.bf16.gmra.mxu1 %vm584_vm1, %v2665_v39 }
  0xa2   : > { %2479 = vmatprep.mubr.msk.bf16.mxu0 %vm2703_vm0, %v2702_v1  ;;  %2579 = vmatprep.mubr.msk.bf16.mxu1 %vm2703_vm0, %v2702_v1 }
  0xa9   : > { %2480 = vmatmul.mubr.msk.bf16.gmra.mxu0 %vm584_vm1, %v2666_v40  ;;  %2580 = vmatmul.mubr.msk.bf16.gmra.mxu1 %vm584_vm1, %v2667_v41 }
  0xaa   : > { %2483 = vmatprep.mubr.msk.bf16.mxu0 %vm2703_vm0, %v2702_v1  ;;  %2583 = vmatprep.mubr.msk.bf16.mxu1 %vm2703_vm0, %v2702_v1 }
  0xb1   : > { %2484 = vmatmul.mubr.msk.bf16.gmra.mxu0 %vm584_vm1, %v2668_v42  ;;  %2584 = vmatmul.mubr.msk.bf16.gmra.mxu1 %vm584_vm1, %v2669_v43 }
  0xb2   : > { %2487 = vmatprep.mubr.msk.bf16.mxu0 %vm2703_vm0, %v2702_v1  ;;  %2587 = vmatprep.mubr.msk.bf16.mxu1 %vm2703_vm0, %v2702_v1 }
  0xb9   : > { %2488 = vmatmul.mubr.msk.bf16.gmra.mxu0 %vm584_vm1, %v2670_v44  ;;  %2588 = vmatmul.mubr.msk.bf16.gmra.mxu1 %vm584_vm1, %v2671_v45 }
  0xba   : > { %2491 = vmatprep.mubr.msk.bf16.mxu0 %vm2703_vm0, %v2702_v1  ;;  %2591 = vmatprep.mubr.msk.bf16.mxu1 %vm2703_vm0, %v2702_v1 }
  0xc1   : > { %2492 = vmatmul.mubr.msk.bf16.gmra.mxu0 %vm584_vm1, %v2672_v46  ;;  %2592 = vmatmul.mubr.msk.bf16.gmra.mxu1 %vm584_vm1, %v2673_v47 }
  0xc2   : > { %2495 = vmatprep.mubr.msk.bf16.mxu0 %vm2703_vm0, %v2702_v1  ;;  %2595 = vmatprep.mubr.msk.bf16.mxu1 %vm2703_vm0, %v2702_v1 }
  0xc9   : > { %2496 = vmatmul.mubr.msk.bf16.gmra.mxu0 %vm584_vm1, %v2674_v48  ;;  %2596 = vmatmul.mubr.msk.bf16.gmra.mxu1 %vm584_vm1, %v2675_v49 }
  0xca   : > { %2499 = vmatprep.mubr.msk.bf16.mxu0 %vm2703_vm0, %v2702_v1 }
  0xd1   : > { %v766_v52 = vpop.f32.mrf.mxu0  ;;  %2500 = vmatmul.mubr.msk.bf16.gmra.mxu0 %vm584_vm1, %v2676_v50  ;;  %v966_v54 = vpop.f32.mrf.mxu1 }
  0xd2   : > { %v767_v53 = vadd.f32 %v2955_v51, %v766_v52  ;;  %v967_v56 = vadd.f32 %v2955_v51, %v966_v54 }
  0xd3   : > { %v2405_v55 = vpop.f32.mrf.mxu0  ;;  %v2505_v58 = vpop.f32.mrf.mxu1 }
  0xd4   : > { %vm1157_vm2 = vcmp.ge.f32.partialorder %v767_v53, 0.0  ;;  %v1255_v57 = vmul.f32 0.2, %v767_v53  ;;  %vm1207_vm3 = vcmp.ge.f32.partialorder %v967_v56, 0.0  ;;  %v1305_v59 = vmul.f32 0.2, %v967_v56 }
  0xd5   : > { %v769_v60 = vpop.f32.mrf.mxu0  ;;  %v969_v63 = vpop.f32.mrf.mxu1 }
  0xd6   : > { %v1353_v61 = vsel %vm1157_vm2, %v767_v53, %v1255_v57  ;;  %v770_v62 = vadd.f32 %v2955_v51, %v769_v60  ;;  %v1403_v1 = vsel %vm1207_vm3, %v967_v56, %v1305_v59  ;;  %v970_v3 = vadd.f32 %v2955_v51, %v969_v63 }
  0xd7   : > { %v2253_v0 = vpack.c.bf16 %v1353_v61, %v1353_v61  ;;  %v2406_v2 = vpop.f32.mrf.mxu0  ;;  %v2303_v4 = vpack.c.bf16 %v1403_v1, %v1403_v1  ;;  %v2506_v6 = vpop.f32.mrf.mxu1 }
  0xd8   : > { %vm1158_vm5 = vcmp.ge.f32.partialorder %v770_v62, 0.0  ;;  %v1256_v5 = vmul.f32 0.2, %v770_v62  ;;  %vm1208_vm6 = vcmp.ge.f32.partialorder %v970_v3, 0.0  ;;  %v1306_v7 = vmul.f32 0.2, %v970_v3 }
  0xd9   : > { %1844 = vst.msk [vmem:[%s2965_s27] sm:$0xf] %vm1843_vm4, %v2253_v0  ;;  %v774_v8 = vpop.f32.mrf.mxu0  ;;  %1894 = vst.msk [vmem:[%s2965_s27 + $0xc8] sm:$0xf] %vm1843_vm4, %v2303_v4  ;;  %v974_v11 = vpop.f32.mrf.mxu1 }
  0xda   : > { %v1354_v9 = vsel %vm1158_vm5, %v770_v62, %v1256_v5  ;;  %v775_v10 = vadd.f32 %v2955_v51, %v774_v8  ;;  %v1404_v13 = vsel %vm1208_vm6, %v970_v3, %v1306_v7  ;;  %v975_v15 = vadd.f32 %v2955_v51, %v974_v11 }
  0xdb   : > { %v2254_v12 = vpack.c.bf16 %v1354_v9, %v1354_v9  ;;  %v2409_v14 = vpop.f32.mrf.mxu0  ;;  %v2304_v16 = vpack.c.bf16 %v1404_v13, %v1404_v13  ;;  %v2509_v18 = vpop.f32.mrf.mxu1 }
  0xdc   : > { %vm1159_vm7 = vcmp.ge.f32.partialorder %v775_v10, 0.0  ;;  %v1257_v17 = vmul.f32 0.2, %v775_v10  ;;  %vm1209_vm8 = vcmp.ge.f32.partialorder %v975_v15, 0.0  ;;  %v1307_v19 = vmul.f32 0.2, %v975_v15 }
  0xdd   : > { %1845 = vst.msk [vmem:[%s2965_s27 + $0x4] sm:$0xf] %vm1843_vm4, %v2254_v12  ;;  %v777_v20 = vpop.f32.mrf.mxu0  ;;  %1895 = vst.msk [vmem:[%s2965_s27 + $0xcc] sm:$0xf] %vm1843_vm4, %v2304_v16  ;;  %v977_v23 = vpop.f32.mrf.mxu1 }
  0xde   : > { %v1355_v21 = vsel %vm1159_vm7, %v775_v10, %v1257_v17  ;;  %v778_v22 = vadd.f32 %v2955_v51, %v777_v20  ;;  %v1405_v25 = vsel %vm1209_vm8, %v975_v15, %v1307_v19  ;;  %v978_v27 = vadd.f32 %v2955_v51, %v977_v23 }
  0xdf   : > { %v2255_v24 = vpack.c.bf16 %v1355_v21, %v1355_v21  ;;  %v2410_v26 = vpop.f32.mrf.mxu0  ;;  %v2305_v28 = vpack.c.bf16 %v1405_v25, %v1405_v25  ;;  %v2510_v30 = vpop.f32.mrf.mxu1 }
  0xe0   : > { %vm1160_vm9 = vcmp.ge.f32.partialorder %v778_v22, 0.0  ;;  %v1258_v29 = vmul.f32 0.2, %v778_v22  ;;  %vm1210_vm10 = vcmp.ge.f32.partialorder %v978_v27, 0.0  ;;  %v1308_v31 = vmul.f32 0.2, %v978_v27 }
  0xe1   : > { %1846 = vst.msk [vmem:[%s2965_s27 + $0x8] sm:$0xf] %vm1843_vm4, %v2255_v24  ;;  %v782_v32 = vpop.f32.mrf.mxu0  ;;  %1896 = vst.msk [vmem:[%s2965_s27 + $0xd0] sm:$0xf] %vm1843_vm4, %v2305_v28  ;;  %v982_v35 = vpop.f32.mrf.mxu1 }
  0xe2   : > { %v1356_v33 = vsel %vm1160_vm9, %v778_v22, %v1258_v29  ;;  %v783_v34 = vadd.f32 %v2955_v51, %v782_v32  ;;  %v1406_v37 = vsel %vm1210_vm10, %v978_v27, %v1308_v31  ;;  %v983_v39 = vadd.f32 %v2955_v51, %v982_v35 }
  0xe3   : > { %v2256_v36 = vpack.c.bf16 %v1356_v33, %v1356_v33  ;;  %v2413_v38 = vpop.f32.mrf.mxu0  ;;  %v2306_v40 = vpack.c.bf16 %v1406_v37, %v1406_v37  ;;  %v2513_v42 = vpop.f32.mrf.mxu1 }
  0xe4   : > { %vm1161_vm11 = vcmp.ge.f32.partialorder %v783_v34, 0.0  ;;  %v1259_v41 = vmul.f32 0.2, %v783_v34  ;;  %vm1211_vm12 = vcmp.ge.f32.partialorder %v983_v39, 0.0  ;;  %v1309_v43 = vmul.f32 0.2, %v983_v39 }
  0xe5   : > { %1847 = vst.msk [vmem:[%s2965_s27 + $0xc] sm:$0xf] %vm1843_vm4, %v2256_v36  ;;  %v785_v44 = vpop.f32.mrf.mxu0  ;;  %1897 = vst.msk [vmem:[%s2965_s27 + $0xd4] sm:$0xf] %vm1843_vm4, %v2306_v40  ;;  %v985_v47 = vpop.f32.mrf.mxu1 }
  0xe6   : > { %v1357_v45 = vsel %vm1161_vm11, %v783_v34, %v1259_v41  ;;  %v786_v46 = vadd.f32 %v2955_v51, %v785_v44  ;;  %v1407_v49 = vsel %vm1211_vm12, %v983_v39, %v1309_v43  ;;  %v986_v52 = vadd.f32 %v2955_v51, %v985_v47 }
  0xe7   : > { %v2257_v48 = vpack.c.bf16 %v1357_v45, %v1357_v45  ;;  %v2414_v50 = vpop.f32.mrf.mxu0  ;;  %v2307_v53 = vpack.c.bf16 %v1407_v49, %v1407_v49  ;;  %v2514_v55 = vpop.f32.mrf.mxu1 }
  0xe8   : > { %vm1162_vm13 = vcmp.ge.f32.partialorder %v786_v46, 0.0  ;;  %v1260_v54 = vmul.f32 0.2, %v786_v46  ;;  %vm1212_vm14 = vcmp.ge.f32.partialorder %v986_v52, 0.0  ;;  %v1310_v56 = vmul.f32 0.2, %v986_v52 }
  0xe9   : > { %1848 = vst.msk [vmem:[%s2965_s27 + $0x10] sm:$0xf] %vm1843_vm4, %v2257_v48  ;;  %v790_v57 = vpop.f32.mrf.mxu0  ;;  %1898 = vst.msk [vmem:[%s2965_s27 + $0xd8] sm:$0xf] %vm1843_vm4, %v2307_v53  ;;  %v990_v60 = vpop.f32.mrf.mxu1 }
  0xea   : > { %v1358_v58 = vsel %vm1162_vm13, %v786_v46, %v1260_v54  ;;  %v791_v59 = vadd.f32 %v2955_v51, %v790_v57  ;;  %v1408_v62 = vsel %vm1212_vm14, %v986_v52, %v1310_v56  ;;  %v991_v0 = vadd.f32 %v2955_v51, %v990_v60 }
  0xeb   : > { %v2258_v61 = vpack.c.bf16 %v1358_v58, %v1358_v58  ;;  %v2417_v63 = vpop.f32.mrf.mxu0  ;;  %v2308_v1 = vpack.c.bf16 %v1408_v62, %v1408_v62  ;;  %v2517_v3 = vpop.f32.mrf.mxu1 }
  0xec   : > { %vm1163_vm15 = vcmp.ge.f32.partialorder %v791_v59, 0.0  ;;  %v1261_v2 = vmul.f32 0.2, %v791_v59  ;;  %vm1213_vm0 = vcmp.ge.f32.partialorder %v991_v0, 0.0  ;;  %v1311_v4 = vmul.f32 0.2, %v991_v0 }
  0xed   : > { %1849 = vst.msk [vmem:[%s2965_s27 + $0x14] sm:$0xf] %vm1843_vm4, %v2258_v61  ;;  %v793_v5 = vpop.f32.mrf.mxu0  ;;  %1899 = vst.msk [vmem:[%s2965_s27 + $0xdc] sm:$0xf] %vm1843_vm4, %v2308_v1  ;;  %v993_v8 = vpop.f32.mrf.mxu1 }
  0xee   : > { %v1359_v6 = vsel %vm1163_vm15, %v791_v59, %v1261_v2  ;;  %v794_v7 = vadd.f32 %v2955_v51, %v793_v5  ;;  %v1409_v10 = vsel %vm1213_vm0, %v991_v0, %v1311_v4  ;;  %v994_v12 = vadd.f32 %v2955_v51, %v993_v8 }
  0xef   : > { %v2259_v9 = vpack.c.bf16 %v1359_v6, %v1359_v6  ;;  %v2418_v11 = vpop.f32.mrf.mxu0  ;;  %v2309_v13 = vpack.c.bf16 %v1409_v10, %v1409_v10  ;;  %v2518_v15 = vpop.f32.mrf.mxu1 }
  0xf0   : > { %vm1164_vm1 = vcmp.ge.f32.partialorder %v794_v7, 0.0  ;;  %v1262_v14 = vmul.f32 0.2, %v794_v7  ;;  %vm1214_vm2 = vcmp.ge.f32.partialorder %v994_v12, 0.0  ;;  %v1312_v16 = vmul.f32 0.2, %v994_v12 }
  0xf1   : > { %1850 = vst.msk [vmem:[%s2965_s27 + $0x18] sm:$0xf] %vm1843_vm4, %v2259_v9  ;;  %v798_v17 = vpop.f32.mrf.mxu0  ;;  %1900 = vst.msk [vmem:[%s2965_s27 + $0xe0] sm:$0xf] %vm1843_vm4, %v2309_v13  ;;  %v998_v20 = vpop.f32.mrf.mxu1 }
  0xf2   : > { %v1360_v18 = vsel %vm1164_vm1, %v794_v7, %v1262_v14  ;;  %v799_v19 = vadd.f32 %v2955_v51, %v798_v17  ;;  %v1410_v22 = vsel %vm1214_vm2, %v994_v12, %v1312_v16  ;;  %v999_v24 = vadd.f32 %v2955_v51, %v998_v20 }
  0xf3   : > { %v2260_v21 = vpack.c.bf16 %v1360_v18, %v1360_v18  ;;  %v2421_v23 = vpop.f32.mrf.mxu0  ;;  %v2310_v25 = vpack.c.bf16 %v1410_v22, %v1410_v22  ;;  %v2521_v27 = vpop.f32.mrf.mxu1 }
  0xf4   : > { %vm1165_vm3 = vcmp.ge.f32.partialorder %v799_v19, 0.0  ;;  %v1263_v26 = vmul.f32 0.2, %v799_v19  ;;  %vm1215_vm5 = vcmp.ge.f32.partialorder %v999_v24, 0.0  ;;  %v1313_v28 = vmul.f32 0.2, %v999_v24 }
  0xf5   : > { %1851 = vst.msk [vmem:[%s2965_s27 + $0x1c] sm:$0xf] %vm1843_vm4, %v2260_v21  ;;  %v801_v29 = vpop.f32.mrf.mxu0  ;;  %1901 = vst.msk [vmem:[%s2965_s27 + $0xe4] sm:$0xf] %vm1843_vm4, %v2310_v25  ;;  %v1001_v32 = vpop.f32.mrf.mxu1 }
  0xf6   : > { %v1361_v30 = vsel %vm1165_vm3, %v799_v19, %v1263_v26  ;;  %v802_v31 = vadd.f32 %v2955_v51, %v801_v29  ;;  %v1411_v34 = vsel %vm1215_vm5, %v999_v24, %v1313_v28  ;;  %v1002_v36 = vadd.f32 %v2955_v51, %v1001_v32 }
  0xf7   : > { %v2261_v33 = vpack.c.bf16 %v1361_v30, %v1361_v30  ;;  %v2422_v35 = vpop.f32.mrf.mxu0  ;;  %v2311_v37 = vpack.c.bf16 %v1411_v34, %v1411_v34  ;;  %v2522_v39 = vpop.f32.mrf.mxu1 }
  0xf8   : > { %vm1166_vm6 = vcmp.ge.f32.partialorder %v802_v31, 0.0  ;;  %v1264_v38 = vmul.f32 0.2, %v802_v31  ;;  %vm1216_vm7 = vcmp.ge.f32.partialorder %v1002_v36, 0.0  ;;  %v1314_v40 = vmul.f32 0.2, %v1002_v36 }
  0xf9   : > { %1852 = vst.msk [vmem:[%s2965_s27 + $0x20] sm:$0xf] %vm1843_vm4, %v2261_v33  ;;  %v806_v41 = vpop.f32.mrf.mxu0  ;;  %1902 = vst.msk [vmem:[%s2965_s27 + $0xe8] sm:$0xf] %vm1843_vm4, %v2311_v37  ;;  %v1006_v44 = vpop.f32.mrf.mxu1 }
  0xfa   : > { %v1362_v42 = vsel %vm1166_vm6, %v802_v31, %v1264_v38  ;;  %v807_v43 = vadd.f32 %v2955_v51, %v806_v41  ;;  %v1412_v46 = vsel %vm1216_vm7, %v1002_v36, %v1314_v40  ;;  %v1007_v48 = vadd.f32 %v2955_v51, %v1006_v44 }
  0xfb   : > { %v2262_v45 = vpack.c.bf16 %v1362_v42, %v1362_v42  ;;  %v2425_v47 = vpop.f32.mrf.mxu0  ;;  %v2312_v49 = vpack.c.bf16 %v1412_v46, %v1412_v46  ;;  %v2525_v52 = vpop.f32.mrf.mxu1 }
  0xfc   : > { %vm1167_vm8 = vcmp.ge.f32.partialorder %v807_v43, 0.0  ;;  %v1265_v50 = vmul.f32 0.2, %v807_v43  ;;  %vm1217_vm9 = vcmp.ge.f32.partialorder %v1007_v48, 0.0  ;;  %v1315_v53 = vmul.f32 0.2, %v1007_v48 }
  0xfd   : > { %1853 = vst.msk [vmem:[%s2965_s27 + $0x24] sm:$0xf] %vm1843_vm4, %v2262_v45  ;;  %v809_v54 = vpop.f32.mrf.mxu0  ;;  %1903 = vst.msk [vmem:[%s2965_s27 + $0xec] sm:$0xf] %vm1843_vm4, %v2312_v49  ;;  %v1009_v57 = vpop.f32.mrf.mxu1 }
  0xfe   : > { %v1363_v55 = vsel %vm1167_vm8, %v807_v43, %v1265_v50  ;;  %v810_v56 = vadd.f32 %v2955_v51, %v809_v54  ;;  %v1413_v59 = vsel %vm1217_vm9, %v1007_v48, %v1315_v53  ;;  %v1010_v61 = vadd.f32 %v2955_v51, %v1009_v57 }
  0xff   : > { %v2263_v58 = vpack.c.bf16 %v1363_v55, %v1363_v55  ;;  %v2426_v60 = vpop.f32.mrf.mxu0  ;;  %v2313_v62 = vpack.c.bf16 %v1413_v59, %v1413_v59  ;;  %v2526_v0 = vpop.f32.mrf.mxu1 }
 0x100   : > { %vm1168_vm10 = vcmp.ge.f32.partialorder %v810_v56, 0.0  ;;  %v1266_v63 = vmul.f32 0.2, %v810_v56  ;;  %vm1218_vm11 = vcmp.ge.f32.partialorder %v1010_v61, 0.0  ;;  %v1316_v1 = vmul.f32 0.2, %v1010_v61 }
 0x101   : > { %1854 = vst.msk [vmem:[%s2965_s27 + $0x28] sm:$0xf] %vm1843_vm4, %v2263_v58  ;;  %v814_v2 = vpop.f32.mrf.mxu0  ;;  %1904 = vst.msk [vmem:[%s2965_s27 + $0xf0] sm:$0xf] %vm1843_vm4, %v2313_v62  ;;  %v1014_v5 = vpop.f32.mrf.mxu1 }
 0x102   : > { %v1364_v3 = vsel %vm1168_vm10, %v810_v56, %v1266_v63  ;;  %v815_v4 = vadd.f32 %v2955_v51, %v814_v2  ;;  %v1414_v7 = vsel %vm1218_vm11, %v1010_v61, %v1316_v1  ;;  %v1015_v9 = vadd.f32 %v2955_v51, %v1014_v5 }
 0x103   : > { %v2264_v6 = vpack.c.bf16 %v1364_v3, %v1364_v3  ;;  %v2429_v8 = vpop.f32.mrf.mxu0  ;;  %v2314_v10 = vpack.c.bf16 %v1414_v7, %v1414_v7  ;;  %v2529_v12 = vpop.f32.mrf.mxu1 }
 0x104   : > { %vm1169_vm12 = vcmp.ge.f32.partialorder %v815_v4, 0.0  ;;  %v1267_v11 = vmul.f32 0.2, %v815_v4  ;;  %vm1219_vm13 = vcmp.ge.f32.partialorder %v1015_v9, 0.0  ;;  %v1317_v13 = vmul.f32 0.2, %v1015_v9 }
 0x105   : > { %1855 = vst.msk [vmem:[%s2965_s27 + $0x2c] sm:$0xf] %vm1843_vm4, %v2264_v6  ;;  %v817_v14 = vpop.f32.mrf.mxu0  ;;  %1905 = vst.msk [vmem:[%s2965_s27 + $0xf4] sm:$0xf] %vm1843_vm4, %v2314_v10  ;;  %v1017_v17 = vpop.f32.mrf.mxu1 }
 0x106   : > { %v1365_v15 = vsel %vm1169_vm12, %v815_v4, %v1267_v11  ;;  %v818_v16 = vadd.f32 %v2955_v51, %v817_v14  ;;  %v1415_v19 = vsel %vm1219_vm13, %v1015_v9, %v1317_v13  ;;  %v1018_v21 = vadd.f32 %v2955_v51, %v1017_v17 }
 0x107   : > { %v2265_v18 = vpack.c.bf16 %v1365_v15, %v1365_v15  ;;  %v2430_v20 = vpop.f32.mrf.mxu0  ;;  %v2315_v22 = vpack.c.bf16 %v1415_v19, %v1415_v19  ;;  %v2530_v24 = vpop.f32.mrf.mxu1 }
 0x108   : > { %vm1170_vm14 = vcmp.ge.f32.partialorder %v818_v16, 0.0  ;;  %v1268_v23 = vmul.f32 0.2, %v818_v16  ;;  %vm1220_vm15 = vcmp.ge.f32.partialorder %v1018_v21, 0.0  ;;  %v1318_v25 = vmul.f32 0.2, %v1018_v21 }
 0x109   : > { %1856 = vst.msk [vmem:[%s2965_s27 + $0x30] sm:$0xf] %vm1843_vm4, %v2265_v18  ;;  %v822_v26 = vpop.f32.mrf.mxu0  ;;  %1906 = vst.msk [vmem:[%s2965_s27 + $0xf8] sm:$0xf] %vm1843_vm4, %v2315_v22  ;;  %v1022_v29 = vpop.f32.mrf.mxu1 }
 0x10a   : > { %v1366_v27 = vsel %vm1170_vm14, %v818_v16, %v1268_v23  ;;  %v823_v28 = vadd.f32 %v2955_v51, %v822_v26  ;;  %v1416_v31 = vsel %vm1220_vm15, %v1018_v21, %v1318_v25  ;;  %v1023_v33 = vadd.f32 %v2955_v51, %v1022_v29 }
 0x10b   : > { %v2266_v30 = vpack.c.bf16 %v1366_v27, %v1366_v27  ;;  %v2433_v32 = vpop.f32.mrf.mxu0  ;;  %v2316_v34 = vpack.c.bf16 %v1416_v31, %v1416_v31  ;;  %v2533_v36 = vpop.f32.mrf.mxu1 }
 0x10c   : > { %vm1171_vm0 = vcmp.ge.f32.partialorder %v823_v28, 0.0  ;;  %v1269_v35 = vmul.f32 0.2, %v823_v28  ;;  %vm1221_vm1 = vcmp.ge.f32.partialorder %v1023_v33, 0.0  ;;  %v1319_v37 = vmul.f32 0.2, %v1023_v33 }
 0x10d   : > { %1857 = vst.msk [vmem:[%s2965_s27 + $0x34] sm:$0xf] %vm1843_vm4, %v2266_v30  ;;  %v825_v38 = vpop.f32.mrf.mxu0  ;;  %1907 = vst.msk [vmem:[%s2965_s27 + $0xfc] sm:$0xf] %vm1843_vm4, %v2316_v34  ;;  %v1025_v41 = vpop.f32.mrf.mxu1 }
 0x10e   : > { %v1367_v39 = vsel %vm1171_vm0, %v823_v28, %v1269_v35  ;;  %v826_v40 = vadd.f32 %v2955_v51, %v825_v38  ;;  %v1417_v43 = vsel %vm1221_vm1, %v1023_v33, %v1319_v37  ;;  %v1026_v45 = vadd.f32 %v2955_v51, %v1025_v41 }
 0x10f   : > { %v2267_v42 = vpack.c.bf16 %v1367_v39, %v1367_v39  ;;  %v2434_v44 = vpop.f32.mrf.mxu0  ;;  %v2317_v46 = vpack.c.bf16 %v1417_v43, %v1417_v43  ;;  %v2534_v48 = vpop.f32.mrf.mxu1 }
 0x110   : > { %vm1172_vm2 = vcmp.ge.f32.partialorder %v826_v40, 0.0  ;;  %v1270_v47 = vmul.f32 0.2, %v826_v40  ;;  %vm1222_vm3 = vcmp.ge.f32.partialorder %v1026_v45, 0.0  ;;  %v1320_v49 = vmul.f32 0.2, %v1026_v45 }
 0x111   : > { %1858 = vst.msk [vmem:[%s2965_s27 + $0x38] sm:$0xf] %vm1843_vm4, %v2267_v42  ;;  %v830_v50 = vpop.f32.mrf.mxu0  ;;  %1908 = vst.msk [vmem:[%s2965_s27 + $0x100] sm:$0xf] %vm1843_vm4, %v2317_v46  ;;  %v1030_v54 = vpop.f32.mrf.mxu1 }
 0x112   : > { %v1368_v52 = vsel %vm1172_vm2, %v826_v40, %v1270_v47  ;;  %v831_v53 = vadd.f32 %v2955_v51, %v830_v50  ;;  %v1418_v56 = vsel %vm1222_vm3, %v1026_v45, %v1320_v49  ;;  %v1031_v58 = vadd.f32 %v2955_v51, %v1030_v54 }
 0x113   : > { %v2268_v55 = vpack.c.bf16 %v1368_v52, %v1368_v52  ;;  %v2437_v57 = vpop.f32.mrf.mxu0  ;;  %v2318_v59 = vpack.c.bf16 %v1418_v56, %v1418_v56  ;;  %v2537_v61 = vpop.f32.mrf.mxu1 }
 0x114   : > { %vm1173_vm5 = vcmp.ge.f32.partialorder %v831_v53, 0.0  ;;  %v1271_v60 = vmul.f32 0.2, %v831_v53  ;;  %vm1223_vm6 = vcmp.ge.f32.partialorder %v1031_v58, 0.0  ;;  %v1321_v62 = vmul.f32 0.2, %v1031_v58 }
 0x115   : > { %1859 = vst.msk [vmem:[%s2965_s27 + $0x3c] sm:$0xf] %vm1843_vm4, %v2268_v55  ;;  %v833_v63 = vpop.f32.mrf.mxu0  ;;  %1909 = vst.msk [vmem:[%s2965_s27 + $0x104] sm:$0xf] %vm1843_vm4, %v2318_v59  ;;  %v1033_v2 = vpop.f32.mrf.mxu1 }
 0x116   : > { %v1369_v0 = vsel %vm1173_vm5, %v831_v53, %v1271_v60  ;;  %v834_v1 = vadd.f32 %v2955_v51, %v833_v63  ;;  %v1419_v4 = vsel %vm1223_vm6, %v1031_v58, %v1321_v62  ;;  %v1034_v6 = vadd.f32 %v2955_v51, %v1033_v2 }
 0x117   : > { %v2269_v3 = vpack.c.bf16 %v1369_v0, %v1369_v0  ;;  %v2438_v5 = vpop.f32.mrf.mxu0  ;;  %v2319_v7 = vpack.c.bf16 %v1419_v4, %v1419_v4  ;;  %v2538_v9 = vpop.f32.mrf.mxu1 }
 0x118   : > { %vm1174_vm7 = vcmp.ge.f32.partialorder %v834_v1, 0.0  ;;  %v1272_v8 = vmul.f32 0.2, %v834_v1  ;;  %vm1224_vm8 = vcmp.ge.f32.partialorder %v1034_v6, 0.0  ;;  %v1322_v10 = vmul.f32 0.2, %v1034_v6 }
 0x119   : > { %1860 = vst.msk [vmem:[%s2965_s27 + $0x40] sm:$0xf] %vm1843_vm4, %v2269_v3  ;;  %v838_v11 = vpop.f32.mrf.mxu0  ;;  %1910 = vst.msk [vmem:[%s2965_s27 + $0x108] sm:$0xf] %vm1843_vm4, %v2319_v7  ;;  %v1038_v14 = vpop.f32.mrf.mxu1 }
 0x11a   : > { %v1370_v12 = vsel %vm1174_vm7, %v834_v1, %v1272_v8  ;;  %v839_v13 = vadd.f32 %v2955_v51, %v838_v11  ;;  %v1420_v16 = vsel %vm1224_vm8, %v1034_v6, %v1322_v10  ;;  %v1039_v18 = vadd.f32 %v2955_v51, %v1038_v14 }
 0x11b   : > { %v2270_v15 = vpack.c.bf16 %v1370_v12, %v1370_v12  ;;  %v2441_v17 = vpop.f32.mrf.mxu0  ;;  %v2320_v19 = vpack.c.bf16 %v1420_v16, %v1420_v16  ;;  %v2541_v21 = vpop.f32.mrf.mxu1 }
 0x11c   : > { %vm1175_vm9 = vcmp.ge.f32.partialorder %v839_v13, 0.0  ;;  %v1273_v20 = vmul.f32 0.2, %v839_v13  ;;  %vm1225_vm10 = vcmp.ge.f32.partialorder %v1039_v18, 0.0  ;;  %v1323_v22 = vmul.f32 0.2, %v1039_v18 }
 0x11d   : > { %1861 = vst.msk [vmem:[%s2965_s27 + $0x44] sm:$0xf] %vm1843_vm4, %v2270_v15  ;;  %v841_v23 = vpop.f32.mrf.mxu0  ;;  %1911 = vst.msk [vmem:[%s2965_s27 + $0x10c] sm:$0xf] %vm1843_vm4, %v2320_v19  ;;  %v1041_v26 = vpop.f32.mrf.mxu1 }
 0x11e   : > { %v1371_v24 = vsel %vm1175_vm9, %v839_v13, %v1273_v20  ;;  %v842_v25 = vadd.f32 %v2955_v51, %v841_v23  ;;  %v1421_v28 = vsel %vm1225_vm10, %v1039_v18, %v1323_v22  ;;  %v1042_v30 = vadd.f32 %v2955_v51, %v1041_v26 }
 0x11f   : > { %v2271_v27 = vpack.c.bf16 %v1371_v24, %v1371_v24  ;;  %v2442_v29 = vpop.f32.mrf.mxu0  ;;  %v2321_v31 = vpack.c.bf16 %v1421_v28, %v1421_v28  ;;  %v2542_v33 = vpop.f32.mrf.mxu1 }
 0x120   : > { %vm1176_vm11 = vcmp.ge.f32.partialorder %v842_v25, 0.0  ;;  %v1274_v32 = vmul.f32 0.2, %v842_v25  ;;  %vm1226_vm12 = vcmp.ge.f32.partialorder %v1042_v30, 0.0  ;;  %v1324_v34 = vmul.f32 0.2, %v1042_v30 }
 0x121   : > { %1862 = vst.msk [vmem:[%s2965_s27 + $0x48] sm:$0xf] %vm1843_vm4, %v2271_v27  ;;  %v846_v35 = vpop.f32.mrf.mxu0  ;;  %1912 = vst.msk [vmem:[%s2965_s27 + $0x110] sm:$0xf] %vm1843_vm4, %v2321_v31  ;;  %v1046_v38 = vpop.f32.mrf.mxu1 }
 0x122   : > { %v1372_v36 = vsel %vm1176_vm11, %v842_v25, %v1274_v32  ;;  %v847_v37 = vadd.f32 %v2955_v51, %v846_v35  ;;  %v1422_v40 = vsel %vm1226_vm12, %v1042_v30, %v1324_v34  ;;  %v1047_v42 = vadd.f32 %v2955_v51, %v1046_v38 }
 0x123   : > { %v2272_v39 = vpack.c.bf16 %v1372_v36, %v1372_v36  ;;  %v2445_v41 = vpop.f32.mrf.mxu0  ;;  %v2322_v43 = vpack.c.bf16 %v1422_v40, %v1422_v40  ;;  %v2545_v45 = vpop.f32.mrf.mxu1 }
 0x124   : > { %vm1177_vm13 = vcmp.ge.f32.partialorder %v847_v37, 0.0  ;;  %v1275_v44 = vmul.f32 0.2, %v847_v37  ;;  %vm1227_vm14 = vcmp.ge.f32.partialorder %v1047_v42, 0.0  ;;  %v1325_v46 = vmul.f32 0.2, %v1047_v42 }
 0x125   : > { %1863 = vst.msk [vmem:[%s2965_s27 + $0x4c] sm:$0xf] %vm1843_vm4, %v2272_v39  ;;  %v849_v47 = vpop.f32.mrf.mxu0  ;;  %1913 = vst.msk [vmem:[%s2965_s27 + $0x114] sm:$0xf] %vm1843_vm4, %v2322_v43  ;;  %v1049_v50 = vpop.f32.mrf.mxu1 }
 0x126   : > { %v1373_v48 = vsel %vm1177_vm13, %v847_v37, %v1275_v44  ;;  %v850_v49 = vadd.f32 %v2955_v51, %v849_v47  ;;  %v1423_v53 = vsel %vm1227_vm14, %v1047_v42, %v1325_v46  ;;  %v1050_v55 = vadd.f32 %v2955_v51, %v1049_v50 }
 0x127   : > { %v2273_v52 = vpack.c.bf16 %v1373_v48, %v1373_v48  ;;  %v2446_v54 = vpop.f32.mrf.mxu0  ;;  %v2323_v56 = vpack.c.bf16 %v1423_v53, %v1423_v53  ;;  %v2546_v58 = vpop.f32.mrf.mxu1 }
 0x128   : > { %vm1178_vm15 = vcmp.ge.f32.partialorder %v850_v49, 0.0  ;;  %v1276_v57 = vmul.f32 0.2, %v850_v49  ;;  %vm1228_vm0 = vcmp.ge.f32.partialorder %v1050_v55, 0.0  ;;  %v1326_v59 = vmul.f32 0.2, %v1050_v55 }
 0x129   : > { %1864 = vst.msk [vmem:[%s2965_s27 + $0x50] sm:$0xf] %vm1843_vm4, %v2273_v52  ;;  %v854_v60 = vpop.f32.mrf.mxu0  ;;  %1914 = vst.msk [vmem:[%s2965_s27 + $0x118] sm:$0xf] %vm1843_vm4, %v2323_v56  ;;  %v1054_v63 = vpop.f32.mrf.mxu1 }
 0x12a   : > { %v1374_v61 = vsel %vm1178_vm15, %v850_v49, %v1276_v57  ;;  %v855_v62 = vadd.f32 %v2955_v51, %v854_v60  ;;  %v1424_v1 = vsel %vm1228_vm0, %v1050_v55, %v1326_v59  ;;  %v1055_v3 = vadd.f32 %v2955_v51, %v1054_v63 }
 0x12b   : > { %v2274_v0 = vpack.c.bf16 %v1374_v61, %v1374_v61  ;;  %v2449_v2 = vpop.f32.mrf.mxu0  ;;  %v2324_v4 = vpack.c.bf16 %v1424_v1, %v1424_v1  ;;  %v2549_v6 = vpop.f32.mrf.mxu1 }
 0x12c   : > { %vm1179_vm1 = vcmp.ge.f32.partialorder %v855_v62, 0.0  ;;  %v1277_v5 = vmul.f32 0.2, %v855_v62  ;;  %vm1229_vm2 = vcmp.ge.f32.partialorder %v1055_v3, 0.0  ;;  %v1327_v7 = vmul.f32 0.2, %v1055_v3 }
 0x12d   : > { %1865 = vst.msk [vmem:[%s2965_s27 + $0x54] sm:$0xf] %vm1843_vm4, %v2274_v0  ;;  %v857_v8 = vpop.f32.mrf.mxu0  ;;  %1915 = vst.msk [vmem:[%s2965_s27 + $0x11c] sm:$0xf] %vm1843_vm4, %v2324_v4  ;;  %v1057_v11 = vpop.f32.mrf.mxu1 }
 0x12e   : > { %v1375_v9 = vsel %vm1179_vm1, %v855_v62, %v1277_v5  ;;  %v858_v10 = vadd.f32 %v2955_v51, %v857_v8  ;;  %v1425_v13 = vsel %vm1229_vm2, %v1055_v3, %v1327_v7  ;;  %v1058_v15 = vadd.f32 %v2955_v51, %v1057_v11 }
 0x12f   : > { %v2275_v12 = vpack.c.bf16 %v1375_v9, %v1375_v9  ;;  %v2450_v14 = vpop.f32.mrf.mxu0  ;;  %v2325_v16 = vpack.c.bf16 %v1425_v13, %v1425_v13  ;;  %v2550_v18 = vpop.f32.mrf.mxu1 }
 0x130   : > { %vm1180_vm3 = vcmp.ge.f32.partialorder %v858_v10, 0.0  ;;  %v1278_v17 = vmul.f32 0.2, %v858_v10  ;;  %vm1230_vm5 = vcmp.ge.f32.partialorder %v1058_v15, 0.0  ;;  %v1328_v19 = vmul.f32 0.2, %v1058_v15 }
 0x131   : > { %1866 = vst.msk [vmem:[%s2965_s27 + $0x58] sm:$0xf] %vm1843_vm4, %v2275_v12  ;;  %v862_v20 = vpop.f32.mrf.mxu0  ;;  %1916 = vst.msk [vmem:[%s2965_s27 + $0x120] sm:$0xf] %vm1843_vm4, %v2325_v16  ;;  %v1062_v23 = vpop.f32.mrf.mxu1 }
 0x132   : > { %v1376_v21 = vsel %vm1180_vm3, %v858_v10, %v1278_v17  ;;  %v863_v22 = vadd.f32 %v2955_v51, %v862_v20  ;;  %v1426_v25 = vsel %vm1230_vm5, %v1058_v15, %v1328_v19  ;;  %v1063_v27 = vadd.f32 %v2955_v51, %v1062_v23 }
 0x133   : > { %v2276_v24 = vpack.c.bf16 %v1376_v21, %v1376_v21  ;;  %v2453_v26 = vpop.f32.mrf.mxu0  ;;  %v2326_v28 = vpack.c.bf16 %v1426_v25, %v1426_v25  ;;  %v2553_v30 = vpop.f32.mrf.mxu1 }
 0x134   : > { %vm1181_vm6 = vcmp.ge.f32.partialorder %v863_v22, 0.0  ;;  %v1279_v29 = vmul.f32 0.2, %v863_v22  ;;  %vm1231_vm7 = vcmp.ge.f32.partialorder %v1063_v27, 0.0  ;;  %v1329_v31 = vmul.f32 0.2, %v1063_v27 }
 0x135   : > { %1867 = vst.msk [vmem:[%s2965_s27 + $0x5c] sm:$0xf] %vm1843_vm4, %v2276_v24  ;;  %v865_v32 = vpop.f32.mrf.mxu0  ;;  %1917 = vst.msk [vmem:[%s2965_s27 + $0x124] sm:$0xf] %vm1843_vm4, %v2326_v28  ;;  %v1065_v35 = vpop.f32.mrf.mxu1 }
 0x136   : > { %v1377_v33 = vsel %vm1181_vm6, %v863_v22, %v1279_v29  ;;  %v866_v34 = vadd.f32 %v2955_v51, %v865_v32  ;;  %v1427_v37 = vsel %vm1231_vm7, %v1063_v27, %v1329_v31  ;;  %v1066_v39 = vadd.f32 %v2955_v51, %v1065_v35 }
 0x137   : > { %v2277_v36 = vpack.c.bf16 %v1377_v33, %v1377_v33  ;;  %v2454_v38 = vpop.f32.mrf.mxu0  ;;  %v2327_v40 = vpack.c.bf16 %v1427_v37, %v1427_v37  ;;  %v2554_v42 = vpop.f32.mrf.mxu1 }
 0x138   : > { %vm1182_vm8 = vcmp.ge.f32.partialorder %v866_v34, 0.0  ;;  %v1280_v41 = vmul.f32 0.2, %v866_v34  ;;  %vm1232_vm9 = vcmp.ge.f32.partialorder %v1066_v39, 0.0  ;;  %v1330_v43 = vmul.f32 0.2, %v1066_v39 }
 0x139   : > { %1868 = vst.msk [vmem:[%s2965_s27 + $0x60] sm:$0xf] %vm1843_vm4, %v2277_v36  ;;  %v870_v44 = vpop.f32.mrf.mxu0  ;;  %1918 = vst.msk [vmem:[%s2965_s27 + $0x128] sm:$0xf] %vm1843_vm4, %v2327_v40  ;;  %v1070_v47 = vpop.f32.mrf.mxu1 }
 0x13a   : > { %v1378_v45 = vsel %vm1182_vm8, %v866_v34, %v1280_v41  ;;  %v871_v46 = vadd.f32 %v2955_v51, %v870_v44  ;;  %v1428_v49 = vsel %vm1232_vm9, %v1066_v39, %v1330_v43  ;;  %v1071_v52 = vadd.f32 %v2955_v51, %v1070_v47 }
 0x13b   : > { %v2278_v48 = vpack.c.bf16 %v1378_v45, %v1378_v45  ;;  %v2457_v50 = vpop.f32.mrf.mxu0  ;;  %v2328_v53 = vpack.c.bf16 %v1428_v49, %v1428_v49  ;;  %v2557_v55 = vpop.f32.mrf.mxu1 }
 0x13c   : > { %vm1183_vm10 = vcmp.ge.f32.partialorder %v871_v46, 0.0  ;;  %v1281_v54 = vmul.f32 0.2, %v871_v46  ;;  %vm1233_vm11 = vcmp.ge.f32.partialorder %v1071_v52, 0.0  ;;  %v1331_v56 = vmul.f32 0.2, %v1071_v52 }
 0x13d   : > { %1869 = vst.msk [vmem:[%s2965_s27 + $0x64] sm:$0xf] %vm1843_vm4, %v2278_v48  ;;  %v873_v57 = vpop.f32.mrf.mxu0  ;;  %1919 = vst.msk [vmem:[%s2965_s27 + $0x12c] sm:$0xf] %vm1843_vm4, %v2328_v53  ;;  %v1073_v60 = vpop.f32.mrf.mxu1 }
 0x13e   : > { %v1379_v58 = vsel %vm1183_vm10, %v871_v46, %v1281_v54  ;;  %v874_v59 = vadd.f32 %v2955_v51, %v873_v57  ;;  %v1429_v62 = vsel %vm1233_vm11, %v1071_v52, %v1331_v56  ;;  %v1074_v0 = vadd.f32 %v2955_v51, %v1073_v60  ;;  %v3156_v56 = vld [vmem:[%s3275_s2] ss:$0 sm:$0xff] }
 0x13f   : > { %v2279_v61 = vpack.c.bf16 %v1379_v58, %v1379_v58  ;;  %v2458_v63 = vpop.f32.mrf.mxu0  ;;  %v2329_v1 = vpack.c.bf16 %v1429_v62, %v1429_v62  ;;  %v2558_v3 = vpop.f32.mrf.mxu1 }
 0x140   : > { %vm1184_vm12 = vcmp.ge.f32.partialorder %v874_v59, 0.0  ;;  %v1282_v2 = vmul.f32 0.2, %v874_v59  ;;  %vm1234_vm13 = vcmp.ge.f32.partialorder %v1074_v0, 0.0  ;;  %v1332_v4 = vmul.f32 0.2, %v1074_v0 }
 0x141   : > { %1870 = vst.msk [vmem:[%s2965_s27 + $0x68] sm:$0xf] %vm1843_vm4, %v2279_v61  ;;  %v878_v5 = vpop.f32.mrf.mxu0  ;;  %1920 = vst.msk [vmem:[%s2965_s27 + $0x130] sm:$0xf] %vm1843_vm4, %v2329_v1  ;;  %v1078_v8 = vpop.f32.mrf.mxu1 }
 0x142   : > { %v1380_v6 = vsel %vm1184_vm12, %v874_v59, %v1282_v2  ;;  %v879_v7 = vadd.f32 %v2955_v51, %v878_v5  ;;  %v1430_v10 = vsel %vm1234_vm13, %v1074_v0, %v1332_v4  ;;  %v1079_v12 = vadd.f32 %v2955_v51, %v1078_v8 }
 0x143   : > { %v2280_v9 = vpack.c.bf16 %v1380_v6, %v1380_v6  ;;  %v2461_v11 = vpop.f32.mrf.mxu0  ;;  %v2330_v13 = vpack.c.bf16 %v1430_v10, %v1430_v10  ;;  %v2561_v15 = vpop.f32.mrf.mxu1 }
 0x144   : > { %vm1185_vm14 = vcmp.ge.f32.partialorder %v879_v7, 0.0  ;;  %v1283_v14 = vmul.f32 0.2, %v879_v7  ;;  %vm1235_vm15 = vcmp.ge.f32.partialorder %v1079_v12, 0.0  ;;  %v1333_v16 = vmul.f32 0.2, %v1079_v12 }
 0x145   : > { %1871 = vst.msk [vmem:[%s2965_s27 + $0x6c] sm:$0xf] %vm1843_vm4, %v2280_v9  ;;  %v881_v17 = vpop.f32.mrf.mxu0  ;;  %1921 = vst.msk [vmem:[%s2965_s27 + $0x134] sm:$0xf] %vm1843_vm4, %v2330_v13  ;;  %v1081_v20 = vpop.f32.mrf.mxu1 }
 0x146   : > { %v1381_v18 = vsel %vm1185_vm14, %v879_v7, %v1283_v14  ;;  %v882_v19 = vadd.f32 %v2955_v51, %v881_v17  ;;  %v1431_v22 = vsel %vm1235_vm15, %v1079_v12, %v1333_v16  ;;  %v1082_v24 = vadd.f32 %v2955_v51, %v1081_v20 }
 0x147   : > { %v2281_v21 = vpack.c.bf16 %v1381_v18, %v1381_v18  ;;  %v2462_v23 = vpop.f32.mrf.mxu0  ;;  %v2331_v25 = vpack.c.bf16 %v1431_v22, %v1431_v22  ;;  %v2562_v27 = vpop.f32.mrf.mxu1 }
 0x148   : > { %vm1186_vm0 = vcmp.ge.f32.partialorder %v882_v19, 0.0  ;;  %v1284_v26 = vmul.f32 0.2, %v882_v19  ;;  %vm1236_vm1 = vcmp.ge.f32.partialorder %v1082_v24, 0.0  ;;  %v1334_v28 = vmul.f32 0.2, %v1082_v24 }
 0x149   : > { %1872 = vst.msk [vmem:[%s2965_s27 + $0x70] sm:$0xf] %vm1843_vm4, %v2281_v21  ;;  %v886_v29 = vpop.f32.mrf.mxu0  ;;  %1922 = vst.msk [vmem:[%s2965_s27 + $0x138] sm:$0xf] %vm1843_vm4, %v2331_v25  ;;  %v1086_v32 = vpop.f32.mrf.mxu1 }
 0x14a   : > { %v1382_v30 = vsel %vm1186_vm0, %v882_v19, %v1284_v26  ;;  %v887_v31 = vadd.f32 %v2955_v51, %v886_v29  ;;  %v1432_v34 = vsel %vm1236_vm1, %v1082_v24, %v1334_v28  ;;  %v1087_v36 = vadd.f32 %v2955_v51, %v1086_v32 }
 0x14b   : > { %v2282_v33 = vpack.c.bf16 %v1382_v30, %v1382_v30  ;;  %v2465_v35 = vpop.f32.mrf.mxu0  ;;  %v2332_v37 = vpack.c.bf16 %v1432_v34, %v1432_v34  ;;  %v2565_v39 = vpop.f32.mrf.mxu1 }
 0x14c   : > { %vm1187_vm2 = vcmp.ge.f32.partialorder %v887_v31, 0.0  ;;  %v1285_v38 = vmul.f32 0.2, %v887_v31  ;;  %vm1237_vm3 = vcmp.ge.f32.partialorder %v1087_v36, 0.0  ;;  %v1335_v40 = vmul.f32 0.2, %v1087_v36 }
 0x14d   : > { %1873 = vst.msk [vmem:[%s2965_s27 + $0x74] sm:$0xf] %vm1843_vm4, %v2282_v33  ;;  %v889_v41 = vpop.f32.mrf.mxu0  ;;  %1923 = vst.msk [vmem:[%s2965_s27 + $0x13c] sm:$0xf] %vm1843_vm4, %v2332_v37  ;;  %v1089_v44 = vpop.f32.mrf.mxu1 }
 0x14e   : > { %v1383_v42 = vsel %vm1187_vm2, %v887_v31, %v1285_v38  ;;  %v890_v43 = vadd.f32 %v2955_v51, %v889_v41  ;;  %v1433_v46 = vsel %vm1237_vm3, %v1087_v36, %v1335_v40  ;;  %v1090_v48 = vadd.f32 %v2955_v51, %v1089_v44 }
 0x14f   : > { %v2283_v45 = vpack.c.bf16 %v1383_v42, %v1383_v42  ;;  %v2466_v47 = vpop.f32.mrf.mxu0  ;;  %v2333_v49 = vpack.c.bf16 %v1433_v46, %v1433_v46  ;;  %v2566_v52 = vpop.f32.mrf.mxu1 }
 0x150   : > { %vm1188_vm5 = vcmp.ge.f32.partialorder %v890_v43, 0.0  ;;  %v1286_v50 = vmul.f32 0.2, %v890_v43  ;;  %vm1238_vm6 = vcmp.ge.f32.partialorder %v1090_v48, 0.0  ;;  %v1336_v53 = vmul.f32 0.2, %v1090_v48 }
 0x151   : > { %1874 = vst.msk [vmem:[%s2965_s27 + $0x78] sm:$0xf] %vm1843_vm4, %v2283_v45  ;;  %v894_v54 = vpop.f32.mrf.mxu0  ;;  %1924 = vst.msk [vmem:[%s2965_s27 + $0x140] sm:$0xf] %vm1843_vm4, %v2333_v49  ;;  %v1094_v57 = vpop.f32.mrf.mxu1 }
 0x152   : > { %v1384_v55 = vsel %vm1188_vm5, %v890_v43, %v1286_v50  ;;  %v895_v51 = vadd.f32 %v3156_v56, %v894_v54  ;;  %v1434_v59 = vsel %vm1238_vm6, %v1090_v48, %v1336_v53  ;;  %v1095_v61 = vadd.f32 %v3156_v56, %v1094_v57 }
 0x153   : > { %v2284_v58 = vpack.c.bf16 %v1384_v55, %v1384_v55  ;;  %v2469_v60 = vpop.f32.mrf.mxu0  ;;  %v2334_v62 = vpack.c.bf16 %v1434_v59, %v1434_v59  ;;  %v2569_v0 = vpop.f32.mrf.mxu1 }
 0x154   : > { %vm1189_vm7 = vcmp.ge.f32.partialorder %v895_v51, 0.0  ;;  %v1287_v63 = vmul.f32 0.2, %v895_v51  ;;  %vm1239_vm8 = vcmp.ge.f32.partialorder %v1095_v61, 0.0  ;;  %v1337_v1 = vmul.f32 0.2, %v1095_v61 }
 0x155   : > { %1875 = vst.msk [vmem:[%s2965_s27 + $0x7c] sm:$0xf] %vm1843_vm4, %v2284_v58  ;;  %v897_v2 = vpop.f32.mrf.mxu0  ;;  %1925 = vst.msk [vmem:[%s2965_s27 + $0x144] sm:$0xf] %vm1843_vm4, %v2334_v62  ;;  %v1097_v5 = vpop.f32.mrf.mxu1 }
 0x156   : > { %v1385_v3 = vsel %vm1189_vm7, %v895_v51, %v1287_v63  ;;  %v898_v4 = vadd.f32 %v3156_v56, %v897_v2  ;;  %v1435_v7 = vsel %vm1239_vm8, %v1095_v61, %v1337_v1  ;;  %v1098_v9 = vadd.f32 %v3156_v56, %v1097_v5 }
 0x157   : > { %v2285_v6 = vpack.c.bf16 %v1385_v3, %v1385_v3  ;;  %v2470_v8 = vpop.f32.mrf.mxu0  ;;  %v2335_v10 = vpack.c.bf16 %v1435_v7, %v1435_v7  ;;  %v2570_v12 = vpop.f32.mrf.mxu1 }
 0x158   : > { %vm1190_vm9 = vcmp.ge.f32.partialorder %v898_v4, 0.0  ;;  %v1288_v11 = vmul.f32 0.2, %v898_v4  ;;  %vm1240_vm10 = vcmp.ge.f32.partialorder %v1098_v9, 0.0  ;;  %v1338_v13 = vmul.f32 0.2, %v1098_v9 }
 0x159   : > { %1876 = vst.msk [vmem:[%s2965_s27 + $0x80] sm:$0xf] %vm1843_vm4, %v2285_v6  ;;  %v902_v14 = vpop.f32.mrf.mxu0  ;;  %1926 = vst.msk [vmem:[%s2965_s27 + $0x148] sm:$0xf] %vm1843_vm4, %v2335_v10  ;;  %v1102_v17 = vpop.f32.mrf.mxu1 }
 0x15a   : > { %v1386_v15 = vsel %vm1190_vm9, %v898_v4, %v1288_v11  ;;  %v903_v16 = vadd.f32 %v3156_v56, %v902_v14  ;;  %v1436_v19 = vsel %vm1240_vm10, %v1098_v9, %v1338_v13  ;;  %v1103_v21 = vadd.f32 %v3156_v56, %v1102_v17 }
 0x15b   : > { %v2286_v18 = vpack.c.bf16 %v1386_v15, %v1386_v15  ;;  %v2473_v20 = vpop.f32.mrf.mxu0  ;;  %v2336_v22 = vpack.c.bf16 %v1436_v19, %v1436_v19  ;;  %v2573_v24 = vpop.f32.mrf.mxu1 }
 0x15c   : > { %vm1191_vm11 = vcmp.ge.f32.partialorder %v903_v16, 0.0  ;;  %v1289_v23 = vmul.f32 0.2, %v903_v16  ;;  %vm1241_vm12 = vcmp.ge.f32.partialorder %v1103_v21, 0.0  ;;  %v1339_v25 = vmul.f32 0.2, %v1103_v21 }
 0x15d   : > { %1877 = vst.msk [vmem:[%s2965_s27 + $0x84] sm:$0xf] %vm1843_vm4, %v2286_v18  ;;  %v905_v26 = vpop.f32.mrf.mxu0  ;;  %1927 = vst.msk [vmem:[%s2965_s27 + $0x14c] sm:$0xf] %vm1843_vm4, %v2336_v22  ;;  %v1105_v29 = vpop.f32.mrf.mxu1 }
 0x15e   : > { %v1387_v27 = vsel %vm1191_vm11, %v903_v16, %v1289_v23  ;;  %v906_v28 = vadd.f32 %v3156_v56, %v905_v26  ;;  %v1437_v31 = vsel %vm1241_vm12, %v1103_v21, %v1339_v25  ;;  %v1106_v33 = vadd.f32 %v3156_v56, %v1105_v29 }
 0x15f   : > { %v2287_v30 = vpack.c.bf16 %v1387_v27, %v1387_v27  ;;  %v2474_v32 = vpop.f32.mrf.mxu0  ;;  %v2337_v34 = vpack.c.bf16 %v1437_v31, %v1437_v31  ;;  %v2574_v36 = vpop.f32.mrf.mxu1 }
 0x160   : > { %vm1192_vm13 = vcmp.ge.f32.partialorder %v906_v28, 0.0  ;;  %v1290_v35 = vmul.f32 0.2, %v906_v28  ;;  %vm1242_vm14 = vcmp.ge.f32.partialorder %v1106_v33, 0.0  ;;  %v1340_v37 = vmul.f32 0.2, %v1106_v33 }
 0x161   : > { %1878 = vst.msk [vmem:[%s2965_s27 + $0x88] sm:$0xf] %vm1843_vm4, %v2287_v30  ;;  %v910_v38 = vpop.f32.mrf.mxu0  ;;  %1928 = vst.msk [vmem:[%s2965_s27 + $0x150] sm:$0xf] %vm1843_vm4, %v2337_v34  ;;  %v1110_v41 = vpop.f32.mrf.mxu1 }
 0x162   : > { %v1388_v39 = vsel %vm1192_vm13, %v906_v28, %v1290_v35  ;;  %v911_v40 = vadd.f32 %v3156_v56, %v910_v38  ;;  %v1438_v43 = vsel %vm1242_vm14, %v1106_v33, %v1340_v37  ;;  %v1111_v45 = vadd.f32 %v3156_v56, %v1110_v41 }
 0x163   : > { %v2288_v42 = vpack.c.bf16 %v1388_v39, %v1388_v39  ;;  %v2477_v44 = vpop.f32.mrf.mxu0  ;;  %v2338_v46 = vpack.c.bf16 %v1438_v43, %v1438_v43  ;;  %v2577_v48 = vpop.f32.mrf.mxu1 }
 0x164   : > { %vm1193_vm15 = vcmp.ge.f32.partialorder %v911_v40, 0.0  ;;  %v1291_v47 = vmul.f32 0.2, %v911_v40  ;;  %vm1243_vm0 = vcmp.ge.f32.partialorder %v1111_v45, 0.0  ;;  %v1341_v49 = vmul.f32 0.2, %v1111_v45 }
 0x165   : > { %1879 = vst.msk [vmem:[%s2965_s27 + $0x8c] sm:$0xf] %vm1843_vm4, %v2288_v42  ;;  %v913_v50 = vpop.f32.mrf.mxu0  ;;  %1929 = vst.msk [vmem:[%s2965_s27 + $0x154] sm:$0xf] %vm1843_vm4, %v2338_v46  ;;  %v1113_v54 = vpop.f32.mrf.mxu1 }
 0x166   : > { %v1389_v52 = vsel %vm1193_vm15, %v911_v40, %v1291_v47  ;;  %v914_v53 = vadd.f32 %v3156_v56, %v913_v50  ;;  %v1439_v51 = vsel %vm1243_vm0, %v1111_v45, %v1341_v49  ;;  %v1114_v58 = vadd.f32 %v3156_v56, %v1113_v54 }
 0x167   : > { %v2289_v55 = vpack.c.bf16 %v1389_v52, %v1389_v52  ;;  %v2478_v57 = vpop.f32.mrf.mxu0  ;;  %v2339_v59 = vpack.c.bf16 %v1439_v51, %v1439_v51  ;;  %v2578_v61 = vpop.f32.mrf.mxu1 }
 0x168   : > { %vm1194_vm1 = vcmp.ge.f32.partialorder %v914_v53, 0.0  ;;  %v1292_v60 = vmul.f32 0.2, %v914_v53  ;;  %vm1244_vm2 = vcmp.ge.f32.partialorder %v1114_v58, 0.0  ;;  %v1342_v62 = vmul.f32 0.2, %v1114_v58 }
 0x169   : > { %1880 = vst.msk [vmem:[%s2965_s27 + $0x90] sm:$0xf] %vm1843_vm4, %v2289_v55  ;;  %v918_v63 = vpop.f32.mrf.mxu0  ;;  %1930 = vst.msk [vmem:[%s2965_s27 + $0x158] sm:$0xf] %vm1843_vm4, %v2339_v59  ;;  %v1118_v2 = vpop.f32.mrf.mxu1 }
 0x16a   : > { %v1390_v0 = vsel %vm1194_vm1, %v914_v53, %v1292_v60  ;;  %v919_v1 = vadd.f32 %v3156_v56, %v918_v63  ;;  %v1440_v4 = vsel %vm1244_vm2, %v1114_v58, %v1342_v62  ;;  %v1119_v6 = vadd.f32 %v3156_v56, %v1118_v2 }
 0x16b   : > { %v2290_v3 = vpack.c.bf16 %v1390_v0, %v1390_v0  ;;  %v2481_v5 = vpop.f32.mrf.mxu0  ;;  %v2340_v7 = vpack.c.bf16 %v1440_v4, %v1440_v4  ;;  %v2581_v9 = vpop.f32.mrf.mxu1 }
 0x16c   : > { %vm1195_vm3 = vcmp.ge.f32.partialorder %v919_v1, 0.0  ;;  %v1293_v8 = vmul.f32 0.2, %v919_v1  ;;  %vm1245_vm5 = vcmp.ge.f32.partialorder %v1119_v6, 0.0  ;;  %v1343_v10 = vmul.f32 0.2, %v1119_v6 }
 0x16d   : > { %1881 = vst.msk [vmem:[%s2965_s27 + $0x94] sm:$0xf] %vm1843_vm4, %v2290_v3  ;;  %v921_v11 = vpop.f32.mrf.mxu0  ;;  %1931 = vst.msk [vmem:[%s2965_s27 + $0x15c] sm:$0xf] %vm1843_vm4, %v2340_v7  ;;  %v1121_v14 = vpop.f32.mrf.mxu1 }
 0x16e   : > { %v1391_v12 = vsel %vm1195_vm3, %v919_v1, %v1293_v8  ;;  %v922_v13 = vadd.f32 %v3156_v56, %v921_v11  ;;  %v1441_v16 = vsel %vm1245_vm5, %v1119_v6, %v1343_v10  ;;  %v1122_v18 = vadd.f32 %v3156_v56, %v1121_v14 }
 0x16f   : > { %v2291_v15 = vpack.c.bf16 %v1391_v12, %v1391_v12  ;;  %v2482_v17 = vpop.f32.mrf.mxu0  ;;  %v2341_v19 = vpack.c.bf16 %v1441_v16, %v1441_v16  ;;  %v2582_v21 = vpop.f32.mrf.mxu1 }
 0x170   : > { %vm1196_vm6 = vcmp.ge.f32.partialorder %v922_v13, 0.0  ;;  %v1294_v20 = vmul.f32 0.2, %v922_v13  ;;  %vm1246_vm7 = vcmp.ge.f32.partialorder %v1122_v18, 0.0  ;;  %v1344_v22 = vmul.f32 0.2, %v1122_v18 }
 0x171   : > { %1882 = vst.msk [vmem:[%s2965_s27 + $0x98] sm:$0xf] %vm1843_vm4, %v2291_v15  ;;  %v926_v23 = vpop.f32.mrf.mxu0  ;;  %1932 = vst.msk [vmem:[%s2965_s27 + $0x160] sm:$0xf] %vm1843_vm4, %v2341_v19  ;;  %v1126_v26 = vpop.f32.mrf.mxu1 }
 0x172   : > { %v1392_v24 = vsel %vm1196_vm6, %v922_v13, %v1294_v20  ;;  %v927_v25 = vadd.f32 %v3156_v56, %v926_v23  ;;  %v1442_v28 = vsel %vm1246_vm7, %v1122_v18, %v1344_v22  ;;  %v1127_v30 = vadd.f32 %v3156_v56, %v1126_v26 }
 0x173   : > { %v2292_v27 = vpack.c.bf16 %v1392_v24, %v1392_v24  ;;  %v2485_v29 = vpop.f32.mrf.mxu0  ;;  %v2342_v31 = vpack.c.bf16 %v1442_v28, %v1442_v28  ;;  %v2585_v33 = vpop.f32.mrf.mxu1 }
 0x174   : > { %vm1197_vm8 = vcmp.ge.f32.partialorder %v927_v25, 0.0  ;;  %v1295_v32 = vmul.f32 0.2, %v927_v25  ;;  %vm1247_vm9 = vcmp.ge.f32.partialorder %v1127_v30, 0.0  ;;  %v1345_v34 = vmul.f32 0.2, %v1127_v30 }
 0x175   : > { %1883 = vst.msk [vmem:[%s2965_s27 + $0x9c] sm:$0xf] %vm1843_vm4, %v2292_v27  ;;  %v929_v35 = vpop.f32.mrf.mxu0  ;;  %1933 = vst.msk [vmem:[%s2965_s27 + $0x164] sm:$0xf] %vm1843_vm4, %v2342_v31  ;;  %v1129_v38 = vpop.f32.mrf.mxu1 }
 0x176   : > { %v1393_v36 = vsel %vm1197_vm8, %v927_v25, %v1295_v32  ;;  %v930_v37 = vadd.f32 %v3156_v56, %v929_v35  ;;  %v1443_v40 = vsel %vm1247_vm9, %v1127_v30, %v1345_v34  ;;  %v1130_v42 = vadd.f32 %v3156_v56, %v1129_v38 }
 0x177   : > { %v2293_v39 = vpack.c.bf16 %v1393_v36, %v1393_v36  ;;  %v2486_v41 = vpop.f32.mrf.mxu0  ;;  %v2343_v43 = vpack.c.bf16 %v1443_v40, %v1443_v40  ;;  %v2586_v45 = vpop.f32.mrf.mxu1 }
 0x178   : > { %vm1198_vm10 = vcmp.ge.f32.partialorder %v930_v37, 0.0  ;;  %v1296_v44 = vmul.f32 0.2, %v930_v37  ;;  %vm1248_vm11 = vcmp.ge.f32.partialorder %v1130_v42, 0.0  ;;  %v1346_v46 = vmul.f32 0.2, %v1130_v42 }
 0x179   : > { %1884 = vst.msk [vmem:[%s2965_s27 + $0xa0] sm:$0xf] %vm1843_vm4, %v2293_v39  ;;  %v934_v47 = vpop.f32.mrf.mxu0  ;;  %1934 = vst.msk [vmem:[%s2965_s27 + $0x168] sm:$0xf] %vm1843_vm4, %v2343_v43  ;;  %v1134_v50 = vpop.f32.mrf.mxu1 }
 0x17a   : > { %v1394_v48 = vsel %vm1198_vm10, %v930_v37, %v1296_v44  ;;  %v935_v49 = vadd.f32 %v3156_v56, %v934_v47  ;;  %v1444_v53 = vsel %vm1248_vm11, %v1130_v42, %v1346_v46  ;;  %v1135_v55 = vadd.f32 %v3156_v56, %v1134_v50 }
 0x17b   : > { %v2294_v52 = vpack.c.bf16 %v1394_v48, %v1394_v48  ;;  %v2489_v54 = vpop.f32.mrf.mxu0  ;;  %v2344_v51 = vpack.c.bf16 %v1444_v53, %v1444_v53  ;;  %v2589_v58 = vpop.f32.mrf.mxu1 }
 0x17c   : > { %vm1199_vm12 = vcmp.ge.f32.partialorder %v935_v49, 0.0  ;;  %v1297_v57 = vmul.f32 0.2, %v935_v49  ;;  %vm1249_vm13 = vcmp.ge.f32.partialorder %v1135_v55, 0.0  ;;  %v1347_v59 = vmul.f32 0.2, %v1135_v55 }
 0x17d   : > { %1885 = vst.msk [vmem:[%s2965_s27 + $0xa4] sm:$0xf] %vm1843_vm4, %v2294_v52  ;;  %v937_v60 = vpop.f32.mrf.mxu0  ;;  %1935 = vst.msk [vmem:[%s2965_s27 + $0x16c] sm:$0xf] %vm1843_vm4, %v2344_v51  ;;  %v1137_v63 = vpop.f32.mrf.mxu1 }
 0x17e   : > { %v1395_v61 = vsel %vm1199_vm12, %v935_v49, %v1297_v57  ;;  %v938_v62 = vadd.f32 %v3156_v56, %v937_v60  ;;  %v1445_v1 = vsel %vm1249_vm13, %v1135_v55, %v1347_v59  ;;  %v1138_v3 = vadd.f32 %v3156_v56, %v1137_v63 }
 0x17f   : > { %v2295_v0 = vpack.c.bf16 %v1395_v61, %v1395_v61  ;;  %v2490_v2 = vpop.f32.mrf.mxu0  ;;  %v2345_v4 = vpack.c.bf16 %v1445_v1, %v1445_v1  ;;  %v2590_v6 = vpop.f32.mrf.mxu1 }
 0x180   : > { %vm1200_vm14 = vcmp.ge.f32.partialorder %v938_v62, 0.0  ;;  %v1298_v5 = vmul.f32 0.2, %v938_v62  ;;  %vm1250_vm15 = vcmp.ge.f32.partialorder %v1138_v3, 0.0  ;;  %v1348_v7 = vmul.f32 0.2, %v1138_v3 }
 0x181   : > { %1886 = vst.msk [vmem:[%s2965_s27 + $0xa8] sm:$0xf] %vm1843_vm4, %v2295_v0  ;;  %v942_v8 = vpop.f32.mrf.mxu0  ;;  %1936 = vst.msk [vmem:[%s2965_s27 + $0x170] sm:$0xf] %vm1843_vm4, %v2345_v4  ;;  %v1142_v11 = vpop.f32.mrf.mxu1 }
 0x182   : > { %v1396_v9 = vsel %vm1200_vm14, %v938_v62, %v1298_v5  ;;  %v943_v10 = vadd.f32 %v3156_v56, %v942_v8  ;;  %v1446_v13 = vsel %vm1250_vm15, %v1138_v3, %v1348_v7  ;;  %v1143_v15 = vadd.f32 %v3156_v56, %v1142_v11 }
 0x183   : > { %v2296_v12 = vpack.c.bf16 %v1396_v9, %v1396_v9  ;;  %v2493_v14 = vpop.f32.mrf.mxu0  ;;  %v2346_v16 = vpack.c.bf16 %v1446_v13, %v1446_v13  ;;  %v2593_v18 = vpop.f32.mrf.mxu1 }
 0x184   : > { %vm1201_vm0 = vcmp.ge.f32.partialorder %v943_v10, 0.0  ;;  %v1299_v17 = vmul.f32 0.2, %v943_v10  ;;  %vm1251_vm1 = vcmp.ge.f32.partialorder %v1143_v15, 0.0  ;;  %v1349_v19 = vmul.f32 0.2, %v1143_v15 }
 0x185   : > { %1887 = vst.msk [vmem:[%s2965_s27 + $0xac] sm:$0xf] %vm1843_vm4, %v2296_v12  ;;  %v945_v20 = vpop.f32.mrf.mxu0  ;;  %1937 = vst.msk [vmem:[%s2965_s27 + $0x174] sm:$0xf] %vm1843_vm4, %v2346_v16  ;;  %v1145_v23 = vpop.f32.mrf.mxu1 }
 0x186   : > { %v1397_v21 = vsel %vm1201_vm0, %v943_v10, %v1299_v17  ;;  %v946_v22 = vadd.f32 %v3156_v56, %v945_v20  ;;  %v1447_v25 = vsel %vm1251_vm1, %v1143_v15, %v1349_v19  ;;  %v1146_v27 = vadd.f32 %v3156_v56, %v1145_v23 }
 0x187   : > { %v2297_v24 = vpack.c.bf16 %v1397_v21, %v1397_v21  ;;  %v2494_v26 = vpop.f32.mrf.mxu0  ;;  %v2347_v28 = vpack.c.bf16 %v1447_v25, %v1447_v25  ;;  %v2594_v30 = vpop.f32.mrf.mxu1 }
 0x188   : > { %vm1202_vm2 = vcmp.ge.f32.partialorder %v946_v22, 0.0  ;;  %v1300_v29 = vmul.f32 0.2, %v946_v22  ;;  %vm1252_vm3 = vcmp.ge.f32.partialorder %v1146_v27, 0.0  ;;  %v1350_v31 = vmul.f32 0.2, %v1146_v27 }
 0x189   : > { %1888 = vst.msk [vmem:[%s2965_s27 + $0xb0] sm:$0xf] %vm1843_vm4, %v2297_v24  ;;  %v950_v32 = vpop.f32.mrf.mxu0  ;;  %1938 = vst.msk [vmem:[%s2965_s27 + $0x178] sm:$0xf] %vm1843_vm4, %v2347_v28  ;;  %v1150_v35 = vpop.f32.mrf.mxu1 }
 0x18a   : > { %v1398_v33 = vsel %vm1202_vm2, %v946_v22, %v1300_v29  ;;  %v951_v34 = vadd.f32 %v3156_v56, %v950_v32  ;;  %v1448_v37 = vsel %vm1252_vm3, %v1146_v27, %v1350_v31  ;;  %v1151_v39 = vadd.f32 %v3156_v56, %v1150_v35 }
 0x18b   : > { %v2298_v36 = vpack.c.bf16 %v1398_v33, %v1398_v33  ;;  %v2497_v38 = vpop.f32.mrf.mxu0  ;;  %v2348_v40 = vpack.c.bf16 %v1448_v37, %v1448_v37  ;;  %v2597_v42 = vpop.f32.mrf.mxu1 }
 0x18c   : > { %vm1203_vm5 = vcmp.ge.f32.partialorder %v951_v34, 0.0  ;;  %v1301_v41 = vmul.f32 0.2, %v951_v34  ;;  %vm1253_vm6 = vcmp.ge.f32.partialorder %v1151_v39, 0.0  ;;  %v1351_v43 = vmul.f32 0.2, %v1151_v39 }
 0x18d   : > { %1889 = vst.msk [vmem:[%s2965_s27 + $0xb4] sm:$0xf] %vm1843_vm4, %v2298_v36  ;;  %v953_v44 = vpop.f32.mrf.mxu0  ;;  %1939 = vst.msk [vmem:[%s2965_s27 + $0x17c] sm:$0xf] %vm1843_vm4, %v2348_v40  ;;  %v1153_v47 = vpop.f32.mrf.mxu1 }
 0x18e   : > { %v1399_v45 = vsel %vm1203_vm5, %v951_v34, %v1301_v41  ;;  %v954_v46 = vadd.f32 %v3156_v56, %v953_v44  ;;  %v1449_v49 = vsel %vm1253_vm6, %v1151_v39, %v1351_v43  ;;  %v1154_v52 = vadd.f32 %v3156_v56, %v1153_v47 }
 0x18f   : > { %v2299_v48 = vpack.c.bf16 %v1399_v45, %v1399_v45  ;;  %v2498_v50 = vpop.f32.mrf.mxu0  ;;  %v2349_v53 = vpack.c.bf16 %v1449_v49, %v1449_v49  ;;  %v2598_v55 = vpop.f32.mrf.mxu1 }
 0x190   : > { %vm1204_vm7 = vcmp.ge.f32.partialorder %v954_v46, 0.0  ;;  %v1302_v54 = vmul.f32 0.2, %v954_v46  ;;  %vm1254_vm8 = vcmp.ge.f32.partialorder %v1154_v52, 0.0  ;;  %v1352_v51 = vmul.f32 0.2, %v1154_v52 }
 0x191   : > { %1890 = vst.msk [vmem:[%s2965_s27 + $0xb8] sm:$0xf] %vm1843_vm4, %v2299_v48  ;;  %v958_v57 = vpop.f32.mrf.mxu0  ;;  %1940 = vst.msk [vmem:[%s2965_s27 + $0x180] sm:$0xf] %vm1843_vm4, %v2349_v53 }
 0x192   : > { %v1400_v58 = vsel %vm1204_vm7, %v954_v46, %v1302_v54  ;;  %v959_v59 = vadd.f32 %v3156_v56, %v958_v57  ;;  %v1450_v61 = vsel %vm1254_vm8, %v1154_v52, %v1352_v51 }
 0x193   : > { %v2300_v60 = vpack.c.bf16 %v1400_v58, %v1400_v58  ;;  %v2501_v62 = vpop.f32.mrf.mxu0  ;;  %v2350_v63 = vpack.c.bf16 %v1450_v61, %v1450_v61 }
 0x194   : > { %vm1205_vm9 = vcmp.ge.f32.partialorder %v959_v59, 0.0  ;;  %v1303_v0 = vmul.f32 0.2, %v959_v59 }
 0x195   : > { %1891 = vst.msk [vmem:[%s2965_s27 + $0xbc] sm:$0xf] %vm1843_vm4, %v2300_v60  ;;  %v961_v1 = vpop.f32.mrf.mxu0  ;;  %1941 = vst.msk [vmem:[%s2965_s27 + $0x184] sm:$0xf] %vm1843_vm4, %v2350_v63 }
 0x196   : > { %v1401_v2 = vsel %vm1205_vm9, %v959_v59, %v1303_v0  ;;  %v962_v3 = vadd.f32 %v3156_v56, %v961_v1 }
 0x197   : > { %v2301_v4 = vpack.c.bf16 %v1401_v2, %v1401_v2  ;;  %v2502_v5 = vpop.f32.mrf.mxu0 }
 0x198   : > { %vm1206_vm10 = vcmp.ge.f32.partialorder %v962_v3, 0.0  ;;  %v1304_v6 = vmul.f32 0.2, %v962_v3 }
 0x199   : > { %1892 = vst.msk [vmem:[%s2965_s27 + $0xc0] sm:$0xf] %vm1843_vm4, %v2301_v4 }
 0x19a   : > { %v1402_v7 = vsel %vm1206_vm10, %v962_v3, %v1304_v6 }
 0x19b   : > { %v2302_v8 = vpack.c.bf16 %v1402_v7, %v1402_v7 }
 0x19d   : > { %1893 = vst.msk [vmem:[%s2965_s27 + $0xc4] sm:$0xf] %vm1843_vm4, %v2302_v8 }
 0x19e PF: > { %s13_s14 = sadd.s32 1, %s2700_s14   ;;  %s3277_s12 = smov %s2696_s13 }
 0x19f   : > { %p10_p5 = scmp.ge.s32.totalorder %s13_s14, 4   ;;  %s3278_s13 = smov %s3280_s15 }
 0x1a1   :  { %12 = sbr.rel (!%p10_p5) target bundleno = 2 (0x2), region = 68 }

// kernel: discriminator_forward.9
= control target key start
LH: loop header
LB: loop body
LE: loop exit
PB: predicated region body
PF: predicated region fallthrough
CT: control target
= control target key end

     0   :  { %v2254_v0 = vmov 0   ;;  %vm1524_vm0 = vcmask 519168   ;;  %vm1574_vm1 = vcmask 523264   ;;  %s3178_s1 = inlined_call_operand.vmem [shape: bf16[512,64], index: 1, kind: input, shape index: {}]   ;;  %s3179_s0 = inlined_call_operand.vmem [shape: bf16[392,512], index: 0, kind: input, shape index: {}]   ;;  %s3180_s2 = inlined_call_operand.vmem [shape: bf16[392,64], index: 2, kind: output, shape index: {0}]   ;;  %s3181_s3 = inlined_call_operand.vmem [shape: f32[1,8,64], index: 3, kind: output, shape index: {1}]   ;;  %s3182_s4 = inlined_call_operand.vmem [shape: f32[1,8,64], index: 4, kind: output, shape index: {2}]  }
   0x1   :  { %863 = vmatprep.subr.bf16.mxu0 %v2254_v0  ;;  %1095 = vmatprep.subr.bf16.mxu1 %v2254_v0  ;;  %v2075_v1 = vld [vmem:[%s3178_s1 + $0x38] sm:$0xff]   ;;  %v2077_v3 = vld [vmem:[%s3178_s1 + $0x30] sm:$0xff]   ;;  %v2079_v5 = vld [vmem:[%s3178_s1 + $0x28] sm:$0xff]  }
   0x2   :  { %v2076_v2 = vld [vmem:[%s3178_s1 + $0xb8] sm:$0xff]   ;;  %864 = vmatpush1.bf16.msra.mxu0 %v2075_v1  ;;  %v2078_v4 = vld [vmem:[%s3178_s1 + $0xb0] sm:$0xff]   ;;  %v2080_v6 = vld [vmem:[%s3178_s1 + $0xa8] sm:$0xff]  }
   0x3   :  { %1096 = vmatpush1.bf16.msra.mxu1 %v2076_v2  ;;  %865 = vmatprep.subr.bf16.mxu0 %v2254_v0  ;;  %v2081_v7 = vld [vmem:[%s3178_s1 + $0x20] sm:$0xff]   ;;  %v2083_v9 = vld [vmem:[%s3178_s1 + $0x18] sm:$0xff]   ;;  %v2085_v11 = vld [vmem:[%s3178_s1 + $0x10] sm:$0xff]  }
   0x4   :  { %1097 = vmatprep.subr.bf16.mxu1 %v2254_v0  ;;  %v2082_v8 = vld [vmem:[%s3178_s1 + $0xa0] sm:$0xff]   ;;  %v2084_v10 = vld [vmem:[%s3178_s1 + $0x98] sm:$0xff]   ;;  %v2086_v12 = vld [vmem:[%s3178_s1 + $0x90] sm:$0xff]  }
   0x5   :  { %v2087_v13 = vld [vmem:[%s3178_s1 + $0x8] sm:$0xff]   ;;  %v2089_v15 = vld [vmem:[%s3178_s1] sm:$0xff]   ;;  %v2091_v17 = vld [vmem:[%s3178_s1 + $0x78] sm:$0xff]  }
   0x6   :  { %866 = vmatpush1.bf16.msra.mxu0 %v2077_v3  ;;  %v2088_v14 = vld [vmem:[%s3178_s1 + $0x88] sm:$0xff]   ;;  %v2090_v16 = vld [vmem:[%s3178_s1 + $0x80] sm:$0xff]   ;;  %v2092_v18 = vld [vmem:[%s3178_s1 + $0xf8] sm:$0xff]  }
   0x7   :  { %1098 = vmatpush1.bf16.msra.mxu1 %v2078_v4  ;;  %867 = vmatprep.subr.bf16.mxu0 %v2254_v0  ;;  %v2109_v19 = vld [vmem:[%s3179_s0 + $0x4] ss:$16 sps:$4 sm:$0xff]   ;;  %v2112_v21 = vld [vmem:[%s3179_s0 + $0xc] ss:$16 sps:$4 sm:$0xff]   ;;  %v2107_v35 = vld [vmem:[%s3179_s0] ss:$16 sps:$4 sm:$0xff]  }
   0x8   :  { %1099 = vmatprep.subr.bf16.mxu1 %v2254_v0  ;;  %v2093_v20 = vld [vmem:[%s3178_s1 + $0x70] sm:$0xff]   ;;  %895 = vmatprep.mubr.bf16.mxu0 %v2109_v19  ;;  %v2095_v23 = vld [vmem:[%s3178_s1 + $0x68] sm:$0xff]   ;;  %v2097_v25 = vld [vmem:[%s3178_s1 + $0x60] sm:$0xff]  }
   0x9   :  { %v2094_v22 = vld [vmem:[%s3178_s1 + $0xf0] sm:$0xff]   ;;  %1127 = vmatprep.mubr.bf16.mxu1 %v2112_v21  ;;  %v2096_v24 = vld [vmem:[%s3178_s1 + $0xe8] sm:$0xff]   ;;  %v2098_v26 = vld [vmem:[%s3178_s1 + $0xe0] sm:$0xff]  }
   0xa   :  { %868 = vmatpush1.bf16.msra.mxu0 %v2079_v5  ;;  %v2099_v27 = vld [vmem:[%s3178_s1 + $0x58] sm:$0xff]   ;;  %v2101_v29 = vld [vmem:[%s3178_s1 + $0x50] sm:$0xff]   ;;  %v2103_v31 = vld [vmem:[%s3178_s1 + $0x48] sm:$0xff]  }
   0xb   :  { %1100 = vmatpush1.bf16.msra.mxu1 %v2080_v6  ;;  %869 = vmatprep.subr.bf16.mxu0 %v2254_v0  ;;  %v2100_v28 = vld [vmem:[%s3178_s1 + $0xd8] sm:$0xff]   ;;  %v2102_v30 = vld [vmem:[%s3178_s1 + $0xd0] sm:$0xff]   ;;  %v2104_v32 = vld [vmem:[%s3178_s1 + $0xc8] sm:$0xff]  }
   0xc   :  { %1101 = vmatprep.subr.bf16.mxu1 %v2254_v0  ;;  %v2105_v33 = vld [vmem:[%s3178_s1 + $0x40] sm:$0xff]   ;;  %v2110_v36 = vld [vmem:[%s3179_s0 + $0x8] ss:$16 sps:$4 sm:$0xff]   ;;  %v2115_v38 = vld [vmem:[%s3179_s0 + $0x2c] ss:$16 sps:$4 sm:$0xff]  }
   0xd   :  { %v2106_v34 = vld [vmem:[%s3178_s1 + $0xc0] sm:$0xff]   ;;  %v2118_v40 = vld [vmem:[%s3179_s0 + $0x28] ss:$16 sps:$4 sm:$0xff]   ;;  %v2121_v42 = vld [vmem:[%s3179_s0 + $0x4c] ss:$16 sps:$4 sm:$0xff]  }
   0xe   :  { %870 = vmatpush1.bf16.msra.mxu0 %v2081_v7  ;;  %v2113_v37 = vld [vmem:[%s3179_s0 + $0x24] ss:$16 sps:$4 sm:$0xff]   ;;  %v2117_v39 = vld [vmem:[%s3179_s0 + $0x20] ss:$16 sps:$4 sm:$0xff]   ;;  %v2124_v44 = vld [vmem:[%s3179_s0 + $0x48] ss:$16 sps:$4 sm:$0xff]  }
   0xf   :  { %1102 = vmatpush1.bf16.msra.mxu1 %v2082_v8  ;;  %871 = vmatprep.subr.bf16.mxu0 %v2254_v0  ;;  %v2119_v41 = vld [vmem:[%s3179_s0 + $0x44] ss:$16 sps:$4 sm:$0xff]   ;;  %v2123_v43 = vld [vmem:[%s3179_s0 + $0x40] ss:$16 sps:$4 sm:$0xff]   ;;  %v2127_v46 = vld [vmem:[%s3179_s0 + $0x6c] ss:$16 sps:$4 sm:$0xff]  }
  0x10   :  { %1103 = vmatprep.subr.bf16.mxu1 %v2254_v0  ;;  %v2125_v45 = vld [vmem:[%s3179_s0 + $0x64] ss:$16 sps:$4 sm:$0xff]   ;;  %v2129_v47 = vld [vmem:[%s3179_s0 + $0x60] ss:$16 sps:$4 sm:$0xff]   ;;  %v2130_v48 = vld [vmem:[%s3179_s0 + $0x68] ss:$16 sps:$4 sm:$0xff]  }
  0x11   :  { %v2131_v49 = vld [vmem:[%s3179_s0 + $0x84] ss:$16 sps:$4 sm:$0xff]   ;;  %v2133_v50 = vld [vmem:[%s3179_s0 + $0x8c] ss:$16 sps:$4 sm:$0xff]   ;;  %v2135_v51 = vld [vmem:[%s3179_s0 + $0x80] ss:$16 sps:$4 sm:$0xff]  }
  0x12   :  { %872 = vmatpush1.bf16.msra.mxu0 %v2083_v9  ;;  %v2136_v52 = vld [vmem:[%s3179_s0 + $0x88] ss:$16 sps:$4 sm:$0xff]   ;;  %v2137_v53 = vld [vmem:[%s3179_s0 + $0xa4] ss:$16 sps:$4 sm:$0xff]   ;;  %v2139_v54 = vld [vmem:[%s3179_s0 + $0xac] ss:$16 sps:$4 sm:$0xff]  }
  0x13   :  { %1104 = vmatpush1.bf16.msra.mxu1 %v2084_v10  ;;  %873 = vmatprep.subr.bf16.mxu0 %v2254_v0  ;;  %v2141_v55 = vld [vmem:[%s3179_s0 + $0xa0] ss:$16 sps:$4 sm:$0xff]   ;;  %v2142_v56 = vld [vmem:[%s3179_s0 + $0xa8] ss:$16 sps:$4 sm:$0xff]   ;;  %v2143_v57 = vld [vmem:[%s3179_s0 + $0xc4] ss:$16 sps:$4 sm:$0xff]  }
  0x14   :  { %1105 = vmatprep.subr.bf16.mxu1 %v2254_v0  ;;  %v2145_v58 = vld [vmem:[%s3179_s0 + $0xcc] ss:$16 sps:$4 sm:$0xff]   ;;  %v2147_v59 = vld [vmem:[%s3179_s0 + $0xc0] ss:$16 sps:$4 sm:$0xff]   ;;  %v2148_v60 = vld [vmem:[%s3179_s0 + $0xc8] ss:$16 sps:$4 sm:$0xff]  }
  0x15   :  { %v2149_v61 = vld [vmem:[%s3179_s0 + $0xe4] ss:$16 sps:$4 sm:$0xff]   ;;  %v2151_v62 = vld [vmem:[%s3179_s0 + $0xec] ss:$16 sps:$4 sm:$0xff]   ;;  %v2153_v63 = vld [vmem:[%s3179_s0 + $0xe0] ss:$16 sps:$4 sm:$0xff]  }
  0x16   :  { %874 = vmatpush1.bf16.msra.mxu0 %v2085_v11  ;;  %v2155_v1 = vld [vmem:[%s3179_s0 + $0x104] ss:$16 sps:$4 sm:$0xff]   ;;  %v2157_v2 = vld [vmem:[%s3179_s0 + $0x10c] ss:$16 sps:$4 sm:$0xff]   ;;  %v2159_v3 = vld [vmem:[%s3179_s0 + $0x100] ss:$16 sps:$4 sm:$0xff]  }
  0x17   :  { %1106 = vmatpush1.bf16.msra.mxu1 %v2086_v12  ;;  %875 = vmatprep.subr.bf16.mxu0 %v2254_v0  ;;  %v2160_v4 = vld [vmem:[%s3179_s0 + $0x108] ss:$16 sps:$4 sm:$0xff]   ;;  %v2161_v5 = vld [vmem:[%s3179_s0 + $0x124] ss:$16 sps:$4 sm:$0xff]   ;;  %v2163_v6 = vld [vmem:[%s3179_s0 + $0x12c] ss:$16 sps:$4 sm:$0xff]  }
  0x18   :  { %1107 = vmatprep.subr.bf16.mxu1 %v2254_v0  ;;  %v2165_v7 = vld [vmem:[%s3179_s0 + $0x120] ss:$16 sps:$4 sm:$0xff]   ;;  %v2166_v8 = vld [vmem:[%s3179_s0 + $0x128] ss:$16 sps:$4 sm:$0xff]   ;;  %v2167_v9 = vld [vmem:[%s3179_s0 + $0x144] ss:$16 sps:$4 sm:$0xff]  }
  0x19   :  { %v2169_v10 = vld [vmem:[%s3179_s0 + $0x14c] ss:$16 sps:$4 sm:$0xff]   ;;  %v2171_v11 = vld [vmem:[%s3179_s0 + $0x140] ss:$16 sps:$4 sm:$0xff]   ;;  %v2172_v12 = vld [vmem:[%s3179_s0 + $0x148] ss:$16 sps:$4 sm:$0xff]  }
  0x1a   :  { %876 = vmatpush1.bf16.msra.mxu0 %v2087_v13  ;;  %v2173_v13 = vld [vmem:[%s3179_s0 + $0x164] ss:$16 sps:$4 sm:$0xff]   ;;  %v2183_v19 = vld [vmem:[%s3179_s0 + $0x180] ss:$16 sps:$4 sm:$0xff]  }
  0x1b   :  { %1108 = vmatpush1.bf16.msra.mxu1 %v2088_v14  ;;  %877 = vmatprep.subr.bf16.mxu0 %v2254_v0  ;;  %v2175_v14 = vld [vmem:[%s3179_s0 + $0x16c] ss:$16 sps:$4 sm:$0xff]   ;;  %v2185_v21 = vld [vmem:[%s3179_s0 + $0x1a4] ss:$16 sps:$4 sm:$0xff]  }
  0x1c   :  { %1109 = vmatprep.subr.bf16.mxu1 %v2254_v0 }
  0x1e   :  { %878 = vmatpush1.bf16.msra.mxu0 %v2089_v15  ;;  %v2177_v15 = vld [vmem:[%s3179_s0 + $0x160] ss:$16 sps:$4 sm:$0xff]  }
  0x1f   :  { %1110 = vmatpush1.bf16.msra.mxu1 %v2090_v16  ;;  %879 = vmatprep.subr.bf16.mxu0 %v2254_v0  ;;  %v2178_v16 = vld [vmem:[%s3179_s0 + $0x168] ss:$16 sps:$4 sm:$0xff]  }
  0x20   :  { %1111 = vmatprep.subr.bf16.mxu1 %v2254_v0 }
  0x22   :  { %880 = vmatpush2.bf16.msra.mxu0 %v2091_v17  ;;  %v2179_v17 = vld [vmem:[%s3179_s0 + $0x184] ss:$16 sps:$4 sm:$0xff]  }
  0x23   :  { %1112 = vmatpush2.bf16.msra.mxu1 %v2092_v18  ;;  %881 = vmatprep.subr.bf16.mxu0 %v2254_v0  ;;  %v2181_v18 = vld [vmem:[%s3179_s0 + $0x18c] ss:$16 sps:$4 sm:$0xff]  }
  0x24   :  { %1113 = vmatprep.subr.bf16.mxu1 %v2254_v0 }
  0x26   :  { %882 = vmatpush2.bf16.msra.mxu0 %v2093_v20  ;;  %v2184_v20 = vld [vmem:[%s3179_s0 + $0x188] ss:$16 sps:$4 sm:$0xff]  }
  0x27   :  { %1114 = vmatpush2.bf16.msra.mxu1 %v2094_v22  ;;  %883 = vmatprep.subr.bf16.mxu0 %v2254_v0  ;;  %v2187_v22 = vld [vmem:[%s3179_s0 + $0x1ac] ss:$16 sps:$4 sm:$0xff]  }
  0x28   :  { %1115 = vmatprep.subr.bf16.mxu1 %v2254_v0 }
  0x2a   :  { %884 = vmatpush2.bf16.msra.mxu0 %v2095_v23  ;;  %v2189_v23 = vld [vmem:[%s3179_s0 + $0x1a0] ss:$16 sps:$4 sm:$0xff]  }
  0x2b   :  { %1116 = vmatpush2.bf16.msra.mxu1 %v2096_v24  ;;  %885 = vmatprep.subr.bf16.mxu0 %v2254_v0  ;;  %v2190_v24 = vld [vmem:[%s3179_s0 + $0x1a8] ss:$16 sps:$4 sm:$0xff]  }
  0x2c   :  { %1117 = vmatprep.subr.bf16.mxu1 %v2254_v0 }
  0x2e   :  { %886 = vmatpush2.bf16.msra.mxu0 %v2097_v25  ;;  %v2191_v25 = vld [vmem:[%s3179_s0 + $0x1c4] ss:$16 sps:$4 sm:$0xff]  }
  0x2f   :  { %1118 = vmatpush2.bf16.msra.mxu1 %v2098_v26  ;;  %887 = vmatprep.subr.bf16.mxu0 %v2254_v0  ;;  %v2193_v26 = vld [vmem:[%s3179_s0 + $0x1cc] ss:$16 sps:$4 sm:$0xff]  }
  0x30   :  { %1119 = vmatprep.subr.bf16.mxu1 %v2254_v0 }
  0x32   :  { %888 = vmatpush2.bf16.msra.mxu0 %v2099_v27  ;;  %v2195_v27 = vld [vmem:[%s3179_s0 + $0x1c0] ss:$16 sps:$4 sm:$0xff]  }
  0x33   :  { %1120 = vmatpush2.bf16.msra.mxu1 %v2100_v28  ;;  %889 = vmatprep.subr.bf16.mxu0 %v2254_v0  ;;  %v2196_v28 = vld [vmem:[%s3179_s0 + $0x1c8] ss:$16 sps:$4 sm:$0xff]  }
  0x34   :  { %1121 = vmatprep.subr.bf16.mxu1 %v2254_v0 }
  0x36   :  { %890 = vmatpush2.bf16.msra.mxu0 %v2101_v29  ;;  %v2197_v29 = vld [vmem:[%s3179_s0 + $0x1e4] ss:$16 sps:$4 sm:$0xff]  }
  0x37   :  { %1122 = vmatpush2.bf16.msra.mxu1 %v2102_v30  ;;  %891 = vmatprep.subr.bf16.mxu0 %v2254_v0  ;;  %v2199_v30 = vld [vmem:[%s3179_s0 + $0x1ec] ss:$16 sps:$4 sm:$0xff]  }
  0x38   :  { %1123 = vmatprep.subr.bf16.mxu1 %v2254_v0 }
  0x3a   :  { %892 = vmatpush2.bf16.msra.mxu0 %v2103_v31  ;;  %v2201_v31 = vld [vmem:[%s3179_s0 + $0x1e0] ss:$16 sps:$4 sm:$0xff]  }
  0x3b   :  { %1124 = vmatpush2.bf16.msra.mxu1 %v2104_v32  ;;  %893 = vmatprep.subr.bf16.mxu0 %v2254_v0  ;;  %v2202_v32 = vld [vmem:[%s3179_s0 + $0x1e8] ss:$16 sps:$4 sm:$0xff]  }
  0x3c   :  { %1125 = vmatprep.subr.bf16.mxu1 %v2254_v0  ;;  %v2154_v0 = vld [vmem:[%s3179_s0 + $0xe8] ss:$16 sps:$4 sm:$0xff]  }
  0x3e   :  { %894 = vmatpush2.bf16.msra.mxu0 %v2105_v33  ;;  %v2203_v33 = vld [vmem:[%s3179_s0 + $0x204] ss:$16 sps:$4 sm:$0xff]  }
  0x3f   :  { %1126 = vmatpush2.bf16.msra.mxu1 %v2106_v34  ;;  %v2205_v34 = vld [vmem:[%s3179_s0 + $0x20c] ss:$16 sps:$4 sm:$0xff]  }
  0x41   :  { %896 = vmatmul.mubr.bf16.vlgmr.msra.gmra.mxu0 %v2107_v35  ;;  %v2207_v35 = vld [vmem:[%s3179_s0 + $0x200] ss:$16 sps:$4 sm:$0xff]  }
  0x42   :  { %1128 = vmatmul.mubr.bf16.vlgmr.msra.gmra.mxu1 %v2110_v36  ;;  %903 = vmatprep.mubr.bf16.mxu0 %v2113_v37  ;;  %v2208_v36 = vld [vmem:[%s3179_s0 + $0x208] ss:$16 sps:$4 sm:$0xff]   ;;  %v2209_v37 = vld [vmem:[%s3179_s0 + $0x224] ss:$16 sps:$4 sm:$0xff]  }
  0x43   :  { %1135 = vmatprep.mubr.bf16.mxu1 %v2115_v38  ;;  %v2211_v38 = vld [vmem:[%s3179_s0 + $0x22c] ss:$16 sps:$4 sm:$0xff]  }
  0x49   :  { %904 = vmatmul.mubr.bf16.gmra.mxu0 %v2117_v39  ;;  %v2213_v39 = vld [vmem:[%s3179_s0 + $0x220] ss:$16 sps:$4 sm:$0xff]  }
  0x4a   :  { %1136 = vmatmul.mubr.bf16.gmra.mxu1 %v2118_v40  ;;  %911 = vmatprep.mubr.bf16.mxu0 %v2119_v41  ;;  %v2214_v40 = vld [vmem:[%s3179_s0 + $0x228] ss:$16 sps:$4 sm:$0xff]   ;;  %v2215_v41 = vld [vmem:[%s3179_s0 + $0x244] ss:$16 sps:$4 sm:$0xff]  }
  0x4b   :  { %1143 = vmatprep.mubr.bf16.mxu1 %v2121_v42  ;;  %v2217_v42 = vld [vmem:[%s3179_s0 + $0x24c] ss:$16 sps:$4 sm:$0xff]  }
  0x51   :  { %912 = vmatmul.mubr.bf16.gmra.mxu0 %v2123_v43  ;;  %v2219_v43 = vld [vmem:[%s3179_s0 + $0x240] ss:$16 sps:$4 sm:$0xff]  }
  0x52   :  { %1144 = vmatmul.mubr.bf16.gmra.mxu1 %v2124_v44  ;;  %919 = vmatprep.mubr.bf16.mxu0 %v2125_v45  ;;  %v2220_v44 = vld [vmem:[%s3179_s0 + $0x248] ss:$16 sps:$4 sm:$0xff]   ;;  %v2221_v45 = vld [vmem:[%s3179_s0 + $0x264] ss:$16 sps:$4 sm:$0xff]  }
  0x53   :  { %1151 = vmatprep.mubr.bf16.mxu1 %v2127_v46  ;;  %v2223_v46 = vld [vmem:[%s3179_s0 + $0x26c] ss:$16 sps:$4 sm:$0xff]  }
  0x59   :  { %920 = vmatmul.mubr.bf16.gmra.mxu0 %v2129_v47  ;;  %v2225_v47 = vld [vmem:[%s3179_s0 + $0x260] ss:$16 sps:$4 sm:$0xff]  }
  0x5a   :  { %1152 = vmatmul.mubr.bf16.gmra.mxu1 %v2130_v48  ;;  %927 = vmatprep.mubr.bf16.mxu0 %v2131_v49  ;;  %v2226_v48 = vld [vmem:[%s3179_s0 + $0x268] ss:$16 sps:$4 sm:$0xff]   ;;  %v2227_v49 = vld [vmem:[%s3179_s0 + $0x284] ss:$16 sps:$4 sm:$0xff]  }
  0x5b   :  { %1159 = vmatprep.mubr.bf16.mxu1 %v2133_v50  ;;  %v2229_v50 = vld [vmem:[%s3179_s0 + $0x28c] ss:$16 sps:$4 sm:$0xff]  }
  0x61   :  { %928 = vmatmul.mubr.bf16.gmra.mxu0 %v2135_v51  ;;  %v2231_v51 = vld [vmem:[%s3179_s0 + $0x280] ss:$16 sps:$4 sm:$0xff]  }
  0x62   :  { %1160 = vmatmul.mubr.bf16.gmra.mxu1 %v2136_v52  ;;  %935 = vmatprep.mubr.bf16.mxu0 %v2137_v53  ;;  %v2232_v52 = vld [vmem:[%s3179_s0 + $0x288] ss:$16 sps:$4 sm:$0xff]   ;;  %v2233_v53 = vld [vmem:[%s3179_s0 + $0x2a4] ss:$16 sps:$4 sm:$0xff]  }
  0x63   :  { %1167 = vmatprep.mubr.bf16.mxu1 %v2139_v54  ;;  %v2235_v54 = vld [vmem:[%s3179_s0 + $0x2ac] ss:$16 sps:$4 sm:$0xff]  }
  0x69   :  { %936 = vmatmul.mubr.bf16.gmra.mxu0 %v2141_v55  ;;  %v2237_v55 = vld [vmem:[%s3179_s0 + $0x2a0] ss:$16 sps:$4 sm:$0xff]  }
  0x6a   :  { %1168 = vmatmul.mubr.bf16.gmra.mxu1 %v2142_v56  ;;  %943 = vmatprep.mubr.bf16.mxu0 %v2143_v57  ;;  %v2238_v56 = vld [vmem:[%s3179_s0 + $0x2a8] ss:$16 sps:$4 sm:$0xff]   ;;  %v2239_v57 = vld [vmem:[%s3179_s0 + $0x2c4] ss:$16 sps:$4 sm:$0xff]  }
  0x6b   :  { %1175 = vmatprep.mubr.bf16.mxu1 %v2145_v58  ;;  %v2241_v58 = vld [vmem:[%s3179_s0 + $0x2cc] ss:$16 sps:$4 sm:$0xff]  }
  0x71   :  { %944 = vmatmul.mubr.bf16.gmra.mxu0 %v2147_v59  ;;  %v2243_v59 = vld [vmem:[%s3179_s0 + $0x2c0] ss:$16 sps:$4 sm:$0xff]  }
  0x72   :  { %1176 = vmatmul.mubr.bf16.gmra.mxu1 %v2148_v60  ;;  %951 = vmatprep.mubr.bf16.mxu0 %v2149_v61  ;;  %v2244_v60 = vld [vmem:[%s3179_s0 + $0x2c8] ss:$16 sps:$4 sm:$0xff]   ;;  %v2245_v61 = vld [vmem:[%s3179_s0 + $0x2e4] ss:$16 sps:$4 sm:$0xff]  }
  0x73   :  { %1183 = vmatprep.mubr.bf16.mxu1 %v2151_v62  ;;  %v2247_v62 = vld [vmem:[%s3179_s0 + $0x2ec] ss:$16 sps:$4 sm:$0xff]  }
  0x79   :  { %952 = vmatmul.mubr.bf16.gmra.mxu0 %v2153_v63  ;;  %v111_v63 = vld [vmem:[%s3179_s0 + $0x300] sm:$0xff] }
  0x7a   :  { %1184 = vmatmul.mubr.bf16.gmra.mxu1 %v2154_v0  ;;  %959 = vmatprep.mubr.bf16.mxu0 %v2155_v1  ;;  %v112_v0 = vld [vmem:[%s3179_s0 + $0x308] sm:$0xff]  ;;  %v2249_v1 = vld [vmem:[%s3179_s0 + $0x2e0] ss:$16 sps:$4 sm:$0xff]  }
  0x7b   :  { %1191 = vmatprep.mubr.bf16.mxu1 %v2157_v2  ;;  %v2250_v2 = vld [vmem:[%s3179_s0 + $0x2e8] ss:$16 sps:$4 sm:$0xff]  }
  0x81   :  { %960 = vmatmul.mubr.bf16.gmra.mxu0 %v2159_v3  ;;  %v1941_v3 = vcombine.high %v111_v63, %v111_v63 }
  0x82   :  { %1192 = vmatmul.mubr.bf16.gmra.mxu1 %v2160_v4  ;;  %967 = vmatprep.mubr.bf16.mxu0 %v2161_v5  ;;  %v1943_v4 = vcombine.high %v112_v0, %v112_v0  ;;  %v1940_v5 = vcombine.low %v111_v63, %v111_v63 }
  0x83   :  { %1199 = vmatprep.mubr.bf16.mxu1 %v2163_v6  ;;  %v1942_v6 = vcombine.low %v112_v0, %v112_v0 }
  0x89   :  { %968 = vmatmul.mubr.bf16.gmra.mxu0 %v2165_v7 }
  0x8a   :  { %1200 = vmatmul.mubr.bf16.gmra.mxu1 %v2166_v8  ;;  %975 = vmatprep.mubr.bf16.mxu0 %v2167_v9 }
  0x8b   :  { %1207 = vmatprep.mubr.bf16.mxu1 %v2169_v10 }
  0x91   :  { %976 = vmatmul.mubr.bf16.gmra.mxu0 %v2171_v11 }
  0x92   :  { %1208 = vmatmul.mubr.bf16.gmra.mxu1 %v2172_v12  ;;  %983 = vmatprep.mubr.bf16.mxu0 %v2173_v13 }
  0x93   :  { %1215 = vmatprep.mubr.bf16.mxu1 %v2175_v14 }
  0x99   :  { %984 = vmatmul.mubr.bf16.gmra.mxu0 %v2177_v15 }
  0x9a   :  { %1216 = vmatmul.mubr.bf16.gmra.mxu1 %v2178_v16  ;;  %991 = vmatprep.mubr.bf16.mxu0 %v2179_v17 }
  0x9b   :  { %1223 = vmatprep.mubr.bf16.mxu1 %v2181_v18 }
  0xa1   :  { %992 = vmatmul.mubr.bf16.gmra.mxu0 %v2183_v19 }
  0xa2   :  { %1224 = vmatmul.mubr.bf16.gmra.mxu1 %v2184_v20  ;;  %999 = vmatprep.mubr.bf16.mxu0 %v2185_v21 }
  0xa3   :  { %1231 = vmatprep.mubr.bf16.mxu1 %v2187_v22 }
  0xa9   :  { %1000 = vmatmul.mubr.bf16.gmra.mxu0 %v2189_v23 }
  0xaa   :  { %1232 = vmatmul.mubr.bf16.gmra.mxu1 %v2190_v24  ;;  %1007 = vmatprep.mubr.bf16.mxu0 %v2191_v25 }
  0xab   :  { %1239 = vmatprep.mubr.bf16.mxu1 %v2193_v26 }
  0xb1   :  { %1008 = vmatmul.mubr.bf16.gmra.mxu0 %v2195_v27 }
  0xb2   :  { %1240 = vmatmul.mubr.bf16.gmra.mxu1 %v2196_v28  ;;  %1015 = vmatprep.mubr.bf16.mxu0 %v2197_v29 }
  0xb3   :  { %1247 = vmatprep.mubr.bf16.mxu1 %v2199_v30 }
  0xb9   :  { %1016 = vmatmul.mubr.bf16.gmra.mxu0 %v2201_v31 }
  0xba   :  { %1248 = vmatmul.mubr.bf16.gmra.mxu1 %v2202_v32  ;;  %1023 = vmatprep.mubr.bf16.mxu0 %v2203_v33 }
  0xbb   :  { %1255 = vmatprep.mubr.bf16.mxu1 %v2205_v34 }
  0xc1   :  { %1024 = vmatmul.mubr.bf16.gmra.mxu0 %v2207_v35 }
  0xc2   :  { %1256 = vmatmul.mubr.bf16.gmra.mxu1 %v2208_v36  ;;  %1031 = vmatprep.mubr.bf16.mxu0 %v2209_v37 }
  0xc3   :  { %1263 = vmatprep.mubr.bf16.mxu1 %v2211_v38 }
  0xc9   :  { %1032 = vmatmul.mubr.bf16.gmra.mxu0 %v2213_v39 }
  0xca   :  { %1264 = vmatmul.mubr.bf16.gmra.mxu1 %v2214_v40  ;;  %1039 = vmatprep.mubr.bf16.mxu0 %v2215_v41 }
  0xcb   :  { %1271 = vmatprep.mubr.bf16.mxu1 %v2217_v42 }
  0xd1   :  { %1040 = vmatmul.mubr.bf16.gmra.mxu0 %v2219_v43 }
  0xd2   :  { %1272 = vmatmul.mubr.bf16.gmra.mxu1 %v2220_v44  ;;  %1047 = vmatprep.mubr.bf16.mxu0 %v2221_v45 }
  0xd3   :  { %1279 = vmatprep.mubr.bf16.mxu1 %v2223_v46 }
  0xd9   :  { %1048 = vmatmul.mubr.bf16.gmra.mxu0 %v2225_v47 }
  0xda   :  { %1280 = vmatmul.mubr.bf16.gmra.mxu1 %v2226_v48  ;;  %1055 = vmatprep.mubr.bf16.mxu0 %v2227_v49 }
  0xdb   :  { %1287 = vmatprep.mubr.bf16.mxu1 %v2229_v50 }
  0xe1   :  { %1056 = vmatmul.mubr.bf16.gmra.mxu0 %v2231_v51 }
  0xe2   :  { %1288 = vmatmul.mubr.bf16.gmra.mxu1 %v2232_v52  ;;  %1063 = vmatprep.mubr.bf16.mxu0 %v2233_v53 }
  0xe3   :  { %1295 = vmatprep.mubr.bf16.mxu1 %v2235_v54 }
  0xe9   :  { %1064 = vmatmul.mubr.bf16.gmra.mxu0 %v2237_v55 }
  0xea   :  { %1296 = vmatmul.mubr.bf16.gmra.mxu1 %v2238_v56  ;;  %1071 = vmatprep.mubr.bf16.mxu0 %v2239_v57 }
  0xeb   :  { %1303 = vmatprep.mubr.bf16.mxu1 %v2241_v58 }
  0xf1   :  { %1072 = vmatmul.mubr.bf16.gmra.mxu0 %v2243_v59 }
  0xf2   :  { %1304 = vmatmul.mubr.bf16.gmra.mxu1 %v2244_v60  ;;  %1079 = vmatprep.mubr.bf16.mxu0 %v2245_v61 }
  0xf3   :  { %1311 = vmatprep.mubr.bf16.mxu1 %v2247_v62 }
  0xf9   :  { %1080 = vmatmul.mubr.bf16.gmra.mxu0 %v2249_v1 }
  0xfa   :  { %1312 = vmatmul.mubr.bf16.gmra.mxu1 %v2250_v2  ;;  %1087 = vmatprep.mubr.bf16.mxu0 %v1941_v3 }
  0xfb   :  { %1319 = vmatprep.mubr.bf16.mxu1 %v1943_v4 }
 0x101   :  { %v897_v7 = vpop.f32.mrf.mxu0  ;;  %1088 = vmatmul.mubr.bf16.gmra.mxu0 %v1940_v5 }
 0x102   :  { %v1129_v8 = vpop.f32.mrf.mxu1  ;;  %1320 = vmatmul.mubr.bf16.gmra.mxu1 %v1942_v6 }
 0x103   :  { %v1130_v9 = vadd.f32 %v1129_v8, %v897_v7  ;;  %v899_v10 = vpop.f32.mrf.mxu0 }
 0x104   :  { %v1131_v11 = vpop.f32.mrf.mxu1 }
 0x105   :  { %v2025_v12 = vpack.c.bf16 %v1130_v9, %v1130_v9  ;;  %v900_v13 = vpop.f32.mrf.mxu0  ;;  %v1678_v15 = vmul.f32 %v1130_v9, %v1130_v9  ;;  %v1575_v19 = vsel %vm1574_vm1, %v1130_v9, 0.0 }
 0x106   :  { %v1132_v14 = vpop.f32.mrf.mxu1 }
 0x107   :  { %1525 = vst.msk [vmem:[%s3180_s2] sm:$0xf] %vm1524_vm0, %v2025_v12  ;;  %v1133_v16 = vadd.f32 %v1132_v14, %v900_v13  ;;  %v902_v17 = vpop.f32.mrf.mxu0  ;;  %v1727_v26 = vsel %vm1574_vm1, %v1678_v15, 0.0 }
 0x108   :  { %v1134_v18 = vpop.f32.mrf.mxu1 }
 0x109   :  { %v2026_v20 = vpack.c.bf16 %v1133_v16, %v1133_v16  ;;  %v1576_v21 = vsel %vm1574_vm1, %v1133_v16, 0.0  ;;  %v1679_v22 = vmul.f32 %v1133_v16, %v1133_v16  ;;  %v905_v23 = vpop.f32.mrf.mxu0 }
 0x10a   :  { %v1577_v24 = vadd.f32 %v1576_v21, %v1575_v19  ;;  %v1137_v25 = vpop.f32.mrf.mxu1 }
 0x10b   :  { %1526 = vst.msk [vmem:[%s3180_s2 + $0x4] sm:$0xf] %vm1524_vm0, %v2026_v20  ;;  %v1728_v27 = vsel %vm1574_vm1, %v1679_v22, 0.0  ;;  %v1138_v28 = vadd.f32 %v1137_v25, %v905_v23  ;;  %v907_v29 = vpop.f32.mrf.mxu0 }
 0x10c   :  { %v1729_v30 = vadd.f32 %v1728_v27, %v1727_v26  ;;  %v1139_v31 = vpop.f32.mrf.mxu1 }
 0x10d   :  { %v2027_v32 = vpack.c.bf16 %v1138_v28, %v1138_v28  ;;  %v1578_v33 = vsel %vm1574_vm1, %v1138_v28, 0.0  ;;  %v1680_v34 = vmul.f32 %v1138_v28, %v1138_v28  ;;  %v908_v35 = vpop.f32.mrf.mxu0 }
 0x10e   :  { %v1579_v36 = vadd.f32 %v1578_v33, %v1577_v24  ;;  %v1140_v37 = vpop.f32.mrf.mxu1 }
 0x10f   :  { %1527 = vst.msk [vmem:[%s3180_s2 + $0x8] sm:$0xf] %vm1524_vm0, %v2027_v32  ;;  %v1730_v38 = vsel %vm1574_vm1, %v1680_v34, 0.0  ;;  %v1141_v39 = vadd.f32 %v1140_v37, %v908_v35  ;;  %v910_v40 = vpop.f32.mrf.mxu0 }
 0x110   :  { %v1731_v41 = vadd.f32 %v1730_v38, %v1729_v30  ;;  %v1142_v42 = vpop.f32.mrf.mxu1 }
 0x111   :  { %v2028_v43 = vpack.c.bf16 %v1141_v39, %v1141_v39  ;;  %v1580_v44 = vsel %vm1574_vm1, %v1141_v39, 0.0  ;;  %v1681_v45 = vmul.f32 %v1141_v39, %v1141_v39  ;;  %v913_v46 = vpop.f32.mrf.mxu0 }
 0x112   :  { %v1581_v47 = vadd.f32 %v1580_v44, %v1579_v36  ;;  %v1145_v48 = vpop.f32.mrf.mxu1 }
 0x113   :  { %1528 = vst.msk [vmem:[%s3180_s2 + $0xc] sm:$0xf] %vm1524_vm0, %v2028_v43  ;;  %v1732_v49 = vsel %vm1574_vm1, %v1681_v45, 0.0  ;;  %v1146_v50 = vadd.f32 %v1145_v48, %v913_v46  ;;  %v915_v51 = vpop.f32.mrf.mxu0 }
 0x114   :  { %v1733_v52 = vadd.f32 %v1732_v49, %v1731_v41  ;;  %v1147_v53 = vpop.f32.mrf.mxu1 }
 0x115   :  { %v2029_v54 = vpack.c.bf16 %v1146_v50, %v1146_v50  ;;  %v1582_v55 = vsel %vm1574_vm1, %v1146_v50, 0.0  ;;  %v1682_v56 = vmul.f32 %v1146_v50, %v1146_v50  ;;  %v916_v57 = vpop.f32.mrf.mxu0 }
 0x116   :  { %v1583_v58 = vadd.f32 %v1582_v55, %v1581_v47  ;;  %v1148_v59 = vpop.f32.mrf.mxu1 }
 0x117   :  { %1529 = vst.msk [vmem:[%s3180_s2 + $0x10] sm:$0xf] %vm1524_vm0, %v2029_v54  ;;  %v1734_v60 = vsel %vm1574_vm1, %v1682_v56, 0.0  ;;  %v1149_v61 = vadd.f32 %v1148_v59, %v916_v57  ;;  %v918_v62 = vpop.f32.mrf.mxu0 }
 0x118   :  { %v1735_v63 = vadd.f32 %v1734_v60, %v1733_v52  ;;  %v1150_v0 = vpop.f32.mrf.mxu1 }
 0x119   :  { %v2030_v1 = vpack.c.bf16 %v1149_v61, %v1149_v61  ;;  %v1584_v2 = vsel %vm1574_vm1, %v1149_v61, 0.0  ;;  %v1683_v3 = vmul.f32 %v1149_v61, %v1149_v61  ;;  %v921_v4 = vpop.f32.mrf.mxu0 }
 0x11a   :  { %v1585_v5 = vadd.f32 %v1584_v2, %v1583_v58  ;;  %v1153_v6 = vpop.f32.mrf.mxu1 }
 0x11b   :  { %1530 = vst.msk [vmem:[%s3180_s2 + $0x14] sm:$0xf] %vm1524_vm0, %v2030_v1  ;;  %v1736_v7 = vsel %vm1574_vm1, %v1683_v3, 0.0  ;;  %v1154_v8 = vadd.f32 %v1153_v6, %v921_v4  ;;  %v923_v9 = vpop.f32.mrf.mxu0 }
 0x11c   :  { %v1737_v10 = vadd.f32 %v1736_v7, %v1735_v63  ;;  %v1155_v11 = vpop.f32.mrf.mxu1 }
 0x11d   :  { %v2031_v12 = vpack.c.bf16 %v1154_v8, %v1154_v8  ;;  %v1586_v13 = vsel %vm1574_vm1, %v1154_v8, 0.0  ;;  %v1684_v14 = vmul.f32 %v1154_v8, %v1154_v8  ;;  %v924_v15 = vpop.f32.mrf.mxu0 }
 0x11e   :  { %v1587_v16 = vadd.f32 %v1586_v13, %v1585_v5  ;;  %v1156_v17 = vpop.f32.mrf.mxu1 }
 0x11f   :  { %1531 = vst.msk [vmem:[%s3180_s2 + $0x18] sm:$0xf] %vm1524_vm0, %v2031_v12  ;;  %v1738_v18 = vsel %vm1574_vm1, %v1684_v14, 0.0  ;;  %v1157_v19 = vadd.f32 %v1156_v17, %v924_v15  ;;  %v926_v20 = vpop.f32.mrf.mxu0 }
 0x120   :  { %v1739_v21 = vadd.f32 %v1738_v18, %v1737_v10  ;;  %v1158_v22 = vpop.f32.mrf.mxu1 }
 0x121   :  { %v2032_v23 = vpack.c.bf16 %v1157_v19, %v1157_v19  ;;  %v1588_v24 = vsel %vm1574_vm1, %v1157_v19, 0.0  ;;  %v1685_v25 = vmul.f32 %v1157_v19, %v1157_v19  ;;  %v929_v26 = vpop.f32.mrf.mxu0 }
 0x122   :  { %v1589_v27 = vadd.f32 %v1588_v24, %v1587_v16  ;;  %v1161_v28 = vpop.f32.mrf.mxu1 }
 0x123   :  { %1532 = vst.msk [vmem:[%s3180_s2 + $0x1c] sm:$0xf] %vm1524_vm0, %v2032_v23  ;;  %v1740_v29 = vsel %vm1574_vm1, %v1685_v25, 0.0  ;;  %v1162_v30 = vadd.f32 %v1161_v28, %v929_v26  ;;  %v931_v31 = vpop.f32.mrf.mxu0 }
 0x124   :  { %v1741_v32 = vadd.f32 %v1740_v29, %v1739_v21  ;;  %v1163_v33 = vpop.f32.mrf.mxu1 }
 0x125   :  { %v2033_v34 = vpack.c.bf16 %v1162_v30, %v1162_v30  ;;  %v1590_v35 = vsel %vm1574_vm1, %v1162_v30, 0.0  ;;  %v1686_v36 = vmul.f32 %v1162_v30, %v1162_v30  ;;  %v932_v37 = vpop.f32.mrf.mxu0 }
 0x126   :  { %v1591_v38 = vadd.f32 %v1590_v35, %v1589_v27  ;;  %v1164_v39 = vpop.f32.mrf.mxu1 }
 0x127   :  { %1533 = vst.msk [vmem:[%s3180_s2 + $0x20] sm:$0xf] %vm1524_vm0, %v2033_v34  ;;  %v1742_v40 = vsel %vm1574_vm1, %v1686_v36, 0.0  ;;  %v1165_v41 = vadd.f32 %v1164_v39, %v932_v37  ;;  %v934_v42 = vpop.f32.mrf.mxu0 }
 0x128   :  { %v1743_v43 = vadd.f32 %v1742_v40, %v1741_v32  ;;  %v1166_v44 = vpop.f32.mrf.mxu1 }
 0x129   :  { %v2034_v45 = vpack.c.bf16 %v1165_v41, %v1165_v41  ;;  %v1592_v46 = vsel %vm1574_vm1, %v1165_v41, 0.0  ;;  %v1687_v47 = vmul.f32 %v1165_v41, %v1165_v41  ;;  %v937_v48 = vpop.f32.mrf.mxu0 }
 0x12a   :  { %v1593_v49 = vadd.f32 %v1592_v46, %v1591_v38  ;;  %v1169_v50 = vpop.f32.mrf.mxu1 }
 0x12b   :  { %1534 = vst.msk [vmem:[%s3180_s2 + $0x24] sm:$0xf] %vm1524_vm0, %v2034_v45  ;;  %v1744_v51 = vsel %vm1574_vm1, %v1687_v47, 0.0  ;;  %v1170_v52 = vadd.f32 %v1169_v50, %v937_v48  ;;  %v939_v53 = vpop.f32.mrf.mxu0 }
 0x12c   :  { %v1745_v54 = vadd.f32 %v1744_v51, %v1743_v43  ;;  %v1171_v55 = vpop.f32.mrf.mxu1 }
 0x12d   :  { %v2035_v56 = vpack.c.bf16 %v1170_v52, %v1170_v52  ;;  %v1594_v57 = vsel %vm1574_vm1, %v1170_v52, 0.0  ;;  %v1688_v58 = vmul.f32 %v1170_v52, %v1170_v52  ;;  %v940_v59 = vpop.f32.mrf.mxu0 }
 0x12e   :  { %v1595_v60 = vadd.f32 %v1594_v57, %v1593_v49  ;;  %v1172_v61 = vpop.f32.mrf.mxu1 }
 0x12f   :  { %1535 = vst.msk [vmem:[%s3180_s2 + $0x28] sm:$0xf] %vm1524_vm0, %v2035_v56  ;;  %v1746_v62 = vsel %vm1574_vm1, %v1688_v58, 0.0  ;;  %v1173_v63 = vadd.f32 %v1172_v61, %v940_v59  ;;  %v942_v0 = vpop.f32.mrf.mxu0 }
 0x130   :  { %v1747_v1 = vadd.f32 %v1746_v62, %v1745_v54  ;;  %v1174_v2 = vpop.f32.mrf.mxu1 }
 0x131   :  { %v2036_v3 = vpack.c.bf16 %v1173_v63, %v1173_v63  ;;  %v1596_v4 = vsel %vm1574_vm1, %v1173_v63, 0.0  ;;  %v1689_v5 = vmul.f32 %v1173_v63, %v1173_v63  ;;  %v945_v6 = vpop.f32.mrf.mxu0 }
 0x132   :  { %v1597_v7 = vadd.f32 %v1596_v4, %v1595_v60  ;;  %v1177_v8 = vpop.f32.mrf.mxu1 }
 0x133   :  { %1536 = vst.msk [vmem:[%s3180_s2 + $0x2c] sm:$0xf] %vm1524_vm0, %v2036_v3  ;;  %v1748_v9 = vsel %vm1574_vm1, %v1689_v5, 0.0  ;;  %v1178_v10 = vadd.f32 %v1177_v8, %v945_v6  ;;  %v947_v11 = vpop.f32.mrf.mxu0 }
 0x134   :  { %v1749_v12 = vadd.f32 %v1748_v9, %v1747_v1  ;;  %v1179_v13 = vpop.f32.mrf.mxu1 }
 0x135   :  { %v2037_v14 = vpack.c.bf16 %v1178_v10, %v1178_v10  ;;  %v1598_v15 = vsel %vm1574_vm1, %v1178_v10, 0.0  ;;  %v1690_v16 = vmul.f32 %v1178_v10, %v1178_v10  ;;  %v948_v17 = vpop.f32.mrf.mxu0 }
 0x136   :  { %v1599_v18 = vadd.f32 %v1598_v15, %v1597_v7  ;;  %v1180_v19 = vpop.f32.mrf.mxu1 }
 0x137   :  { %1537 = vst.msk [vmem:[%s3180_s2 + $0x30] sm:$0xf] %vm1524_vm0, %v2037_v14  ;;  %v1750_v20 = vsel %vm1574_vm1, %v1690_v16, 0.0  ;;  %v1181_v21 = vadd.f32 %v1180_v19, %v948_v17  ;;  %v950_v22 = vpop.f32.mrf.mxu0 }
 0x138   :  { %v1751_v23 = vadd.f32 %v1750_v20, %v1749_v12  ;;  %v1182_v24 = vpop.f32.mrf.mxu1 }
 0x139   :  { %v2038_v25 = vpack.c.bf16 %v1181_v21, %v1181_v21  ;;  %v1600_v26 = vsel %vm1574_vm1, %v1181_v21, 0.0  ;;  %v1691_v27 = vmul.f32 %v1181_v21, %v1181_v21  ;;  %v953_v28 = vpop.f32.mrf.mxu0 }
 0x13a   :  { %v1601_v29 = vadd.f32 %v1600_v26, %v1599_v18  ;;  %v1185_v30 = vpop.f32.mrf.mxu1 }
 0x13b   :  { %1538 = vst.msk [vmem:[%s3180_s2 + $0x34] sm:$0xf] %vm1524_vm0, %v2038_v25  ;;  %v1752_v31 = vsel %vm1574_vm1, %v1691_v27, 0.0  ;;  %v1186_v32 = vadd.f32 %v1185_v30, %v953_v28  ;;  %v955_v33 = vpop.f32.mrf.mxu0 }
 0x13c   :  { %v1753_v34 = vadd.f32 %v1752_v31, %v1751_v23  ;;  %v1187_v35 = vpop.f32.mrf.mxu1 }
 0x13d   :  { %v2039_v36 = vpack.c.bf16 %v1186_v32, %v1186_v32  ;;  %v1602_v37 = vsel %vm1574_vm1, %v1186_v32, 0.0  ;;  %v1692_v38 = vmul.f32 %v1186_v32, %v1186_v32  ;;  %v956_v39 = vpop.f32.mrf.mxu0 }
 0x13e   :  { %v1603_v40 = vadd.f32 %v1602_v37, %v1601_v29  ;;  %v1188_v41 = vpop.f32.mrf.mxu1 }
 0x13f   :  { %1539 = vst.msk [vmem:[%s3180_s2 + $0x38] sm:$0xf] %vm1524_vm0, %v2039_v36  ;;  %v1754_v42 = vsel %vm1574_vm1, %v1692_v38, 0.0  ;;  %v1189_v43 = vadd.f32 %v1188_v41, %v956_v39  ;;  %v958_v44 = vpop.f32.mrf.mxu0 }
 0x140   :  { %v1755_v45 = vadd.f32 %v1754_v42, %v1753_v34  ;;  %v1190_v46 = vpop.f32.mrf.mxu1 }
 0x141   :  { %v2040_v47 = vpack.c.bf16 %v1189_v43, %v1189_v43  ;;  %v1604_v48 = vsel %vm1574_vm1, %v1189_v43, 0.0  ;;  %v1693_v49 = vmul.f32 %v1189_v43, %v1189_v43  ;;  %v961_v50 = vpop.f32.mrf.mxu0 }
 0x142   :  { %v1605_v51 = vadd.f32 %v1604_v48, %v1603_v40  ;;  %v1193_v52 = vpop.f32.mrf.mxu1 }
 0x143   :  { %1540 = vst.msk [vmem:[%s3180_s2 + $0x3c] sm:$0xf] %vm1524_vm0, %v2040_v47  ;;  %v1756_v53 = vsel %vm1574_vm1, %v1693_v49, 0.0  ;;  %v1194_v54 = vadd.f32 %v1193_v52, %v961_v50  ;;  %v963_v55 = vpop.f32.mrf.mxu0 }
 0x144   :  { %v1757_v56 = vadd.f32 %v1756_v53, %v1755_v45  ;;  %v1195_v57 = vpop.f32.mrf.mxu1 }
 0x145   :  { %v2041_v58 = vpack.c.bf16 %v1194_v54, %v1194_v54  ;;  %v1606_v59 = vsel %vm1574_vm1, %v1194_v54, 0.0  ;;  %v1694_v60 = vmul.f32 %v1194_v54, %v1194_v54  ;;  %v964_v61 = vpop.f32.mrf.mxu0 }
 0x146   :  { %v2799_v62 = vadd.f32 %v1606_v59, %v1605_v51  ;;  %v1196_v63 = vpop.f32.mrf.mxu1 }
 0x147   :  { %1541 = vst.msk [vmem:[%s3180_s2 + $0x40] sm:$0xf] %vm1524_vm0, %v2041_v58  ;;  %v1758_v0 = vsel %vm1574_vm1, %v1694_v60, 0.0  ;;  %v2806_v1 = vadd.f32 %v1196_v63, %v964_v61  ;;  %v966_v2 = vpop.f32.mrf.mxu0 }
 0x148   :  { %v2808_v3 = vadd.f32 %v1758_v0, %v1757_v56  ;;  %v1198_v4 = vpop.f32.mrf.mxu1 }
 0x149   :  { %v2042_v5 = vpack.c.bf16 %v2806_v1, %v2806_v1  ;;  %v969_v6 = vpop.f32.mrf.mxu0 }
 0x14a   :  { %v1201_v7 = vpop.f32.mrf.mxu1 }
 0x14b   :  { %1542 = vst.msk [vmem:[%s3180_s2 + $0x44] sm:$0xf] %vm1524_vm0, %v2042_v5  ;;  %v2816_v8 = vadd.f32 %v1201_v7, %v969_v6  ;;  %v971_v9 = vpop.f32.mrf.mxu0 }
 0x14c   :  { %v1203_v10 = vpop.f32.mrf.mxu1 }
 0x14d   :  { %v2043_v11 = vpack.c.bf16 %v2816_v8, %v2816_v8  ;;  %v972_v12 = vpop.f32.mrf.mxu0 }
 0x14e   :  { %v1204_v13 = vpop.f32.mrf.mxu1 }
 0x14f   :  { %1543 = vst.msk [vmem:[%s3180_s2 + $0x48] sm:$0xf] %vm1524_vm0, %v2043_v11  ;;  %v2824_v14 = vadd.f32 %v1204_v13, %v972_v12  ;;  %v974_v15 = vpop.f32.mrf.mxu0 }
 0x150   :  { %v1206_v16 = vpop.f32.mrf.mxu1 }
 0x151   :  { %v2044_v17 = vpack.c.bf16 %v2824_v14, %v2824_v14  ;;  %v977_v18 = vpop.f32.mrf.mxu0 }
 0x152   :  { %v1209_v19 = vpop.f32.mrf.mxu1 }
 0x153   :  { %1544 = vst.msk [vmem:[%s3180_s2 + $0x4c] sm:$0xf] %vm1524_vm0, %v2044_v17  ;;  %v2832_v20 = vadd.f32 %v1209_v19, %v977_v18  ;;  %v979_v21 = vpop.f32.mrf.mxu0 }
 0x154   :  { %v1211_v22 = vpop.f32.mrf.mxu1 }
 0x155   :  { %v2045_v23 = vpack.c.bf16 %v2832_v20, %v2832_v20  ;;  %v980_v24 = vpop.f32.mrf.mxu0 }
 0x156   :  { %v1212_v25 = vpop.f32.mrf.mxu1 }
 0x157   :  { %1545 = vst.msk [vmem:[%s3180_s2 + $0x50] sm:$0xf] %vm1524_vm0, %v2045_v23  ;;  %v2840_v26 = vadd.f32 %v1212_v25, %v980_v24  ;;  %v982_v27 = vpop.f32.mrf.mxu0 }
 0x158   :  { %v1214_v28 = vpop.f32.mrf.mxu1 }
 0x159   :  { %v2046_v29 = vpack.c.bf16 %v2840_v26, %v2840_v26  ;;  %v985_v30 = vpop.f32.mrf.mxu0 }
 0x15a   :  { %v1217_v31 = vpop.f32.mrf.mxu1 }
 0x15b   :  { %1546 = vst.msk [vmem:[%s3180_s2 + $0x54] sm:$0xf] %vm1524_vm0, %v2046_v29  ;;  %v2848_v32 = vadd.f32 %v1217_v31, %v985_v30  ;;  %v987_v33 = vpop.f32.mrf.mxu0 }
 0x15c   :  { %v1219_v34 = vpop.f32.mrf.mxu1 }
 0x15d   :  { %v2047_v35 = vpack.c.bf16 %v2848_v32, %v2848_v32  ;;  %v988_v36 = vpop.f32.mrf.mxu0 }
 0x15e   :  { %v1220_v37 = vpop.f32.mrf.mxu1 }
 0x15f   :  { %1547 = vst.msk [vmem:[%s3180_s2 + $0x58] sm:$0xf] %vm1524_vm0, %v2047_v35  ;;  %v2856_v38 = vadd.f32 %v1220_v37, %v988_v36  ;;  %v990_v39 = vpop.f32.mrf.mxu0  ;;  %v1695_v36 = vmul.f32 %v2806_v1, %v2806_v1 }
 0x160   :  { %v1222_v40 = vpop.f32.mrf.mxu1 }
 0x161   :  { %v2048_v41 = vpack.c.bf16 %v2856_v38, %v2856_v38  ;;  %v993_v42 = vpop.f32.mrf.mxu0 }
 0x162   :  { %v1225_v43 = vpop.f32.mrf.mxu1 }
 0x163   :  { %1548 = vst.msk [vmem:[%s3180_s2 + $0x5c] sm:$0xf] %vm1524_vm0, %v2048_v41  ;;  %v2864_v44 = vadd.f32 %v1225_v43, %v993_v42  ;;  %v995_v45 = vpop.f32.mrf.mxu0  ;;  %v1608_v41 = vsel %vm1574_vm1, %v2806_v1, 0.0  ;;  %v1696_v42 = vmul.f32 %v2816_v8, %v2816_v8 }
 0x164   :  { %v1227_v46 = vpop.f32.mrf.mxu1 }
 0x165   :  { %v2049_v47 = vpack.c.bf16 %v2864_v44, %v2864_v44  ;;  %v996_v48 = vpop.f32.mrf.mxu0 }
 0x166   :  { %v1228_v49 = vpop.f32.mrf.mxu1 }
 0x167   :  { %1549 = vst.msk [vmem:[%s3180_s2 + $0x60] sm:$0xf] %vm1524_vm0, %v2049_v47  ;;  %v2872_v50 = vadd.f32 %v1228_v49, %v996_v48  ;;  %v998_v51 = vpop.f32.mrf.mxu0  ;;  %v1760_v47 = vsel %vm1574_vm1, %v1695_v36, 0.0  ;;  %v1610_v48 = vsel %vm1574_vm1, %v2816_v8, 0.0  ;;  %v1697_v49 = vmul.f32 %v2824_v14, %v2824_v14 }
 0x168   :  { %v1230_v52 = vpop.f32.mrf.mxu1  ;;  %v1698_v8 = vmul.f32 %v2832_v20, %v2832_v20 }
 0x169   :  { %v2050_v53 = vpack.c.bf16 %v2872_v50, %v2872_v50  ;;  %v1001_v54 = vpop.f32.mrf.mxu0  ;;  %v1609_v52 = vadd.f32 %v1608_v41, %v2799_v62  ;;  %v1614_v62 = vsel %vm1574_vm1, %v2832_v20, 0.0  ;;  %v1700_v20 = vmul.f32 %v2848_v32, %v2848_v32 }
 0x16a   :  { %v1233_v55 = vpop.f32.mrf.mxu1  ;;  %v1703_v41 = vmul.f32 %v2872_v50, %v2872_v50 }
 0x16b   :  { %1550 = vst.msk [vmem:[%s3180_s2 + $0x64] sm:$0xf] %vm1524_vm0, %v2050_v53  ;;  %v2880_v56 = vadd.f32 %v1233_v55, %v1001_v54  ;;  %v1003_v57 = vpop.f32.mrf.mxu0  ;;  %v1762_v54 = vsel %vm1574_vm1, %v1696_v42, 0.0  ;;  %v1612_v55 = vsel %vm1574_vm1, %v2824_v14, 0.0 }
 0x16c   :  { %v1235_v58 = vpop.f32.mrf.mxu1 }
 0x16d   :  { %v2051_v59 = vpack.c.bf16 %v2880_v56, %v2880_v56  ;;  %v1004_v60 = vpop.f32.mrf.mxu0 }
 0x16e   :  { %v1236_v61 = vpop.f32.mrf.mxu1 }
 0x16f   :  { %1551 = vst.msk [vmem:[%s3180_s2 + $0x68] sm:$0xf] %vm1524_vm0, %v2051_v59  ;;  %v2888_v63 = vadd.f32 %v1236_v61, %v1004_v60  ;;  %v1006_v0 = vpop.f32.mrf.mxu0  ;;  %v1761_v59 = vadd.f32 %v1760_v47, %v2808_v3  ;;  %v1611_v60 = vadd.f32 %v1610_v48, %v1609_v52  ;;  %v1624_v48 = vsel %vm1574_vm1, %v2872_v50, 0.0 }
 0x170   :  { %v1238_v2 = vpop.f32.mrf.mxu1  ;;  %v1764_v0 = vsel %vm1574_vm1, %v1697_v49, 0.0 }
 0x171   :  { %v2052_v4 = vpack.c.bf16 %v2888_v63, %v2888_v63  ;;  %v1009_v5 = vpop.f32.mrf.mxu0  ;;  %v1699_v2 = vmul.f32 %v2840_v26, %v2840_v26  ;;  %v1613_v3 = vadd.f32 %v1612_v55, %v1611_v60  ;;  %v1776_v55 = vsel %vm1574_vm1, %v1703_v41, 0.0 }
 0x172   :  { %v1241_v6 = vpop.f32.mrf.mxu1 }
 0x173   :  { %1552 = vst.msk [vmem:[%s3180_s2 + $0x6c] sm:$0xf] %vm1524_vm0, %v2052_v4  ;;  %v2896_v7 = vadd.f32 %v1241_v6, %v1009_v5  ;;  %v1011_v9 = vpop.f32.mrf.mxu0  ;;  %v1763_v5 = vadd.f32 %v1762_v54, %v1761_v59 }
 0x174   :  { %v1243_v10 = vpop.f32.mrf.mxu1  ;;  %v1766_v9 = vsel %vm1574_vm1, %v1698_v8, 0.0  ;;  %v1626_v8 = vsel %vm1574_vm1, %v2880_v56, 0.0 }
 0x175   :  { %v2053_v11 = vpack.c.bf16 %v2896_v7, %v2896_v7  ;;  %v1012_v12 = vpop.f32.mrf.mxu0  ;;  %v1616_v10 = vsel %vm1574_vm1, %v2840_v26, 0.0 }
 0x176   :  { %v1244_v13 = vpop.f32.mrf.mxu1 }
 0x177   :  { %1553 = vst.msk [vmem:[%s3180_s2 + $0x70] sm:$0xf] %vm1524_vm0, %v2053_v11  ;;  %v2904_v15 = vadd.f32 %v1244_v13, %v1012_v12  ;;  %v1014_v16 = vpop.f32.mrf.mxu0  ;;  %v1765_v13 = vadd.f32 %v1764_v0, %v1763_v5 }
 0x178   :  { %v1246_v17 = vpop.f32.mrf.mxu1  ;;  %v1615_v16 = vadd.f32 %v1614_v62, %v1613_v3  ;;  %v1628_v62 = vsel %vm1574_vm1, %v2888_v63, 0.0 }
 0x179   :  { %v2054_v18 = vpack.c.bf16 %v2904_v15, %v2904_v15  ;;  %v1017_v19 = vpop.f32.mrf.mxu0 }
 0x17a   :  { %v1249_v21 = vpop.f32.mrf.mxu1 }
 0x17b   :  { %1554 = vst.msk [vmem:[%s3180_s2 + $0x74] sm:$0xf] %vm1524_vm0, %v2054_v18  ;;  %v2912_v22 = vadd.f32 %v1249_v21, %v1017_v19  ;;  %v1019_v23 = vpop.f32.mrf.mxu0  ;;  %v1768_v18 = vsel %vm1574_vm1, %v1699_v2, 0.0  ;;  %v1618_v19 = vsel %vm1574_vm1, %v2848_v32, 0.0  ;;  %v1701_v21 = vmul.f32 %v2856_v38, %v2856_v38 }
 0x17c   :  { %v1251_v24 = vpop.f32.mrf.mxu1  ;;  %v1702_v32 = vmul.f32 %v2864_v44, %v2864_v44 }
 0x17d   :  { %v2055_v25 = vpack.c.bf16 %v2912_v22, %v2912_v22  ;;  %v1020_v27 = vpop.f32.mrf.mxu0  ;;  %v1767_v24 = vadd.f32 %v1766_v9, %v1765_v13 }
 0x17e   :  { %v1252_v28 = vpop.f32.mrf.mxu1  ;;  %v1774_v47 = vsel %vm1574_vm1, %v1702_v32, 0.0 }
 0x17f   :  { %1555 = vst.msk [vmem:[%s3180_s2 + $0x78] sm:$0xf] %vm1524_vm0, %v2055_v25  ;;  %v2920_v29 = vadd.f32 %v1252_v28, %v1020_v27  ;;  %v1022_v30 = vpop.f32.mrf.mxu0  ;;  %v1617_v25 = vadd.f32 %v1616_v10, %v1615_v16  ;;  %v1770_v28 = vsel %vm1574_vm1, %v1700_v20, 0.0  ;;  %v1630_v10 = vsel %vm1574_vm1, %v2896_v7, 0.0 }
 0x180   :  { %v1254_v31 = vpop.f32.mrf.mxu1  ;;  %v1620_v30 = vsel %vm1574_vm1, %v2856_v38, 0.0  ;;  %v1707_v20 = vmul.f32 %v2904_v15, %v2904_v15 }
 0x181   :  { %v2056_v33 = vpack.c.bf16 %v2920_v29, %v2920_v29  ;;  %v1025_v34 = vpop.f32.mrf.mxu0 }
 0x182   :  { %v1257_v35 = vpop.f32.mrf.mxu1 }
 0x183   :  { %1556 = vst.msk [vmem:[%s3180_s2 + $0x7c] sm:$0xf] %vm1524_vm0, %v2056_v33  ;;  %v2930_v37 = vadd.f32 %v1257_v35, %v1025_v34  ;;  %v1027_v39 = vpop.f32.mrf.mxu0  ;;  %v1769_v34 = vadd.f32 %v1768_v18, %v1767_v24  ;;  %v1619_v35 = vadd.f32 %v1618_v19, %v1617_v25  ;;  %v1632_v18 = vsel %vm1574_vm1, %v2904_v15, 0.0 }
 0x184   :  { %v1259_v40 = vpop.f32.mrf.mxu1  ;;  %v1772_v39 = vsel %vm1574_vm1, %v1701_v21, 0.0 }
 0x185   :  { %v2057_v43 = vpack.c.bf16 %v2930_v37, %v2930_v37  ;;  %v1028_v45 = vpop.f32.mrf.mxu0  ;;  %v1622_v40 = vsel %vm1574_vm1, %v2864_v44, 0.0  ;;  %v1704_v44 = vmul.f32 %v2880_v56, %v2880_v56  ;;  %v1706_v56 = vmul.f32 %v2896_v7, %v2896_v7 }
 0x186   :  { %v1260_v46 = vpop.f32.mrf.mxu1  ;;  %v1708_v7 = vmul.f32 %v2912_v22, %v2912_v22 }
 0x187   :  { %1557 = vst.msk [vmem:[%s3180_s2 + $0x80] sm:$0xf] %vm1524_vm0, %v2057_v43  ;;  %v2947_v1 = vadd.f32 %v1260_v46, %v1028_v45  ;;  %v1030_v51 = vpop.f32.mrf.mxu0  ;;  %v1771_v43 = vadd.f32 %v1770_v28, %v1769_v34  ;;  %v1621_v45 = vadd.f32 %v1620_v30, %v1619_v35  ;;  %v1778_v0 = vsel %vm1574_vm1, %v1704_v44, 0.0 }
 0x188   :  { %v1262_v53 = vpop.f32.mrf.mxu1  ;;  %v1634_v28 = vsel %vm1574_vm1, %v2912_v22, 0.0  ;;  %v1709_v30 = vmul.f32 %v2920_v29, %v2920_v29  ;;  %v1786_v35 = vsel %vm1574_vm1, %v1708_v7, 0.0  ;;  %v1710_v22 = vmul.f32 %v2930_v37, %v2930_v37 }
 0x189   :  { %v2058_v57 = vpack.c.bf16 %v2947_v1, %v2947_v1  ;;  %v1033_v58 = vpop.f32.mrf.mxu0  ;;  %v1773_v52 = vadd.f32 %v1772_v39, %v1771_v43  ;;  %v1623_v53 = vadd.f32 %v1622_v40, %v1621_v45 }
 0x18a   :  { %v1265_v61 = vpop.f32.mrf.mxu1  ;;  %v1788_v45 = vsel %vm1574_vm1, %v1709_v30, 0.0 }
 0x18b   :  { %1558 = vst.msk [vmem:[%s3180_s2 + $0x84] sm:$0xf] %vm1524_vm0, %v2058_v57  ;;  %v2967_v14 = vadd.f32 %v1265_v61, %v1033_v58  ;;  %v1035_v4 = vpop.f32.mrf.mxu0  ;;  %v1705_v57 = vmul.f32 %v2888_v63, %v2888_v63  ;;  %v1775_v59 = vadd.f32 %v1774_v47, %v1773_v52  ;;  %v1625_v60 = vadd.f32 %v1624_v48, %v1623_v53 }
 0x18c   :  { %v1267_v6 = vpop.f32.mrf.mxu1  ;;  %v1711_v47 = vmul.f32 %v2947_v1, %v2947_v1  ;;  %v1790_v52 = vsel %vm1574_vm1, %v1710_v22, 0.0  ;;  %v1640_v53 = vsel %vm1574_vm1, %v2947_v1, 0.0 }
 0x18d   :  { %v2059_v11 = vpack.c.bf16 %v2967_v14, %v2967_v14  ;;  %v1036_v12 = vpop.f32.mrf.mxu0  ;;  %v1777_v5 = vadd.f32 %v1776_v55, %v1775_v59  ;;  %v1627_v3 = vadd.f32 %v1626_v8, %v1625_v60  ;;  %v1780_v9 = vsel %vm1574_vm1, %v1705_v57, 0.0 }
 0x18e   :  { %v1268_v17 = vpop.f32.mrf.mxu1  ;;  %v1792_v59 = vsel %vm1574_vm1, %v1711_v47, 0.0  ;;  %v1642_v60 = vsel %vm1574_vm1, %v2967_v14, 0.0 }
 0x18f   :  { %1559 = vst.msk [vmem:[%s3180_s2 + $0x88] sm:$0xf] %vm1524_vm0, %v2059_v11  ;;  %v2985_v26 = vadd.f32 %v1268_v17, %v1036_v12  ;;  %v1038_v23 = vpop.f32.mrf.mxu0  ;;  %v1779_v12 = vadd.f32 %v1778_v0, %v1777_v5  ;;  %v1629_v13 = vadd.f32 %v1628_v62, %v1627_v3  ;;  %v1782_v17 = vsel %vm1574_vm1, %v1706_v56, 0.0 }
 0x190   :  { %v1270_v27 = vpop.f32.mrf.mxu1 }
 0x191   :  { %v2060_v31 = vpack.c.bf16 %v2985_v26, %v2985_v26  ;;  %v1041_v33 = vpop.f32.mrf.mxu0  ;;  %v1781_v23 = vadd.f32 %v1780_v9, %v1779_v12  ;;  %v1631_v24 = vadd.f32 %v1630_v10, %v1629_v13  ;;  %v1784_v27 = vsel %vm1574_vm1, %v1707_v20, 0.0 }
 0x192   :  { %v1273_v36 = vpop.f32.mrf.mxu1  ;;  %v1644_v5 = vsel %vm1574_vm1, %v2985_v26, 0.0 }
 0x193   :  { %1560 = vst.msk [vmem:[%s3180_s2 + $0x8c] sm:$0xf] %vm1524_vm0, %v2060_v31  ;;  %v3003_v38 = vadd.f32 %v1273_v36, %v1041_v33  ;;  %v1043_v42 = vpop.f32.mrf.mxu0  ;;  %v1783_v31 = vadd.f32 %v1782_v17, %v1781_v23  ;;  %v1633_v33 = vadd.f32 %v1632_v18, %v1631_v24  ;;  %v1636_v36 = vsel %vm1574_vm1, %v2920_v29, 0.0 }
 0x194   :  { %v1275_v46 = vpop.f32.mrf.mxu1 }
 0x195   :  { %v2061_v49 = vpack.c.bf16 %v3003_v38, %v3003_v38  ;;  %v1044_v51 = vpop.f32.mrf.mxu0  ;;  %v1785_v41 = vadd.f32 %v1784_v27, %v1783_v31  ;;  %v1635_v42 = vadd.f32 %v1634_v28, %v1633_v33  ;;  %v1638_v46 = vsel %vm1574_vm1, %v2930_v37, 0.0 }
 0x196   :  { %v1276_v54 = vpop.f32.mrf.mxu1  ;;  %v1712_v37 = vmul.f32 %v2967_v14, %v2967_v14  ;;  %v1714_v14 = vmul.f32 %v3003_v38, %v3003_v38  ;;  %v1646_v12 = vsel %vm1574_vm1, %v3003_v38, 0.0 }
 0x197   :  { %1561 = vst.msk [vmem:[%s3180_s2 + $0x90] sm:$0xf] %vm1524_vm0, %v2061_v49  ;;  %v3021_v50 = vadd.f32 %v1276_v54, %v1044_v51  ;;  %v1046_v58 = vpop.f32.mrf.mxu0  ;;  %v1787_v44 = vadd.f32 %v1786_v35, %v1785_v41  ;;  %v1637_v49 = vadd.f32 %v1636_v36, %v1635_v42 }
 0x198   :  { %v1278_v61 = vpop.f32.mrf.mxu1 }
 0x199   :  { %v2062_v2 = vpack.c.bf16 %v3021_v50, %v3021_v50  ;;  %v1049_v4 = vpop.f32.mrf.mxu0  ;;  %v1789_v8 = vadd.f32 %v1788_v45, %v1787_v44  ;;  %v1639_v57 = vadd.f32 %v1638_v46, %v1637_v49  ;;  %v1713_v61 = vmul.f32 %v2985_v26, %v2985_v26 }
 0x19a   :  { %v1281_v6 = vpop.f32.mrf.mxu1  ;;  %v1715_v13 = vmul.f32 %v3021_v50, %v3021_v50 }
 0x19b   :  { %1562 = vst.msk [vmem:[%s3180_s2 + $0x94] sm:$0xf] %vm1524_vm0, %v2062_v2  ;;  %v3039_v63 = vadd.f32 %v1281_v6, %v1049_v4  ;;  %v1051_v11 = vpop.f32.mrf.mxu0  ;;  %v1791_v62 = vadd.f32 %v1790_v52, %v1789_v8  ;;  %v1641_v56 = vadd.f32 %v1640_v53, %v1639_v57  ;;  %v1794_v4 = vsel %vm1574_vm1, %v1712_v37, 0.0 }
 0x19c   :  { %v1283_v16 = vpop.f32.mrf.mxu1  ;;  %v1796_v11 = vsel %vm1574_vm1, %v1713_v61, 0.0  ;;  %v1800_v30 = vsel %vm1574_vm1, %v1715_v13, 0.0 }
 0x19d   :  { %v2063_v19 = vpack.c.bf16 %v3039_v63, %v3039_v63  ;;  %v1052_v21 = vpop.f32.mrf.mxu0  ;;  %v1793_v9 = vadd.f32 %v1792_v59, %v1791_v62  ;;  %v1643_v10 = vadd.f32 %v1642_v60, %v1641_v56  ;;  %v1716_v38 = vmul.f32 %v3039_v63, %v3039_v63 }
 0x19e   :  { %v1284_v25 = vpop.f32.mrf.mxu1 }
 0x19f   :  { %1563 = vst.msk [vmem:[%s3180_s2 + $0x98] sm:$0xf] %vm1524_vm0, %v2063_v19  ;;  %v3057_v15 = vadd.f32 %v1284_v25, %v1052_v21  ;;  %v1054_v32 = vpop.f32.mrf.mxu0  ;;  %v1795_v17 = vadd.f32 %v1794_v4, %v1793_v9  ;;  %v1645_v18 = vadd.f32 %v1644_v5, %v1643_v10  ;;  %v1798_v19 = vsel %vm1574_vm1, %v1714_v14, 0.0 }
 0x1a0   :  { %v1286_v34 = vpop.f32.mrf.mxu1  ;;  %v1648_v21 = vsel %vm1574_vm1, %v3021_v50, 0.0  ;;  %v1650_v32 = vsel %vm1574_vm1, %v3039_v63, 0.0  ;;  %v1802_v22 = vsel %vm1574_vm1, %v1716_v38, 0.0 }
 0x1a1   :  { %v2064_v39 = vpack.c.bf16 %v3057_v15, %v3057_v15  ;;  %v1057_v40 = vpop.f32.mrf.mxu0  ;;  %v1797_v25 = vadd.f32 %v1796_v11, %v1795_v17  ;;  %v1647_v27 = vadd.f32 %v1646_v12, %v1645_v18  ;;  %v1717_v31 = vmul.f32 %v3057_v15, %v3057_v15 }
 0x1a2   :  { %v1289_v43 = vpop.f32.mrf.mxu1 }
 0x1a3   :  { %1564 = vst.msk [vmem:[%s3180_s2 + $0x9c] sm:$0xf] %vm1524_vm0, %v2064_v39  ;;  %v3075_v29 = vadd.f32 %v1289_v43, %v1057_v40  ;;  %v1059_v48 = vpop.f32.mrf.mxu0  ;;  %v1799_v34 = vadd.f32 %v1798_v19, %v1797_v25  ;;  %v1649_v35 = vadd.f32 %v1648_v21, %v1647_v27  ;;  %v1652_v39 = vsel %vm1574_vm1, %v3057_v15, 0.0 }
 0x1a4   :  { %v1291_v51 = vpop.f32.mrf.mxu1  ;;  %v1804_v46 = vsel %vm1574_vm1, %v1717_v31, 0.0 }
 0x1a5   :  { %v2065_v54 = vpack.c.bf16 %v3075_v29, %v3075_v29  ;;  %v1060_v55 = vpop.f32.mrf.mxu0  ;;  %v1718_v63 = vmul.f32 %v3075_v29, %v3075_v29  ;;  %v1801_v42 = vadd.f32 %v1800_v30, %v1799_v34  ;;  %v1651_v43 = vadd.f32 %v1650_v32, %v1649_v35 }
 0x1a6   :  { %v1292_v58 = vpop.f32.mrf.mxu1  ;;  %v1654_v47 = vsel %vm1574_vm1, %v3075_v29, 0.0 }
 0x1a7   :  { %1565 = vst.msk [vmem:[%s3180_s2 + $0xa0] sm:$0xf] %vm1524_vm0, %v2065_v54  ;;  %v1293_v1 = vadd.f32 %v1292_v58, %v1060_v55  ;;  %v1062_v0 = vpop.f32.mrf.mxu0  ;;  %v1803_v49 = vadd.f32 %v1802_v22, %v1801_v42  ;;  %v1653_v51 = vadd.f32 %v1652_v39, %v1651_v43  ;;  %v1806_v53 = vsel %vm1574_vm1, %v1718_v63, 0.0 }
 0x1a8   :  { %v1294_v2 = vpop.f32.mrf.mxu1 }
 0x1a9   :  { %v2066_v3 = vpack.c.bf16 %v1293_v1, %v1293_v1  ;;  %v1065_v6 = vpop.f32.mrf.mxu0  ;;  %v1719_v48 = vmul.f32 %v1293_v1, %v1293_v1  ;;  %v1656_v37 = vsel %vm1574_vm1, %v1293_v1, 0.0  ;;  %v1805_v57 = vadd.f32 %v1804_v46, %v1803_v49 }
 0x1aa   :  { %v1297_v20 = vpop.f32.mrf.mxu1  ;;  %v1655_v29 = vadd.f32 %v1654_v47, %v1653_v51 }
 0x1ab   :  { %1566 = vst.msk [vmem:[%s3180_s2 + $0xa4] sm:$0xf] %vm1524_vm0, %v2066_v3  ;;  %v1298_v26 = vadd.f32 %v1297_v20, %v1065_v6  ;;  %v1067_v16 = vpop.f32.mrf.mxu0  ;;  %v1808_v59 = vsel %vm1574_vm1, %v1719_v48, 0.0  ;;  %v1807_v56 = vadd.f32 %v1806_v53, %v1805_v57 }
 0x1ac   :  { %v1299_v7 = vpop.f32.mrf.mxu1  ;;  %v1657_v1 = vadd.f32 %v1656_v37, %v1655_v29 }
 0x1ad   :  { %v2067_v23 = vpack.c.bf16 %v1298_v26, %v1298_v26  ;;  %v1068_v24 = vpop.f32.mrf.mxu0  ;;  %v1720_v54 = vmul.f32 %v1298_v26, %v1298_v26  ;;  %v1658_v60 = vsel %vm1574_vm1, %v1298_v26, 0.0  ;;  %v1809_v9 = vadd.f32 %v1808_v59, %v1807_v56 }
 0x1ae   :  { %v1300_v28 = vpop.f32.mrf.mxu1  ;;  %v1659_v10 = vadd.f32 %v1658_v60, %v1657_v1 }
 0x1af   :  { %1567 = vst.msk [vmem:[%s3180_s2 + $0xa8] sm:$0xf] %vm1524_vm0, %v2067_v23  ;;  %v1301_v50 = vadd.f32 %v1300_v28, %v1068_v24  ;;  %v1070_v33 = vpop.f32.mrf.mxu0  ;;  %v1810_v4 = vsel %vm1574_vm1, %v1720_v54, 0.0 }
 0x1b0   :  { %v1302_v36 = vpop.f32.mrf.mxu1  ;;  %v1811_v17 = vadd.f32 %v1810_v4, %v1809_v9 }
 0x1b1   :  { %v2068_v40 = vpack.c.bf16 %v1301_v50, %v1301_v50  ;;  %v1073_v41 = vpop.f32.mrf.mxu0  ;;  %v1721_v61 = vmul.f32 %v1301_v50, %v1301_v50  ;;  %v1660_v5 = vsel %vm1574_vm1, %v1301_v50, 0.0 }
 0x1b2   :  { %v1305_v45 = vpop.f32.mrf.mxu1  ;;  %v1661_v18 = vadd.f32 %v1660_v5, %v1659_v10 }
 0x1b3   :  { %1568 = vst.msk [vmem:[%s3180_s2 + $0xac] sm:$0xf] %vm1524_vm0, %v2068_v40  ;;  %v1306_v15 = vadd.f32 %v1305_v45, %v1073_v41  ;;  %v1075_v44 = vpop.f32.mrf.mxu0  ;;  %v1812_v11 = vsel %vm1574_vm1, %v1721_v61, 0.0 }
 0x1b4   :  { %v1307_v52 = vpop.f32.mrf.mxu1  ;;  %v1813_v25 = vadd.f32 %v1812_v11, %v1811_v17 }
 0x1b5   :  { %v2069_v55 = vpack.c.bf16 %v1306_v15, %v1306_v15  ;;  %v1076_v8 = vpop.f32.mrf.mxu0  ;;  %v1722_v14 = vmul.f32 %v1306_v15, %v1306_v15  ;;  %v1662_v12 = vsel %vm1574_vm1, %v1306_v15, 0.0 }
 0x1b6   :  { %v1308_v58 = vpop.f32.mrf.mxu1  ;;  %v1663_v27 = vadd.f32 %v1662_v12, %v1661_v18 }
 0x1b7   :  { %1569 = vst.msk [vmem:[%s3180_s2 + $0xb0] sm:$0xf] %vm1524_vm0, %v2069_v55  ;;  %v1309_v0 = vadd.f32 %v1308_v58, %v1076_v8  ;;  %v1078_v62 = vpop.f32.mrf.mxu0  ;;  %v1814_v19 = vsel %vm1574_vm1, %v1722_v14, 0.0 }
 0x1b8   :  { %v1310_v2 = vpop.f32.mrf.mxu1  ;;  %v1815_v33 = vadd.f32 %v1814_v19, %v1813_v25 }
 0x1b9   :  { %v2070_v3 = vpack.c.bf16 %v1309_v0, %v1309_v0  ;;  %v1081_v6 = vpop.f32.mrf.mxu0  ;;  %v1723_v13 = vmul.f32 %v1309_v0, %v1309_v0  ;;  %v1664_v21 = vsel %vm1574_vm1, %v1309_v0, 0.0 }
 0x1ba   :  { %v1313_v20 = vpop.f32.mrf.mxu1  ;;  %v1665_v34 = vadd.f32 %v1664_v21, %v1663_v27 }
 0x1bb   :  { %1570 = vst.msk [vmem:[%s3180_s2 + $0xb4] sm:$0xf] %vm1524_vm0, %v2070_v3  ;;  %v1314_v26 = vadd.f32 %v1313_v20, %v1081_v6  ;;  %v1083_v16 = vpop.f32.mrf.mxu0  ;;  %v1816_v30 = vsel %vm1574_vm1, %v1723_v13, 0.0 }
 0x1bc   :  { %v1315_v7 = vpop.f32.mrf.mxu1  ;;  %v1817_v41 = vadd.f32 %v1816_v30, %v1815_v33 }
 0x1bd   :  { %v2071_v38 = vpack.c.bf16 %v1314_v26, %v1314_v26  ;;  %v1724_v23 = vmul.f32 %v1314_v26, %v1314_v26  ;;  %v1084_v24 = vpop.f32.mrf.mxu0  ;;  %v1666_v32 = vsel %vm1574_vm1, %v1314_v26, 0.0 }
 0x1be   :  { %v1316_v28 = vpop.f32.mrf.mxu1  ;;  %v1667_v42 = vadd.f32 %v1666_v32, %v1665_v34 }
 0x1bf   :  { %1571 = vst.msk [vmem:[%s3180_s2 + $0xb8] sm:$0xf] %vm1524_vm0, %v2071_v38  ;;  %v1317_v31 = vadd.f32 %v1316_v28, %v1084_v24  ;;  %v1086_v50 = vpop.f32.mrf.mxu0  ;;  %v1818_v36 = vsel %vm1574_vm1, %v1724_v23, 0.0 }
 0x1c0   :  { %v1318_v35 = vpop.f32.mrf.mxu1  ;;  %v1819_v48 = vadd.f32 %v1818_v36, %v1817_v41 }
 0x1c1   :  { %v2072_v22 = vpack.c.bf16 %v1317_v31, %v1317_v31  ;;  %v1668_v39 = vsel %vm1574_vm1, %v1317_v31, 0.0  ;;  %v1725_v63 = vmul.f32 %v1317_v31, %v1317_v31  ;;  %v1089_v40 = vpop.f32.mrf.mxu0 }
 0x1c2   :  { %v1321_v43 = vpop.f32.mrf.mxu1  ;;  %v1669_v15 = vadd.f32 %v1668_v39, %v1667_v42 }
 0x1c3   :  { %1572 = vst.msk [vmem:[%s3180_s2 + $0xbc] sm:$0xf] %vm1524_vm0, %v2072_v22  ;;  %v1820_v45 = vsel %vm1574_vm1, %v1725_v63, 0.0  ;;  %v1322_v46 = vadd.f32 %v1321_v43, %v1089_v40  ;;  %v1091_v47 = vpop.f32.mrf.mxu0 }
 0x1c4   :  { %v1323_v44 = vpop.f32.mrf.mxu1  ;;  %v1821_v37 = vadd.f32 %v1820_v45, %v1819_v48 }
 0x1c5   :  { %v2073_v49 = vpack.c.bf16 %v1322_v46, %v1322_v46  ;;  %v1670_v51 = vsel %vm1574_vm1, %v1322_v46, 0.0  ;;  %v1726_v52 = vmul.f32 %v1322_v46, %v1322_v46  ;;  %v1092_v53 = vpop.f32.mrf.mxu0 }
 0x1c6   :  { %v1671_v54 = vadd.f32 %v1670_v51, %v1669_v15  ;;  %v1324_v55 = vpop.f32.mrf.mxu1 }
 0x1c7   :  { %1573 = vst.msk [vmem:[%s3180_s2 + $0xc0] sm:$0xf] %vm1524_vm0, %v2073_v49  ;;  %v1822_v8 = vsel %vm1574_vm1, %v1726_v52, 0.0  ;;  %v1093_v57 = vpop.f32.mrf.mxu0 }
 0x1c8   :  { %v1672_v29 = vrot.slane %v1671_v54, 4  ;;  %v1823_v58 = vadd.f32 %v1822_v8, %v1821_v37  ;;  %v1325_v59 = vpop.f32.mrf.mxu1 }
 0x1ca   :  { %v1673_v60 = vadd.f32 %v1672_v29, %v1671_v54  ;;  %v1824_v61 = vrot.slane %v1823_v58, 4 }
 0x1cc   :  { %v1674_v0 = vrot.slane %v1673_v60, 2  ;;  %v1825_v62 = vadd.f32 %v1824_v61, %v1823_v58 }
 0x1ce   :  { %v1675_v56 = vadd.f32 %v1674_v0, %v1673_v60  ;;  %v1826_v1 = vrot.slane %v1825_v62, 2 }
 0x1d0   :  { %v1676_v2 = vrot.slane %v1675_v56, 1  ;;  %v1827_v4 = vadd.f32 %v1826_v1, %v1825_v62 }
 0x1d2   :  { %v1677_v5 = vadd.f32 %v1676_v2, %v1675_v56  ;;  %v1828_v14 = vrot.slane %v1827_v4, 1 }
 0x1d4   :  { %v1829_v3 = vadd.f32 %v1828_v14, %v1827_v4  ;;  %1830 = vst.msk [vmem:[%s3181_s3] sm:$0xff] %vm1574_vm1, %v1677_v5 }
 0x1d6   :  { %1831 = vst.msk [vmem:[%s3182_s4] sm:$0xff] %vm1574_vm1, %v1829_v3 }

// kernel: discriminator_forward.10
= control target key start
LH: loop header
LB: loop body
LE: loop exit
PB: predicated region body
PF: predicated region fallthrough
CT: control target
= control target key end

     0   :  { %vm568_vm0 = vcmask 519168   ;;  %s1244_s0 = inlined_call_operand.vmem [shape: bf16[392,64], index: 0, kind: input, shape index: {}]   ;;  %s1245_s1 = inlined_call_operand.vmem [shape: f32[1,64], index: 1, kind: input, shape index: {}]   ;;  %s1246_s2 = inlined_call_operand.vmem [shape: f32[1,64], index: 2, kind: input, shape index: {}]   ;;  %s1247_s3 = inlined_call_operand.vmem [shape: bf16[392,64], index: 3, kind: output, shape index: {}]  }
   0x1   :  { %v723_v0 = vld [vmem:[%s1244_s0] sm:$0xff]   ;;  %v818_v4 = vld [vmem:[%s1244_s0 + $0x8] sm:$0xff]   ;;  %v819_v5 = vld [vmem:[%s1244_s0 + $0x10] sm:$0xff]  }
   0x2   :  { %v867_v1 = vld [vmem:[%s1245_s1] ss:$0 sm:$0xff]  ;;  %v724_v2 = vunpack.c.l.bf16 %v723_v0  ;;  %v725_v3 = vunpack.c.h.bf16 %v723_v0  ;;  %v820_v6 = vld [vmem:[%s1244_s0 + $0x18] sm:$0xff]   ;;  %v728_v8 = vunpack.c.l.bf16 %v818_v4  ;;  %v729_v9 = vunpack.c.h.bf16 %v818_v4  ;;  %v822_v40 = vld [vmem:[%s1244_s0 + $0x28] sm:$0xff]  }
   0x3   :  { %v881_v7 = vld [vmem:[%s1246_s2] ss:$0 sm:$0xff]  ;;  %v732_v10 = vunpack.c.l.bf16 %v819_v5  ;;  %v733_v11 = vunpack.c.h.bf16 %v819_v5  ;;  %v736_v14 = vunpack.c.l.bf16 %v820_v6  ;;  %v737_v15 = vunpack.c.h.bf16 %v820_v6  ;;  %v823_v52 = vld [vmem:[%s1244_s0 + $0x30] sm:$0xff]  }
   0x4   :  { %v119_v12 = vmul.f32 %v724_v2, %v867_v1  ;;  %v120_v13 = vmul.f32 %v725_v3, %v867_v1  ;;  %v121_v16 = vmul.f32 %v728_v8, %v867_v1  ;;  %v122_v17 = vmul.f32 %v729_v9, %v867_v1  ;;  %v821_v39 = vld [vmem:[%s1244_s0 + $0x20] sm:$0xff]  }
   0x5   :  { %v123_v18 = vmul.f32 %v732_v10, %v867_v1  ;;  %v124_v19 = vmul.f32 %v733_v11, %v867_v1  ;;  %v125_v22 = vmul.f32 %v736_v14, %v867_v1  ;;  %v126_v23 = vmul.f32 %v737_v15, %v867_v1 }
   0x6   :  { %v175_v20 = vadd.f32 %v881_v7, %v119_v12  ;;  %v176_v21 = vadd.f32 %v881_v7, %v120_v13  ;;  %v177_v24 = vadd.f32 %v881_v7, %v121_v16  ;;  %v178_v25 = vadd.f32 %v881_v7, %v122_v17  ;;  %v824_v17 = vld [vmem:[%s1244_s0 + $0x38] sm:$0xff]  }
   0x7   :  { %v179_v26 = vadd.f32 %v881_v7, %v123_v18  ;;  %v180_v27 = vadd.f32 %v881_v7, %v124_v19  ;;  %v181_v46 = vadd.f32 %v881_v7, %v125_v22  ;;  %v182_v47 = vadd.f32 %v881_v7, %v126_v23  ;;  %v825_v18 = vld [vmem:[%s1244_s0 + $0x40] sm:$0xff]   ;;  %v826_v23 = vld [vmem:[%s1244_s0 + $0x48] sm:$0xff]  }
   0x8   :  { %vm224_vm1 = vcmp.ge.f32.partialorder %v175_v20, 0.0  ;;  %v273_v28 = vmul.f32 0.2, %v175_v20  ;;  %vm225_vm2 = vcmp.ge.f32.partialorder %v176_v21, 0.0  ;;  %v274_v29 = vmul.f32 0.2, %v176_v21 }
   0x9   :  { %vm226_vm3 = vcmp.ge.f32.partialorder %v177_v24, 0.0  ;;  %v275_v30 = vmul.f32 0.2, %v177_v24  ;;  %vm227_vm4 = vcmp.ge.f32.partialorder %v178_v25, 0.0  ;;  %v276_v31 = vmul.f32 0.2, %v178_v25 }
   0xa   :  { %v322_v32 = vsel %vm224_vm1, %v175_v20, %v273_v28  ;;  %v323_v33 = vsel %vm225_vm2, %v176_v21, %v274_v29  ;;  %vm228_vm5 = vcmp.ge.f32.partialorder %v179_v26, 0.0  ;;  %v277_v34 = vmul.f32 0.2, %v179_v26 }
   0xb   :  { %v673_v35 = vpack.c.bf16 %v322_v32, %v322_v32  ;;  %v674_v36 = vpack.c.bf16 %v323_v33, %v323_v33  ;;  %v324_v37 = vsel %vm226_vm3, %v177_v24, %v275_v30  ;;  %v325_v38 = vsel %vm227_vm4, %v178_v25, %v276_v31 }
   0xc   :  { %v675_v41 = vpack.c.bf16 %v324_v37, %v324_v37  ;;  %v676_v42 = vpack.c.bf16 %v325_v38, %v325_v38  ;;  %v326_v43 = vsel %vm228_vm5, %v179_v26, %v277_v34  ;;  %vm229_vm6 = vcmp.ge.f32.partialorder %v180_v27, 0.0 }
   0xd   :  { %569 = vst.msk [vmem:[%s1247_s3] sm:$0xf] %vm568_vm0, %v673_v35  ;;  %570 = vst.msk [vmem:[%s1247_s3 + $0x4] sm:$0xf] %vm568_vm0, %v674_v36  ;;  %v677_v44 = vpack.c.bf16 %v326_v43, %v326_v43  ;;  %v278_v45 = vmul.f32 0.2, %v180_v27  ;;  %v740_v48 = vunpack.c.l.bf16 %v821_v39  ;;  %v741_v49 = vunpack.c.h.bf16 %v821_v39 }
   0xe   :  { %571 = vst.msk [vmem:[%s1247_s3 + $0x8] sm:$0xf] %vm568_vm0, %v675_v41  ;;  %572 = vst.msk [vmem:[%s1247_s3 + $0xc] sm:$0xf] %vm568_vm0, %v676_v42  ;;  %v744_v50 = vunpack.c.l.bf16 %v822_v40  ;;  %v745_v51 = vunpack.c.h.bf16 %v822_v40  ;;  %vm230_vm7 = vcmp.ge.f32.partialorder %v181_v46, 0.0  ;;  %vm231_vm8 = vcmp.ge.f32.partialorder %v182_v47, 0.0 }
   0xf   :  { %573 = vst.msk [vmem:[%s1247_s3 + $0x10] sm:$0xf] %vm568_vm0, %v677_v44  ;;  %v327_v53 = vsel %vm229_vm6, %v180_v27, %v278_v45  ;;  %v279_v54 = vmul.f32 0.2, %v181_v46  ;;  %v280_v56 = vmul.f32 0.2, %v182_v47  ;;  %v127_v57 = vmul.f32 %v740_v48, %v867_v1 }
  0x10   :  { %v678_v55 = vpack.c.bf16 %v327_v53, %v327_v53  ;;  %v128_v58 = vmul.f32 %v741_v49, %v867_v1  ;;  %v129_v60 = vmul.f32 %v744_v50, %v867_v1  ;;  %v130_v61 = vmul.f32 %v745_v51, %v867_v1 }
  0x11   :  { %v328_v59 = vsel %vm230_vm7, %v181_v46, %v279_v54  ;;  %v748_v62 = vunpack.c.l.bf16 %v823_v52  ;;  %v329_v0 = vsel %vm231_vm8, %v182_v47, %v280_v56  ;;  %v183_v2 = vadd.f32 %v881_v7, %v127_v57  ;;  %v827_v57 = vld [vmem:[%s1244_s0 + $0x50] sm:$0xff]  }
  0x12   :  { %574 = vst.msk [vmem:[%s1247_s3 + $0x14] sm:$0xf] %vm568_vm0, %v678_v55  ;;  %v679_v63 = vpack.c.bf16 %v328_v59, %v328_v59  ;;  %v184_v3 = vadd.f32 %v881_v7, %v128_v58  ;;  %v680_v4 = vpack.c.bf16 %v329_v0, %v329_v0  ;;  %v185_v5 = vadd.f32 %v881_v7, %v129_v60 }
  0x13   :  { %v186_v6 = vadd.f32 %v881_v7, %v130_v61  ;;  %v131_v8 = vmul.f32 %v748_v62, %v867_v1  ;;  %vm232_vm9 = vcmp.ge.f32.partialorder %v183_v2, 0.0  ;;  %v281_v9 = vmul.f32 0.2, %v183_v2  ;;  %v828_v62 = vld [vmem:[%s1244_s0 + $0x58] sm:$0xff]  }
  0x14   :  { %575 = vst.msk [vmem:[%s1247_s3 + $0x18] sm:$0xf] %vm568_vm0, %v679_v63  ;;  %vm233_vm10 = vcmp.ge.f32.partialorder %v184_v3, 0.0  ;;  %v282_v10 = vmul.f32 0.2, %v184_v3  ;;  %vm234_vm11 = vcmp.ge.f32.partialorder %v185_v5, 0.0  ;;  %v749_v16 = vunpack.c.h.bf16 %v823_v52 }
  0x15   :  { %576 = vst.msk [vmem:[%s1247_s3 + $0x1c] sm:$0xf] %vm568_vm0, %v680_v4  ;;  %v283_v11 = vmul.f32 0.2, %v185_v5  ;;  %vm235_vm12 = vcmp.ge.f32.partialorder %v186_v6, 0.0  ;;  %v330_v13 = vsel %vm232_vm9, %v183_v2, %v281_v9  ;;  %v187_v15 = vadd.f32 %v881_v7, %v131_v8 }
  0x16   :  { %v284_v12 = vmul.f32 0.2, %v186_v6  ;;  %v331_v14 = vsel %vm233_vm10, %v184_v3, %v282_v10  ;;  %v681_v19 = vpack.c.bf16 %v330_v13, %v330_v13  ;;  %v132_v27 = vmul.f32 %v749_v16, %v867_v1  ;;  %v829_v3 = vld [vmem:[%s1244_s0 + $0x60] sm:$0xff]   ;;  %v830_v13 = vld [vmem:[%s1244_s0 + $0x68] sm:$0xff]  }
  0x17   :  { %v682_v20 = vpack.c.bf16 %v331_v14, %v331_v14  ;;  %v332_v21 = vsel %vm234_vm11, %v185_v5, %v283_v11  ;;  %vm236_vm13 = vcmp.ge.f32.partialorder %v187_v15, 0.0  ;;  %v285_v26 = vmul.f32 0.2, %v187_v15 }
  0x18   :  { %v333_v22 = vsel %vm235_vm12, %v186_v6, %v284_v12  ;;  %v683_v24 = vpack.c.bf16 %v332_v21, %v332_v21  ;;  %577 = vst.msk [vmem:[%s1247_s3 + $0x20] sm:$0xf] %vm568_vm0, %v681_v19  ;;  %v752_v28 = vunpack.c.l.bf16 %v824_v17  ;;  %v753_v29 = vunpack.c.h.bf16 %v824_v17 }
  0x19   :  { %v684_v25 = vpack.c.bf16 %v333_v22, %v333_v22  ;;  %578 = vst.msk [vmem:[%s1247_s3 + $0x24] sm:$0xf] %vm568_vm0, %v682_v20  ;;  %v756_v30 = vunpack.c.l.bf16 %v825_v18  ;;  %v334_v31 = vsel %vm236_vm13, %v187_v15, %v285_v26  ;;  %v757_v32 = vunpack.c.h.bf16 %v825_v18 }
  0x1a   :  { %579 = vst.msk [vmem:[%s1247_s3 + $0x28] sm:$0xf] %vm568_vm0, %v683_v24  ;;  %v760_v33 = vunpack.c.l.bf16 %v826_v23  ;;  %v761_v34 = vunpack.c.h.bf16 %v826_v23  ;;  %v685_v35 = vpack.c.bf16 %v334_v31, %v334_v31  ;;  %v188_v36 = vadd.f32 %v881_v7, %v132_v27 }
  0x1b   :  { %580 = vst.msk [vmem:[%s1247_s3 + $0x2c] sm:$0xf] %vm568_vm0, %v684_v25  ;;  %v133_v37 = vmul.f32 %v752_v28, %v867_v1  ;;  %v134_v38 = vmul.f32 %v753_v29, %v867_v1  ;;  %v135_v39 = vmul.f32 %v756_v30, %v867_v1  ;;  %v136_v40 = vmul.f32 %v757_v32, %v867_v1 }
  0x1c   :  { %v137_v41 = vmul.f32 %v760_v33, %v867_v1  ;;  %v138_v42 = vmul.f32 %v761_v34, %v867_v1  ;;  %581 = vst.msk [vmem:[%s1247_s3 + $0x30] sm:$0xf] %vm568_vm0, %v685_v35  ;;  %vm237_vm14 = vcmp.ge.f32.partialorder %v188_v36, 0.0  ;;  %v286_v43 = vmul.f32 0.2, %v188_v36 }
  0x1d   :  { %v189_v44 = vadd.f32 %v881_v7, %v133_v37  ;;  %v190_v45 = vadd.f32 %v881_v7, %v134_v38  ;;  %v191_v46 = vadd.f32 %v881_v7, %v135_v39  ;;  %v192_v47 = vadd.f32 %v881_v7, %v136_v40 }
  0x1e   :  { %v193_v48 = vadd.f32 %v881_v7, %v137_v41  ;;  %v194_v49 = vadd.f32 %v881_v7, %v138_v42  ;;  %v335_v50 = vsel %vm237_vm14, %v188_v36, %v286_v43  ;;  %v764_v8 = vunpack.c.l.bf16 %v827_v57  ;;  %v831_v41 = vld [vmem:[%s1244_s0 + $0x70] sm:$0xff]  }
  0x1f   :  { %vm238_vm15 = vcmp.ge.f32.partialorder %v189_v44, 0.0  ;;  %v287_v51 = vmul.f32 0.2, %v189_v44  ;;  %vm239_vm1 = vcmp.ge.f32.partialorder %v190_v45, 0.0  ;;  %v686_v52 = vpack.c.bf16 %v335_v50, %v335_v50 }
  0x20   :  { %v288_v53 = vmul.f32 0.2, %v190_v45  ;;  %vm240_vm2 = vcmp.ge.f32.partialorder %v191_v46, 0.0  ;;  %v289_v54 = vmul.f32 0.2, %v191_v46  ;;  %vm241_vm3 = vcmp.ge.f32.partialorder %v192_v47, 0.0 }
  0x21   :  { %v336_v55 = vsel %vm238_vm15, %v189_v44, %v287_v51  ;;  %v290_v56 = vmul.f32 0.2, %v192_v47  ;;  %vm242_vm4 = vcmp.ge.f32.partialorder %v193_v48, 0.0  ;;  %582 = vst.msk [vmem:[%s1247_s3 + $0x34] sm:$0xf] %vm568_vm0, %v686_v52  ;;  %vm243_vm5 = vcmp.ge.f32.partialorder %v194_v49, 0.0 }
  0x22   :  { %v687_v58 = vpack.c.bf16 %v336_v55, %v336_v55  ;;  %v337_v59 = vsel %vm239_vm1, %v190_v45, %v288_v53  ;;  %v338_v60 = vsel %vm240_vm2, %v191_v46, %v289_v54  ;;  %v291_v61 = vmul.f32 0.2, %v193_v48  ;;  %v832_v45 = vld [vmem:[%s1244_s0 + $0x78] sm:$0xff]  }
  0x23   :  { %v688_v63 = vpack.c.bf16 %v337_v59, %v337_v59  ;;  %v689_v0 = vpack.c.bf16 %v338_v60, %v338_v60  ;;  %v339_v2 = vsel %vm241_vm3, %v192_v47, %v290_v56  ;;  %v292_v6 = vmul.f32 0.2, %v194_v49 }
  0x24   :  { %583 = vst.msk [vmem:[%s1247_s3 + $0x38] sm:$0xf] %vm568_vm0, %v687_v58  ;;  %v690_v4 = vpack.c.bf16 %v339_v2, %v339_v2  ;;  %v340_v5 = vsel %vm242_vm4, %v193_v48, %v291_v61  ;;  %v765_v10 = vunpack.c.h.bf16 %v827_v57  ;;  %v768_v11 = vunpack.c.l.bf16 %v828_v62 }
  0x25   :  { %584 = vst.msk [vmem:[%s1247_s3 + $0x3c] sm:$0xf] %vm568_vm0, %v688_v63  ;;  %585 = vst.msk [vmem:[%s1247_s3 + $0x40] sm:$0xf] %vm568_vm0, %v689_v0  ;;  %v691_v9 = vpack.c.bf16 %v340_v5, %v340_v5  ;;  %v769_v12 = vunpack.c.h.bf16 %v828_v62  ;;  %v341_v14 = vsel %vm243_vm5, %v194_v49, %v292_v6  ;;  %v139_v15 = vmul.f32 %v764_v8, %v867_v1  ;;  %v833_v62 = vld [vmem:[%s1244_s0 + $0x80] sm:$0xff]  }
  0x26   :  { %586 = vst.msk [vmem:[%s1247_s3 + $0x44] sm:$0xf] %vm568_vm0, %v690_v4  ;;  %v772_v16 = vunpack.c.l.bf16 %v829_v3  ;;  %v773_v17 = vunpack.c.h.bf16 %v829_v3  ;;  %v692_v18 = vpack.c.bf16 %v341_v14, %v341_v14  ;;  %v140_v19 = vmul.f32 %v765_v10, %v867_v1 }
  0x27   :  { %587 = vst.msk [vmem:[%s1247_s3 + $0x48] sm:$0xf] %vm568_vm0, %v691_v9  ;;  %v141_v20 = vmul.f32 %v768_v11, %v867_v1  ;;  %v142_v21 = vmul.f32 %v769_v12, %v867_v1  ;;  %v195_v22 = vadd.f32 %v881_v7, %v139_v15  ;;  %v776_v25 = vunpack.c.l.bf16 %v830_v13 }
  0x28   :  { %v143_v23 = vmul.f32 %v772_v16, %v867_v1  ;;  %v144_v24 = vmul.f32 %v773_v17, %v867_v1  ;;  %588 = vst.msk [vmem:[%s1247_s3 + $0x4c] sm:$0xf] %vm568_vm0, %v692_v18  ;;  %v196_v26 = vadd.f32 %v881_v7, %v140_v19  ;;  %v777_v29 = vunpack.c.h.bf16 %v830_v13  ;;  %v834_v16 = vld [vmem:[%s1244_s0 + $0x88] sm:$0xff]  }
  0x29   :  { %v197_v27 = vadd.f32 %v881_v7, %v141_v20  ;;  %v198_v28 = vadd.f32 %v881_v7, %v142_v21  ;;  %vm244_vm6 = vcmp.ge.f32.partialorder %v195_v22, 0.0  ;;  %v293_v30 = vmul.f32 0.2, %v195_v22 }
  0x2a   :  { %v199_v31 = vadd.f32 %v881_v7, %v143_v23  ;;  %v200_v32 = vadd.f32 %v881_v7, %v144_v24  ;;  %vm245_vm7 = vcmp.ge.f32.partialorder %v196_v26, 0.0  ;;  %v294_v33 = vmul.f32 0.2, %v196_v26  ;;  %v835_v24 = vld [vmem:[%s1244_s0 + $0x90] sm:$0xff]  }
  0x2b   :  { %vm246_vm8 = vcmp.ge.f32.partialorder %v197_v27, 0.0  ;;  %v295_v34 = vmul.f32 0.2, %v197_v27  ;;  %v342_v35 = vsel %vm244_vm6, %v195_v22, %v293_v30  ;;  %vm247_vm9 = vcmp.ge.f32.partialorder %v198_v28, 0.0 }
  0x2c   :  { %v296_v36 = vmul.f32 0.2, %v198_v28  ;;  %vm248_vm10 = vcmp.ge.f32.partialorder %v199_v31, 0.0  ;;  %v693_v37 = vpack.c.bf16 %v342_v35, %v342_v35  ;;  %v343_v38 = vsel %vm245_vm7, %v196_v26, %v294_v33 }
  0x2d   :  { %v344_v39 = vsel %vm246_vm8, %v197_v27, %v295_v34  ;;  %v297_v40 = vmul.f32 0.2, %v199_v31  ;;  %v694_v42 = vpack.c.bf16 %v343_v38, %v343_v38  ;;  %vm249_vm11 = vcmp.ge.f32.partialorder %v200_v32, 0.0 }
  0x2e   :  { %v695_v43 = vpack.c.bf16 %v344_v39, %v344_v39  ;;  %v345_v44 = vsel %vm247_vm9, %v198_v28, %v296_v36  ;;  %589 = vst.msk [vmem:[%s1247_s3 + $0x50] sm:$0xf] %vm568_vm0, %v693_v37  ;;  %v298_v48 = vmul.f32 0.2, %v200_v32  ;;  %v145_v49 = vmul.f32 %v776_v25, %v867_v1 }
  0x2f   :  { %v696_v46 = vpack.c.bf16 %v345_v44, %v345_v44  ;;  %v346_v47 = vsel %vm248_vm10, %v199_v31, %v297_v40  ;;  %590 = vst.msk [vmem:[%s1247_s3 + $0x54] sm:$0xf] %vm568_vm0, %v694_v42  ;;  %v146_v51 = vmul.f32 %v777_v29, %v867_v1  ;;  %v780_v52 = vunpack.c.l.bf16 %v831_v41  ;;  %v1108_v29 = vld [vmem:[%s1244_s0 + $0x98] sm:$0xff]  }
  0x30   :  { %591 = vst.msk [vmem:[%s1247_s3 + $0x58] sm:$0xf] %vm568_vm0, %v695_v43  ;;  %v697_v50 = vpack.c.bf16 %v346_v47, %v346_v47  ;;  %v781_v53 = vunpack.c.h.bf16 %v831_v41  ;;  %v347_v54 = vsel %vm249_vm11, %v200_v32, %v298_v48  ;;  %v201_v55 = vadd.f32 %v881_v7, %v145_v49 }
  0x31   :  { %592 = vst.msk [vmem:[%s1247_s3 + $0x5c] sm:$0xf] %vm568_vm0, %v696_v46  ;;  %v784_v56 = vunpack.c.l.bf16 %v832_v45  ;;  %v785_v57 = vunpack.c.h.bf16 %v832_v45  ;;  %v698_v58 = vpack.c.bf16 %v347_v54, %v347_v54  ;;  %v202_v59 = vadd.f32 %v881_v7, %v146_v51 }
  0x32   :  { %593 = vst.msk [vmem:[%s1247_s3 + $0x60] sm:$0xf] %vm568_vm0, %v697_v50  ;;  %v147_v60 = vmul.f32 %v780_v52, %v867_v1  ;;  %v148_v61 = vmul.f32 %v781_v53, %v867_v1  ;;  %vm250_vm12 = vcmp.ge.f32.partialorder %v201_v55, 0.0  ;;  %v299_v63 = vmul.f32 0.2, %v201_v55 }
  0x33   :  { %v149_v0 = vmul.f32 %v784_v56, %v867_v1  ;;  %v150_v2 = vmul.f32 %v785_v57, %v867_v1  ;;  %594 = vst.msk [vmem:[%s1247_s3 + $0x64] sm:$0xf] %vm568_vm0, %v698_v58  ;;  %vm251_vm13 = vcmp.ge.f32.partialorder %v202_v59, 0.0  ;;  %v300_v3 = vmul.f32 0.2, %v202_v59  ;;  %v837_v58 = vld [vmem:[%s1244_s0 + $0xa0] sm:$0xff]  }
  0x34   :  { %v203_v4 = vadd.f32 %v881_v7, %v147_v60  ;;  %v204_v5 = vadd.f32 %v881_v7, %v148_v61  ;;  %v348_v6 = vsel %vm250_vm12, %v201_v55, %v299_v63  ;;  %v788_v10 = vunpack.c.l.bf16 %v833_v62 }
  0x35   :  { %v205_v8 = vadd.f32 %v881_v7, %v149_v0  ;;  %v206_v9 = vadd.f32 %v881_v7, %v150_v2  ;;  %v699_v11 = vpack.c.bf16 %v348_v6, %v348_v6  ;;  %v349_v12 = vsel %vm251_vm13, %v202_v59, %v300_v3  ;;  %v839_v6 = vld [vmem:[%s1244_s0 + $0xb0] sm:$0xff]  }
  0x36   :  { %vm252_vm14 = vcmp.ge.f32.partialorder %v203_v4, 0.0  ;;  %v301_v13 = vmul.f32 0.2, %v203_v4  ;;  %v700_v14 = vpack.c.bf16 %v349_v12, %v349_v12  ;;  %vm253_vm15 = vcmp.ge.f32.partialorder %v204_v5, 0.0  ;;  %v840_v12 = vld [vmem:[%s1244_s0 + $0xb8] sm:$0xff]  }
  0x37   :  { %v302_v15 = vmul.f32 0.2, %v204_v5  ;;  %vm254_vm1 = vcmp.ge.f32.partialorder %v205_v8, 0.0  ;;  %595 = vst.msk [vmem:[%s1247_s3 + $0x68] sm:$0xf] %vm568_vm0, %v699_v11  ;;  %vm255_vm2 = vcmp.ge.f32.partialorder %v206_v9, 0.0  ;;  %v151_v22 = vmul.f32 %v788_v10, %v867_v1 }
  0x38   :  { %v350_v17 = vsel %vm252_vm14, %v203_v4, %v301_v13  ;;  %v303_v18 = vmul.f32 0.2, %v205_v8  ;;  %v304_v19 = vmul.f32 0.2, %v206_v9  ;;  %596 = vst.msk [vmem:[%s1247_s3 + $0x6c] sm:$0xf] %vm568_vm0, %v700_v14  ;;  %v789_v23 = vunpack.c.h.bf16 %v833_v62 }
  0x39   :  { %v701_v20 = vpack.c.bf16 %v350_v17, %v350_v17  ;;  %v351_v21 = vsel %vm253_vm15, %v204_v5, %v302_v15  ;;  %v792_v28 = vunpack.c.l.bf16 %v834_v16  ;;  %v207_v32 = vadd.f32 %v881_v7, %v151_v22  ;;  %v838_v5 = vld [vmem:[%s1244_s0 + $0xa8] sm:$0xff]  }
  0x3a   :  { %v702_v25 = vpack.c.bf16 %v351_v21, %v351_v21  ;;  %v352_v26 = vsel %vm254_vm1, %v205_v8, %v303_v18  ;;  %v353_v27 = vsel %vm255_vm2, %v206_v9, %v304_v19  ;;  %v152_v33 = vmul.f32 %v789_v23, %v867_v1 }
  0x3b   :  { %597 = vst.msk [vmem:[%s1247_s3 + $0x70] sm:$0xf] %vm568_vm0, %v701_v20  ;;  %v703_v30 = vpack.c.bf16 %v352_v26, %v352_v26  ;;  %v704_v31 = vpack.c.bf16 %v353_v27, %v353_v27  ;;  %v153_v34 = vmul.f32 %v792_v28, %v867_v1  ;;  %v793_v35 = vunpack.c.h.bf16 %v834_v16 }
  0x3c   :  { %598 = vst.msk [vmem:[%s1247_s3 + $0x74] sm:$0xf] %vm568_vm0, %v702_v25  ;;  %v796_v36 = vunpack.c.l.bf16 %v835_v24  ;;  %v797_v37 = vunpack.c.h.bf16 %v835_v24  ;;  %vm256_vm3 = vcmp.ge.f32.partialorder %v207_v32, 0.0  ;;  %v305_v38 = vmul.f32 0.2, %v207_v32 }
  0x3d   :  { %599 = vst.msk [vmem:[%s1247_s3 + $0x78] sm:$0xf] %vm568_vm0, %v703_v30  ;;  %600 = vst.msk [vmem:[%s1247_s3 + $0x7c] sm:$0xf] %vm568_vm0, %v704_v31  ;;  %v208_v39 = vadd.f32 %v881_v7, %v152_v33  ;;  %v800_v40 = vunpack.c.l.bf16 %v1108_v29  ;;  %v209_v41 = vadd.f32 %v881_v7, %v153_v34  ;;  %v154_v42 = vmul.f32 %v793_v35, %v867_v1 }
  0x3e   :  { %v155_v43 = vmul.f32 %v796_v36, %v867_v1  ;;  %v156_v44 = vmul.f32 %v797_v37, %v867_v1  ;;  %v354_v45 = vsel %vm256_vm3, %v207_v32, %v305_v38  ;;  %v801_v3 = vunpack.c.h.bf16 %v1108_v29 }
  0x3f   :  { %vm257_vm4 = vcmp.ge.f32.partialorder %v208_v39, 0.0  ;;  %v306_v46 = vmul.f32 0.2, %v208_v39  ;;  %v157_v47 = vmul.f32 %v800_v40, %v867_v1  ;;  %v705_v48 = vpack.c.bf16 %v354_v45, %v354_v45 }
  0x40   :  { %vm258_vm5 = vcmp.ge.f32.partialorder %v209_v41, 0.0  ;;  %v307_v49 = vmul.f32 0.2, %v209_v41  ;;  %v210_v50 = vadd.f32 %v881_v7, %v154_v42  ;;  %v211_v52 = vadd.f32 %v881_v7, %v155_v43 }
  0x41   :  { %v355_v51 = vsel %vm257_vm4, %v208_v39, %v306_v46  ;;  %v212_v53 = vadd.f32 %v881_v7, %v156_v44  ;;  %v213_v54 = vadd.f32 %v881_v7, %v157_v47  ;;  %601 = vst.msk [vmem:[%s1247_s3 + $0x80] sm:$0xf] %vm568_vm0, %v705_v48  ;;  %v804_v4 = vunpack.c.l.bf16 %v837_v58 }
  0x42   :  { %v706_v55 = vpack.c.bf16 %v355_v51, %v355_v51  ;;  %v356_v56 = vsel %vm258_vm5, %v209_v41, %v307_v49  ;;  %vm259_vm6 = vcmp.ge.f32.partialorder %v210_v50, 0.0  ;;  %v308_v57 = vmul.f32 0.2, %v210_v50  ;;  %v62_v41 = vld [vmem:[%s1244_s0 + $0xc0] sm:$0xf] }
  0x43   :  { %v707_v59 = vpack.c.bf16 %v356_v56, %v356_v56  ;;  %vm260_vm7 = vcmp.ge.f32.partialorder %v211_v52, 0.0  ;;  %v309_v60 = vmul.f32 0.2, %v211_v52  ;;  %vm261_vm8 = vcmp.ge.f32.partialorder %v212_v53, 0.0 }
  0x44   :  { %602 = vst.msk [vmem:[%s1247_s3 + $0x84] sm:$0xf] %vm568_vm0, %v706_v55  ;;  %v357_v61 = vsel %vm259_vm6, %v210_v50, %v308_v57  ;;  %v310_v62 = vmul.f32 0.2, %v212_v53  ;;  %vm262_vm9 = vcmp.ge.f32.partialorder %v213_v54, 0.0  ;;  %v805_v11 = vunpack.c.h.bf16 %v837_v58 }
  0x45   :  { %v311_v63 = vmul.f32 0.2, %v213_v54  ;;  %603 = vst.msk [vmem:[%s1247_s3 + $0x88] sm:$0xf] %vm568_vm0, %v707_v59  ;;  %v708_v0 = vpack.c.bf16 %v357_v61, %v357_v61  ;;  %v358_v2 = vsel %vm260_vm7, %v211_v52, %v309_v60  ;;  %v158_v15 = vmul.f32 %v801_v3, %v867_v1 }
  0x46   :  { %v709_v8 = vpack.c.bf16 %v358_v2, %v358_v2  ;;  %v359_v9 = vsel %vm261_vm8, %v212_v53, %v310_v62  ;;  %v159_v16 = vmul.f32 %v804_v4, %v867_v1  ;;  %v160_v17 = vmul.f32 %v805_v11, %v867_v1 }
  0x47   :  { %v360_v10 = vsel %vm262_vm9, %v213_v54, %v311_v63  ;;  %604 = vst.msk [vmem:[%s1247_s3 + $0x8c] sm:$0xf] %vm568_vm0, %v708_v0  ;;  %v710_v13 = vpack.c.bf16 %v359_v9, %v359_v9  ;;  %v808_v18 = vunpack.c.l.bf16 %v838_v5  ;;  %v809_v19 = vunpack.c.h.bf16 %v838_v5 }
  0x48   :  { %v711_v14 = vpack.c.bf16 %v360_v10, %v360_v10  ;;  %605 = vst.msk [vmem:[%s1247_s3 + $0x90] sm:$0xf] %vm568_vm0, %v709_v8  ;;  %v812_v20 = vunpack.c.l.bf16 %v839_v6  ;;  %v214_v21 = vadd.f32 %v881_v7, %v158_v15  ;;  %v215_v22 = vadd.f32 %v881_v7, %v159_v16 }
  0x49   :  { %606 = vst.msk [vmem:[%s1247_s3 + $0x94] sm:$0xf] %vm568_vm0, %v710_v13  ;;  %v813_v23 = vunpack.c.h.bf16 %v839_v6  ;;  %v816_v24 = vunpack.c.l.bf16 %v840_v12  ;;  %v216_v25 = vadd.f32 %v881_v7, %v160_v17  ;;  %v161_v26 = vmul.f32 %v808_v18, %v867_v1 }
  0x4a   :  { %607 = vst.msk [vmem:[%s1247_s3 + $0x98] sm:$0xf] %vm568_vm0, %v711_v14  ;;  %v162_v27 = vmul.f32 %v809_v19, %v867_v1  ;;  %v163_v28 = vmul.f32 %v812_v20, %v867_v1  ;;  %vm263_vm10 = vcmp.ge.f32.partialorder %v214_v21, 0.0  ;;  %v312_v29 = vmul.f32 0.2, %v214_v21 }
  0x4b   :  { %vm264_vm11 = vcmp.ge.f32.partialorder %v215_v22, 0.0  ;;  %v313_v30 = vmul.f32 0.2, %v215_v22  ;;  %vm265_vm12 = vcmp.ge.f32.partialorder %v216_v25, 0.0  ;;  %v314_v31 = vmul.f32 0.2, %v216_v25 }
  0x4c   :  { %v217_v32 = vadd.f32 %v881_v7, %v161_v26  ;;  %v218_v33 = vadd.f32 %v881_v7, %v162_v27  ;;  %v361_v34 = vsel %vm263_vm10, %v214_v21, %v312_v29  ;;  %v219_v36 = vadd.f32 %v881_v7, %v163_v28 }
  0x4d   :  { %v362_v35 = vsel %vm264_vm11, %v215_v22, %v313_v30  ;;  %v164_v37 = vmul.f32 %v813_v23, %v867_v1  ;;  %v712_v38 = vpack.c.bf16 %v361_v34, %v361_v34  ;;  %v363_v40 = vsel %vm265_vm12, %v216_v25, %v314_v31 }
  0x4e   :  { %v713_v39 = vpack.c.bf16 %v362_v35, %v362_v35  ;;  %vm266_vm13 = vcmp.ge.f32.partialorder %v217_v32, 0.0  ;;  %v714_v42 = vpack.c.bf16 %v363_v40, %v363_v40  ;;  %v315_v43 = vmul.f32 0.2, %v217_v32 }
  0x4f   :  { %vm267_vm14 = vcmp.ge.f32.partialorder %v218_v33, 0.0  ;;  %v316_v44 = vmul.f32 0.2, %v218_v33  ;;  %608 = vst.msk [vmem:[%s1247_s3 + $0x9c] sm:$0xf] %vm568_vm0, %v712_v38  ;;  %vm268_vm15 = vcmp.ge.f32.partialorder %v219_v36, 0.0  ;;  %v220_v46 = vadd.f32 %v881_v7, %v164_v37 }
  0x50   :  { %609 = vst.msk [vmem:[%s1247_s3 + $0xa0] sm:$0xf] %vm568_vm0, %v713_v39  ;;  %v317_v45 = vmul.f32 0.2, %v219_v36  ;;  %v165_v47 = vmul.f32 %v816_v24, %v867_v1  ;;  %610 = vst.msk [vmem:[%s1247_s3 + $0xa4] sm:$0xf] %vm568_vm0, %v714_v42  ;;  %v364_v48 = vsel %vm266_vm13, %v217_v32, %v315_v43  ;;  %v817_v50 = vunpack.c.h.bf16 %v840_v12 }
  0x51   :  { %v365_v49 = vsel %vm267_vm14, %v218_v33, %v316_v44  ;;  %v111_v51 = vunpack.c.l.bf16 %v62_v41  ;;  %v715_v52 = vpack.c.bf16 %v364_v48, %v364_v48  ;;  %vm269_vm1 = vcmp.ge.f32.partialorder %v220_v46, 0.0 }
  0x52   :  { %v716_v53 = vpack.c.bf16 %v365_v49, %v365_v49  ;;  %v366_v54 = vsel %vm268_vm15, %v219_v36, %v317_v45  ;;  %v318_v56 = vmul.f32 0.2, %v220_v46  ;;  %v221_v57 = vadd.f32 %v881_v7, %v165_v47 }
  0x53   :  { %v717_v55 = vpack.c.bf16 %v366_v54, %v366_v54  ;;  %v166_v58 = vmul.f32 %v817_v50, %v867_v1  ;;  %611 = vst.msk [vmem:[%s1247_s3 + $0xa8] sm:$0xf] %vm568_vm0, %v715_v52  ;;  %v167_v59 = vmul.f32 %v867_v1, %v111_v51 }
  0x54   :  { %612 = vst.msk [vmem:[%s1247_s3 + $0xac] sm:$0xf] %vm568_vm0, %v716_v53  ;;  %v367_v60 = vsel %vm269_vm1, %v220_v46, %v318_v56  ;;  %vm270_vm2 = vcmp.ge.f32.partialorder %v221_v57, 0.0  ;;  %v319_v61 = vmul.f32 0.2, %v221_v57 }
  0x55   :  { %613 = vst.msk [vmem:[%s1247_s3 + $0xb0] sm:$0xf] %vm568_vm0, %v717_v55  ;;  %v222_v62 = vadd.f32 %v881_v7, %v166_v58  ;;  %v718_v63 = vpack.c.bf16 %v367_v60, %v367_v60  ;;  %v223_v0 = vadd.f32 %v881_v7, %v167_v59 }
  0x56   :  { %v368_v2 = vsel %vm270_vm2, %v221_v57, %v319_v61 }
  0x57   :  { %vm271_vm3 = vcmp.ge.f32.partialorder %v222_v62, 0.0  ;;  %v320_v3 = vmul.f32 0.2, %v222_v62  ;;  %614 = vst.msk [vmem:[%s1247_s3 + $0xb4] sm:$0xf] %vm568_vm0, %v718_v63  ;;  %v719_v1 = vpack.c.bf16 %v368_v2, %v368_v2  ;;  %vm272_vm4 = vcmp.ge.f32.partialorder %v223_v0, 0.0 }
  0x58   :  { %v321_v4 = vmul.f32 0.2, %v223_v0 }
  0x59   :  { %v369_v5 = vsel %vm271_vm3, %v222_v62, %v320_v3  ;;  %615 = vst.msk [vmem:[%s1247_s3 + $0xb8] sm:$0xf] %vm568_vm0, %v719_v1 }
  0x5a   :  { %v720_v6 = vpack.c.bf16 %v369_v5, %v369_v5  ;;  %v370_v8 = vsel %vm272_vm4, %v223_v0, %v321_v4 }
  0x5b   :  { %v721_v7 = vpack.c.bf16 %v370_v8, %v370_v8 }
  0x5c   :  { %616 = vst.msk [vmem:[%s1247_s3 + $0xbc] sm:$0xf] %vm568_vm0, %v720_v6 }
  0x5d   :  { %617 = vst.msk [vmem:[%s1247_s3 + $0xc0] sm:$0xf] %vm568_vm0, %v721_v7 }

// kernel: discriminator_forward.12
= control target key start
LH: loop header
LB: loop body
LE: loop exit
PB: predicated region body
PF: predicated region fallthrough
CT: control target
= control target key end

     0   :  { %s1262_s0 = inlined_call_operand.vmem [shape: bf16[392,128], index: 0, kind: input, shape index: {}]   ;;  %s1263_s1 = inlined_call_operand.vmem [shape: f32[1,128], index: 1, kind: input, shape index: {}]   ;;  %s1264_s2 = inlined_call_operand.vmem [shape: f32[1,128], index: 2, kind: input, shape index: {}]   ;;  %s1265_s3 = inlined_call_operand.vmem [shape: bf16[392,128], index: 3, kind: output, shape index: {}]  }
   0x1   :  { %v722_v0 = vld [vmem:[%s1262_s0] sm:$0xff]   ;;  %v937_v4 = vld [vmem:[%s1262_s0 + $0x8] sm:$0xff]   ;;  %v938_v5 = vld [vmem:[%s1262_s0 + $0x10] sm:$0xff]  }
   0x2   :  { %v1009_v1 = vld [vmem:[%s1263_s1] ss:$0 sm:$0xff]  ;;  %v723_v2 = vunpack.c.l.bf16 %v722_v0  ;;  %v724_v3 = vunpack.c.h.bf16 %v722_v0  ;;  %v939_v6 = vld [vmem:[%s1262_s0 + $0x18] sm:$0xff]   ;;  %v727_v8 = vunpack.c.l.bf16 %v937_v4  ;;  %v728_v9 = vunpack.c.h.bf16 %v937_v4  ;;  %v941_v35 = vld [vmem:[%s1262_s0 + $0x28] sm:$0xff]  }
   0x3   :  { %v1023_v7 = vld [vmem:[%s1264_s2] ss:$0 sm:$0xff]  ;;  %v731_v10 = vunpack.c.l.bf16 %v938_v5  ;;  %v732_v11 = vunpack.c.h.bf16 %v938_v5  ;;  %v735_v14 = vunpack.c.l.bf16 %v939_v6  ;;  %v736_v15 = vunpack.c.h.bf16 %v939_v6  ;;  %v942_v48 = vld [vmem:[%s1262_s0 + $0x30] sm:$0xff]   ;;  %v943_v4 = vld [vmem:[%s1262_s0 + $0x38] sm:$0xff]  }
   0x4   :  { %v119_v12 = vmul.f32 %v723_v2, %v1009_v1  ;;  %v120_v13 = vmul.f32 %v724_v3, %v1009_v1  ;;  %v121_v16 = vmul.f32 %v727_v8, %v1009_v1  ;;  %v122_v17 = vmul.f32 %v728_v9, %v1009_v1  ;;  %v940_v34 = vld [vmem:[%s1262_s0 + $0x20] sm:$0xff]  }
   0x5   :  { %v123_v18 = vmul.f32 %v731_v10, %v1009_v1  ;;  %v124_v19 = vmul.f32 %v732_v11, %v1009_v1  ;;  %v125_v22 = vmul.f32 %v735_v14, %v1009_v1  ;;  %v126_v23 = vmul.f32 %v736_v15, %v1009_v1  ;;  %v944_v15 = vld [vmem:[%s1262_s0 + $0x40] sm:$0xff]  }
   0x6   :  { %v175_v20 = vadd.f32 %v1023_v7, %v119_v12  ;;  %v176_v21 = vadd.f32 %v1023_v7, %v120_v13  ;;  %v177_v24 = vadd.f32 %v1023_v7, %v121_v16  ;;  %v178_v25 = vadd.f32 %v1023_v7, %v122_v17 }
   0x7   :  { %v179_v26 = vadd.f32 %v1023_v7, %v123_v18  ;;  %v180_v27 = vadd.f32 %v1023_v7, %v124_v19  ;;  %v181_v42 = vadd.f32 %v1023_v7, %v125_v22  ;;  %v182_v43 = vadd.f32 %v1023_v7, %v126_v23 }
   0x8   :  { %vm224_vm0 = vcmp.ge.f32.partialorder %v175_v20, 0.0  ;;  %vm225_vm1 = vcmp.ge.f32.partialorder %v176_v21, 0.0  ;;  %v273_v28 = vmul.f32 0.2, %v175_v20  ;;  %v274_v29 = vmul.f32 0.2, %v176_v21 }
   0x9   :  { %vm226_vm2 = vcmp.ge.f32.partialorder %v177_v24, 0.0  ;;  %vm227_vm3 = vcmp.ge.f32.partialorder %v178_v25, 0.0  ;;  %v275_v30 = vmul.f32 0.2, %v177_v24  ;;  %v276_v31 = vmul.f32 0.2, %v178_v25 }
   0xa   :  { %v322_v32 = vsel %vm224_vm0, %v175_v20, %v273_v28  ;;  %v323_v33 = vsel %vm225_vm1, %v176_v21, %v274_v29  ;;  %vm228_vm4 = vcmp.ge.f32.partialorder %v179_v26, 0.0  ;;  %vm229_vm5 = vcmp.ge.f32.partialorder %v180_v27, 0.0 }
   0xb   :  { %v820_v36 = vpack.c.bf16 %v323_v33, %v322_v32  ;;  %v324_v37 = vsel %vm226_vm2, %v177_v24, %v275_v30  ;;  %v325_v38 = vsel %vm227_vm3, %v178_v25, %v276_v31  ;;  %v277_v39 = vmul.f32 0.2, %v179_v26 }
   0xc   :  { %v825_v40 = vpack.c.bf16 %v325_v38, %v324_v37  ;;  %v278_v41 = vmul.f32 0.2, %v180_v27  ;;  %v739_v45 = vunpack.c.l.bf16 %v940_v34  ;;  %v740_v46 = vunpack.c.h.bf16 %v940_v34 }
   0xd   :  { %821 = vst [vmem:[%s1265_s3] sm:$0xff] %v820_v36   ;;  %v326_v44 = vsel %vm228_vm4, %v179_v26, %v277_v39  ;;  %v743_v47 = vunpack.c.l.bf16 %v941_v35  ;;  %vm230_vm6 = vcmp.ge.f32.partialorder %v181_v42, 0.0  ;;  %vm231_vm7 = vcmp.ge.f32.partialorder %v182_v43, 0.0  ;;  %v945_v26 = vld [vmem:[%s1262_s0 + $0x48] sm:$0xff]  }
   0xe   :  { %960 = vst [vmem:[%s1265_s3 + $0x8] sm:$0xff] %v825_v40   ;;  %v327_v49 = vsel %vm229_vm5, %v180_v27, %v278_v41  ;;  %v279_v50 = vmul.f32 0.2, %v181_v42  ;;  %v280_v52 = vmul.f32 0.2, %v182_v43  ;;  %v127_v53 = vmul.f32 %v739_v45, %v1009_v1  ;;  %v946_v27 = vld [vmem:[%s1262_s0 + $0x50] sm:$0xff]  }
   0xf   :  { %v830_v51 = vpack.c.bf16 %v327_v49, %v326_v44  ;;  %v128_v54 = vmul.f32 %v740_v46, %v1009_v1  ;;  %v744_v56 = vunpack.c.h.bf16 %v941_v35  ;;  %v129_v57 = vmul.f32 %v743_v47, %v1009_v1 }
  0x10   :  { %v328_v55 = vsel %vm230_vm6, %v181_v42, %v279_v50  ;;  %v747_v58 = vunpack.c.l.bf16 %v942_v48  ;;  %v329_v59 = vsel %vm231_vm7, %v182_v43, %v280_v52  ;;  %v183_v60 = vadd.f32 %v1023_v7, %v127_v53 }
  0x11   :  { %961 = vst [vmem:[%s1265_s3 + $0x10] sm:$0xff] %v830_v51   ;;  %v184_v61 = vadd.f32 %v1023_v7, %v128_v54  ;;  %v748_v62 = vunpack.c.h.bf16 %v942_v48  ;;  %v835_v63 = vpack.c.bf16 %v329_v59, %v328_v55  ;;  %v130_v0 = vmul.f32 %v744_v56, %v1009_v1  ;;  %v947_v55 = vld [vmem:[%s1262_s0 + $0x58] sm:$0xff]  }
  0x12   :  { %v185_v2 = vadd.f32 %v1023_v7, %v129_v57  ;;  %v131_v3 = vmul.f32 %v747_v58, %v1009_v1  ;;  %vm232_vm8 = vcmp.ge.f32.partialorder %v183_v60, 0.0  ;;  %v281_v5 = vmul.f32 0.2, %v183_v60 }
  0x13   :  { %vm233_vm9 = vcmp.ge.f32.partialorder %v184_v61, 0.0  ;;  %v282_v6 = vmul.f32 0.2, %v184_v61  ;;  %962 = vst [vmem:[%s1265_s3 + $0x18] sm:$0xff] %v835_v63   ;;  %v186_v8 = vadd.f32 %v1023_v7, %v130_v0  ;;  %v132_v10 = vmul.f32 %v748_v62, %v1009_v1 }
  0x14   :  { %vm234_vm10 = vcmp.ge.f32.partialorder %v185_v2, 0.0  ;;  %v283_v9 = vmul.f32 0.2, %v185_v2  ;;  %v330_v11 = vsel %vm232_vm8, %v183_v60, %v281_v5  ;;  %v187_v13 = vadd.f32 %v1023_v7, %v131_v3  ;;  %v948_v60 = vld [vmem:[%s1262_s0 + $0x60] sm:$0xff]  }
  0x15   :  { %v331_v12 = vsel %vm233_vm9, %v184_v61, %v282_v6  ;;  %v751_v14 = vunpack.c.l.bf16 %v943_v4  ;;  %vm235_vm11 = vcmp.ge.f32.partialorder %v186_v8, 0.0  ;;  %v284_v17 = vmul.f32 0.2, %v186_v8 }
  0x16   :  { %v840_v16 = vpack.c.bf16 %v331_v12, %v330_v11  ;;  %v332_v18 = vsel %vm234_vm10, %v185_v2, %v283_v9  ;;  %v188_v19 = vadd.f32 %v1023_v7, %v132_v10  ;;  %vm236_vm12 = vcmp.ge.f32.partialorder %v187_v13, 0.0  ;;  %v949_v9 = vld [vmem:[%s1262_s0 + $0x68] sm:$0xff]  }
  0x17   :  { %v285_v20 = vmul.f32 0.2, %v187_v13  ;;  %v752_v21 = vunpack.c.h.bf16 %v943_v4  ;;  %v333_v22 = vsel %vm235_vm11, %v186_v8, %v284_v17  ;;  %v133_v23 = vmul.f32 %v751_v14, %v1009_v1 }
  0x18   :  { %963 = vst [vmem:[%s1265_s3 + $0x20] sm:$0xff] %v840_v16   ;;  %v755_v24 = vunpack.c.l.bf16 %v944_v15  ;;  %v756_v25 = vunpack.c.h.bf16 %v944_v15  ;;  %v845_v28 = vpack.c.bf16 %v333_v22, %v332_v18  ;;  %vm237_vm13 = vcmp.ge.f32.partialorder %v188_v19, 0.0 }
  0x19   :  { %v286_v29 = vmul.f32 0.2, %v188_v19  ;;  %v334_v30 = vsel %vm236_vm12, %v187_v13, %v285_v20  ;;  %v134_v31 = vmul.f32 %v752_v21, %v1009_v1  ;;  %v189_v32 = vadd.f32 %v1023_v7, %v133_v23 }
  0x1a   :  { %v135_v33 = vmul.f32 %v755_v24, %v1009_v1  ;;  %v136_v34 = vmul.f32 %v756_v25, %v1009_v1  ;;  %964 = vst [vmem:[%s1265_s3 + $0x28] sm:$0xff] %v845_v28   ;;  %v759_v36 = vunpack.c.l.bf16 %v945_v26  ;;  %v760_v37 = vunpack.c.h.bf16 %v945_v26  ;;  %v950_v28 = vld [vmem:[%s1262_s0 + $0x70] sm:$0xff]  }
  0x1b   :  { %v335_v35 = vsel %vm237_vm13, %v188_v19, %v286_v29  ;;  %v763_v38 = vunpack.c.l.bf16 %v946_v27  ;;  %v190_v40 = vadd.f32 %v1023_v7, %v134_v31  ;;  %vm238_vm14 = vcmp.ge.f32.partialorder %v189_v32, 0.0 }
  0x1c   :  { %v850_v39 = vpack.c.bf16 %v335_v35, %v334_v30  ;;  %v287_v41 = vmul.f32 0.2, %v189_v32  ;;  %v191_v42 = vadd.f32 %v1023_v7, %v135_v33  ;;  %v192_v43 = vadd.f32 %v1023_v7, %v136_v34 }
  0x1d   :  { %v137_v44 = vmul.f32 %v759_v36, %v1009_v1  ;;  %v138_v45 = vmul.f32 %v760_v37, %v1009_v1  ;;  %vm239_vm15 = vcmp.ge.f32.partialorder %v190_v40, 0.0  ;;  %v288_v46 = vmul.f32 0.2, %v190_v40  ;;  %v951_v37 = vld [vmem:[%s1262_s0 + $0x78] sm:$0xff]  }
  0x1e   :  { %965 = vst [vmem:[%s1265_s3 + $0x30] sm:$0xff] %v850_v39   ;;  %v336_v47 = vsel %vm238_vm14, %v189_v32, %v287_v41  ;;  %v764_v48 = vunpack.c.h.bf16 %v946_v27  ;;  %vm240_vm0 = vcmp.ge.f32.partialorder %v191_v42, 0.0  ;;  %vm241_vm1 = vcmp.ge.f32.partialorder %v192_v43, 0.0 }
  0x1f   :  { %v289_v49 = vmul.f32 0.2, %v191_v42  ;;  %v290_v50 = vmul.f32 0.2, %v192_v43  ;;  %v337_v51 = vsel %vm239_vm15, %v190_v40, %v288_v46  ;;  %v193_v52 = vadd.f32 %v1023_v7, %v137_v44 }
  0x20   :  { %v194_v53 = vadd.f32 %v1023_v7, %v138_v45  ;;  %v139_v54 = vmul.f32 %v763_v38, %v1009_v1  ;;  %v855_v56 = vpack.c.bf16 %v337_v51, %v336_v47  ;;  %v140_v59 = vmul.f32 %v764_v48, %v1009_v1 }
  0x21   :  { %v338_v57 = vsel %vm240_vm0, %v191_v42, %v289_v49  ;;  %v339_v58 = vsel %vm241_vm1, %v192_v43, %v290_v50  ;;  %vm242_vm2 = vcmp.ge.f32.partialorder %v193_v52, 0.0  ;;  %v291_v62 = vmul.f32 0.2, %v193_v52  ;;  %v952_v42 = vld [vmem:[%s1262_s0 + $0x80] sm:$0xff]   ;;  %v953_v50 = vld [vmem:[%s1262_s0 + $0x88] sm:$0xff]  }
  0x22   :  { %v860_v61 = vpack.c.bf16 %v339_v58, %v338_v57  ;;  %vm243_vm3 = vcmp.ge.f32.partialorder %v194_v53, 0.0  ;;  %966 = vst [vmem:[%s1265_s3 + $0x38] sm:$0xff] %v855_v56   ;;  %v292_v63 = vmul.f32 0.2, %v194_v53  ;;  %v195_v0 = vadd.f32 %v1023_v7, %v139_v54 }
  0x23   :  { %v196_v2 = vadd.f32 %v1023_v7, %v140_v59  ;;  %v767_v3 = vunpack.c.l.bf16 %v947_v55  ;;  %v340_v4 = vsel %vm242_vm2, %v193_v52, %v291_v62  ;;  %v768_v5 = vunpack.c.h.bf16 %v947_v55 }
  0x24   :  { %967 = vst [vmem:[%s1265_s3 + $0x40] sm:$0xff] %v860_v61   ;;  %v771_v6 = vunpack.c.l.bf16 %v948_v60  ;;  %v772_v8 = vunpack.c.h.bf16 %v948_v60  ;;  %v341_v10 = vsel %vm243_vm3, %v194_v53, %v292_v63  ;;  %vm244_vm4 = vcmp.ge.f32.partialorder %v195_v0, 0.0 }
  0x25   :  { %vm245_vm5 = vcmp.ge.f32.partialorder %v196_v2, 0.0  ;;  %v293_v11 = vmul.f32 0.2, %v195_v0  ;;  %v865_v12 = vpack.c.bf16 %v341_v10, %v340_v4  ;;  %v294_v13 = vmul.f32 0.2, %v196_v2 }
  0x26   :  { %v141_v14 = vmul.f32 %v767_v3, %v1009_v1  ;;  %v142_v15 = vmul.f32 %v768_v5, %v1009_v1  ;;  %v143_v17 = vmul.f32 %v771_v6, %v1009_v1  ;;  %v144_v18 = vmul.f32 %v772_v8, %v1009_v1 }
  0x27   :  { %v342_v16 = vsel %vm244_vm4, %v195_v0, %v293_v11  ;;  %v775_v19 = vunpack.c.l.bf16 %v949_v9  ;;  %968 = vst [vmem:[%s1265_s3 + $0x48] sm:$0xff] %v865_v12   ;;  %v343_v20 = vsel %vm245_vm5, %v196_v2, %v294_v13  ;;  %v776_v23 = vunpack.c.h.bf16 %v949_v9 }
  0x28   :  { %v197_v21 = vadd.f32 %v1023_v7, %v141_v14  ;;  %v198_v22 = vadd.f32 %v1023_v7, %v142_v15  ;;  %v870_v24 = vpack.c.bf16 %v343_v20, %v342_v16  ;;  %v199_v25 = vadd.f32 %v1023_v7, %v143_v17  ;;  %v954_v15 = vld [vmem:[%s1262_s0 + $0x90] sm:$0xff]   ;;  %v955_v20 = vld [vmem:[%s1262_s0 + $0x98] sm:$0xff]  }
  0x29   :  { %v200_v26 = vadd.f32 %v1023_v7, %v144_v18  ;;  %v145_v27 = vmul.f32 %v775_v19, %v1009_v1  ;;  %v146_v35 = vmul.f32 %v776_v23, %v1009_v1  ;;  %v779_v41 = vunpack.c.l.bf16 %v950_v28 }
  0x2a   :  { %vm246_vm6 = vcmp.ge.f32.partialorder %v197_v21, 0.0  ;;  %vm247_vm7 = vcmp.ge.f32.partialorder %v198_v22, 0.0  ;;  %v295_v29 = vmul.f32 0.2, %v197_v21  ;;  %v296_v30 = vmul.f32 0.2, %v198_v22 }
  0x2b   :  { %969 = vst [vmem:[%s1265_s3 + $0x50] sm:$0xff] %v870_v24   ;;  %vm248_vm8 = vcmp.ge.f32.partialorder %v199_v25, 0.0  ;;  %vm249_vm9 = vcmp.ge.f32.partialorder %v200_v26, 0.0  ;;  %v297_v31 = vmul.f32 0.2, %v199_v25  ;;  %v201_v36 = vadd.f32 %v1023_v7, %v145_v27 }
  0x2c   :  { %v298_v32 = vmul.f32 0.2, %v200_v26  ;;  %v344_v33 = vsel %vm246_vm6, %v197_v21, %v295_v29  ;;  %v345_v34 = vsel %vm247_vm7, %v198_v22, %v296_v30  ;;  %v202_v44 = vadd.f32 %v1023_v7, %v146_v35  ;;  %v956_v21 = vld [vmem:[%s1262_s0 + $0xa0] sm:$0xff]  }
  0x2d   :  { %v875_v38 = vpack.c.bf16 %v345_v34, %v344_v33  ;;  %v346_v39 = vsel %vm248_vm8, %v199_v25, %v297_v31  ;;  %vm250_vm10 = vcmp.ge.f32.partialorder %v201_v36, 0.0  ;;  %v299_v45 = vmul.f32 0.2, %v201_v36 }
  0x2e   :  { %v347_v40 = vsel %vm249_vm9, %v200_v26, %v298_v32  ;;  %v780_v46 = vunpack.c.h.bf16 %v950_v28  ;;  %v147_v47 = vmul.f32 %v779_v41, %v1009_v1  ;;  %v783_v48 = vunpack.c.l.bf16 %v951_v37 }
  0x2f   :  { %v880_v43 = vpack.c.bf16 %v347_v40, %v346_v39  ;;  %970 = vst [vmem:[%s1265_s3 + $0x58] sm:$0xff] %v875_v38   ;;  %v784_v49 = vunpack.c.h.bf16 %v951_v37  ;;  %vm251_vm11 = vcmp.ge.f32.partialorder %v202_v44, 0.0  ;;  %v300_v51 = vmul.f32 0.2, %v202_v44  ;;  %v957_v40 = vld [vmem:[%s1262_s0 + $0xa8] sm:$0xff]  }
  0x30   :  { %v348_v52 = vsel %vm250_vm10, %v201_v36, %v299_v45  ;;  %v787_v53 = vunpack.c.l.bf16 %v952_v42  ;;  %v148_v54 = vmul.f32 %v780_v46, %v1009_v1  ;;  %v203_v55 = vadd.f32 %v1023_v7, %v147_v47 }
  0x31   :  { %971 = vst [vmem:[%s1265_s3 + $0x60] sm:$0xff] %v880_v43   ;;  %v149_v56 = vmul.f32 %v783_v48, %v1009_v1  ;;  %v150_v57 = vmul.f32 %v784_v49, %v1009_v1  ;;  %v349_v58 = vsel %vm251_vm11, %v202_v44, %v300_v51  ;;  %v788_v59 = vunpack.c.h.bf16 %v952_v42 }
  0x32   :  { %v151_v60 = vmul.f32 %v787_v53, %v1009_v1  ;;  %v791_v61 = vunpack.c.l.bf16 %v953_v50  ;;  %v885_v62 = vpack.c.bf16 %v349_v58, %v348_v52  ;;  %v204_v63 = vadd.f32 %v1023_v7, %v148_v54 }
  0x33   :  { %vm252_vm12 = vcmp.ge.f32.partialorder %v203_v55, 0.0  ;;  %v301_v0 = vmul.f32 0.2, %v203_v55  ;;  %v205_v2 = vadd.f32 %v1023_v7, %v149_v56  ;;  %v206_v3 = vadd.f32 %v1023_v7, %v150_v57 }
  0x34   :  { %v152_v4 = vmul.f32 %v788_v59, %v1009_v1  ;;  %v207_v5 = vadd.f32 %v1023_v7, %v151_v60  ;;  %972 = vst [vmem:[%s1265_s3 + $0x68] sm:$0xff] %v885_v62   ;;  %vm253_vm13 = vcmp.ge.f32.partialorder %v204_v63, 0.0  ;;  %v302_v6 = vmul.f32 0.2, %v204_v63 }
  0x35   :  { %v350_v8 = vsel %vm252_vm12, %v203_v55, %v301_v0  ;;  %v792_v9 = vunpack.c.h.bf16 %v953_v50  ;;  %vm254_vm14 = vcmp.ge.f32.partialorder %v205_v2, 0.0  ;;  %vm255_vm15 = vcmp.ge.f32.partialorder %v206_v3, 0.0  ;;  %v958_v0 = vld [vmem:[%s1262_s0 + $0xb0] sm:$0xff]  }
  0x36   :  { %v303_v10 = vmul.f32 0.2, %v205_v2  ;;  %v304_v11 = vmul.f32 0.2, %v206_v3  ;;  %v351_v12 = vsel %vm253_vm13, %v204_v63, %v302_v6  ;;  %v208_v13 = vadd.f32 %v1023_v7, %v152_v4 }
  0x37   :  { %vm256_vm0 = vcmp.ge.f32.partialorder %v207_v5, 0.0  ;;  %v305_v14 = vmul.f32 0.2, %v207_v5  ;;  %v890_v16 = vpack.c.bf16 %v351_v12, %v350_v8  ;;  %v153_v19 = vmul.f32 %v791_v61, %v1009_v1 }
  0x38   :  { %v352_v17 = vsel %vm254_vm14, %v205_v2, %v303_v10  ;;  %v353_v18 = vsel %vm255_vm15, %v206_v3, %v304_v11  ;;  %vm257_vm1 = vcmp.ge.f32.partialorder %v208_v13, 0.0  ;;  %v306_v23 = vmul.f32 0.2, %v208_v13  ;;  %v959_v2 = vld [vmem:[%s1262_s0 + $0xb8] sm:$0xff]  }
  0x39   :  { %v895_v22 = vpack.c.bf16 %v353_v18, %v352_v17  ;;  %v354_v24 = vsel %vm256_vm0, %v207_v5, %v305_v14  ;;  %973 = vst [vmem:[%s1265_s3 + $0x70] sm:$0xff] %v890_v16   ;;  %v154_v25 = vmul.f32 %v792_v9, %v1009_v1  ;;  %v209_v26 = vadd.f32 %v1023_v7, %v153_v19  ;;  %v62_v18 = vld [vmem:[%s1262_s0 + $0xc0] sm:$0xf] }
  0x3a   :  { %v795_v27 = vunpack.c.l.bf16 %v954_v15  ;;  %v796_v28 = vunpack.c.h.bf16 %v954_v15  ;;  %v355_v29 = vsel %vm257_vm1, %v208_v13, %v306_v23  ;;  %v799_v30 = vunpack.c.l.bf16 %v955_v20 }
  0x3b   :  { %974 = vst [vmem:[%s1265_s3 + $0x78] sm:$0xff] %v895_v22   ;;  %v800_v31 = vunpack.c.h.bf16 %v955_v20  ;;  %v803_v32 = vunpack.c.l.bf16 %v956_v21  ;;  %v900_v33 = vpack.c.bf16 %v355_v29, %v354_v24  ;;  %v210_v34 = vadd.f32 %v1023_v7, %v154_v25 }
  0x3c   :  { %vm258_vm2 = vcmp.ge.f32.partialorder %v209_v26, 0.0  ;;  %v307_v35 = vmul.f32 0.2, %v209_v26  ;;  %v155_v36 = vmul.f32 %v795_v27, %v1009_v1  ;;  %v156_v37 = vmul.f32 %v796_v28, %v1009_v1 }
  0x3d   :  { %v157_v38 = vmul.f32 %v799_v30, %v1009_v1  ;;  %v158_v39 = vmul.f32 %v800_v31, %v1009_v1  ;;  %975 = vst [vmem:[%s1265_s3 + $0x80] sm:$0xff] %v900_v33   ;;  %vm259_vm3 = vcmp.ge.f32.partialorder %v210_v34, 0.0  ;;  %v308_v41 = vmul.f32 0.2, %v210_v34 }
  0x3e   :  { %v356_v42 = vsel %vm258_vm2, %v209_v26, %v307_v35  ;;  %v804_v43 = vunpack.c.h.bf16 %v956_v21  ;;  %v211_v44 = vadd.f32 %v1023_v7, %v155_v36  ;;  %v212_v45 = vadd.f32 %v1023_v7, %v156_v37 }
  0x3f   :  { %v213_v46 = vadd.f32 %v1023_v7, %v157_v38  ;;  %v214_v47 = vadd.f32 %v1023_v7, %v158_v39  ;;  %v357_v48 = vsel %vm259_vm3, %v210_v34, %v308_v41  ;;  %v159_v49 = vmul.f32 %v803_v32, %v1009_v1 }
  0x40   :  { %v160_v50 = vmul.f32 %v804_v43, %v1009_v1  ;;  %v807_v51 = vunpack.c.l.bf16 %v957_v40  ;;  %v905_v52 = vpack.c.bf16 %v357_v48, %v356_v42  ;;  %vm260_vm4 = vcmp.ge.f32.partialorder %v211_v44, 0.0 }
  0x41   :  { %vm261_vm5 = vcmp.ge.f32.partialorder %v212_v45, 0.0  ;;  %v309_v53 = vmul.f32 0.2, %v211_v44  ;;  %v310_v54 = vmul.f32 0.2, %v212_v45  ;;  %vm262_vm6 = vcmp.ge.f32.partialorder %v213_v46, 0.0 }
  0x42   :  { %vm263_vm7 = vcmp.ge.f32.partialorder %v214_v47, 0.0  ;;  %v311_v55 = vmul.f32 0.2, %v213_v46  ;;  %976 = vst [vmem:[%s1265_s3 + $0x88] sm:$0xff] %v905_v52   ;;  %v312_v57 = vmul.f32 0.2, %v214_v47  ;;  %v215_v58 = vadd.f32 %v1023_v7, %v159_v49 }
  0x43   :  { %v358_v56 = vsel %vm260_vm4, %v211_v44, %v309_v53  ;;  %v216_v59 = vadd.f32 %v1023_v7, %v160_v50  ;;  %v359_v60 = vsel %vm261_vm5, %v212_v45, %v310_v54  ;;  %v808_v62 = vunpack.c.h.bf16 %v957_v40 }
  0x44   :  { %v360_v61 = vsel %vm262_vm6, %v213_v46, %v311_v55  ;;  %v161_v63 = vmul.f32 %v807_v51, %v1009_v1  ;;  %v910_v3 = vpack.c.bf16 %v359_v60, %v358_v56  ;;  %v361_v4 = vsel %vm263_vm7, %v214_v47, %v312_v57 }
  0x45   :  { %vm264_vm8 = vcmp.ge.f32.partialorder %v215_v58, 0.0  ;;  %vm265_vm9 = vcmp.ge.f32.partialorder %v216_v59, 0.0  ;;  %v915_v5 = vpack.c.bf16 %v361_v4, %v360_v61  ;;  %v313_v6 = vmul.f32 0.2, %v215_v58 }
  0x46   :  { %v314_v8 = vmul.f32 0.2, %v216_v59  ;;  %v162_v9 = vmul.f32 %v808_v62, %v1009_v1  ;;  %977 = vst [vmem:[%s1265_s3 + $0x90] sm:$0xff] %v910_v3   ;;  %v217_v10 = vadd.f32 %v1023_v7, %v161_v63  ;;  %v811_v11 = vunpack.c.l.bf16 %v958_v0 }
  0x47   :  { %v812_v12 = vunpack.c.h.bf16 %v958_v0  ;;  %v815_v13 = vunpack.c.l.bf16 %v959_v2  ;;  %978 = vst [vmem:[%s1265_s3 + $0x98] sm:$0xff] %v915_v5   ;;  %v362_v14 = vsel %vm264_vm8, %v215_v58, %v313_v6  ;;  %v816_v17 = vunpack.c.h.bf16 %v959_v2 }
  0x48   :  { %v363_v15 = vsel %vm265_vm9, %v216_v59, %v314_v8  ;;  %v218_v16 = vadd.f32 %v1023_v7, %v162_v9  ;;  %vm266_vm10 = vcmp.ge.f32.partialorder %v217_v10, 0.0  ;;  %v315_v20 = vmul.f32 0.2, %v217_v10 }
  0x49   :  { %v920_v19 = vpack.c.bf16 %v363_v15, %v362_v14  ;;  %v163_v21 = vmul.f32 %v811_v11, %v1009_v1  ;;  %v164_v23 = vmul.f32 %v812_v12, %v1009_v1  ;;  %v165_v24 = vmul.f32 %v815_v13, %v1009_v1 }
  0x4a   :  { %vm267_vm11 = vcmp.ge.f32.partialorder %v218_v16, 0.0  ;;  %v316_v22 = vmul.f32 0.2, %v218_v16  ;;  %v364_v25 = vsel %vm266_vm10, %v217_v10, %v315_v20  ;;  %v166_v27 = vmul.f32 %v816_v17, %v1009_v1 }
  0x4b   :  { %979 = vst [vmem:[%s1265_s3 + $0xa0] sm:$0xff] %v920_v19   ;;  %v219_v26 = vadd.f32 %v1023_v7, %v163_v21  ;;  %v111_v28 = vunpack.c.l.bf16 %v62_v18  ;;  %v220_v30 = vadd.f32 %v1023_v7, %v164_v23  ;;  %v221_v31 = vadd.f32 %v1023_v7, %v165_v24 }
  0x4c   :  { %v365_v29 = vsel %vm267_vm11, %v218_v16, %v316_v22  ;;  %v222_v34 = vadd.f32 %v1023_v7, %v166_v27 }
  0x4d   :  { %v925_v32 = vpack.c.bf16 %v365_v29, %v364_v25  ;;  %vm268_vm12 = vcmp.ge.f32.partialorder %v219_v26, 0.0  ;;  %v317_v33 = vmul.f32 0.2, %v219_v26  ;;  %vm269_vm13 = vcmp.ge.f32.partialorder %v220_v30, 0.0 }
  0x4e   :  { %v318_v35 = vmul.f32 0.2, %v220_v30  ;;  %vm270_vm14 = vcmp.ge.f32.partialorder %v221_v31, 0.0  ;;  %v319_v36 = vmul.f32 0.2, %v221_v31  ;;  %vm271_vm15 = vcmp.ge.f32.partialorder %v222_v34, 0.0 }
  0x4f   :  { %980 = vst [vmem:[%s1265_s3 + $0xa8] sm:$0xff] %v925_v32   ;;  %v366_v37 = vsel %vm268_vm12, %v219_v26, %v317_v33  ;;  %v320_v38 = vmul.f32 0.2, %v222_v34  ;;  %v167_v39 = vmul.f32 %v1009_v1, %v111_v28 }
  0x50   :  { %v367_v40 = vsel %vm269_vm13, %v220_v30, %v318_v35  ;;  %v368_v41 = vsel %vm270_vm14, %v221_v31, %v319_v36 }
  0x51   :  { %v930_v42 = vpack.c.bf16 %v367_v40, %v366_v37  ;;  %v369_v43 = vsel %vm271_vm15, %v222_v34, %v320_v38  ;;  %v223_v44 = vadd.f32 %v1023_v7, %v167_v39 }
  0x52   :  { %v935_v45 = vpack.c.bf16 %v369_v43, %v368_v41 }
  0x53   :  { %981 = vst [vmem:[%s1265_s3 + $0xb0] sm:$0xff] %v930_v42   ;;  %vm272_vm0 = vcmp.ge.f32.partialorder %v223_v44, 0.0  ;;  %v321_v46 = vmul.f32 0.2, %v223_v44 }
  0x54   :  { %982 = vst [vmem:[%s1265_s3 + $0xb8] sm:$0xff] %v935_v45  }
  0x55   :  { %v370_v47 = vsel %vm272_vm0, %v223_v44, %v321_v46 }
  0x56   :  { %v720_v48 = vpack.c.bf16 %v370_v47, %v370_v47 }
  0x58   :  { %616 = vst [vmem:[%s1265_s3 + $0xc0] sm:$0xf] %v720_v48 }

// kernel: discriminator_forward.11
= control target key start
LH: loop header
LB: loop body
LE: loop exit
PB: predicated region body
PF: predicated region fallthrough
CT: control target
= control target key end

     0   :  { %v3064_v0 = vmov 0   ;;  %v3065_v24 = vmov 0.0   ;;  %vm3066_vm0 = vmmov 0   ;;  %vm1067_vm1 = vcmask 523264   ;;  %s4068_s1 = inlined_call_operand.vmem [shape: bf16[576,128], index: 1, kind: input, shape index: {}]   ;;  %s4069_s0 = inlined_call_operand.vmem [shape: bf16[392,576], index: 0, kind: input, shape index: {}]   ;;  %s4070_s2 = inlined_call_operand.vmem [shape: bf16[392,128], index: 2, kind: output, shape index: {0}]   ;;  %s4071_s3 = inlined_call_operand.vmem [shape: f32[1,8,128], index: 3, kind: output, shape index: {1}]   ;;  %s4072_s4 = inlined_call_operand.vmem [shape: f32[1,8,128], index: 4, kind: output, shape index: {2}]  }
   0x1   :  { %1143 = vmatprep.subr.bf16.mxu0 %v3064_v0  ;;  %2820 = vmatprep.subr.bf16.mxu1 %v3064_v0  ;;  %v2855_v1 = vld [vmem:[%s4068_s1 + $0x38] sm:$0xff]   ;;  %v2856_v2 = vld [vmem:[%s4068_s1 + $0x30] sm:$0xff]   ;;  %v2857_v3 = vld [vmem:[%s4068_s1 + $0x28] sm:$0xff]  }
   0x2   :  { %1144 = vmatpush1.bf16.msra.mxu0 %v2855_v1  ;;  %2836 = vmatpush1.bf16.msra.mxu1 %v2855_v1  ;;  %v2858_v4 = vld [vmem:[%s4068_s1 + $0x20] sm:$0xff]   ;;  %v2859_v5 = vld [vmem:[%s4068_s1 + $0x18] sm:$0xff]   ;;  %v2860_v7 = vld [vmem:[%s4068_s1 + $0x10] sm:$0xff]  }
   0x3   :  { %1145 = vmatprep.subr.bf16.mxu0 %v3064_v0  ;;  %2821 = vmatprep.subr.bf16.mxu1 %v3064_v0  ;;  %v2873_v6 = vld [vmem:[%s4069_s0 + $0x4] ss:$20 sps:$4 sm:$0xff]   ;;  %v2876_v8 = vld [vmem:[%s4069_s0 + $0x20c] ss:$20 sps:$4 sm:$0xff]   ;;  %v2864_v12 = vld [vmem:[%s4068_s1 + $0x70] sm:$0xff]  }
   0x4   :  { %1175 = vmatprep.mubr.bf16.mxu0 %v2873_v6  ;;  %1279 = vmatprep.mubr.bf16.mxu1 %v2876_v8  ;;  %v2861_v9 = vld [vmem:[%s4068_s1 + $0x8] sm:$0xff]   ;;  %v2862_v10 = vld [vmem:[%s4068_s1] sm:$0xff]   ;;  %v2863_v11 = vld [vmem:[%s4068_s1 + $0x78] sm:$0xff]  }
   0x5   :  { %v2865_v13 = vld [vmem:[%s4068_s1 + $0x68] sm:$0xff]   ;;  %v2866_v14 = vld [vmem:[%s4068_s1 + $0x60] sm:$0xff]   ;;  %v2867_v15 = vld [vmem:[%s4068_s1 + $0x58] sm:$0xff]  }
   0x6   :  { %1146 = vmatpush1.bf16.msra.mxu0 %v2856_v2  ;;  %2837 = vmatpush1.bf16.msra.mxu1 %v2856_v2  ;;  %v2868_v16 = vld [vmem:[%s4068_s1 + $0x50] sm:$0xff]   ;;  %v2869_v17 = vld [vmem:[%s4068_s1 + $0x48] sm:$0xff]   ;;  %v2870_v18 = vld [vmem:[%s4068_s1 + $0x40] sm:$0xff]  }
   0x7   :  { %1147 = vmatprep.subr.bf16.mxu0 %v3064_v0  ;;  %2822 = vmatprep.subr.bf16.mxu1 %v3064_v0  ;;  %v2871_v19 = vld [vmem:[%s4069_s0] ss:$20 sps:$4 sm:$0xff]   ;;  %v2874_v20 = vld [vmem:[%s4069_s0 + $0x208] ss:$20 sps:$4 sm:$0xff]   ;;  %v2884_v29 = vld [vmem:[%s4069_s0 + $0x230] ss:$20 sps:$4 sm:$0xff]  }
   0x8   :  { %v2877_v21 = vld [vmem:[%s4068_s1 + $0x118] sm:$0xff]   ;;  %v2878_v22 = vld [vmem:[%s4069_s0 + $0x2c] ss:$20 sps:$4 sm:$0xff]   ;;  %v2880_v23 = vld [vmem:[%s4069_s0 + $0x234] ss:$20 sps:$4 sm:$0xff]  }
   0x9   :  { %v2882_v25 = vld [vmem:[%s4068_s1 + $0xb8] sm:$0xff]   ;;  %v2900_v26 = vld [vmem:[%s4068_s1 + $0x110] sm:$0xff]   ;;  %v2892_v32 = vld [vmem:[%s4068_s1 + $0xa8] sm:$0xff]  }
   0xa   :  { %1148 = vmatpush1.bf16.msra.mxu0 %v2857_v3  ;;  %2838 = vmatpush1.bf16.msra.mxu1 %v2857_v3  ;;  %v2885_v27 = vld [vmem:[%s4068_s1 + $0xb0] sm:$0xff]   ;;  %v2883_v28 = vld [vmem:[%s4069_s0 + $0x28] ss:$20 sps:$4 sm:$0xff]   ;;  %v2899_v34 = vld [vmem:[%s4068_s1 + $0xa0] sm:$0xff]  }
   0xb   :  { %1149 = vmatprep.subr.bf16.mxu0 %v3064_v0  ;;  %2823 = vmatprep.subr.bf16.mxu1 %v3064_v0  ;;  %v2886_v30 = vld [vmem:[%s4069_s0 + $0x54] ss:$20 sps:$4 sm:$0xff]   ;;  %v2888_v31 = vld [vmem:[%s4069_s0 + $0x25c] ss:$20 sps:$4 sm:$0xff]   ;;  %v2951_v35 = vld [vmem:[%s4068_s1 + $0x100] sm:$0xff]  }
   0xc   :  { %v2923_v33 = vld [vmem:[%s4068_s1 + $0x108] sm:$0xff]   ;;  %v2890_v36 = vld [vmem:[%s4069_s0 + $0x50] ss:$20 sps:$4 sm:$0xff]   ;;  %v2905_v40 = vld [vmem:[%s4068_s1 + $0x98] sm:$0xff]  }
   0xd   :  { %v2891_v37 = vld [vmem:[%s4069_s0 + $0x258] ss:$20 sps:$4 sm:$0xff]   ;;  %v2893_v38 = vld [vmem:[%s4069_s0 + $0x7c] ss:$20 sps:$4 sm:$0xff]   ;;  %v2898_v42 = vld [vmem:[%s4069_s0 + $0x280] ss:$20 sps:$4 sm:$0xff]  }
   0xe   :  { %1150 = vmatpush1.bf16.msra.mxu0 %v2858_v4  ;;  %2839 = vmatpush1.bf16.msra.mxu1 %v2858_v4  ;;  %v2895_v39 = vld [vmem:[%s4069_s0 + $0x284] ss:$20 sps:$4 sm:$0xff]   ;;  %v2908_v43 = vld [vmem:[%s4068_s1 + $0x90] sm:$0xff]   ;;  %v2903_v45 = vld [vmem:[%s4069_s0 + $0x2ac] ss:$20 sps:$4 sm:$0xff]  }
   0xf   :  { %1151 = vmatprep.subr.bf16.mxu0 %v3064_v0  ;;  %2824 = vmatprep.subr.bf16.mxu1 %v3064_v0  ;;  %v2897_v41 = vld [vmem:[%s4069_s0 + $0x78] ss:$20 sps:$4 sm:$0xff]   ;;  %v2922_v47 = vld [vmem:[%s4068_s1 + $0x80] sm:$0xff]   ;;  %v2907_v49 = vld [vmem:[%s4069_s0 + $0x2a8] ss:$20 sps:$4 sm:$0xff]  }
  0x10   :  { %v2901_v44 = vld [vmem:[%s4069_s0 + $0xa4] ss:$20 sps:$4 sm:$0xff]   ;;  %v2915_v46 = vld [vmem:[%s4068_s1 + $0x88] sm:$0xff]   ;;  %v2906_v48 = vld [vmem:[%s4069_s0 + $0xa0] ss:$20 sps:$4 sm:$0xff]  }
  0x11   :  { %v2909_v50 = vld [vmem:[%s4069_s0 + $0xcc] ss:$20 sps:$4 sm:$0xff]   ;;  %v2911_v51 = vld [vmem:[%s4069_s0 + $0x2d4] ss:$20 sps:$4 sm:$0xff]   ;;  %v2928_v52 = vld [vmem:[%s4068_s1 + $0xf8] sm:$0xff]  }
  0x12   :  { %1152 = vmatpush1.bf16.msra.mxu0 %v2859_v5  ;;  %2840 = vmatpush1.bf16.msra.mxu1 %v2859_v5  ;;  %v2931_v53 = vld [vmem:[%s4068_s1 + $0xf0] sm:$0xff]   ;;  %v2913_v54 = vld [vmem:[%s4069_s0 + $0xc8] ss:$20 sps:$4 sm:$0xff]   ;;  %v2945_v59 = vld [vmem:[%s4068_s1 + $0xe0] sm:$0xff]  }
  0x13   :  { %1153 = vmatprep.subr.bf16.mxu0 %v3064_v0  ;;  %2825 = vmatprep.subr.bf16.mxu1 %v3064_v0  ;;  %v2914_v55 = vld [vmem:[%s4069_s0 + $0x2d0] ss:$20 sps:$4 sm:$0xff]   ;;  %v2916_v56 = vld [vmem:[%s4069_s0 + $0xf4] ss:$20 sps:$4 sm:$0xff]   ;;  %v2921_v61 = vld [vmem:[%s4069_s0 + $0x2f8] ss:$20 sps:$4 sm:$0xff]  }
  0x14   :  { %v2918_v57 = vld [vmem:[%s4069_s0 + $0x2fc] ss:$20 sps:$4 sm:$0xff]   ;;  %v2938_v58 = vld [vmem:[%s4068_s1 + $0xe8] sm:$0xff]   ;;  %v2926_v63 = vld [vmem:[%s4069_s0 + $0x324] ss:$20 sps:$4 sm:$0xff]  }
  0x15   :  { %v2920_v60 = vld [vmem:[%s4069_s0 + $0xf0] ss:$20 sps:$4 sm:$0xff]   ;;  %v2950_v1 = vld [vmem:[%s4068_s1 + $0xd8] sm:$0xff]   ;;  %v2930_v4 = vld [vmem:[%s4069_s0 + $0x320] ss:$20 sps:$4 sm:$0xff]  }
  0x16   :  { %1154 = vmatpush1.bf16.msra.mxu0 %v2860_v7  ;;  %2841 = vmatpush1.bf16.msra.mxu1 %v2860_v7  ;;  %v2924_v62 = vld [vmem:[%s4069_s0 + $0x11c] ss:$20 sps:$4 sm:$0xff]   ;;  %v2929_v3 = vld [vmem:[%s4069_s0 + $0x118] ss:$20 sps:$4 sm:$0xff]   ;;  %v2961_v8 = vld [vmem:[%s4068_s1 + $0xc0] sm:$0xff]  }
  0x17   :  { %1155 = vmatprep.subr.bf16.mxu0 %v3064_v0  ;;  %2826 = vmatprep.subr.bf16.mxu1 %v3064_v0  ;;  %v2954_v2 = vld [vmem:[%s4068_s1 + $0xd0] sm:$0xff]   ;;  %v2932_v5 = vld [vmem:[%s4069_s0 + $0x144] ss:$20 sps:$4 sm:$0xff]   ;;  %v2934_v6 = vld [vmem:[%s4069_s0 + $0x34c] ss:$20 sps:$4 sm:$0xff]  }
  0x18   :  { %v2960_v7 = vld [vmem:[%s4068_s1 + $0xc8] sm:$0xff]  }
  0x1a   :  { %1156 = vmatpush1.bf16.msra.mxu0 %v2861_v9  ;;  %2842 = vmatpush1.bf16.msra.mxu1 %v2861_v9  ;;  %v2936_v9 = vld [vmem:[%s4069_s0 + $0x140] ss:$20 sps:$4 sm:$0xff]  }
  0x1b   :  { %1157 = vmatprep.subr.bf16.mxu0 %v3064_v0  ;;  %2827 = vmatprep.subr.bf16.mxu1 %v3064_v0 }
  0x1e   :  { %1158 = vmatpush1.bf16.msra.mxu0 %v2862_v10  ;;  %2843 = vmatpush1.bf16.msra.mxu1 %v2862_v10  ;;  %v2937_v10 = vld [vmem:[%s4069_s0 + $0x348] ss:$20 sps:$4 sm:$0xff]  }
  0x1f   :  { %1159 = vmatprep.subr.bf16.mxu0 %v3064_v0  ;;  %2828 = vmatprep.subr.bf16.mxu1 %v3064_v0 }
  0x22   :  { %1160 = vmatpush2.bf16.msra.mxu0 %v2863_v11  ;;  %2844 = vmatpush2.bf16.msra.mxu1 %v2863_v11  ;;  %v2939_v11 = vld [vmem:[%s4069_s0 + $0x16c] ss:$20 sps:$4 sm:$0xff]  }
  0x23   :  { %1161 = vmatprep.subr.bf16.mxu0 %v3064_v0  ;;  %2829 = vmatprep.subr.bf16.mxu1 %v3064_v0 }
  0x26   :  { %1162 = vmatpush2.bf16.msra.mxu0 %v2864_v12  ;;  %2845 = vmatpush2.bf16.msra.mxu1 %v2864_v12  ;;  %v2941_v12 = vld [vmem:[%s4069_s0 + $0x374] ss:$20 sps:$4 sm:$0xff]  }
  0x27   :  { %1163 = vmatprep.subr.bf16.mxu0 %v3064_v0  ;;  %2830 = vmatprep.subr.bf16.mxu1 %v3064_v0 }
  0x2a   :  { %1164 = vmatpush2.bf16.msra.mxu0 %v2865_v13  ;;  %2846 = vmatpush2.bf16.msra.mxu1 %v2865_v13  ;;  %v2944_v13 = vld [vmem:[%s4069_s0 + $0x370] ss:$20 sps:$4 sm:$0xff]  }
  0x2b   :  { %1165 = vmatprep.subr.bf16.mxu0 %v3064_v0  ;;  %2831 = vmatprep.subr.bf16.mxu1 %v3064_v0 }
  0x2e   :  { %1166 = vmatpush2.bf16.msra.mxu0 %v2866_v14  ;;  %2847 = vmatpush2.bf16.msra.mxu1 %v2866_v14  ;;  %v2946_v14 = vld [vmem:[%s4069_s0 + $0x194] ss:$20 sps:$4 sm:$0xff]  }
  0x2f   :  { %1167 = vmatprep.subr.bf16.mxu0 %v3064_v0  ;;  %2832 = vmatprep.subr.bf16.mxu1 %v3064_v0 }
  0x32   :  { %1168 = vmatpush2.bf16.msra.mxu0 %v2867_v15  ;;  %2848 = vmatpush2.bf16.msra.mxu1 %v2867_v15  ;;  %v2948_v15 = vld [vmem:[%s4069_s0 + $0x39c] ss:$20 sps:$4 sm:$0xff]  }
  0x33   :  { %1169 = vmatprep.subr.bf16.mxu0 %v3064_v0  ;;  %2833 = vmatprep.subr.bf16.mxu1 %v3064_v0 }
  0x36   :  { %1170 = vmatpush2.bf16.msra.mxu0 %v2868_v16  ;;  %2849 = vmatpush2.bf16.msra.mxu1 %v2868_v16  ;;  %v159_v16 = vld [vmem:[%s4069_s0 + $0x3c0] sm:$0xff] }
  0x37   :  { %1171 = vmatprep.subr.bf16.mxu0 %v3064_v0  ;;  %2834 = vmatprep.subr.bf16.mxu1 %v3064_v0 }
  0x3a   :  { %1172 = vmatpush2.bf16.msra.mxu0 %v2869_v17  ;;  %2850 = vmatpush2.bf16.msra.mxu1 %v2869_v17  ;;  %v2952_v17 = vld [vmem:[%s4069_s0 + $0x190] ss:$20 sps:$4 sm:$0xff]  }
  0x3b   :  { %1173 = vmatprep.subr.bf16.mxu0 %v3064_v0  ;;  %2835 = vmatprep.subr.bf16.mxu1 %v3064_v0 }
  0x3e   :  { %1174 = vmatpush2.bf16.msra.mxu0 %v2870_v18  ;;  %2851 = vmatpush2.bf16.msra.mxu1 %v2870_v18  ;;  %v2953_v18 = vld [vmem:[%s4069_s0 + $0x398] ss:$20 sps:$4 sm:$0xff]  }
  0x3f   :  { %2712 = vmatprep.subr.bf16.mxu0 %v3065_v24  ;;  %1375 = vmatprep.subr.bf16.mxu1 %v3064_v0 }
  0x41   :  { %1176 = vmatmul.mubr.bf16.vlgmr.msra.gmra.mxu0 %v2871_v19  ;;  %1280 = vmatmul.mubr.bf16.vlgmr.msra.gmra.mxu1 %v2874_v20  ;;  %v2955_v19 = vld [vmem:[%s4069_s0 + $0x1bc] ss:$20 sps:$4 sm:$0xff]   ;;  %v2377_v20 = vcombine.high %v159_v16, %v159_v16 }
  0x42   :  { %2713 = vmatpush3.bf16.msra.mxu0 %v2877_v21  ;;  %1183 = vmatprep.mubr.bf16.mxu0 %v2878_v22  ;;  %v2958_v21 = vld [vmem:[%s4069_s0 + $0x1b8] ss:$20 sps:$4 sm:$0xff]   ;;  %v2376_v22 = vcombine.low %v159_v16, %v159_v16 }
  0x43   :  { %1287 = vmatprep.mubr.bf16.mxu1 %v2880_v23  ;;  %1376 = vmatpush1.bf16.msra.mxu1 %v2882_v25  ;;  %v2962_v23 = vld [vmem:[%s4069_s0 + $0x1e4] ss:$20 sps:$4 sm:$0xff]   ;;  %v2966_v25 = vld [vmem:[%s4069_s0 + $0xc] ss:$20 sps:$4 sm:$0xff]  }
  0x44   :  { %1377 = vmatprep.subr.bf16.mxu1 %v3064_v0  ;;  %2714 = vmatprep.subr.bf16.mxu0 %v3065_v24 }
  0x46   :  { %2715 = vmatpush3.bf16.msra.mxu0 %v2900_v26  ;;  %v2964_v26 = vld [vmem:[%s4069_s0 + $0x8] ss:$20 sps:$4 sm:$0xff]  }
  0x47   :  { %1378 = vmatpush1.bf16.msra.mxu1 %v2885_v27  ;;  %2716 = vmatprep.subr.bf16.mxu0 %v3065_v24  ;;  %v2967_v27 = vld [vmem:[%s4069_s0 + $0x1e0] ss:$20 sps:$4 sm:$0xff]  }
  0x48   :  { %1379 = vmatprep.subr.bf16.mxu1 %v3064_v0 }
  0x49   :  { %1184 = vmatmul.mubr.bf16.gmra.mxu0 %v2883_v28  ;;  %1288 = vmatmul.mubr.bf16.gmra.mxu1 %v2884_v29  ;;  %v2968_v28 = vld [vmem:[%s4069_s0 + $0x34] ss:$20 sps:$4 sm:$0xff]   ;;  %v2970_v29 = vld [vmem:[%s4069_s0 + $0x30] ss:$20 sps:$4 sm:$0xff]  }
  0x4a   :  { %1191 = vmatprep.mubr.bf16.mxu0 %v2886_v30  ;;  %1295 = vmatprep.mubr.bf16.mxu1 %v2888_v31  ;;  %v2971_v30 = vld [vmem:[%s4069_s0 + $0x10] ss:$20 sps:$4 sm:$0xff]  }
  0x4b   :  { %1380 = vmatpush1.bf16.msra.mxu1 %v2892_v32  ;;  %2717 = vmatpush3.bf16.msra.mxu0 %v2923_v33  ;;  %v2972_v31 = vld [vmem:[%s4069_s0 + $0x5c] ss:$20 sps:$4 sm:$0xff]   ;;  %v2974_v32 = vld [vmem:[%s4069_s0 + $0x58] ss:$20 sps:$4 sm:$0xff]  }
  0x4c   :  { %1381 = vmatprep.subr.bf16.mxu1 %v3064_v0  ;;  %2718 = vmatprep.subr.bf16.mxu0 %v3065_v24  ;;  %v2975_v33 = vld [vmem:[%s4069_s0 + $0x38] ss:$20 sps:$4 sm:$0xff]  }
  0x4f   :  { %1382 = vmatpush1.bf16.msra.mxu1 %v2899_v34  ;;  %2719 = vmatpush3.bf16.msra.mxu0 %v2951_v35  ;;  %v2976_v34 = vld [vmem:[%s4069_s0 + $0x84] ss:$20 sps:$4 sm:$0xff]   ;;  %v2978_v35 = vld [vmem:[%s4069_s0 + $0x80] ss:$20 sps:$4 sm:$0xff]  }
  0x50   :  { %1383 = vmatprep.subr.bf16.mxu1 %v3064_v0 }
  0x51   :  { %1192 = vmatmul.mubr.bf16.gmra.mxu0 %v2890_v36  ;;  %1296 = vmatmul.mubr.bf16.gmra.mxu1 %v2891_v37  ;;  %v2979_v36 = vld [vmem:[%s4069_s0 + $0x60] ss:$20 sps:$4 sm:$0xff]  }
  0x52   :  { %1199 = vmatprep.mubr.bf16.mxu0 %v2893_v38  ;;  %1303 = vmatprep.mubr.bf16.mxu1 %v2895_v39  ;;  %v2980_v37 = vld [vmem:[%s4069_s0 + $0xac] ss:$20 sps:$4 sm:$0xff]   ;;  %v2982_v38 = vld [vmem:[%s4069_s0 + $0xa8] ss:$20 sps:$4 sm:$0xff]  }
  0x53   :  { %1384 = vmatpush1.bf16.msra.mxu1 %v2905_v40  ;;  %v2983_v39 = vld [vmem:[%s4069_s0 + $0x88] ss:$20 sps:$4 sm:$0xff]  }
  0x54   :  { %1385 = vmatprep.subr.bf16.mxu1 %v3064_v0  ;;  %v2984_v40 = vld [vmem:[%s4069_s0 + $0xd4] ss:$20 sps:$4 sm:$0xff]  }
  0x57   :  { %1386 = vmatpush1.bf16.msra.mxu1 %v2908_v43  ;;  %v2988_v43 = vld [vmem:[%s4069_s0 + $0xfc] ss:$20 sps:$4 sm:$0xff]  }
  0x58   :  { %1387 = vmatprep.subr.bf16.mxu1 %v3064_v0 }
  0x59   :  { %1200 = vmatmul.mubr.bf16.gmra.mxu0 %v2897_v41  ;;  %1304 = vmatmul.mubr.bf16.gmra.mxu1 %v2898_v42  ;;  %v2986_v41 = vld [vmem:[%s4069_s0 + $0xd0] ss:$20 sps:$4 sm:$0xff]  }
  0x5a   :  { %1207 = vmatprep.mubr.bf16.mxu0 %v2901_v44  ;;  %1311 = vmatprep.mubr.bf16.mxu1 %v2903_v45  ;;  %v2987_v42 = vld [vmem:[%s4069_s0 + $0xb0] ss:$20 sps:$4 sm:$0xff]   ;;  %v2990_v44 = vld [vmem:[%s4069_s0 + $0xf8] ss:$20 sps:$4 sm:$0xff]  }
  0x5b   :  { %1388 = vmatpush1.bf16.msra.mxu1 %v2915_v46  ;;  %v2991_v45 = vld [vmem:[%s4069_s0 + $0xd8] ss:$20 sps:$4 sm:$0xff]  }
  0x5c   :  { %1389 = vmatprep.subr.bf16.mxu1 %v3064_v0  ;;  %v2992_v46 = vld [vmem:[%s4069_s0 + $0x124] ss:$20 sps:$4 sm:$0xff]  }
  0x5f   :  { %1390 = vmatpush1.bf16.msra.mxu1 %v2922_v47  ;;  %v2994_v47 = vld [vmem:[%s4069_s0 + $0x120] ss:$20 sps:$4 sm:$0xff]  }
  0x60   :  { %1391 = vmatprep.subr.bf16.mxu1 %v3064_v0 }
  0x61   :  { %1208 = vmatmul.mubr.bf16.gmra.mxu0 %v2906_v48  ;;  %1312 = vmatmul.mubr.bf16.gmra.mxu1 %v2907_v49  ;;  %v2995_v48 = vld [vmem:[%s4069_s0 + $0x100] ss:$20 sps:$4 sm:$0xff]  }
  0x62   :  { %1215 = vmatprep.mubr.bf16.mxu0 %v2909_v50  ;;  %1319 = vmatprep.mubr.bf16.mxu1 %v2911_v51  ;;  %v2996_v49 = vld [vmem:[%s4069_s0 + $0x14c] ss:$20 sps:$4 sm:$0xff]   ;;  %v2998_v50 = vld [vmem:[%s4069_s0 + $0x148] ss:$20 sps:$4 sm:$0xff]  }
  0x63   :  { %1392 = vmatpush2.bf16.msra.mxu1 %v2928_v52  ;;  %v2999_v51 = vld [vmem:[%s4069_s0 + $0x128] ss:$20 sps:$4 sm:$0xff]  }
  0x64   :  { %1393 = vmatprep.subr.bf16.mxu1 %v3064_v0  ;;  %v3000_v52 = vld [vmem:[%s4069_s0 + $0x174] ss:$20 sps:$4 sm:$0xff]  }
  0x67   :  { %1394 = vmatpush2.bf16.msra.mxu1 %v2931_v53  ;;  %v3002_v53 = vld [vmem:[%s4069_s0 + $0x170] ss:$20 sps:$4 sm:$0xff]  }
  0x68   :  { %1395 = vmatprep.subr.bf16.mxu1 %v3064_v0 }
  0x69   :  { %1216 = vmatmul.mubr.bf16.gmra.mxu0 %v2913_v54  ;;  %1320 = vmatmul.mubr.bf16.gmra.mxu1 %v2914_v55  ;;  %v3003_v54 = vld [vmem:[%s4069_s0 + $0x150] ss:$20 sps:$4 sm:$0xff]  }
  0x6a   :  { %1223 = vmatprep.mubr.bf16.mxu0 %v2916_v56  ;;  %1327 = vmatprep.mubr.bf16.mxu1 %v2918_v57  ;;  %v3004_v55 = vld [vmem:[%s4069_s0 + $0x19c] ss:$20 sps:$4 sm:$0xff]   ;;  %v3006_v56 = vld [vmem:[%s4069_s0 + $0x198] ss:$20 sps:$4 sm:$0xff]  }
  0x6b   :  { %1396 = vmatpush2.bf16.msra.mxu1 %v2938_v58  ;;  %v3007_v57 = vld [vmem:[%s4069_s0 + $0x178] ss:$20 sps:$4 sm:$0xff]  }
  0x6c   :  { %1397 = vmatprep.subr.bf16.mxu1 %v3064_v0  ;;  %v3008_v58 = vld [vmem:[%s4069_s0 + $0x1c4] ss:$20 sps:$4 sm:$0xff]  }
  0x6f   :  { %1398 = vmatpush2.bf16.msra.mxu1 %v2945_v59  ;;  %v3010_v59 = vld [vmem:[%s4069_s0 + $0x1c0] ss:$20 sps:$4 sm:$0xff]  }
  0x70   :  { %1399 = vmatprep.subr.bf16.mxu1 %v3064_v0 }
  0x71   :  { %1224 = vmatmul.mubr.bf16.gmra.mxu0 %v2920_v60  ;;  %1328 = vmatmul.mubr.bf16.gmra.mxu1 %v2921_v61  ;;  %v3011_v60 = vld [vmem:[%s4069_s0 + $0x1a0] ss:$20 sps:$4 sm:$0xff]  }
  0x72   :  { %1231 = vmatprep.mubr.bf16.mxu0 %v2924_v62  ;;  %1335 = vmatprep.mubr.bf16.mxu1 %v2926_v63  ;;  %v3012_v61 = vld [vmem:[%s4069_s0 + $0x1ec] ss:$20 sps:$4 sm:$0xff]   ;;  %v3014_v62 = vld [vmem:[%s4069_s0 + $0x1e8] ss:$20 sps:$4 sm:$0xff]  }
  0x73   :  { %1400 = vmatpush2.bf16.msra.mxu1 %v2950_v1  ;;  %v3015_v63 = vld [vmem:[%s4069_s0 + $0x1c8] ss:$20 sps:$4 sm:$0xff]  }
  0x74   :  { %1401 = vmatprep.subr.bf16.mxu1 %v3064_v0  ;;  %v3016_v1 = vld [vmem:[%s4069_s0 + $0x214] ss:$20 sps:$4 sm:$0xff]  }
  0x77   :  { %1402 = vmatpush2.bf16.msra.mxu1 %v2954_v2 }
  0x78   :  { %1403 = vmatprep.subr.bf16.mxu1 %v3064_v0 }
  0x79   :  { %1232 = vmatmul.mubr.bf16.gmra.mxu0 %v2929_v3  ;;  %1336 = vmatmul.mubr.bf16.gmra.mxu1 %v2930_v4 }
  0x7a   :  { %1239 = vmatprep.mubr.bf16.mxu0 %v2932_v5  ;;  %1343 = vmatprep.mubr.bf16.mxu1 %v2934_v6 }
  0x7b   :  { %1404 = vmatpush2.bf16.msra.mxu1 %v2960_v7 }
  0x7c   :  { %1405 = vmatprep.subr.bf16.mxu1 %v3064_v0  ;;  %v2943_v0 = vld [vmem:[%s4069_s0 + $0x168] ss:$20 sps:$4 sm:$0xff]  }
  0x7f   :  { %1406 = vmatpush2.bf16.msra.mxu1 %v2961_v8  ;;  %v3018_v8 = vld [vmem:[%s4069_s0 + $0x210] ss:$20 sps:$4 sm:$0xff]  }
  0x81   :  { %1240 = vmatmul.mubr.bf16.gmra.mxu0 %v2936_v9  ;;  %1344 = vmatmul.mubr.bf16.gmra.mxu1 %v2937_v10  ;;  %v3019_v9 = vld [vmem:[%s4069_s0 + $0x1f0] ss:$20 sps:$4 sm:$0xff]  }
  0x82   :  { %1247 = vmatprep.mubr.bf16.mxu0 %v2939_v11  ;;  %1351 = vmatprep.mubr.bf16.mxu1 %v2941_v12  ;;  %v3020_v10 = vld [vmem:[%s4069_s0 + $0x23c] ss:$20 sps:$4 sm:$0xff]  }
  0x89   :  { %1248 = vmatmul.mubr.bf16.gmra.mxu0 %v2943_v0  ;;  %1352 = vmatmul.mubr.bf16.gmra.mxu1 %v2944_v13 }
  0x8a   :  { %1255 = vmatprep.mubr.bf16.mxu0 %v2946_v14  ;;  %1359 = vmatprep.mubr.bf16.mxu1 %v2948_v15 }
  0x91   :  { %1256 = vmatmul.mubr.bf16.gmra.mxu0 %v2952_v17  ;;  %1360 = vmatmul.mubr.bf16.gmra.mxu1 %v2953_v18  ;;  %v3022_v18 = vld [vmem:[%s4069_s0 + $0x238] ss:$20 sps:$4 sm:$0xff]  }
  0x92   :  { %1263 = vmatprep.mubr.bf16.mxu0 %v2955_v19  ;;  %1367 = vmatprep.mubr.bf16.mxu1 %v2377_v20  ;;  %v3023_v19 = vld [vmem:[%s4069_s0 + $0x218] ss:$20 sps:$4 sm:$0xff]  }
  0x93   :  { %v3024_v20 = vld [vmem:[%s4069_s0 + $0x264] ss:$20 sps:$4 sm:$0xff]  }
  0x99   :  { %1264 = vmatmul.mubr.bf16.gmra.mxu0 %v2958_v21  ;;  %1368 = vmatmul.mubr.bf16.gmra.mxu1 %v2376_v22 }
  0x9a   :  { %1271 = vmatprep.mubr.bf16.mxu0 %v2962_v23  ;;  %1407 = vmatprep.mubr.bf16.mxu1 %v2966_v25 }
  0xa1   :  { %1272 = vmatmul.mubr.bf16.gmra.mxu0 %v2967_v27  ;;  %1408 = vmatmul.mubr.bf16.vlgmr.msra.gmra.mxu1 %v2964_v26 }
  0xa2   :  { %1415 = vmatprep.mubr.bf16.mxu1 %v2968_v28  ;;  %2720 = vmatprep.mubr.msk.bf16.mxu0 %vm3066_vm0, %v3065_v24 }
  0xa9   :  { %1416 = vmatmul.mubr.bf16.gmra.mxu1 %v2970_v29  ;;  %2721 = vmatmul.mubr.msk.bf16.vlgmr.msra.gmra.mxu0 %vm1067_vm1, %v2971_v30  ;;  %v3026_v30 = vld [vmem:[%s4069_s0 + $0x260] ss:$20 sps:$4 sm:$0xff]  }
  0xaa   :  { %1423 = vmatprep.mubr.bf16.mxu1 %v2972_v31  ;;  %2724 = vmatprep.mubr.msk.bf16.mxu0 %vm3066_vm0, %v3065_v24  ;;  %v3027_v31 = vld [vmem:[%s4069_s0 + $0x240] ss:$20 sps:$4 sm:$0xff]  }
  0xb1   :  { %1424 = vmatmul.mubr.bf16.gmra.mxu1 %v2974_v32  ;;  %2725 = vmatmul.mubr.msk.bf16.gmra.mxu0 %vm1067_vm1, %v2975_v33  ;;  %v3030_v32 = vld [vmem:[%s4069_s0 + $0x28c] ss:$20 sps:$4 sm:$0xff]  }
  0xb2   :  { %1431 = vmatprep.mubr.bf16.mxu1 %v2976_v34  ;;  %2728 = vmatprep.mubr.msk.bf16.mxu0 %vm3066_vm0, %v3065_v24 }
  0xb9   :  { %1432 = vmatmul.mubr.bf16.gmra.mxu1 %v2978_v35  ;;  %2729 = vmatmul.mubr.msk.bf16.gmra.mxu0 %vm1067_vm1, %v2979_v36 }
  0xba   :  { %1439 = vmatprep.mubr.bf16.mxu1 %v2980_v37  ;;  %2732 = vmatprep.mubr.msk.bf16.mxu0 %vm3066_vm0, %v3065_v24 }
  0xc1   :  { %1440 = vmatmul.mubr.bf16.gmra.mxu1 %v2982_v38  ;;  %2733 = vmatmul.mubr.msk.bf16.gmra.mxu0 %vm1067_vm1, %v2983_v39 }
  0xc2   :  { %1447 = vmatprep.mubr.bf16.mxu1 %v2984_v40  ;;  %2736 = vmatprep.mubr.msk.bf16.mxu0 %vm3066_vm0, %v3065_v24 }
  0xc9   :  { %1448 = vmatmul.mubr.bf16.gmra.mxu1 %v2986_v41  ;;  %2737 = vmatmul.mubr.msk.bf16.gmra.mxu0 %vm1067_vm1, %v2987_v42  ;;  %v3028_v41 = vld [vmem:[%s4069_s0 + $0x288] ss:$20 sps:$4 sm:$0xff]  }
  0xca   :  { %1455 = vmatprep.mubr.bf16.mxu1 %v2988_v43  ;;  %2740 = vmatprep.mubr.msk.bf16.mxu0 %vm3066_vm0, %v3065_v24  ;;  %v3031_v42 = vld [vmem:[%s4069_s0 + $0x268] ss:$20 sps:$4 sm:$0xff]  }
  0xcb   :  { %v3034_v43 = vld [vmem:[%s4069_s0 + $0x2b4] ss:$20 sps:$4 sm:$0xff]  }
  0xd1   :  { %1456 = vmatmul.mubr.bf16.gmra.mxu1 %v2990_v44  ;;  %2741 = vmatmul.mubr.msk.bf16.gmra.mxu0 %vm1067_vm1, %v2991_v45 }
  0xd2   :  { %1463 = vmatprep.mubr.bf16.mxu1 %v2992_v46  ;;  %2744 = vmatprep.mubr.msk.bf16.mxu0 %vm3066_vm0, %v3065_v24 }
  0xd9   :  { %1464 = vmatmul.mubr.bf16.gmra.mxu1 %v2994_v47  ;;  %2745 = vmatmul.mubr.msk.bf16.gmra.mxu0 %vm1067_vm1, %v2995_v48 }
  0xda   :  { %1471 = vmatprep.mubr.bf16.mxu1 %v2996_v49  ;;  %2748 = vmatprep.mubr.msk.bf16.mxu0 %vm3066_vm0, %v3065_v24 }
  0xe1   :  { %1472 = vmatmul.mubr.bf16.gmra.mxu1 %v2998_v50  ;;  %2749 = vmatmul.mubr.msk.bf16.gmra.mxu0 %vm1067_vm1, %v2999_v51 }
  0xe2   :  { %1479 = vmatprep.mubr.bf16.mxu1 %v3000_v52  ;;  %2752 = vmatprep.mubr.msk.bf16.mxu0 %vm3066_vm0, %v3065_v24  ;;  %v3032_v52 = vld [vmem:[%s4069_s0 + $0x2b0] ss:$20 sps:$4 sm:$0xff]  }
  0xe9   :  { %1480 = vmatmul.mubr.bf16.gmra.mxu1 %v3002_v53  ;;  %2753 = vmatmul.mubr.msk.bf16.gmra.mxu0 %vm1067_vm1, %v3003_v54  ;;  %v3035_v53 = vld [vmem:[%s4069_s0 + $0x290] ss:$20 sps:$4 sm:$0xff]  }
  0xea   :  { %1487 = vmatprep.mubr.bf16.mxu1 %v3004_v55  ;;  %2756 = vmatprep.mubr.msk.bf16.mxu0 %vm3066_vm0, %v3065_v24  ;;  %v3038_v54 = vld [vmem:[%s4069_s0 + $0x2dc] ss:$20 sps:$4 sm:$0xff]  }
  0xf1   :  { %1488 = vmatmul.mubr.bf16.gmra.mxu1 %v3006_v56  ;;  %2757 = vmatmul.mubr.msk.bf16.gmra.mxu0 %vm1067_vm1, %v3007_v57 }
  0xf2   :  { %1495 = vmatprep.mubr.bf16.mxu1 %v3008_v58  ;;  %2760 = vmatprep.mubr.msk.bf16.mxu0 %vm3066_vm0, %v3065_v24 }
  0xf9   :  { %1496 = vmatmul.mubr.bf16.gmra.mxu1 %v3010_v59  ;;  %2761 = vmatmul.mubr.msk.bf16.gmra.mxu0 %vm1067_vm1, %v3011_v60 }
  0xfa   :  { %1503 = vmatprep.mubr.bf16.mxu1 %v3012_v61  ;;  %2764 = vmatprep.mubr.msk.bf16.mxu0 %vm3066_vm0, %v3065_v24 }
 0x101   :  { %v3551_v2 = vpop.f32.mrf.mxu0  ;;  %v3553_v3 = vpop.f32.mrf.mxu1  ;;  %1504 = vmatmul.mubr.bf16.gmra.mxu1 %v3014_v62  ;;  %2765 = vmatmul.mubr.msk.bf16.gmra.mxu0 %vm1067_vm1, %v3015_v63  ;;  %v3036_v63 = vld [vmem:[%s4069_s0 + $0x2d8] ss:$20 sps:$4 sm:$0xff]  }
 0x102   :  { %1511 = vmatprep.mubr.bf16.mxu1 %v3016_v1  ;;  %2768 = vmatprep.mubr.msk.bf16.mxu0 %vm3066_vm0, %v3065_v24  ;;  %v3039_v1 = vld [vmem:[%s4069_s0 + $0x2b8] ss:$20 sps:$4 sm:$0xff]  }
 0x103   :  { %v1179_v4 = vpop.f32.mrf.mxu0  ;;  %v1283_v5 = vpop.f32.mrf.mxu1 }
 0x104   :  { %v3042_v4 = vld [vmem:[%s4069_s0 + $0x304] ss:$20 sps:$4 sm:$0xff]  }
 0x105   :  { %v3558_v6 = vpop.f32.mrf.mxu0  ;;  %v3560_v7 = vpop.f32.mrf.mxu1 }
 0x107   :  { %v1182_v11 = vpop.f32.mrf.mxu0  ;;  %v1286_v12 = vpop.f32.mrf.mxu1 }
 0x109   :  { %v3571_v0 = vpop.f32.mrf.mxu0  ;;  %v3573_v13 = vpop.f32.mrf.mxu1  ;;  %1512 = vmatmul.mubr.bf16.gmra.mxu1 %v3018_v8  ;;  %2769 = vmatmul.mubr.msk.bf16.gmra.mxu0 %vm1067_vm1, %v3019_v9 }
 0x10a   :  { %1519 = vmatprep.mubr.bf16.mxu1 %v3020_v10  ;;  %2772 = vmatprep.mubr.msk.bf16.mxu0 %vm3066_vm0, %v3065_v24 }
 0x10b   :  { %v1187_v14 = vpop.f32.mrf.mxu0  ;;  %v1291_v15 = vpop.f32.mrf.mxu1 }
 0x10d   :  { %v3578_v16 = vpop.f32.mrf.mxu0  ;;  %v3580_v17 = vpop.f32.mrf.mxu1 }
 0x10f   :  { %v1190_v21 = vpop.f32.mrf.mxu0  ;;  %v1294_v22 = vpop.f32.mrf.mxu1 }
 0x111   :  { %v3591_v23 = vpop.f32.mrf.mxu0  ;;  %v3593_v25 = vpop.f32.mrf.mxu1  ;;  %1520 = vmatmul.mubr.bf16.gmra.mxu1 %v3022_v18  ;;  %2773 = vmatmul.mubr.msk.bf16.gmra.mxu0 %vm1067_vm1, %v3023_v19  ;;  %v3040_v18 = vld [vmem:[%s4069_s0 + $0x300] ss:$20 sps:$4 sm:$0xff]  }
 0x112   :  { %1527 = vmatprep.mubr.bf16.mxu1 %v3024_v20  ;;  %2776 = vmatprep.mubr.msk.bf16.mxu0 %vm3066_vm0, %v3065_v24  ;;  %v3043_v19 = vld [vmem:[%s4069_s0 + $0x2e0] ss:$20 sps:$4 sm:$0xff]  }
 0x113   :  { %v1195_v26 = vpop.f32.mrf.mxu0  ;;  %v1299_v27 = vpop.f32.mrf.mxu1  ;;  %v3046_v20 = vld [vmem:[%s4069_s0 + $0x32c] ss:$20 sps:$4 sm:$0xff]  }
 0x115   :  { %v3598_v28 = vpop.f32.mrf.mxu0  ;;  %v3600_v29 = vpop.f32.mrf.mxu1 }
 0x117   :  { %v1198_v33 = vpop.f32.mrf.mxu0  ;;  %v1302_v34 = vpop.f32.mrf.mxu1 }
 0x118   :  { %v3044_v34 = vld [vmem:[%s4069_s0 + $0x328] ss:$20 sps:$4 sm:$0xff]  }
 0x119   :  { %v3611_v35 = vpop.f32.mrf.mxu0  ;;  %v3613_v36 = vpop.f32.mrf.mxu1  ;;  %1528 = vmatmul.mubr.bf16.gmra.mxu1 %v3026_v30  ;;  %2777 = vmatmul.mubr.msk.bf16.gmra.mxu0 %vm1067_vm1, %v3027_v31 }
 0x11a   :  { %1535 = vmatprep.mubr.bf16.mxu1 %v3030_v32  ;;  %2780 = vmatprep.mubr.msk.bf16.mxu0 %vm3066_vm0, %v3065_v24 }
 0x11b   :  { %v1203_v37 = vpop.f32.mrf.mxu0  ;;  %v1307_v38 = vpop.f32.mrf.mxu1 }
 0x11c   :  { %v3047_v37 = vld [vmem:[%s4069_s0 + $0x308] ss:$20 sps:$4 sm:$0xff]  }
 0x11d   :  { %v3618_v39 = vpop.f32.mrf.mxu0  ;;  %v3620_v40 = vpop.f32.mrf.mxu1  ;;  %v3050_v38 = vld [vmem:[%s4069_s0 + $0x354] ss:$20 sps:$4 sm:$0xff]  }
 0x11f   :  { %v1206_v44 = vpop.f32.mrf.mxu0  ;;  %v1310_v45 = vpop.f32.mrf.mxu1 }
 0x121   :  { %v3631_v46 = vpop.f32.mrf.mxu0  ;;  %v3633_v47 = vpop.f32.mrf.mxu1  ;;  %1536 = vmatmul.mubr.bf16.gmra.mxu1 %v3028_v41  ;;  %2781 = vmatmul.mubr.msk.bf16.gmra.mxu0 %vm1067_vm1, %v3031_v42 }
 0x122   :  { %1543 = vmatprep.mubr.bf16.mxu1 %v3034_v43  ;;  %2784 = vmatprep.mubr.msk.bf16.mxu0 %vm3066_vm0, %v3065_v24 }
 0x123   :  { %v1211_v48 = vpop.f32.mrf.mxu0  ;;  %v1315_v49 = vpop.f32.mrf.mxu1 }
 0x125   :  { %v3638_v50 = vpop.f32.mrf.mxu0  ;;  %v3640_v51 = vpop.f32.mrf.mxu1 }
 0x127   :  { %v1214_v55 = vpop.f32.mrf.mxu0  ;;  %v1318_v56 = vpop.f32.mrf.mxu1 }
 0x128   :  { %v3054_v55 = vld [vmem:[%s4069_s0 + $0x37c] ss:$20 sps:$4 sm:$0xff]  }
 0x129   :  { %v3651_v57 = vpop.f32.mrf.mxu0  ;;  %v3653_v58 = vpop.f32.mrf.mxu1  ;;  %1544 = vmatmul.mubr.bf16.gmra.mxu1 %v3032_v52  ;;  %2785 = vmatmul.mubr.msk.bf16.gmra.mxu0 %vm1067_vm1, %v3035_v53  ;;  %v3048_v53 = vld [vmem:[%s4069_s0 + $0x350] ss:$20 sps:$4 sm:$0xff]  }
 0x12a   :  { %1551 = vmatprep.mubr.bf16.mxu1 %v3038_v54  ;;  %2788 = vmatprep.mubr.msk.bf16.mxu0 %vm3066_vm0, %v3065_v24  ;;  %v3051_v54 = vld [vmem:[%s4069_s0 + $0x330] ss:$20 sps:$4 sm:$0xff]  }
 0x12b   :  { %v1219_v59 = vpop.f32.mrf.mxu0  ;;  %v1323_v60 = vpop.f32.mrf.mxu1 }
 0x12d   :  { %v3658_v61 = vpop.f32.mrf.mxu0  ;;  %v3660_v62 = vpop.f32.mrf.mxu1 }
 0x12f   :  { %v1222_v5 = vpop.f32.mrf.mxu0  ;;  %v1326_v8 = vpop.f32.mrf.mxu1 }
 0x131   :  { %v3671_v9 = vpop.f32.mrf.mxu0  ;;  %v3673_v10 = vpop.f32.mrf.mxu1  ;;  %1552 = vmatmul.mubr.bf16.gmra.mxu1 %v3036_v63  ;;  %2789 = vmatmul.mubr.msk.bf16.gmra.mxu0 %vm1067_vm1, %v3039_v1 }
 0x132   :  { %1559 = vmatprep.mubr.bf16.mxu1 %v3042_v4  ;;  %2792 = vmatprep.mubr.msk.bf16.mxu0 %vm3066_vm0, %v3065_v24 }
 0x133   :  { %v1227_v11 = vpop.f32.mrf.mxu0  ;;  %v1331_v12 = vpop.f32.mrf.mxu1 }
 0x134   :  { %v3052_v11 = vld [vmem:[%s4069_s0 + $0x378] ss:$20 sps:$4 sm:$0xff]  }
 0x135   :  { %v3678_v14 = vpop.f32.mrf.mxu0  ;;  %v3680_v15 = vpop.f32.mrf.mxu1  ;;  %v3055_v12 = vld [vmem:[%s4069_s0 + $0x358] ss:$20 sps:$4 sm:$0xff]  }
 0x137   :  { %v1230_v21 = vpop.f32.mrf.mxu0  ;;  %v1334_v22 = vpop.f32.mrf.mxu1 }
 0x139   :  { %v3691_v26 = vpop.f32.mrf.mxu0  ;;  %v3693_v27 = vpop.f32.mrf.mxu1  ;;  %1560 = vmatmul.mubr.bf16.gmra.mxu1 %v3040_v18  ;;  %2793 = vmatmul.mubr.msk.bf16.gmra.mxu0 %vm1067_vm1, %v3043_v19  ;;  %v3058_v18 = vld [vmem:[%s4069_s0 + $0x3a4] ss:$20 sps:$4 sm:$0xff]  }
 0x13a   :  { %1567 = vmatprep.mubr.bf16.mxu1 %v3046_v20  ;;  %2796 = vmatprep.mubr.msk.bf16.mxu0 %vm3066_vm0, %v3065_v24 }
 0x13b   :  { %v1235_v30 = vpop.f32.mrf.mxu0  ;;  %v1339_v31 = vpop.f32.mrf.mxu1 }
 0x13d   :  { %v3698_v32 = vpop.f32.mrf.mxu0  ;;  %v3700_v33 = vpop.f32.mrf.mxu1 }
 0x13f   :  { %v1238_v41 = vpop.f32.mrf.mxu0  ;;  %v1342_v42 = vpop.f32.mrf.mxu1 }
 0x140   :  { %v3056_v41 = vld [vmem:[%s4069_s0 + $0x3a0] ss:$20 sps:$4 sm:$0xff]  }
 0x141   :  { %v3711_v43 = vpop.f32.mrf.mxu0  ;;  %v3713_v44 = vpop.f32.mrf.mxu1  ;;  %1568 = vmatmul.mubr.bf16.gmra.mxu1 %v3044_v34  ;;  %2797 = vmatmul.mubr.msk.bf16.gmra.mxu0 %vm1067_vm1, %v3047_v37  ;;  %v160_v34 = vld [vmem:[%s4069_s0 + $0x3c8] sm:$0xff]  ;;  %v3059_v42 = vld [vmem:[%s4069_s0 + $0x380] ss:$20 sps:$4 sm:$0xff]  }
 0x142   :  { %4073 = vst [vmem:[#allocation2_spill] sm:$0xff] %v3713_v44  ;;  %1575 = vmatprep.mubr.bf16.mxu1 %v3050_v38  ;;  %2800 = vmatprep.mubr.msk.bf16.mxu0 %vm3066_vm0, %v3065_v24 }
 0x143   :  { %v1243_v45 = vpop.f32.mrf.mxu0  ;;  %v1347_v48 = vpop.f32.mrf.mxu1 }
 0x144   :  { %v2379_v45 = vcombine.high %v160_v34, %v160_v34 }
 0x145   :  { %v3718_v49 = vpop.f32.mrf.mxu0  ;;  %v3720_v52 = vpop.f32.mrf.mxu1 }
 0x146   :  { %4074 = vst [vmem:[#allocation3_spill] sm:$0xff] %v3720_v52 }
 0x147   :  { %v1246_v56 = vpop.f32.mrf.mxu0  ;;  %v1350_v59 = vpop.f32.mrf.mxu1 }
 0x149   :  { %v3731_v60 = vpop.f32.mrf.mxu0  ;;  %v3733_v63 = vpop.f32.mrf.mxu1  ;;  %1576 = vmatmul.mubr.bf16.gmra.mxu1 %v3048_v53  ;;  %2801 = vmatmul.mubr.msk.bf16.gmra.mxu0 %vm1067_vm1, %v3051_v54 }
 0x14a   :  { %4075 = vst [vmem:[#allocation4_spill] sm:$0xff] %v3733_v63  ;;  %1583 = vmatprep.mubr.bf16.mxu1 %v3054_v55  ;;  %2804 = vmatprep.mubr.msk.bf16.mxu0 %vm3066_vm0, %v3065_v24 }
 0x14b   :  { %v1251_v1 = vpop.f32.mrf.mxu0  ;;  %v1355_v4 = vpop.f32.mrf.mxu1 }
 0x14d   :  { %v3738_v5 = vpop.f32.mrf.mxu0  ;;  %v3740_v8 = vpop.f32.mrf.mxu1 }
 0x14e   :  { %4076 = vst [vmem:[#allocation5_spill] sm:$0xff] %v3740_v8 }
 0x14f   :  { %v1254_v19 = vpop.f32.mrf.mxu0  ;;  %v1358_v20 = vpop.f32.mrf.mxu1 }
 0x151   :  { %v3751_v21 = vpop.f32.mrf.mxu0  ;;  %v3753_v22 = vpop.f32.mrf.mxu1  ;;  %1584 = vmatmul.mubr.bf16.gmra.mxu1 %v3052_v11  ;;  %2805 = vmatmul.mubr.msk.bf16.gmra.mxu0 %vm1067_vm1, %v3055_v12  ;;  %v2378_v11 = vcombine.low %v160_v34, %v160_v34  ;;  %v3062_v12 = vld [vmem:[%s4069_s0 + $0x3a8] ss:$20 sps:$4 sm:$0xff]  }
 0x152   :  { %4077 = vst [vmem:[#allocation6_spill] sm:$0xff] %v3753_v22  ;;  %1591 = vmatprep.mubr.bf16.mxu1 %v3058_v18  ;;  %2808 = vmatprep.mubr.msk.bf16.mxu0 %vm3066_vm0, %v3065_v24 }
 0x153   :  { %v1259_v30 = vpop.f32.mrf.mxu0  ;;  %v1363_v31 = vpop.f32.mrf.mxu1 }
 0x155   :  { %v3761_v37 = vpop.f32.mrf.mxu0  ;;  %v3763_v38 = vpop.f32.mrf.mxu1 }
 0x156   :  { %4078 = vst [vmem:[#allocation7_spill] sm:$0xff] %v3763_v38 }
 0x157   :  { %v1262_v48 = vpop.f32.mrf.mxu0  ;;  %v1366_v53 = vpop.f32.mrf.mxu1 }
 0x159   :  { %v3771_v54 = vpop.f32.mrf.mxu0  ;;  %v3773_v55 = vpop.f32.mrf.mxu1  ;;  %1592 = vmatmul.mubr.bf16.gmra.mxu1 %v3056_v41  ;;  %2809 = vmatmul.mubr.msk.bf16.gmra.mxu0 %vm1067_vm1, %v3059_v42 }
 0x15a   :  { %4079 = vst [vmem:[#allocation8_spill] sm:$0xff] %v3773_v55  ;;  %1599 = vmatprep.mubr.bf16.mxu1 %v2379_v45  ;;  %2812 = vmatprep.mubr.msk.bf16.mxu0 %vm3066_vm0, %v3065_v24  ;;  %v3063_v45 = vld [vmem:[%s4069_s0 + $0x3d0] ss:$0 sps:$4 sm:$0xff]  }
 0x15b   :  { %v1267_v56 = vpop.f32.mrf.mxu0  ;;  %v1371_v59 = vpop.f32.mrf.mxu1 }
 0x15d   :  { %v3778_v1 = vpop.f32.mrf.mxu0  ;;  %v1372_v4 = vpop.f32.mrf.mxu1 }
 0x15f   :  { %v1270_v18 = vpop.f32.mrf.mxu0  ;;  %v1373_v19 = vpop.f32.mrf.mxu1 }
 0x161   :  { %v3783_v20 = vpop.f32.mrf.mxu0  ;;  %v1409_v30 = vpop.f32.mrf.mxu1  ;;  %1600 = vmatmul.mubr.bf16.gmra.mxu1 %v2378_v11  ;;  %2813 = vmatmul.mubr.msk.bf16.gmra.mxu0 %vm1067_vm1, %v3062_v12 }
 0x162   :  { %2816 = vmatprep.mubr.msk.bf16.mxu0 %vm3066_vm0, %v3065_v24  ;;  %v1410_v4 = vadd.f32 %v1409_v30, %v3551_v2 }
 0x163   :  { %v1275_v31 = vpop.f32.mrf.mxu0  ;;  %v1411_v41 = vpop.f32.mrf.mxu1 }
 0x165   :  { %v3788_v42 = vpop.f32.mrf.mxu0  ;;  %v1412_v34 = vpop.f32.mrf.mxu1 }
 0x166   :  { %v1413_v24 = vadd.f32 %v1412_v34, %v3558_v6 }
 0x167   :  { %v1278_v48 = vpop.f32.mrf.mxu0  ;;  %v1414_v53 = vpop.f32.mrf.mxu1 }
 0x169   :  { %v1417_v56 = vpop.f32.mrf.mxu1  ;;  %v1641_v59 = vpop.f32.mrf.mxu0  ;;  %2817 = vmatmul.mubr.msk.bf16.gmra.mxu0 %vm1067_vm1, %v3063_v45 }
 0x16a   :  { %v1642_v18 = vadd.f32 %v1641_v59, %v1410_v4  ;;  %v1418_v55 = vadd.f32 %v1417_v56, %v3571_v0 }
 0x16b   :  { %v1419_v11 = vpop.f32.mrf.mxu1  ;;  %v2722_v12 = vpop.f32.mrf.mxu0 }
 0x16c   :  { %v2139_v48 = vmul.f32 %v1642_v18, %v1642_v18 }
 0x16d   :  { %v1420_v19 = vpop.f32.mrf.mxu1  ;;  %v1644_v31 = vpop.f32.mrf.mxu0 }
 0x16e   :  { %v1645_v41 = vadd.f32 %v1644_v31, %v1413_v24  ;;  %v1421_v59 = vadd.f32 %v1420_v19, %v3578_v16 }
 0x16f   :  { %v1422_v38 = vpop.f32.mrf.mxu1  ;;  %v2723_v22 = vpop.f32.mrf.mxu0 }
 0x170   :  { %v2543_v53 = vpack.c.bf16 %v1645_v41, %v1642_v18  ;;  %v2085_v8 = vadd.f32 %v1645_v41, %v1642_v18  ;;  %v2140_v63 = vmul.f32 %v1645_v41, %v1645_v41 }
 0x171   :  { %v1425_v52 = vpop.f32.mrf.mxu1  ;;  %v1649_v45 = vpop.f32.mrf.mxu0 }
 0x172   :  { %2544 = vst [vmem:[%s4070_s2] sm:$0xff] %v2543_v53   ;;  %v2188_v2 = vadd.f32 %v2140_v63, %v2139_v48  ;;  %v1650_v6 = vadd.f32 %v1649_v45, %v1418_v55  ;;  %v1426_v18 = vadd.f32 %v1425_v52, %v3591_v23 }
 0x173   :  { %v1427_v30 = vpop.f32.mrf.mxu1  ;;  %v2726_v34 = vpop.f32.mrf.mxu0 }
 0x174   :  { %v2086_v4 = vadd.f32 %v2085_v8, %v1650_v6  ;;  %v2141_v0 = vmul.f32 %v1650_v6, %v1650_v6 }
 0x175   :  { %v1428_v38 = vpop.f32.mrf.mxu1  ;;  %v1652_v22 = vpop.f32.mrf.mxu0 }
 0x176   :  { %v2189_v56 = vadd.f32 %v2188_v2, %v2141_v0  ;;  %v1653_v11 = vadd.f32 %v1652_v22, %v1421_v59  ;;  %v1429_v48 = vadd.f32 %v1428_v38, %v3598_v28 }
 0x177   :  { %v1430_v12 = vpop.f32.mrf.mxu1  ;;  %v2727_v24 = vpop.f32.mrf.mxu0 }
 0x178   :  { %v2548_v31 = vpack.c.bf16 %v1653_v11, %v1650_v6  ;;  %v2087_v41 = vadd.f32 %v2086_v4, %v1653_v11  ;;  %v2142_v44 = vmul.f32 %v1653_v11, %v1653_v11 }
 0x179   :  { %v1433_v53 = vpop.f32.mrf.mxu1  ;;  %v1657_v63 = vpop.f32.mrf.mxu0 }
 0x17a   :  { %2660 = vst [vmem:[%s4070_s2 + $0x8] sm:$0xff] %v2548_v31   ;;  %v2190_v16 = vadd.f32 %v2189_v56, %v2142_v44  ;;  %v1658_v8 = vadd.f32 %v1657_v63, %v1426_v18  ;;  %v1434_v4 = vadd.f32 %v1433_v53, %v3611_v35 }
 0x17b   :  { %v1435_v55 = vpop.f32.mrf.mxu1  ;;  %v2730_v19 = vpop.f32.mrf.mxu0 }
 0x17c   :  { %v2088_v45 = vadd.f32 %v2087_v41, %v1658_v8  ;;  %v2143_v2 = vmul.f32 %v1658_v8, %v1658_v8 }
 0x17d   :  { %v1436_v30 = vpop.f32.mrf.mxu1  ;;  %v1660_v34 = vpop.f32.mrf.mxu0 }
 0x17e   :  { %v2191_v23 = vadd.f32 %v2190_v16, %v2143_v2  ;;  %v1661_v52 = vadd.f32 %v1660_v34, %v1429_v48  ;;  %v1437_v18 = vadd.f32 %v1436_v30, %v3618_v39 }
 0x17f   :  { %v1438_v6 = vpop.f32.mrf.mxu1  ;;  %v2731_v59 = vpop.f32.mrf.mxu0 }
 0x180   :  { %v2553_v0 = vpack.c.bf16 %v1661_v52, %v1658_v8  ;;  %v2089_v22 = vadd.f32 %v2088_v45, %v1661_v52  ;;  %v2144_v11 = vmul.f32 %v1661_v52, %v1661_v52 }
 0x181   :  { %v1441_v12 = vpop.f32.mrf.mxu1  ;;  %v1665_v44 = vpop.f32.mrf.mxu0 }
 0x182   :  { %2661 = vst [vmem:[%s4070_s2 + $0x10] sm:$0xff] %v2553_v0   ;;  %v2192_v28 = vadd.f32 %v2191_v23, %v2144_v11  ;;  %v1666_v38 = vadd.f32 %v1665_v44, %v1434_v4  ;;  %v1442_v19 = vadd.f32 %v1441_v12, %v3631_v46 }
 0x183   :  { %v1443_v56 = vpop.f32.mrf.mxu1  ;;  %v2734_v24 = vpop.f32.mrf.mxu0 }
 0x184   :  { %v2090_v31 = vadd.f32 %v2089_v22, %v1666_v38  ;;  %v2145_v41 = vmul.f32 %v1666_v38, %v1666_v38 }
 0x185   :  { %v1444_v63 = vpop.f32.mrf.mxu1  ;;  %v1668_v16 = vpop.f32.mrf.mxu0 }
 0x186   :  { %v2193_v35 = vadd.f32 %v2192_v28, %v2145_v41  ;;  %v1669_v53 = vadd.f32 %v1668_v16, %v1437_v18  ;;  %v1445_v59 = vadd.f32 %v1444_v63, %v3638_v50 }
 0x187   :  { %v1446_v8 = vpop.f32.mrf.mxu1  ;;  %v2735_v55 = vpop.f32.mrf.mxu0 }
 0x188   :  { %v2558_v48 = vpack.c.bf16 %v1669_v53, %v1666_v38  ;;  %v2091_v45 = vadd.f32 %v2090_v31, %v1669_v53  ;;  %v2146_v2 = vmul.f32 %v1669_v53, %v1669_v53 }
 0x189   :  { %v1449_v34 = vpop.f32.mrf.mxu1  ;;  %v1673_v23 = vpop.f32.mrf.mxu0 }
 0x18a   :  { %2662 = vst [vmem:[%s4070_s2 + $0x18] sm:$0xff] %v2558_v48   ;;  %v2194_v39 = vadd.f32 %v2193_v35, %v2146_v2  ;;  %v1674_v30 = vadd.f32 %v1673_v23, %v1442_v19  ;;  %v1450_v38 = vadd.f32 %v1449_v34, %v3651_v57 }
 0x18b   :  { %v1451_v52 = vpop.f32.mrf.mxu1  ;;  %v2738_v6 = vpop.f32.mrf.mxu0 }
 0x18c   :  { %v2092_v4 = vadd.f32 %v2091_v45, %v1674_v30  ;;  %v2147_v0 = vmul.f32 %v1674_v30, %v1674_v30 }
 0x18d   :  { %v1452_v22 = vpop.f32.mrf.mxu1  ;;  %v1676_v11 = vpop.f32.mrf.mxu0 }
 0x18e   :  { %v2195_v46 = vadd.f32 %v2194_v39, %v2147_v0  ;;  %v1677_v12 = vadd.f32 %v1676_v11, %v1445_v59  ;;  %v1453_v53 = vadd.f32 %v1452_v22, %v3658_v61 }
 0x18f   :  { %v1454_v44 = vpop.f32.mrf.mxu1  ;;  %v2739_v28 = vpop.f32.mrf.mxu0 }
 0x190   :  { %v2563_v56 = vpack.c.bf16 %v1677_v12, %v1674_v30  ;;  %v2093_v24 = vadd.f32 %v2092_v4, %v1677_v12  ;;  %v2148_v18 = vmul.f32 %v1677_v12, %v1677_v12 }
 0x191   :  { %v1457_v31 = vpop.f32.mrf.mxu1  ;;  %v1681_v41 = vpop.f32.mrf.mxu0 }
 0x192   :  { %2663 = vst [vmem:[%s4070_s2 + $0x20] sm:$0xff] %v2563_v56   ;;  %v2196_v50 = vadd.f32 %v2195_v46, %v2148_v18  ;;  %v1682_v63 = vadd.f32 %v1681_v41, %v1450_v38  ;;  %v1458_v23 = vadd.f32 %v1457_v31, %v3671_v9 }
 0x193   :  { %v1459_v16 = vpop.f32.mrf.mxu1  ;;  %v2742_v35 = vpop.f32.mrf.mxu0 }
 0x194   :  { %v2094_v8 = vadd.f32 %v2093_v24, %v1682_v63  ;;  %v2149_v55 = vmul.f32 %v1682_v63, %v1682_v63 }
 0x195   :  { %v1460_v19 = vpop.f32.mrf.mxu1  ;;  %v1684_v48 = vpop.f32.mrf.mxu0 }
 0x196   :  { %v2197_v57 = vadd.f32 %v2196_v50, %v2149_v55  ;;  %v1685_v45 = vadd.f32 %v1684_v48, %v1453_v53  ;;  %v1461_v11 = vadd.f32 %v1460_v19, %v3678_v14 }
 0x197   :  { %v1462_v2 = vpop.f32.mrf.mxu1  ;;  %v2743_v34 = vpop.f32.mrf.mxu0 }
 0x198   :  { %v2568_v39 = vpack.c.bf16 %v1685_v45, %v1682_v63  ;;  %v2095_v30 = vadd.f32 %v2094_v8, %v1685_v45  ;;  %v2150_v52 = vmul.f32 %v1685_v45, %v1685_v45 }
 0x199   :  { %v1465_v6 = vpop.f32.mrf.mxu1  ;;  %v1689_v59 = vpop.f32.mrf.mxu0 }
 0x19a   :  { %2664 = vst [vmem:[%s4070_s2 + $0x28] sm:$0xff] %v2568_v39   ;;  %v2198_v61 = vadd.f32 %v2197_v57, %v2150_v52  ;;  %v1690_v4 = vadd.f32 %v1689_v59, %v1458_v23  ;;  %v1466_v18 = vadd.f32 %v1465_v6, %v3691_v26 }
 0x19b   :  { %v1467_v0 = vpop.f32.mrf.mxu1  ;;  %v2746_v22 = vpop.f32.mrf.mxu0 }
 0x19c   :  { %v2096_v46 = vadd.f32 %v2095_v30, %v1690_v4  ;;  %v2151_v12 = vmul.f32 %v1690_v4, %v1690_v4 }
 0x19d   :  { %v1468_v44 = vpop.f32.mrf.mxu1  ;;  %v1692_v28 = vpop.f32.mrf.mxu0 }
 0x19e   :  { %v2199_v9 = vadd.f32 %v2198_v61, %v2151_v12  ;;  %v1693_v38 = vadd.f32 %v1692_v28, %v1461_v11  ;;  %v1469_v55 = vadd.f32 %v1468_v44, %v3698_v32 }
 0x19f   :  { %v1470_v56 = vpop.f32.mrf.mxu1  ;;  %v2747_v24 = vpop.f32.mrf.mxu0 }
 0x1a0   :  { %v2573_v31 = vpack.c.bf16 %v1693_v38, %v1690_v4  ;;  %v2097_v41 = vadd.f32 %v2096_v46, %v1693_v38  ;;  %v2152_v50 = vmul.f32 %v1693_v38, %v1693_v38 }
 0x1a1   :  { %v1473_v63 = vpop.f32.mrf.mxu1  ;;  %v1697_v16 = vpop.f32.mrf.mxu0 }
 0x1a2   :  { %2665 = vst [vmem:[%s4070_s2 + $0x30] sm:$0xff] %v2573_v31   ;;  %v2200_v14 = vadd.f32 %v2199_v9, %v2152_v50  ;;  %v1698_v35 = vadd.f32 %v1697_v16, %v1466_v18  ;;  %v1474_v0 = vadd.f32 %v1473_v63, %v3711_v43 }
 0x1a3   :  { %v1475_v53 = vpop.f32.mrf.mxu1  ;;  %v2750_v8 = vpop.f32.mrf.mxu0 }
 0x1a4   :  { %v2098_v19 = vadd.f32 %v2097_v41, %v1698_v35  ;;  %v2153_v48 = vmul.f32 %v1698_v35, %v1698_v35 }
 0x1a5   :  { %v1476_v57 = vpop.f32.mrf.mxu1  ;;  %v1700_v45 = vpop.f32.mrf.mxu0 }
 0x1a6   :  { %v2201_v26 = vadd.f32 %v2200_v14, %v2153_v48  ;;  %v1701_v2 = vadd.f32 %v1700_v45, %v1469_v55  ;;  %v1477_v22 = vadd.f32 %v1476_v57, %v3718_v49 }
 0x1a7   :  { %v1478_v34 = vpop.f32.mrf.mxu1  ;;  %v2751_v23 = vpop.f32.mrf.mxu0 }
 0x1a8   :  { %v2578_v39 = vpack.c.bf16 %v1701_v2, %v1698_v35  ;;  %v3831_v30 = vadd.f32 %v2098_v19, %v1701_v2  ;;  %v2154_v52 = vmul.f32 %v1701_v2, %v1701_v2 }
 0x1a9   :  { %v1481_v6 = vpop.f32.mrf.mxu1  ;;  %v1705_v59 = vpop.f32.mrf.mxu0 }
 0x1aa   :  { %2666 = vst [vmem:[%s4070_s2 + $0x38] sm:$0xff] %v2578_v39   ;;  %v3836_v61 = vadd.f32 %v2201_v26, %v2154_v52  ;;  %v3840_v12 = vadd.f32 %v1705_v59, %v1474_v0  ;;  %v1482_v49 = vadd.f32 %v1481_v6, %v3731_v60 }
 0x1ab   :  { %v1483_v32 = vpop.f32.mrf.mxu1  ;;  %v2754_v4 = vpop.f32.mrf.mxu0 }
 0x1ad   :  { %v1484_v11 = vpop.f32.mrf.mxu1  ;;  %v1708_v46 = vpop.f32.mrf.mxu0 }
 0x1ae   :  { %v3842_v44 = vadd.f32 %v1708_v46, %v1477_v22  ;;  %v1485_v31 = vadd.f32 %v1484_v11, %v3738_v5 }
 0x1af   :  { %v1486_v28 = vpop.f32.mrf.mxu1  ;;  %v2755_v9 = vpop.f32.mrf.mxu0 }
 0x1b0   :  { %v2583_v38 = vpack.c.bf16 %v3842_v44, %v3840_v12 }
 0x1b1   :  { %v1489_v56 = vpop.f32.mrf.mxu1  ;;  %v1713_v24 = vpop.f32.mrf.mxu0 }
 0x1b2   :  { %2667 = vst [vmem:[%s4070_s2 + $0x40] sm:$0xff] %v2583_v38   ;;  %v3851_v63 = vadd.f32 %v1713_v24, %v1482_v49  ;;  %v1490_v5 = vadd.f32 %v1489_v56, %v3751_v21 }
 0x1b3   :  { %v1491_v43 = vpop.f32.mrf.mxu1  ;;  %v2758_v18 = vpop.f32.mrf.mxu0 }
 0x1b5   :  { %v1492_v41 = vpop.f32.mrf.mxu1  ;;  %v1716_v50 = vpop.f32.mrf.mxu0 }
 0x1b6   :  { %v3853_v16 = vadd.f32 %v1716_v50, %v1485_v31  ;;  %v1493_v48 = vadd.f32 %v1492_v41, %v3761_v37 }
 0x1b7   :  { %v1494_v14 = vpop.f32.mrf.mxu1  ;;  %v2759_v35 = vpop.f32.mrf.mxu0 }
 0x1b8   :  { %v2588_v53 = vpack.c.bf16 %v3853_v16, %v3851_v63 }
 0x1b9   :  { %v1497_v8 = vpop.f32.mrf.mxu1  ;;  %v1721_v55 = vpop.f32.mrf.mxu0 }
 0x1ba   :  { %2668 = vst [vmem:[%s4070_s2 + $0x48] sm:$0xff] %v2588_v53   ;;  %v3862_v26 = vadd.f32 %v1721_v55, %v1490_v5  ;;  %v1498_v37 = vadd.f32 %v1497_v8, %v3771_v54 }
 0x1bb   :  { %v1499_v60 = vpop.f32.mrf.mxu1  ;;  %v2762_v19 = vpop.f32.mrf.mxu0 }
 0x1bd   :  { %v1500_v57 = vpop.f32.mrf.mxu1  ;;  %v1724_v45 = vpop.f32.mrf.mxu0 }
 0x1be   :  { %v3864_v2 = vadd.f32 %v1724_v45, %v1493_v48  ;;  %v1501_v32 = vadd.f32 %v1500_v57, %v3778_v1 }
 0x1bf   :  { %v1502_v34 = vpop.f32.mrf.mxu1  ;;  %v2763_v23 = vpop.f32.mrf.mxu0 }
 0x1c0   :  { %v2593_v39 = vpack.c.bf16 %v3864_v2, %v3862_v26 }
 0x1c1   :  { %v1505_v52 = vpop.f32.mrf.mxu1  ;;  %v1729_v6 = vpop.f32.mrf.mxu0 }
 0x1c2   :  { %2669 = vst [vmem:[%s4070_s2 + $0x50] sm:$0xff] %v2593_v39   ;;  %v3873_v22 = vadd.f32 %v1729_v6, %v1498_v37  ;;  %v1506_v1 = vadd.f32 %v1505_v52, %v3783_v20 }
 0x1c3   :  { %v1507_v21 = vpop.f32.mrf.mxu1  ;;  %v2766_v59 = vpop.f32.mrf.mxu0 }
 0x1c5   :  { %v1508_v4 = vpop.f32.mrf.mxu1  ;;  %v1732_v0 = vpop.f32.mrf.mxu0 }
 0x1c6   :  { %v3875_v11 = vadd.f32 %v1732_v0, %v1501_v32  ;;  %v1509_v43 = vadd.f32 %v1508_v4, %v3788_v42 }
 0x1c7   :  { %v1510_v46 = vpop.f32.mrf.mxu1  ;;  %v2767_v28 = vpop.f32.mrf.mxu0 }
 0x1c8   :  { %v2598_v9 = vpack.c.bf16 %v3875_v11, %v3873_v22 }
 0x1c9   :  { %v1513_v38 = vpop.f32.mrf.mxu1  ;;  %v1737_v56 = vpop.f32.mrf.mxu0 }
 0x1ca   :  { %2670 = vst [vmem:[%s4070_s2 + $0x58] sm:$0xff] %v2598_v9   ;;  %v3884_v31 = vadd.f32 %v1737_v56, %v1506_v1  ;;  %v1514_v42 = vadd.f32 %v1513_v38, %v3553_v3 }
 0x1cb   :  { %v1515_v54 = vpop.f32.mrf.mxu1  ;;  %v2770_v24 = vpop.f32.mrf.mxu0 }
 0x1cd   :  { %v1516_v18 = vpop.f32.mrf.mxu1  ;;  %v1740_v49 = vpop.f32.mrf.mxu0 }
 0x1ce   :  { %v3886_v41 = vadd.f32 %v1740_v49, %v1509_v43  ;;  %v1517_v60 = vadd.f32 %v1516_v18, %v3560_v7 }
 0x1cf   :  { %v1518_v50 = vpop.f32.mrf.mxu1  ;;  %v2771_v14 = vpop.f32.mrf.mxu0 }
 0x1d0   :  { %v2603_v35 = vpack.c.bf16 %v3886_v41, %v3884_v31 }
 0x1d1   :  { %v1521_v53 = vpop.f32.mrf.mxu1  ;;  %v1745_v8 = vpop.f32.mrf.mxu0 }
 0x1d2   :  { %2671 = vst [vmem:[%s4070_s2 + $0x60] sm:$0xff] %v2603_v35   ;;  %v3895_v48 = vadd.f32 %v1745_v8, %v1514_v42  ;;  %v1522_v7 = vadd.f32 %v1521_v53, %v3573_v13  ;;  %v2155_v35 = vmul.f32 %v3840_v12, %v3840_v12 }
 0x1d3   :  { %v1523_v20 = vpop.f32.mrf.mxu1  ;;  %v2774_v55 = vpop.f32.mrf.mxu0 }
 0x1d4   :  { %v2100_v55 = vadd.f32 %v3831_v30, %v3840_v12  ;;  %v2158_v30 = vmul.f32 %v3853_v16, %v3853_v16 }
 0x1d5   :  { %v1524_v19 = vpop.f32.mrf.mxu1  ;;  %v1748_v5 = vpop.f32.mrf.mxu0 }
 0x1d6   :  { %v3897_v57 = vadd.f32 %v1748_v5, %v1517_v60  ;;  %v1525_v21 = vadd.f32 %v1524_v19, %v3580_v17  ;;  %v2203_v19 = vadd.f32 %v3836_v61, %v2155_v35  ;;  %v2157_v5 = vmul.f32 %v3851_v63, %v3851_v63 }
 0x1d7   :  { %v1526_v45 = vpop.f32.mrf.mxu1  ;;  %v2775_v34 = vpop.f32.mrf.mxu0 }
 0x1d8   :  { %v2608_v23 = vpack.c.bf16 %v3897_v57, %v3895_v48 }
 0x1d9   :  { %v1529_v39 = vpop.f32.mrf.mxu1  ;;  %v1753_v52 = vpop.f32.mrf.mxu0 }
 0x1da   :  { %2672 = vst [vmem:[%s4070_s2 + $0x68] sm:$0xff] %v2608_v23   ;;  %v3906_v32 = vadd.f32 %v1753_v52, %v1522_v7  ;;  %v1530_v17 = vadd.f32 %v1529_v39, %v3593_v25  ;;  %v2156_v25 = vmul.f32 %v3842_v44, %v3842_v44  ;;  %v2101_v23 = vadd.f32 %v2100_v55, %v3842_v44 }
 0x1db   :  { %v1531_v3 = vpop.f32.mrf.mxu1  ;;  %v2778_v6 = vpop.f32.mrf.mxu0  ;;  %v2159_v7 = vmul.f32 %v3862_v26, %v3862_v26 }
 0x1dc   :  { %v2204_v3 = vadd.f32 %v2203_v19, %v2156_v25 }
 0x1dd   :  { %v1532_v59 = vpop.f32.mrf.mxu1  ;;  %v1756_v37 = vpop.f32.mrf.mxu0 }
 0x1de   :  { %v3908_v4 = vadd.f32 %v1756_v37, %v1525_v21  ;;  %v1533_v54 = vadd.f32 %v1532_v59, %v3600_v29  ;;  %v2205_v6 = vadd.f32 %v2204_v3, %v2157_v5 }
 0x1df   :  { %v1534_v0 = vpop.f32.mrf.mxu1  ;;  %v2779_v46 = vpop.f32.mrf.mxu0 }
 0x1e0   :  { %v2613_v28 = vpack.c.bf16 %v3908_v4, %v3906_v32  ;;  %v2206_v37 = vadd.f32 %v2205_v6, %v2158_v30  ;;  %v2160_v0 = vmul.f32 %v3864_v2, %v3864_v2  ;;  %v2167_v6 = vmul.f32 %v3906_v32, %v3906_v32 }
 0x1e1   :  { %v1537_v9 = vpop.f32.mrf.mxu1  ;;  %v1761_v38 = vpop.f32.mrf.mxu0 }
 0x1e2   :  { %2673 = vst [vmem:[%s4070_s2 + $0x70] sm:$0xff] %v2613_v28   ;;  %v3917_v43 = vadd.f32 %v1761_v38, %v1530_v17  ;;  %v1538_v42 = vadd.f32 %v1537_v9, %v3613_v36 }
 0x1e3   :  { %v1539_v13 = vpop.f32.mrf.mxu1  ;;  %v2782_v56 = vpop.f32.mrf.mxu0 }
 0x1e4   :  { %v2207_v13 = vadd.f32 %v2206_v37, %v2159_v7 }
 0x1e5   :  { %v1540_v24 = vpop.f32.mrf.mxu1  ;;  %v1764_v1 = vpop.f32.mrf.mxu0 }
 0x1e6   :  { %v3919_v18 = vadd.f32 %v1764_v1, %v1533_v54  ;;  %v1541_v60 = vadd.f32 %v1540_v24, %v3620_v40  ;;  %v2102_v40 = vadd.f32 %v2101_v23, %v3851_v63 }
 0x1e7   :  { %v1542_v49 = vpop.f32.mrf.mxu1  ;;  %v2783_v50 = vpop.f32.mrf.mxu0 }
 0x1e8   :  { %v2618_v14 = vpack.c.bf16 %v3919_v18, %v3917_v43  ;;  %v2103_v59 = vadd.f32 %v2102_v40, %v3853_v16  ;;  %v2161_v16 = vmul.f32 %v3873_v22, %v3873_v22  ;;  %v2208_v49 = vadd.f32 %v2207_v13, %v2160_v0 }
 0x1e9   :  { %v1545_v53 = vpop.f32.mrf.mxu1  ;;  %v1769_v8 = vpop.f32.mrf.mxu0 }
 0x1ea   :  { %2674 = vst [vmem:[%s4070_s2 + $0x78] sm:$0xff] %v2618_v14   ;;  %v3938_v39 = vadd.f32 %v1769_v8, %v1538_v42  ;;  %v2104_v28 = vadd.f32 %v2103_v59, %v3862_v26  ;;  %v1546_v9 = vadd.f32 %v1545_v53, %v3633_v47  ;;  %v2162_v26 = vmul.f32 %v3875_v11, %v3875_v11 }
 0x1eb   :  { %v1547_v29 = vpop.f32.mrf.mxu1  ;;  %v2786_v20 = vpop.f32.mrf.mxu0  ;;  %v2209_v35 = vadd.f32 %v2208_v49, %v2161_v16  ;;  %v2163_v53 = vmul.f32 %v3884_v31, %v3884_v31  ;;  %v2168_v59 = vmul.f32 %v3908_v4, %v3908_v4 }
 0x1ec   :  { %v2105_v54 = vadd.f32 %v2104_v28, %v3864_v2  ;;  %v2164_v20 = vmul.f32 %v3886_v41, %v3886_v41 }
 0x1ed   :  { %v1548_v45 = vpop.f32.mrf.mxu1  ;;  %v1772_v34 = vpop.f32.mrf.mxu0  ;;  %v2210_v29 = vadd.f32 %v2209_v35, %v2162_v26 }
 0x1ee   :  { %v3940_v52 = vadd.f32 %v1772_v34, %v1541_v60  ;;  %v1549_v38 = vadd.f32 %v1548_v45, %v3640_v51  ;;  %v2106_v51 = vadd.f32 %v2105_v54, %v3873_v22  ;;  %v2170_v54 = vmul.f32 %v3919_v18, %v3919_v18 }
 0x1ef   :  { %v1550_v36 = vpop.f32.mrf.mxu1  ;;  %v2787_v12 = vpop.f32.mrf.mxu0  ;;  %v2211_v5 = vadd.f32 %v2210_v29, %v2163_v53 }
 0x1f0   :  { %v2623_v61 = vpack.c.bf16 %v3940_v52, %v3938_v39  ;;  %v2107_v25 = vadd.f32 %v2106_v51, %v3875_v11  ;;  %v2165_v11 = vmul.f32 %v3895_v48, %v3895_v48  ;;  %v2172_v35 = vmul.f32 %v3940_v52, %v3940_v52 }
 0x1f1   :  { %v1553_v44 = vpop.f32.mrf.mxu1  ;;  %v1777_v21 = vpop.f32.mrf.mxu0  ;;  %v2212_v36 = vadd.f32 %v2211_v5, %v2164_v20 }
 0x1f2   :  { %2675 = vst [vmem:[%s4070_s2 + $0x80] sm:$0xff] %v2623_v61   ;;  %v3961_v24 = vadd.f32 %v1777_v21, %v1546_v9  ;;  %v2108_v42 = vadd.f32 %v2107_v25, %v3884_v31  ;;  %v1554_v60 = vadd.f32 %v1553_v44, %v3653_v58  ;;  %v2166_v31 = vmul.f32 %v3897_v57, %v3897_v57 }
 0x1f3   :  { %v1555_v63 = vpop.f32.mrf.mxu1  ;;  %v2790_v46 = vpop.f32.mrf.mxu0  ;;  %v2213_v61 = vadd.f32 %v2212_v36, %v2165_v11 }
 0x1f4   :  { %v2109_v23 = vadd.f32 %v2108_v42, %v3886_v41 }
 0x1f5   :  { %v1556_v56 = vpop.f32.mrf.mxu1  ;;  %v1780_v17 = vpop.f32.mrf.mxu0  ;;  %v2214_v21 = vadd.f32 %v2213_v61, %v2166_v31 }
 0x1f6   :  { %v3963_v1 = vadd.f32 %v1780_v17, %v1549_v38  ;;  %v1557_v19 = vadd.f32 %v1556_v56, %v3660_v62  ;;  %v2110_v62 = vadd.f32 %v2109_v23, %v3895_v48 }
 0x1f7   :  { %v1558_v50 = vpop.f32.mrf.mxu1  ;;  %v2791_v47 = vpop.f32.mrf.mxu0  ;;  %v2215_v28 = vadd.f32 %v2214_v21, %v2167_v6  ;;  %v4081_v6 = vld [vmem:[#allocation3_spill] sm:$0xff] }
 0x1f8   :  { %v2628_v14 = vpack.c.bf16 %v3963_v1, %v3961_v24  ;;  %v2111_v44 = vadd.f32 %v2110_v62, %v3897_v57  ;;  %v2169_v57 = vmul.f32 %v3917_v43, %v3917_v43  ;;  %v2171_v50 = vmul.f32 %v3938_v39, %v3938_v39 }
 0x1f9   :  { %v1561_v2 = vpop.f32.mrf.mxu1  ;;  %v1785_v8 = vpop.f32.mrf.mxu0  ;;  %v2216_v17 = vadd.f32 %v2215_v28, %v2168_v59  ;;  %v2174_v5 = vmul.f32 %v3963_v1, %v3963_v1 }
 0x1fa   :  { %2676 = vst [vmem:[%s4070_s2 + $0x88] sm:$0xff] %v2628_v14   ;;  %v3984_v3 = vadd.f32 %v1785_v8, %v1554_v60  ;;  %v2112_v0 = vadd.f32 %v2111_v44, %v3906_v32  ;;  %v1562_v63 = vadd.f32 %v1561_v2, %v3673_v10 }
 0x1fb   :  { %v1563_v22 = vpop.f32.mrf.mxu1  ;;  %v2794_v55 = vpop.f32.mrf.mxu0  ;;  %v2217_v26 = vadd.f32 %v2216_v17, %v2169_v57 }
 0x1fc   :  { %v2113_v13 = vadd.f32 %v2112_v0, %v3908_v4 }
 0x1fd   :  { %v1564_v45 = vpop.f32.mrf.mxu1  ;;  %v1788_v34 = vpop.f32.mrf.mxu0  ;;  %v2218_v14 = vadd.f32 %v2217_v26, %v2170_v54 }
 0x1fe   :  { %v3986_v30 = vadd.f32 %v1788_v34, %v1557_v19  ;;  %v1565_v46 = vadd.f32 %v1564_v45, %v3680_v15  ;;  %v2114_v10 = vadd.f32 %v2113_v13, %v3917_v43  ;;  %v2175_v34 = vmul.f32 %v3984_v3, %v3984_v3 }
 0x1ff   :  { %v1566_v12 = vpop.f32.mrf.mxu1  ;;  %v2795_v58 = vpop.f32.mrf.mxu0  ;;  %v2219_v29 = vadd.f32 %v2218_v14, %v2171_v50 }
 0x200   :  { %v2633_v40 = vpack.c.bf16 %v3986_v30, %v3984_v3  ;;  %v2115_v4 = vadd.f32 %v2114_v10, %v3919_v18  ;;  %v2173_v18 = vmul.f32 %v3961_v24, %v3961_v24  ;;  %v2176_v12 = vmul.f32 %v3986_v30, %v3986_v30 }
 0x201   :  { %v1569_v41 = vpop.f32.mrf.mxu1  ;;  %v1793_v7 = vpop.f32.mrf.mxu0  ;;  %v2220_v19 = vadd.f32 %v2219_v29, %v2172_v35 }
 0x202   :  { %2677 = vst [vmem:[%s4070_s2 + $0x90] sm:$0xff] %v2633_v40   ;;  %v1794_v16 = vadd.f32 %v1793_v7, %v1562_v63  ;;  %v2116_v2 = vadd.f32 %v2115_v4, %v3938_v39  ;;  %v1570_v8 = vadd.f32 %v1569_v41, %v3693_v27  ;;  %v4080_v40 = vld [vmem:[#allocation2_spill] sm:$0xff] }
 0x203   :  { %v1571_v48 = vpop.f32.mrf.mxu1  ;;  %v2798_v37 = vpop.f32.mrf.mxu0 }
 0x204   :  { %v2117_v55 = vadd.f32 %v2116_v2, %v3940_v52  ;;  %v2177_v44 = vmul.f32 %v1794_v16, %v1794_v16 }
 0x205   :  { %v1572_v9 = vpop.f32.mrf.mxu1  ;;  %v1796_v38 = vpop.f32.mrf.mxu0 }
 0x206   :  { %v4007_v56 = vadd.f32 %v1796_v38, %v1565_v46  ;;  %v1573_v25 = vadd.f32 %v1572_v9, %v3700_v33  ;;  %v2118_v27 = vadd.f32 %v2117_v55, %v3961_v24  ;;  %v2221_v33 = vadd.f32 %v2220_v19, %v2173_v18 }
 0x207   :  { %v1574_v32 = vpop.f32.mrf.mxu1  ;;  %v2799_v49 = vpop.f32.mrf.mxu0 }
 0x208   :  { %v2638_v15 = vpack.c.bf16 %v4007_v56, %v1794_v16  ;;  %v2119_v31 = vadd.f32 %v2118_v27, %v3963_v1  ;;  %v2222_v52 = vadd.f32 %v2221_v33, %v2174_v5  ;;  %v2178_v63 = vmul.f32 %v4007_v56, %v4007_v56  ;;  %v4082_v49 = vld [vmem:[#allocation4_spill] sm:$0xff] }
 0x209   :  { %v1577_v47 = vpop.f32.mrf.mxu1  ;;  %v1801_v51 = vpop.f32.mrf.mxu0 }
 0x20a   :  { %2678 = vst [vmem:[%s4070_s2 + $0x98] sm:$0xff] %v2638_v15   ;;  %v1802_v42 = vadd.f32 %v1801_v51, %v1570_v8  ;;  %v2120_v24 = vadd.f32 %v2119_v31, %v3984_v3  ;;  %v1578_v61 = vadd.f32 %v1577_v47, %v4080_v40  ;;  %v2223_v7 = vadd.f32 %v2222_v52, %v2175_v34  ;;  %v4083_v47 = vld [vmem:[#allocation5_spill] sm:$0xff] }
 0x20b   :  { %v1579_v53 = vpop.f32.mrf.mxu1  ;;  %v2802_v43 = vpop.f32.mrf.mxu0 }
 0x20c   :  { %v2121_v59 = vadd.f32 %v2120_v24, %v3986_v30  ;;  %v2224_v0 = vadd.f32 %v2223_v7, %v2176_v12  ;;  %v2179_v38 = vmul.f32 %v1802_v42, %v1802_v42  ;;  %v4086_v7 = vld [vmem:[#allocation8_spill] sm:$0xff] }
 0x20d   :  { %v1580_v20 = vpop.f32.mrf.mxu1  ;;  %v1804_v22 = vpop.f32.mrf.mxu0 }
 0x20e   :  { %v1805_v60 = vadd.f32 %v1804_v22, %v1573_v25  ;;  %v1581_v41 = vadd.f32 %v1580_v20, %v4081_v6  ;;  %v2122_v57 = vadd.f32 %v2121_v59, %v1794_v16  ;;  %v2225_v9 = vadd.f32 %v2224_v0, %v2177_v44  ;;  %v4084_v20 = vld [vmem:[#allocation6_spill] sm:$0xff] }
 0x20f   :  { %v1582_v11 = vpop.f32.mrf.mxu1  ;;  %v2803_v39 = vpop.f32.mrf.mxu0 }
 0x210   :  { %v2643_v45 = vpack.c.bf16 %v1805_v60, %v1802_v42  ;;  %v2123_v54 = vadd.f32 %v2122_v57, %v4007_v56  ;;  %v2226_v30 = vadd.f32 %v2225_v9, %v2178_v63  ;;  %v2180_v32 = vmul.f32 %v1805_v60, %v1805_v60 }
 0x211   :  { %v1585_v23 = vpop.f32.mrf.mxu1  ;;  %v1809_v36 = vpop.f32.mrf.mxu0 }
 0x212   :  { %2679 = vst [vmem:[%s4070_s2 + $0xa0] sm:$0xff] %v2643_v45   ;;  %v1810_v48 = vadd.f32 %v1809_v36, %v1578_v61  ;;  %v1586_v10 = vadd.f32 %v1585_v23, %v4082_v49  ;;  %v2124_v50 = vadd.f32 %v2123_v54, %v1802_v42  ;;  %v2227_v51 = vadd.f32 %v2226_v30, %v2179_v38  ;;  %v4085_v36 = vld [vmem:[#allocation7_spill] sm:$0xff] }
 0x213   :  { %v1587_v58 = vpop.f32.mrf.mxu1  ;;  %v2806_v62 = vpop.f32.mrf.mxu0 }
 0x214   :  { %v2181_v4 = vmul.f32 %v1810_v48, %v1810_v48  ;;  %v2125_v43 = vadd.f32 %v2124_v50, %v1805_v60  ;;  %v2228_v2 = vadd.f32 %v2227_v51, %v2180_v32 }
 0x215   :  { %v1588_v21 = vpop.f32.mrf.mxu1  ;;  %v1812_v1 = vpop.f32.mrf.mxu0 }
 0x216   :  { %v1813_v37 = vadd.f32 %v1812_v1, %v1581_v41  ;;  %v1589_v16 = vadd.f32 %v1588_v21, %v4083_v47  ;;  %v2126_v18 = vadd.f32 %v2125_v43, %v1810_v48  ;;  %v2229_v19 = vadd.f32 %v2228_v2, %v2181_v4 }
 0x217   :  { %v1590_v46 = vpop.f32.mrf.mxu1  ;;  %v2807_v28 = vpop.f32.mrf.mxu0 }
 0x218   :  { %v2648_v3 = vpack.c.bf16 %v1813_v37, %v1810_v48  ;;  %v2182_v8 = vmul.f32 %v1813_v37, %v1813_v37  ;;  %v2127_v39 = vadd.f32 %v2126_v18, %v1813_v37 }
 0x219   :  { %v1593_v13 = vpop.f32.mrf.mxu1  ;;  %v1817_v17 = vpop.f32.mrf.mxu0 }
 0x21a   :  { %2680 = vst [vmem:[%s4070_s2 + $0xa8] sm:$0xff] %v2648_v3   ;;  %v1818_v14 = vadd.f32 %v1817_v17, %v1586_v10  ;;  %v1594_v22 = vadd.f32 %v1593_v13, %v4084_v20  ;;  %v2230_v60 = vadd.f32 %v2229_v19, %v2182_v8 }
 0x21b   :  { %v1595_v15 = vpop.f32.mrf.mxu1  ;;  %v2810_v26 = vpop.f32.mrf.mxu0 }
 0x21c   :  { %v2183_v5 = vmul.f32 %v1818_v14, %v1818_v14  ;;  %v2128_v23 = vadd.f32 %v2127_v39, %v1818_v14 }
 0x21d   :  { %v1596_v35 = vpop.f32.mrf.mxu1  ;;  %v1820_v53 = vpop.f32.mrf.mxu0 }
 0x21e   :  { %v1821_v56 = vadd.f32 %v1820_v53, %v1589_v16  ;;  %v1597_v31 = vadd.f32 %v1596_v35, %v4085_v36  ;;  %v2231_v52 = vadd.f32 %v2230_v60, %v2183_v5 }
 0x21f   :  { %v1598_v25 = vpop.f32.mrf.mxu1  ;;  %v2811_v29 = vpop.f32.mrf.mxu0 }
 0x220   :  { %v2653_v55 = vpack.c.bf16 %v1821_v56, %v1818_v14  ;;  %v2184_v45 = vmul.f32 %v1821_v56, %v1821_v56  ;;  %v2129_v62 = vadd.f32 %v2128_v23, %v1821_v56 }
 0x221   :  { %v1601_v42 = vpop.f32.mrf.mxu1  ;;  %v1825_v11 = vpop.f32.mrf.mxu0 }
 0x222   :  { %2681 = vst [vmem:[%s4070_s2 + $0xb0] sm:$0xff] %v2653_v55   ;;  %v1826_v27 = vadd.f32 %v1825_v11, %v1594_v22  ;;  %v2232_v61 = vadd.f32 %v2231_v52, %v2184_v45  ;;  %v1602_v44 = vadd.f32 %v1601_v42, %v4086_v7 }
 0x223   :  { %v2814_v33 = vpop.f32.mrf.mxu0  ;;  %v1603_v34 = vpop.f32.mrf.mxu1 }
 0x224   :  { %v2185_v24 = vmul.f32 %v1826_v27, %v1826_v27  ;;  %v2130_v21 = vadd.f32 %v2129_v62, %v1826_v27 }
 0x225   :  { %v1828_v12 = vpop.f32.mrf.mxu0  ;;  %v1604_v58 = vpop.f32.mrf.mxu1 }
 0x226   :  { %v1829_v40 = vadd.f32 %v1828_v12, %v1597_v31  ;;  %v2233_v37 = vadd.f32 %v2232_v61, %v2185_v24 }
 0x227   :  { %v2815_v6 = vpop.f32.mrf.mxu0  ;;  %v1605_v41 = vpop.f32.mrf.mxu1 }
 0x228   :  { %v2658_v1 = vpack.c.bf16 %v1829_v40, %v1826_v27  ;;  %v2186_v59 = vmul.f32 %v1829_v40, %v1829_v40  ;;  %v2131_v0 = vadd.f32 %v2130_v21, %v1829_v40 }
 0x229   :  { %v1833_v48 = vpop.f32.mrf.mxu0 }
 0x22a   :  { %2682 = vst [vmem:[%s4070_s2 + $0xb8] sm:$0xff] %v2658_v1   ;;  %v1834_v63 = vadd.f32 %v1833_v48, %v1602_v44  ;;  %v2234_v28 = vadd.f32 %v2233_v37, %v2186_v59 }
 0x22b   :  { %v2818_v46 = vpop.f32.mrf.mxu0 }
 0x22c   :  { %v2539_v57 = vpack.c.bf16 %v1834_v63, %v1834_v63  ;;  %v2132_v3 = vadd.f32 %v2131_v0, %v1834_v63  ;;  %v2187_v9 = vmul.f32 %v1834_v63, %v1834_v63 }
 0x22d   :  { %v1836_v38 = vpop.f32.mrf.mxu0 }
 0x22e   :  { %2084 = vst [vmem:[%s4070_s2 + $0xc0] sm:$0xf] %v2539_v57  ;;  %v2133_v13 = vrot.slane %v2132_v3, 4  ;;  %v2235_v17 = vadd.f32 %v2234_v28, %v2187_v9 }
 0x22f   :  { %v2819_v54 = vpop.f32.mrf.mxu0 }
 0x230   :  { %v2134_v30 = vadd.f32 %v2133_v13, %v2132_v3  ;;  %v2236_v32 = vrot.slane %v2235_v17, 4 }
 0x232   :  { %v2135_v49 = vrot.slane %v2134_v30, 2  ;;  %v2237_v10 = vadd.f32 %v2236_v32, %v2235_v17 }
 0x234   :  { %v2136_v15 = vadd.f32 %v2135_v49, %v2134_v30  ;;  %v2238_v26 = vrot.slane %v2237_v10, 2 }
 0x236   :  { %v2137_v50 = vrot.slane %v2136_v15, 1  ;;  %v2239_v47 = vadd.f32 %v2238_v26, %v2237_v10 }
 0x238   :  { %v2138_v16 = vadd.f32 %v2137_v50, %v2136_v15  ;;  %v2240_v51 = vrot.slane %v2239_v47, 1 }
 0x23a   :  { %v2241_v4 = vadd.f32 %v2240_v51, %v2239_v47  ;;  %2242 = vst [vmem:[%s4071_s3] sm:$0xff] %v2138_v16 }
 0x23c   :  { %2243 = vst [vmem:[%s4072_s4] sm:$0xff] %v2241_v4 }

// kernel: discriminator_forward.14
= control target key start
LH: loop header
LB: loop body
LE: loop exit
PB: predicated region body
PF: predicated region fallthrough
CT: control target
= control target key end

     0   :  { %v163_v0 = vlaneseq  ;;  %s1666_s0 = inlined_call_operand.vmem [shape: bf16[392,256], index: 0, kind: input, shape index: {}]   ;;  %s1667_s1 = inlined_call_operand.vmem [shape: f32[1,256], index: 1, kind: input, shape index: {}]   ;;  %s1668_s2 = inlined_call_operand.vmem [shape: f32[1,256], index: 2, kind: input, shape index: {}]   ;;  %s1669_s3 = inlined_call_operand.vmem [shape: bf16[392,256], index: 3, kind: output, shape index: {}]  }
   0x1   :  { %v14_v1 = vld [vmem:[%s1666_s0] sm:$0xff]  ;;  %v15_v6 = vld [vmem:[%s1666_s0 + $0x8] sm:$0xff]  ;;  %v16_v7 = vld [vmem:[%s1666_s0 + $0x10] sm:$0xff] }
   0x2   :  { %v161_v2 = vld [vmem:[%s1667_s1] sm:$0x3]  ;;  %v63_v3 = vunpack.c.l.bf16 %v14_v1  ;;  %v64_v4 = vunpack.c.h.bf16 %v14_v1  ;;  %v164_v5 = vshrl.u32 %v163_v0, 7  ;;  %v17_v8 = vld [vmem:[%s1666_s0 + $0x18] sm:$0xff]  ;;  %v65_v10 = vunpack.c.l.bf16 %v15_v6  ;;  %v1168_v15 = vld [vmem:[%s1666_s0 + $0x28] sm:$0xff] }
   0x3   :  { %v271_v9 = vld [vmem:[%s1668_s2] sm:$0x3]  ;;  %v66_v11 = vunpack.c.h.bf16 %v15_v6  ;;  %v67_v12 = vunpack.c.l.bf16 %v16_v7  ;;  %v68_v13 = vunpack.c.h.bf16 %v16_v7  ;;  %v69_v18 = vunpack.c.l.bf16 %v17_v8  ;;  %v1173_v20 = vld [vmem:[%s1666_s0 + $0x30] sm:$0xff]  ;;  %v1178_v21 = vld [vmem:[%s1666_s0 + $0x38] sm:$0xff] }
   0x4   :  { %v1163_v14 = vld [vmem:[%s1666_s0 + $0x20] sm:$0xff]  ;;  %v165_v16 = vsub.s32 0, %v164_v5  ;;  %v169_v17 = vsub.s32 1, %v164_v5  ;;  %v70_v19 = vunpack.c.h.bf16 %v17_v8  ;;  %v73_v24 = vunpack.c.l.bf16 %v1168_v15 }
   0x5   :  { %v71_v22 = vunpack.c.l.bf16 %v1163_v14  ;;  %v72_v23 = vunpack.c.h.bf16 %v1163_v14  ;;  %v74_v25 = vunpack.c.h.bf16 %v1168_v15  ;;  %v75_v30 = vunpack.c.l.bf16 %v1173_v20 }
   0x6   :  { %v1184_v26 = vrot.slane %v161_v2, %v165_v16  ;;  %v1186_v27 = vrot.slane %v161_v2, %v169_v17  ;;  %v1188_v28 = vrot.slane %v271_v9, %v165_v16  ;;  %v1190_v29 = vrot.slane %v271_v9, %v169_v17 }
   0x7   :  { %v76_v31 = vunpack.c.h.bf16 %v1173_v20  ;;  %v77_v32 = vunpack.c.l.bf16 %v1178_v21  ;;  %v78_v33 = vunpack.c.h.bf16 %v1178_v21 }
   0x8   :  { %v173_v34 = vmul.f32 %v1184_v26, %v63_v3  ;;  %v174_v35 = vmul.f32 %v1186_v27, %v64_v4  ;;  %v175_v36 = vmul.f32 %v1184_v26, %v65_v10  ;;  %v176_v37 = vmul.f32 %v1186_v27, %v66_v11 }
   0x9   :  { %v177_v38 = vmul.f32 %v1184_v26, %v67_v12  ;;  %v178_v39 = vmul.f32 %v1186_v27, %v68_v13  ;;  %v179_v40 = vmul.f32 %v1184_v26, %v69_v18  ;;  %v180_v41 = vmul.f32 %v1186_v27, %v70_v19 }
   0xa   :  { %v283_v42 = vadd.f32 %v1188_v28, %v173_v34  ;;  %v284_v43 = vadd.f32 %v1190_v29, %v174_v35  ;;  %v285_v44 = vadd.f32 %v1188_v28, %v175_v36  ;;  %v286_v45 = vadd.f32 %v1190_v29, %v176_v37  ;;  %v23_v37 = vld [vmem:[%s1666_s0 + $0x48] sm:$0xff] }
   0xb   :  { %v287_v46 = vadd.f32 %v1188_v28, %v177_v38  ;;  %v288_v47 = vadd.f32 %v1190_v29, %v178_v39  ;;  %v289_v48 = vadd.f32 %v1188_v28, %v179_v40  ;;  %v290_v49 = vadd.f32 %v1190_v29, %v180_v41 }
   0xc   :  { %vm381_vm0 = vcmp.ge.f32.partialorder %v283_v42, 0.0  ;;  %vm382_vm1 = vcmp.ge.f32.partialorder %v284_v43, 0.0  ;;  %v479_v50 = vmul.f32 0.2, %v283_v42  ;;  %v480_v51 = vmul.f32 0.2, %v284_v43 }
   0xd   :  { %vm383_vm2 = vcmp.ge.f32.partialorder %v285_v44, 0.0  ;;  %vm384_vm3 = vcmp.ge.f32.partialorder %v286_v45, 0.0  ;;  %v481_v52 = vmul.f32 0.2, %v285_v44  ;;  %v482_v53 = vmul.f32 0.2, %v286_v45 }
   0xe   :  { %v577_v54 = vsel %vm381_vm0, %v283_v42, %v479_v50  ;;  %v578_v55 = vsel %vm382_vm1, %v284_v43, %v480_v51  ;;  %vm385_vm4 = vcmp.ge.f32.partialorder %v287_v46, 0.0  ;;  %vm386_vm5 = vcmp.ge.f32.partialorder %v288_v47, 0.0 }
   0xf   :  { %v1073_v56 = vpack.c.bf16 %v578_v55, %v577_v54  ;;  %v579_v57 = vsel %vm383_vm2, %v285_v44, %v481_v52  ;;  %v580_v58 = vsel %vm384_vm3, %v286_v45, %v482_v53  ;;  %v483_v59 = vmul.f32 0.2, %v287_v46 }
  0x10   :  { %v1074_v60 = vpack.c.bf16 %v580_v58, %v579_v57  ;;  %v484_v61 = vmul.f32 0.2, %v288_v47  ;;  %vm387_vm6 = vcmp.ge.f32.partialorder %v289_v48, 0.0  ;;  %vm388_vm7 = vcmp.ge.f32.partialorder %v290_v49, 0.0 }
  0x11   :  { %971 = vst [vmem:[%s1669_s3] sm:$0xff] %v1073_v56  ;;  %v581_v62 = vsel %vm385_vm4, %v287_v46, %v483_v59  ;;  %v485_v63 = vmul.f32 0.2, %v289_v48  ;;  %v486_v0 = vmul.f32 0.2, %v290_v49  ;;  %v181_v1 = vmul.f32 %v1184_v26, %v71_v22  ;;  %v24_v46 = vld [vmem:[%s1666_s0 + $0x50] sm:$0xff] }
  0x12   :  { %972 = vst [vmem:[%s1669_s3 + $0x8] sm:$0xff] %v1074_v60  ;;  %v582_v2 = vsel %vm386_vm5, %v288_v47, %v484_v61  ;;  %v182_v3 = vmul.f32 %v1186_v27, %v72_v23  ;;  %v183_v4 = vmul.f32 %v1184_v26, %v73_v24  ;;  %v184_v5 = vmul.f32 %v1186_v27, %v74_v25 }
  0x13   :  { %v1075_v6 = vpack.c.bf16 %v582_v2, %v581_v62  ;;  %v583_v7 = vsel %vm387_vm6, %v289_v48, %v485_v63  ;;  %v584_v8 = vsel %vm388_vm7, %v290_v49, %v486_v0  ;;  %v291_v9 = vadd.f32 %v1188_v28, %v181_v1  ;;  %v25_v1 = vld [vmem:[%s1666_s0 + $0x58] sm:$0xff] }
  0x14   :  { %v1076_v10 = vpack.c.bf16 %v584_v8, %v583_v7  ;;  %v292_v11 = vadd.f32 %v1190_v29, %v182_v3  ;;  %v293_v12 = vadd.f32 %v1188_v28, %v183_v4  ;;  %v294_v13 = vadd.f32 %v1190_v29, %v184_v5 }
  0x15   :  { %973 = vst [vmem:[%s1669_s3 + $0x10] sm:$0xff] %v1075_v6  ;;  %vm389_vm8 = vcmp.ge.f32.partialorder %v291_v9, 0.0  ;;  %v487_v14 = vmul.f32 0.2, %v291_v9  ;;  %v185_v15 = vmul.f32 %v1184_v26, %v75_v30  ;;  %v186_v16 = vmul.f32 %v1186_v27, %v76_v31  ;;  %v22_v31 = vld [vmem:[%s1666_s0 + $0x40] sm:$0xff] }
  0x16   :  { %974 = vst [vmem:[%s1669_s3 + $0x18] sm:$0xff] %v1076_v10  ;;  %vm390_vm9 = vcmp.ge.f32.partialorder %v292_v11, 0.0  ;;  %v488_v17 = vmul.f32 0.2, %v292_v11  ;;  %vm391_vm10 = vcmp.ge.f32.partialorder %v293_v12, 0.0  ;;  %vm392_vm11 = vcmp.ge.f32.partialorder %v294_v13, 0.0 }
  0x17   :  { %v585_v18 = vsel %vm389_vm8, %v291_v9, %v487_v14  ;;  %v489_v19 = vmul.f32 0.2, %v293_v12  ;;  %v490_v20 = vmul.f32 0.2, %v294_v13  ;;  %v295_v22 = vadd.f32 %v1188_v28, %v185_v15  ;;  %v26_v10 = vld [vmem:[%s1666_s0 + $0x60] sm:$0xff]  ;;  %v27_v15 = vld [vmem:[%s1666_s0 + $0x68] sm:$0xff] }
  0x18   :  { %v586_v23 = vsel %vm390_vm9, %v292_v11, %v488_v17  ;;  %v296_v24 = vadd.f32 %v1190_v29, %v186_v16  ;;  %v187_v25 = vmul.f32 %v1184_v26, %v77_v32  ;;  %v188_v30 = vmul.f32 %v1186_v27, %v78_v33 }
  0x19   :  { %v1077_v34 = vpack.c.bf16 %v586_v23, %v585_v18  ;;  %v587_v35 = vsel %vm391_vm10, %v293_v12, %v489_v19  ;;  %v588_v36 = vsel %vm392_vm11, %v294_v13, %v490_v20  ;;  %vm393_vm12 = vcmp.ge.f32.partialorder %v295_v22, 0.0 }
  0x1a   :  { %v1078_v38 = vpack.c.bf16 %v588_v36, %v587_v35  ;;  %vm394_vm13 = vcmp.ge.f32.partialorder %v296_v24, 0.0  ;;  %v491_v39 = vmul.f32 0.2, %v295_v22  ;;  %v492_v32 = vmul.f32 0.2, %v296_v24 }
  0x1b   :  { %975 = vst [vmem:[%s1669_s3 + $0x20] sm:$0xff] %v1077_v34  ;;  %v297_v21 = vadd.f32 %v1188_v28, %v187_v25  ;;  %v298_v33 = vadd.f32 %v1190_v29, %v188_v30  ;;  %v79_v40 = vunpack.c.l.bf16 %v22_v31  ;;  %v80_v41 = vunpack.c.h.bf16 %v22_v31 }
  0x1c   :  { %976 = vst [vmem:[%s1669_s3 + $0x28] sm:$0xff] %v1078_v38  ;;  %v589_v42 = vsel %vm393_vm12, %v295_v22, %v491_v39  ;;  %v590_v43 = vsel %vm394_vm13, %v296_v24, %v492_v32  ;;  %v81_v44 = vunpack.c.l.bf16 %v23_v37  ;;  %v82_v45 = vunpack.c.h.bf16 %v23_v37  ;;  %v28_v37 = vld [vmem:[%s1666_s0 + $0x70] sm:$0xff] }
  0x1d   :  { %v1079_v47 = vpack.c.bf16 %v590_v43, %v589_v42  ;;  %vm395_vm14 = vcmp.ge.f32.partialorder %v297_v21, 0.0  ;;  %vm396_vm15 = vcmp.ge.f32.partialorder %v298_v33, 0.0  ;;  %v493_v48 = vmul.f32 0.2, %v297_v21 }
  0x1e   :  { %v494_v49 = vmul.f32 0.2, %v298_v33  ;;  %v189_v50 = vmul.f32 %v1184_v26, %v79_v40  ;;  %v190_v51 = vmul.f32 %v1186_v27, %v80_v41  ;;  %v191_v52 = vmul.f32 %v1184_v26, %v81_v44 }
  0x1f   :  { %977 = vst [vmem:[%s1669_s3 + $0x30] sm:$0xff] %v1079_v47  ;;  %v591_v53 = vsel %vm395_vm14, %v297_v21, %v493_v48  ;;  %v192_v54 = vmul.f32 %v1186_v27, %v82_v45  ;;  %v83_v55 = vunpack.c.l.bf16 %v24_v46  ;;  %v84_v56 = vunpack.c.h.bf16 %v24_v46 }
  0x20   :  { %v592_v57 = vsel %vm396_vm15, %v298_v33, %v494_v49  ;;  %v299_v58 = vadd.f32 %v1188_v28, %v189_v50  ;;  %v300_v59 = vadd.f32 %v1190_v29, %v190_v51  ;;  %v301_v60 = vadd.f32 %v1188_v28, %v191_v52 }
  0x21   :  { %v1080_v61 = vpack.c.bf16 %v592_v57, %v591_v53  ;;  %v302_v62 = vadd.f32 %v1190_v29, %v192_v54  ;;  %v193_v63 = vmul.f32 %v1184_v26, %v83_v55  ;;  %v194_v0 = vmul.f32 %v1186_v27, %v84_v56  ;;  %v29_v53 = vld [vmem:[%s1666_s0 + $0x78] sm:$0xff] }
  0x22   :  { %vm397_vm0 = vcmp.ge.f32.partialorder %v299_v58, 0.0  ;;  %vm398_vm1 = vcmp.ge.f32.partialorder %v300_v59, 0.0  ;;  %v495_v2 = vmul.f32 0.2, %v299_v58  ;;  %v496_v3 = vmul.f32 0.2, %v300_v59 }
  0x23   :  { %978 = vst [vmem:[%s1669_s3 + $0x38] sm:$0xff] %v1080_v61  ;;  %vm399_vm2 = vcmp.ge.f32.partialorder %v301_v60, 0.0  ;;  %vm400_vm3 = vcmp.ge.f32.partialorder %v302_v62, 0.0  ;;  %v497_v4 = vmul.f32 0.2, %v301_v60  ;;  %v303_v8 = vadd.f32 %v1188_v28, %v193_v63 }
  0x24   :  { %v498_v5 = vmul.f32 0.2, %v302_v62  ;;  %v593_v6 = vsel %vm397_vm0, %v299_v58, %v495_v2  ;;  %v594_v7 = vsel %vm398_vm1, %v300_v59, %v496_v3  ;;  %v304_v9 = vadd.f32 %v1190_v29, %v194_v0  ;;  %v30_v58 = vld [vmem:[%s1666_s0 + $0x80] sm:$0xff]  ;;  %v31_v59 = vld [vmem:[%s1666_s0 + $0x88] sm:$0xff] }
  0x25   :  { %v1081_v11 = vpack.c.bf16 %v594_v7, %v593_v6  ;;  %v595_v12 = vsel %vm399_vm2, %v301_v60, %v497_v4  ;;  %v85_v14 = vunpack.c.l.bf16 %v25_v1  ;;  %vm401_vm4 = vcmp.ge.f32.partialorder %v303_v8, 0.0 }
  0x26   :  { %v596_v13 = vsel %vm400_vm3, %v302_v62, %v498_v5  ;;  %vm402_vm5 = vcmp.ge.f32.partialorder %v304_v9, 0.0  ;;  %v499_v17 = vmul.f32 0.2, %v303_v8  ;;  %v500_v18 = vmul.f32 0.2, %v304_v9 }
  0x27   :  { %v1082_v16 = vpack.c.bf16 %v596_v13, %v595_v12  ;;  %979 = vst [vmem:[%s1669_s3 + $0x40] sm:$0xff] %v1081_v11  ;;  %v86_v19 = vunpack.c.h.bf16 %v25_v1  ;;  %v195_v20 = vmul.f32 %v1184_v26, %v85_v14  ;;  %v87_v22 = vunpack.c.l.bf16 %v26_v10 }
  0x28   :  { %v597_v23 = vsel %vm401_vm4, %v303_v8, %v499_v17  ;;  %v88_v24 = vunpack.c.h.bf16 %v26_v10  ;;  %v89_v25 = vunpack.c.l.bf16 %v27_v15  ;;  %v90_v30 = vunpack.c.h.bf16 %v27_v15 }
  0x29   :  { %980 = vst [vmem:[%s1669_s3 + $0x48] sm:$0xff] %v1082_v16  ;;  %v598_v31 = vsel %vm402_vm5, %v304_v9, %v500_v18  ;;  %v196_v34 = vmul.f32 %v1186_v27, %v86_v19  ;;  %v305_v35 = vadd.f32 %v1188_v28, %v195_v20  ;;  %v197_v36 = vmul.f32 %v1184_v26, %v87_v22 }
  0x2a   :  { %v1083_v38 = vpack.c.bf16 %v598_v31, %v597_v23  ;;  %v198_v39 = vmul.f32 %v1186_v27, %v88_v24  ;;  %v199_v32 = vmul.f32 %v1184_v26, %v89_v25  ;;  %v200_v21 = vmul.f32 %v1186_v27, %v90_v30  ;;  %v32_v25 = vld [vmem:[%s1666_s0 + $0x90] sm:$0xff] }
  0x2b   :  { %v306_v33 = vadd.f32 %v1190_v29, %v196_v34  ;;  %vm403_vm6 = vcmp.ge.f32.partialorder %v305_v35, 0.0  ;;  %v501_v40 = vmul.f32 0.2, %v305_v35  ;;  %v307_v41 = vadd.f32 %v1188_v28, %v197_v36 }
  0x2c   :  { %981 = vst [vmem:[%s1669_s3 + $0x50] sm:$0xff] %v1083_v38  ;;  %v308_v42 = vadd.f32 %v1190_v29, %v198_v39  ;;  %v309_v43 = vadd.f32 %v1188_v28, %v199_v32  ;;  %v310_v44 = vadd.f32 %v1190_v29, %v200_v21  ;;  %v91_v45 = vunpack.c.l.bf16 %v28_v37 }
  0x2d   :  { %vm404_vm7 = vcmp.ge.f32.partialorder %v306_v33, 0.0  ;;  %v502_v46 = vmul.f32 0.2, %v306_v33  ;;  %v599_v47 = vsel %vm403_vm6, %v305_v35, %v501_v40  ;;  %vm405_vm8 = vcmp.ge.f32.partialorder %v307_v41, 0.0 }
  0x2e   :  { %vm406_vm9 = vcmp.ge.f32.partialorder %v308_v42, 0.0  ;;  %v503_v48 = vmul.f32 0.2, %v307_v41  ;;  %v504_v49 = vmul.f32 0.2, %v308_v42  ;;  %vm407_vm10 = vcmp.ge.f32.partialorder %v309_v43, 0.0 }
  0x2f   :  { %v600_v50 = vsel %vm404_vm7, %v306_v33, %v502_v46  ;;  %vm408_vm11 = vcmp.ge.f32.partialorder %v310_v44, 0.0  ;;  %v505_v51 = vmul.f32 0.2, %v309_v43  ;;  %v506_v52 = vmul.f32 0.2, %v310_v44  ;;  %v33_v33 = vld [vmem:[%s1666_s0 + $0x98] sm:$0xff] }
  0x30   :  { %v1084_v54 = vpack.c.bf16 %v600_v50, %v599_v47  ;;  %v601_v55 = vsel %vm405_vm8, %v307_v41, %v503_v48  ;;  %v602_v56 = vsel %vm406_vm9, %v308_v42, %v504_v49  ;;  %v92_v57 = vunpack.c.h.bf16 %v28_v37 }
  0x31   :  { %v1085_v60 = vpack.c.bf16 %v602_v56, %v601_v55  ;;  %v603_v61 = vsel %vm407_vm10, %v309_v43, %v505_v51  ;;  %v604_v62 = vsel %vm408_vm11, %v310_v44, %v506_v52  ;;  %v201_v63 = vmul.f32 %v1184_v26, %v91_v45  ;;  %v34_v44 = vld [vmem:[%s1666_s0 + $0xa0] sm:$0xff] }
  0x32   :  { %982 = vst [vmem:[%s1669_s3 + $0x58] sm:$0xff] %v1084_v54  ;;  %v1086_v0 = vpack.c.bf16 %v604_v62, %v603_v61  ;;  %v202_v1 = vmul.f32 %v1186_v27, %v92_v57  ;;  %v93_v2 = vunpack.c.l.bf16 %v29_v53  ;;  %v94_v3 = vunpack.c.h.bf16 %v29_v53 }
  0x33   :  { %983 = vst [vmem:[%s1669_s3 + $0x60] sm:$0xff] %v1085_v60  ;;  %v311_v4 = vadd.f32 %v1188_v28, %v201_v63  ;;  %v95_v5 = vunpack.c.l.bf16 %v30_v58  ;;  %v96_v6 = vunpack.c.h.bf16 %v30_v58  ;;  %v97_v7 = vunpack.c.l.bf16 %v31_v59 }
  0x34   :  { %984 = vst [vmem:[%s1669_s3 + $0x68] sm:$0xff] %v1086_v0  ;;  %v312_v8 = vadd.f32 %v1190_v29, %v202_v1  ;;  %v203_v9 = vmul.f32 %v1184_v26, %v93_v2  ;;  %v204_v10 = vmul.f32 %v1186_v27, %v94_v3  ;;  %v98_v11 = vunpack.c.h.bf16 %v31_v59  ;;  %v35_v59 = vld [vmem:[%s1666_s0 + $0xa8] sm:$0xff] }
  0x35   :  { %vm409_vm12 = vcmp.ge.f32.partialorder %v311_v4, 0.0  ;;  %v507_v12 = vmul.f32 0.2, %v311_v4  ;;  %v205_v13 = vmul.f32 %v1184_v26, %v95_v5  ;;  %v206_v14 = vmul.f32 %v1186_v27, %v96_v6 }
  0x36   :  { %vm410_vm13 = vcmp.ge.f32.partialorder %v312_v8, 0.0  ;;  %v508_v15 = vmul.f32 0.2, %v312_v8  ;;  %v313_v16 = vadd.f32 %v1188_v28, %v203_v9  ;;  %v314_v17 = vadd.f32 %v1190_v29, %v204_v10 }
  0x37   :  { %v605_v18 = vsel %vm409_vm12, %v311_v4, %v507_v12  ;;  %v315_v19 = vadd.f32 %v1188_v28, %v205_v13  ;;  %v316_v20 = vadd.f32 %v1190_v29, %v206_v14  ;;  %v207_v22 = vmul.f32 %v1184_v26, %v97_v7  ;;  %v36_v12 = vld [vmem:[%s1666_s0 + $0xb0] sm:$0xff] }
  0x38   :  { %v606_v23 = vsel %vm410_vm13, %v312_v8, %v508_v15  ;;  %vm411_vm14 = vcmp.ge.f32.partialorder %v313_v16, 0.0  ;;  %vm412_vm15 = vcmp.ge.f32.partialorder %v314_v17, 0.0  ;;  %v509_v24 = vmul.f32 0.2, %v313_v16 }
  0x39   :  { %v1087_v30 = vpack.c.bf16 %v606_v23, %v605_v18  ;;  %v510_v31 = vmul.f32 0.2, %v314_v17  ;;  %vm413_vm0 = vcmp.ge.f32.partialorder %v315_v19, 0.0  ;;  %vm414_vm1 = vcmp.ge.f32.partialorder %v316_v20, 0.0 }
  0x3a   :  { %v607_v34 = vsel %vm411_vm14, %v313_v16, %v509_v24  ;;  %v511_v35 = vmul.f32 0.2, %v315_v19  ;;  %v512_v36 = vmul.f32 0.2, %v316_v20  ;;  %v208_v37 = vmul.f32 %v1186_v27, %v98_v11  ;;  %v37_v16 = vld [vmem:[%s1666_s0 + $0xb8] sm:$0xff] }
  0x3b   :  { %985 = vst [vmem:[%s1669_s3 + $0x70] sm:$0xff] %v1087_v30  ;;  %v608_v38 = vsel %vm412_vm15, %v314_v17, %v510_v31  ;;  %v317_v39 = vadd.f32 %v1188_v28, %v207_v22  ;;  %v99_v32 = vunpack.c.l.bf16 %v32_v25  ;;  %v100_v21 = vunpack.c.h.bf16 %v32_v25 }
  0x3c   :  { %v1088_v40 = vpack.c.bf16 %v608_v38, %v607_v34  ;;  %v609_v41 = vsel %vm413_vm0, %v315_v19, %v511_v35  ;;  %v610_v42 = vsel %vm414_vm1, %v316_v20, %v512_v36  ;;  %v318_v43 = vadd.f32 %v1190_v29, %v208_v37 }
  0x3d   :  { %v1089_v45 = vpack.c.bf16 %v610_v42, %v609_v41  ;;  %vm415_vm2 = vcmp.ge.f32.partialorder %v317_v39, 0.0  ;;  %v513_v46 = vmul.f32 0.2, %v317_v39  ;;  %v209_v47 = vmul.f32 %v1184_v26, %v99_v32 }
  0x3e   :  { %986 = vst [vmem:[%s1669_s3 + $0x78] sm:$0xff] %v1088_v40  ;;  %vm416_vm3 = vcmp.ge.f32.partialorder %v318_v43, 0.0  ;;  %v514_v48 = vmul.f32 0.2, %v318_v43  ;;  %v210_v49 = vmul.f32 %v1186_v27, %v100_v21  ;;  %v101_v50 = vunpack.c.l.bf16 %v33_v33 }
  0x3f   :  { %987 = vst [vmem:[%s1669_s3 + $0x80] sm:$0xff] %v1089_v45  ;;  %v611_v51 = vsel %vm415_vm2, %v317_v39, %v513_v46  ;;  %v319_v52 = vadd.f32 %v1188_v28, %v209_v47  ;;  %v102_v53 = vunpack.c.h.bf16 %v33_v33  ;;  %v103_v54 = vunpack.c.l.bf16 %v34_v44  ;;  %v38_v39 = vld [vmem:[%s1666_s0 + $0xc0] sm:$0xff] }
  0x40   :  { %v612_v55 = vsel %vm416_vm3, %v318_v43, %v514_v48  ;;  %v320_v56 = vadd.f32 %v1190_v29, %v210_v49  ;;  %v211_v57 = vmul.f32 %v1184_v26, %v101_v50  ;;  %v104_v58 = vunpack.c.h.bf16 %v34_v44  ;;  %v39_v50 = vld [vmem:[%s1666_s0 + $0xc8] sm:$0xff] }
  0x41   :  { %v1090_v60 = vpack.c.bf16 %v612_v55, %v611_v51  ;;  %vm417_vm4 = vcmp.ge.f32.partialorder %v319_v52, 0.0  ;;  %v515_v61 = vmul.f32 0.2, %v319_v52  ;;  %v212_v62 = vmul.f32 %v1186_v27, %v102_v53 }
  0x42   :  { %vm418_vm5 = vcmp.ge.f32.partialorder %v320_v56, 0.0  ;;  %v516_v63 = vmul.f32 0.2, %v320_v56  ;;  %v321_v0 = vadd.f32 %v1188_v28, %v211_v57  ;;  %v213_v1 = vmul.f32 %v1184_v26, %v103_v54 }
  0x43   :  { %988 = vst [vmem:[%s1669_s3 + $0x88] sm:$0xff] %v1090_v60  ;;  %v613_v2 = vsel %vm417_vm4, %v319_v52, %v515_v61  ;;  %v322_v3 = vadd.f32 %v1190_v29, %v212_v62  ;;  %v214_v4 = vmul.f32 %v1186_v27, %v104_v58  ;;  %v105_v5 = vunpack.c.l.bf16 %v35_v59  ;;  %v40_v60 = vld [vmem:[%s1666_s0 + $0xd0] sm:$0xff]  ;;  %v41_v61 = vld [vmem:[%s1666_s0 + $0xd8] sm:$0xff] }
  0x44   :  { %v614_v6 = vsel %vm418_vm5, %v320_v56, %v516_v63  ;;  %vm419_vm6 = vcmp.ge.f32.partialorder %v321_v0, 0.0  ;;  %v517_v7 = vmul.f32 0.2, %v321_v0  ;;  %v323_v8 = vadd.f32 %v1188_v28, %v213_v1 }
  0x45   :  { %v1091_v9 = vpack.c.bf16 %v614_v6, %v613_v2  ;;  %vm420_vm7 = vcmp.ge.f32.partialorder %v322_v3, 0.0  ;;  %v518_v10 = vmul.f32 0.2, %v322_v3  ;;  %v324_v11 = vadd.f32 %v1190_v29, %v214_v4 }
  0x46   :  { %v615_v13 = vsel %vm419_vm6, %v321_v0, %v517_v7  ;;  %vm421_vm8 = vcmp.ge.f32.partialorder %v323_v8, 0.0  ;;  %v519_v14 = vmul.f32 0.2, %v323_v8  ;;  %v106_v15 = vunpack.c.h.bf16 %v35_v59 }
  0x47   :  { %989 = vst [vmem:[%s1669_s3 + $0x90] sm:$0xff] %v1091_v9  ;;  %v616_v17 = vsel %vm420_vm7, %v322_v3, %v518_v10  ;;  %vm422_vm9 = vcmp.ge.f32.partialorder %v324_v11, 0.0  ;;  %v520_v18 = vmul.f32 0.2, %v324_v11  ;;  %v215_v19 = vmul.f32 %v1184_v26, %v105_v5 }
  0x48   :  { %v1092_v20 = vpack.c.bf16 %v616_v17, %v615_v13  ;;  %v617_v22 = vsel %vm421_vm8, %v323_v8, %v519_v14  ;;  %v216_v23 = vmul.f32 %v1186_v27, %v106_v15  ;;  %v107_v24 = vunpack.c.l.bf16 %v36_v12 }
  0x49   :  { %v618_v25 = vsel %vm422_vm9, %v324_v11, %v520_v18  ;;  %v325_v30 = vadd.f32 %v1188_v28, %v215_v19  ;;  %v108_v31 = vunpack.c.h.bf16 %v36_v12  ;;  %v109_v34 = vunpack.c.l.bf16 %v37_v16 }
  0x4a   :  { %990 = vst [vmem:[%s1669_s3 + $0x98] sm:$0xff] %v1092_v20  ;;  %v1093_v35 = vpack.c.bf16 %v618_v25, %v617_v22  ;;  %v326_v36 = vadd.f32 %v1190_v29, %v216_v23  ;;  %v217_v37 = vmul.f32 %v1184_v26, %v107_v24  ;;  %v110_v38 = vunpack.c.h.bf16 %v37_v16 }
  0x4b   :  { %vm423_vm10 = vcmp.ge.f32.partialorder %v325_v30, 0.0  ;;  %v521_v32 = vmul.f32 0.2, %v325_v30  ;;  %v218_v21 = vmul.f32 %v1186_v27, %v108_v31  ;;  %v219_v33 = vmul.f32 %v1184_v26, %v109_v34  ;;  %v42_v31 = vld [vmem:[%s1666_s0 + $0xe0] sm:$0xff] }
  0x4c   :  { %991 = vst [vmem:[%s1669_s3 + $0xa0] sm:$0xff] %v1093_v35  ;;  %vm424_vm11 = vcmp.ge.f32.partialorder %v326_v36, 0.0  ;;  %v522_v40 = vmul.f32 0.2, %v326_v36  ;;  %v327_v41 = vadd.f32 %v1188_v28, %v217_v37  ;;  %v220_v42 = vmul.f32 %v1186_v27, %v110_v38  ;;  %v43_v37 = vld [vmem:[%s1666_s0 + $0xe8] sm:$0xff] }
  0x4d   :  { %v619_v43 = vsel %vm423_vm10, %v325_v30, %v521_v32  ;;  %v328_v44 = vadd.f32 %v1190_v29, %v218_v21  ;;  %v329_v45 = vadd.f32 %v1188_v28, %v219_v33  ;;  %v111_v46 = vunpack.c.l.bf16 %v38_v39 }
  0x4e   :  { %v620_v47 = vsel %vm424_vm11, %v326_v36, %v522_v40  ;;  %vm425_vm12 = vcmp.ge.f32.partialorder %v327_v41, 0.0  ;;  %v523_v48 = vmul.f32 0.2, %v327_v41  ;;  %v330_v49 = vadd.f32 %v1190_v29, %v220_v42 }
  0x4f   :  { %v1094_v51 = vpack.c.bf16 %v620_v47, %v619_v43  ;;  %vm426_vm13 = vcmp.ge.f32.partialorder %v328_v44, 0.0  ;;  %v524_v52 = vmul.f32 0.2, %v328_v44  ;;  %vm427_vm14 = vcmp.ge.f32.partialorder %v329_v45, 0.0 }
  0x50   :  { %v621_v53 = vsel %vm425_vm12, %v327_v41, %v523_v48  ;;  %vm428_vm15 = vcmp.ge.f32.partialorder %v330_v49, 0.0  ;;  %v525_v54 = vmul.f32 0.2, %v329_v45  ;;  %v526_v55 = vmul.f32 0.2, %v330_v49 }
  0x51   :  { %992 = vst [vmem:[%s1669_s3 + $0xa8] sm:$0xff] %v1094_v51  ;;  %v622_v56 = vsel %vm426_vm13, %v328_v44, %v524_v52  ;;  %v112_v57 = vunpack.c.h.bf16 %v38_v39  ;;  %v221_v58 = vmul.f32 %v1184_v26, %v111_v46  ;;  %v113_v59 = vunpack.c.l.bf16 %v39_v50  ;;  %v44_v46 = vld [vmem:[%s1666_s0 + $0xf0] sm:$0xff] }
  0x52   :  { %v1095_v62 = vpack.c.bf16 %v622_v56, %v621_v53  ;;  %v623_v63 = vsel %vm427_vm14, %v329_v45, %v525_v54  ;;  %v624_v0 = vsel %vm428_vm15, %v330_v49, %v526_v55  ;;  %v114_v1 = vunpack.c.h.bf16 %v39_v50 }
  0x53   :  { %v1096_v2 = vpack.c.bf16 %v624_v0, %v623_v63  ;;  %v222_v3 = vmul.f32 %v1186_v27, %v112_v57  ;;  %v331_v4 = vadd.f32 %v1188_v28, %v221_v58  ;;  %v223_v5 = vmul.f32 %v1184_v26, %v113_v59 }
  0x54   :  { %993 = vst [vmem:[%s1669_s3 + $0xb0] sm:$0xff] %v1095_v62  ;;  %v224_v6 = vmul.f32 %v1186_v27, %v114_v1  ;;  %v115_v7 = vunpack.c.l.bf16 %v40_v60  ;;  %v116_v8 = vunpack.c.h.bf16 %v40_v60  ;;  %v117_v9 = vunpack.c.l.bf16 %v41_v61  ;;  %v45_v1 = vld [vmem:[%s1666_s0 + $0xf8] sm:$0xff] }
  0x55   :  { %994 = vst [vmem:[%s1669_s3 + $0xb8] sm:$0xff] %v1096_v2  ;;  %v332_v10 = vadd.f32 %v1190_v29, %v222_v3  ;;  %vm429_vm0 = vcmp.ge.f32.partialorder %v331_v4, 0.0  ;;  %v527_v11 = vmul.f32 0.2, %v331_v4  ;;  %v333_v12 = vadd.f32 %v1188_v28, %v223_v5 }
  0x56   :  { %v334_v13 = vadd.f32 %v1190_v29, %v224_v6  ;;  %v225_v14 = vmul.f32 %v1184_v26, %v115_v7  ;;  %v226_v15 = vmul.f32 %v1186_v27, %v116_v8  ;;  %v118_v16 = vunpack.c.h.bf16 %v41_v61 }
  0x57   :  { %vm430_vm1 = vcmp.ge.f32.partialorder %v332_v10, 0.0  ;;  %v528_v17 = vmul.f32 0.2, %v332_v10  ;;  %v625_v18 = vsel %vm429_vm0, %v331_v4, %v527_v11  ;;  %vm431_vm2 = vcmp.ge.f32.partialorder %v333_v12, 0.0 }
  0x58   :  { %vm432_vm3 = vcmp.ge.f32.partialorder %v334_v13, 0.0  ;;  %v529_v19 = vmul.f32 0.2, %v333_v12  ;;  %v530_v20 = vmul.f32 0.2, %v334_v13  ;;  %v335_v22 = vadd.f32 %v1188_v28, %v225_v14 }
  0x59   :  { %v626_v23 = vsel %vm430_vm1, %v332_v10, %v528_v17  ;;  %v336_v24 = vadd.f32 %v1190_v29, %v226_v15  ;;  %v227_v25 = vmul.f32 %v1184_v26, %v117_v9  ;;  %v228_v30 = vmul.f32 %v1186_v27, %v118_v16  ;;  %v46_v10 = vld [vmem:[%s1666_s0 + $0x100] sm:$0xff]  ;;  %v47_v15 = vld [vmem:[%s1666_s0 + $0x108] sm:$0xff] }
  0x5a   :  { %v1097_v34 = vpack.c.bf16 %v626_v23, %v625_v18  ;;  %v627_v35 = vsel %vm431_vm2, %v333_v12, %v529_v19  ;;  %v628_v36 = vsel %vm432_vm3, %v334_v13, %v530_v20  ;;  %vm433_vm4 = vcmp.ge.f32.partialorder %v335_v22, 0.0 }
  0x5b   :  { %v1098_v38 = vpack.c.bf16 %v628_v36, %v627_v35  ;;  %vm434_vm5 = vcmp.ge.f32.partialorder %v336_v24, 0.0  ;;  %v531_v39 = vmul.f32 0.2, %v335_v22  ;;  %v532_v32 = vmul.f32 0.2, %v336_v24 }
  0x5c   :  { %995 = vst [vmem:[%s1669_s3 + $0xc0] sm:$0xff] %v1097_v34  ;;  %v337_v21 = vadd.f32 %v1188_v28, %v227_v25  ;;  %v338_v33 = vadd.f32 %v1190_v29, %v228_v30  ;;  %v119_v40 = vunpack.c.l.bf16 %v42_v31  ;;  %v120_v41 = vunpack.c.h.bf16 %v42_v31 }
  0x5d   :  { %996 = vst [vmem:[%s1669_s3 + $0xc8] sm:$0xff] %v1098_v38  ;;  %v629_v42 = vsel %vm433_vm4, %v335_v22, %v531_v39  ;;  %v630_v43 = vsel %vm434_vm5, %v336_v24, %v532_v32  ;;  %v121_v44 = vunpack.c.l.bf16 %v43_v37  ;;  %v122_v45 = vunpack.c.h.bf16 %v43_v37  ;;  %v48_v37 = vld [vmem:[%s1666_s0 + $0x110] sm:$0xff] }
  0x5e   :  { %v1099_v47 = vpack.c.bf16 %v630_v43, %v629_v42  ;;  %vm435_vm6 = vcmp.ge.f32.partialorder %v337_v21, 0.0  ;;  %vm436_vm7 = vcmp.ge.f32.partialorder %v338_v33, 0.0  ;;  %v533_v48 = vmul.f32 0.2, %v337_v21 }
  0x5f   :  { %v534_v49 = vmul.f32 0.2, %v338_v33  ;;  %v229_v50 = vmul.f32 %v1184_v26, %v119_v40  ;;  %v230_v51 = vmul.f32 %v1186_v27, %v120_v41  ;;  %v231_v52 = vmul.f32 %v1184_v26, %v121_v44 }
  0x60   :  { %997 = vst [vmem:[%s1669_s3 + $0xd0] sm:$0xff] %v1099_v47  ;;  %v631_v53 = vsel %vm435_vm6, %v337_v21, %v533_v48  ;;  %v232_v54 = vmul.f32 %v1186_v27, %v122_v45  ;;  %v123_v55 = vunpack.c.l.bf16 %v44_v46  ;;  %v124_v56 = vunpack.c.h.bf16 %v44_v46 }
  0x61   :  { %v632_v57 = vsel %vm436_vm7, %v338_v33, %v534_v49  ;;  %v339_v58 = vadd.f32 %v1188_v28, %v229_v50  ;;  %v340_v59 = vadd.f32 %v1190_v29, %v230_v51  ;;  %v341_v60 = vadd.f32 %v1188_v28, %v231_v52 }
  0x62   :  { %v1100_v61 = vpack.c.bf16 %v632_v57, %v631_v53  ;;  %v342_v62 = vadd.f32 %v1190_v29, %v232_v54  ;;  %v233_v63 = vmul.f32 %v1184_v26, %v123_v55  ;;  %v234_v0 = vmul.f32 %v1186_v27, %v124_v56  ;;  %v49_v53 = vld [vmem:[%s1666_s0 + $0x118] sm:$0xff] }
  0x63   :  { %vm437_vm8 = vcmp.ge.f32.partialorder %v339_v58, 0.0  ;;  %vm438_vm9 = vcmp.ge.f32.partialorder %v340_v59, 0.0  ;;  %v535_v2 = vmul.f32 0.2, %v339_v58  ;;  %v536_v3 = vmul.f32 0.2, %v340_v59 }
  0x64   :  { %998 = vst [vmem:[%s1669_s3 + $0xd8] sm:$0xff] %v1100_v61  ;;  %vm439_vm10 = vcmp.ge.f32.partialorder %v341_v60, 0.0  ;;  %vm440_vm11 = vcmp.ge.f32.partialorder %v342_v62, 0.0  ;;  %v537_v4 = vmul.f32 0.2, %v341_v60  ;;  %v343_v8 = vadd.f32 %v1188_v28, %v233_v63 }
  0x65   :  { %v538_v5 = vmul.f32 0.2, %v342_v62  ;;  %v633_v6 = vsel %vm437_vm8, %v339_v58, %v535_v2  ;;  %v634_v7 = vsel %vm438_vm9, %v340_v59, %v536_v3  ;;  %v344_v9 = vadd.f32 %v1190_v29, %v234_v0  ;;  %v50_v58 = vld [vmem:[%s1666_s0 + $0x120] sm:$0xff]  ;;  %v51_v59 = vld [vmem:[%s1666_s0 + $0x128] sm:$0xff] }
  0x66   :  { %v1101_v11 = vpack.c.bf16 %v634_v7, %v633_v6  ;;  %v635_v12 = vsel %vm439_vm10, %v341_v60, %v537_v4  ;;  %v125_v14 = vunpack.c.l.bf16 %v45_v1  ;;  %vm441_vm12 = vcmp.ge.f32.partialorder %v343_v8, 0.0 }
  0x67   :  { %v636_v13 = vsel %vm440_vm11, %v342_v62, %v538_v5  ;;  %vm442_vm13 = vcmp.ge.f32.partialorder %v344_v9, 0.0  ;;  %v539_v17 = vmul.f32 0.2, %v343_v8  ;;  %v540_v18 = vmul.f32 0.2, %v344_v9 }
  0x68   :  { %v1102_v16 = vpack.c.bf16 %v636_v13, %v635_v12  ;;  %999 = vst [vmem:[%s1669_s3 + $0xe0] sm:$0xff] %v1101_v11  ;;  %v126_v19 = vunpack.c.h.bf16 %v45_v1  ;;  %v235_v20 = vmul.f32 %v1184_v26, %v125_v14  ;;  %v127_v22 = vunpack.c.l.bf16 %v46_v10 }
  0x69   :  { %v637_v23 = vsel %vm441_vm12, %v343_v8, %v539_v17  ;;  %v128_v24 = vunpack.c.h.bf16 %v46_v10  ;;  %v129_v25 = vunpack.c.l.bf16 %v47_v15  ;;  %v130_v30 = vunpack.c.h.bf16 %v47_v15 }
  0x6a   :  { %1000 = vst [vmem:[%s1669_s3 + $0xe8] sm:$0xff] %v1102_v16  ;;  %v638_v31 = vsel %vm442_vm13, %v344_v9, %v540_v18  ;;  %v236_v34 = vmul.f32 %v1186_v27, %v126_v19  ;;  %v345_v35 = vadd.f32 %v1188_v28, %v235_v20  ;;  %v237_v36 = vmul.f32 %v1184_v26, %v127_v22 }
  0x6b   :  { %v1103_v38 = vpack.c.bf16 %v638_v31, %v637_v23  ;;  %v238_v39 = vmul.f32 %v1186_v27, %v128_v24  ;;  %v239_v32 = vmul.f32 %v1184_v26, %v129_v25  ;;  %v240_v21 = vmul.f32 %v1186_v27, %v130_v30  ;;  %v52_v25 = vld [vmem:[%s1666_s0 + $0x130] sm:$0xff] }
  0x6c   :  { %v346_v33 = vadd.f32 %v1190_v29, %v236_v34  ;;  %vm443_vm14 = vcmp.ge.f32.partialorder %v345_v35, 0.0  ;;  %v541_v40 = vmul.f32 0.2, %v345_v35  ;;  %v347_v41 = vadd.f32 %v1188_v28, %v237_v36 }
  0x6d   :  { %1001 = vst [vmem:[%s1669_s3 + $0xf0] sm:$0xff] %v1103_v38  ;;  %v348_v42 = vadd.f32 %v1190_v29, %v238_v39  ;;  %v349_v43 = vadd.f32 %v1188_v28, %v239_v32  ;;  %v350_v44 = vadd.f32 %v1190_v29, %v240_v21  ;;  %v131_v45 = vunpack.c.l.bf16 %v48_v37 }
  0x6e   :  { %vm444_vm15 = vcmp.ge.f32.partialorder %v346_v33, 0.0  ;;  %v542_v46 = vmul.f32 0.2, %v346_v33  ;;  %v639_v47 = vsel %vm443_vm14, %v345_v35, %v541_v40  ;;  %vm445_vm0 = vcmp.ge.f32.partialorder %v347_v41, 0.0 }
  0x6f   :  { %vm446_vm1 = vcmp.ge.f32.partialorder %v348_v42, 0.0  ;;  %v543_v48 = vmul.f32 0.2, %v347_v41  ;;  %v544_v49 = vmul.f32 0.2, %v348_v42  ;;  %vm447_vm2 = vcmp.ge.f32.partialorder %v349_v43, 0.0 }
  0x70   :  { %v640_v50 = vsel %vm444_vm15, %v346_v33, %v542_v46  ;;  %vm448_vm3 = vcmp.ge.f32.partialorder %v350_v44, 0.0  ;;  %v545_v51 = vmul.f32 0.2, %v349_v43  ;;  %v546_v52 = vmul.f32 0.2, %v350_v44  ;;  %v53_v33 = vld [vmem:[%s1666_s0 + $0x138] sm:$0xff] }
  0x71   :  { %v1104_v54 = vpack.c.bf16 %v640_v50, %v639_v47  ;;  %v641_v55 = vsel %vm445_vm0, %v347_v41, %v543_v48  ;;  %v642_v56 = vsel %vm446_vm1, %v348_v42, %v544_v49  ;;  %v132_v57 = vunpack.c.h.bf16 %v48_v37 }
  0x72   :  { %v1105_v60 = vpack.c.bf16 %v642_v56, %v641_v55  ;;  %v643_v61 = vsel %vm447_vm2, %v349_v43, %v545_v51  ;;  %v644_v62 = vsel %vm448_vm3, %v350_v44, %v546_v52  ;;  %v241_v63 = vmul.f32 %v1184_v26, %v131_v45  ;;  %v54_v44 = vld [vmem:[%s1666_s0 + $0x140] sm:$0xff] }
  0x73   :  { %1002 = vst [vmem:[%s1669_s3 + $0xf8] sm:$0xff] %v1104_v54  ;;  %v1106_v0 = vpack.c.bf16 %v644_v62, %v643_v61  ;;  %v242_v1 = vmul.f32 %v1186_v27, %v132_v57  ;;  %v133_v2 = vunpack.c.l.bf16 %v49_v53  ;;  %v134_v3 = vunpack.c.h.bf16 %v49_v53 }
  0x74   :  { %1003 = vst [vmem:[%s1669_s3 + $0x100] sm:$0xff] %v1105_v60  ;;  %v351_v4 = vadd.f32 %v1188_v28, %v241_v63  ;;  %v135_v5 = vunpack.c.l.bf16 %v50_v58  ;;  %v136_v6 = vunpack.c.h.bf16 %v50_v58  ;;  %v137_v7 = vunpack.c.l.bf16 %v51_v59 }
  0x75   :  { %1004 = vst [vmem:[%s1669_s3 + $0x108] sm:$0xff] %v1106_v0  ;;  %v352_v8 = vadd.f32 %v1190_v29, %v242_v1  ;;  %v243_v9 = vmul.f32 %v1184_v26, %v133_v2  ;;  %v244_v10 = vmul.f32 %v1186_v27, %v134_v3  ;;  %v138_v11 = vunpack.c.h.bf16 %v51_v59  ;;  %v55_v59 = vld [vmem:[%s1666_s0 + $0x148] sm:$0xff] }
  0x76   :  { %vm449_vm4 = vcmp.ge.f32.partialorder %v351_v4, 0.0  ;;  %v547_v12 = vmul.f32 0.2, %v351_v4  ;;  %v245_v13 = vmul.f32 %v1184_v26, %v135_v5  ;;  %v246_v14 = vmul.f32 %v1186_v27, %v136_v6 }
  0x77   :  { %vm450_vm5 = vcmp.ge.f32.partialorder %v352_v8, 0.0  ;;  %v548_v15 = vmul.f32 0.2, %v352_v8  ;;  %v353_v16 = vadd.f32 %v1188_v28, %v243_v9  ;;  %v354_v17 = vadd.f32 %v1190_v29, %v244_v10 }
  0x78   :  { %v645_v18 = vsel %vm449_vm4, %v351_v4, %v547_v12  ;;  %v355_v19 = vadd.f32 %v1188_v28, %v245_v13  ;;  %v356_v20 = vadd.f32 %v1190_v29, %v246_v14  ;;  %v247_v22 = vmul.f32 %v1184_v26, %v137_v7  ;;  %v56_v12 = vld [vmem:[%s1666_s0 + $0x150] sm:$0xff] }
  0x79   :  { %v646_v23 = vsel %vm450_vm5, %v352_v8, %v548_v15  ;;  %vm451_vm6 = vcmp.ge.f32.partialorder %v353_v16, 0.0  ;;  %vm452_vm7 = vcmp.ge.f32.partialorder %v354_v17, 0.0  ;;  %v549_v24 = vmul.f32 0.2, %v353_v16 }
  0x7a   :  { %v1107_v30 = vpack.c.bf16 %v646_v23, %v645_v18  ;;  %v550_v31 = vmul.f32 0.2, %v354_v17  ;;  %vm453_vm8 = vcmp.ge.f32.partialorder %v355_v19, 0.0  ;;  %vm454_vm9 = vcmp.ge.f32.partialorder %v356_v20, 0.0 }
  0x7b   :  { %v647_v34 = vsel %vm451_vm6, %v353_v16, %v549_v24  ;;  %v551_v35 = vmul.f32 0.2, %v355_v19  ;;  %v552_v36 = vmul.f32 0.2, %v356_v20  ;;  %v248_v37 = vmul.f32 %v1186_v27, %v138_v11  ;;  %v57_v16 = vld [vmem:[%s1666_s0 + $0x158] sm:$0xff] }
  0x7c   :  { %1005 = vst [vmem:[%s1669_s3 + $0x110] sm:$0xff] %v1107_v30  ;;  %v648_v38 = vsel %vm452_vm7, %v354_v17, %v550_v31  ;;  %v357_v39 = vadd.f32 %v1188_v28, %v247_v22  ;;  %v139_v32 = vunpack.c.l.bf16 %v52_v25  ;;  %v140_v21 = vunpack.c.h.bf16 %v52_v25 }
  0x7d   :  { %v1108_v40 = vpack.c.bf16 %v648_v38, %v647_v34  ;;  %v649_v41 = vsel %vm453_vm8, %v355_v19, %v551_v35  ;;  %v650_v42 = vsel %vm454_vm9, %v356_v20, %v552_v36  ;;  %v358_v43 = vadd.f32 %v1190_v29, %v248_v37 }
  0x7e   :  { %v1109_v45 = vpack.c.bf16 %v650_v42, %v649_v41  ;;  %vm455_vm10 = vcmp.ge.f32.partialorder %v357_v39, 0.0  ;;  %v553_v46 = vmul.f32 0.2, %v357_v39  ;;  %v249_v47 = vmul.f32 %v1184_v26, %v139_v32 }
  0x7f   :  { %1006 = vst [vmem:[%s1669_s3 + $0x118] sm:$0xff] %v1108_v40  ;;  %vm456_vm11 = vcmp.ge.f32.partialorder %v358_v43, 0.0  ;;  %v554_v48 = vmul.f32 0.2, %v358_v43  ;;  %v250_v49 = vmul.f32 %v1186_v27, %v140_v21  ;;  %v141_v50 = vunpack.c.l.bf16 %v53_v33 }
  0x80   :  { %1007 = vst [vmem:[%s1669_s3 + $0x120] sm:$0xff] %v1109_v45  ;;  %v651_v51 = vsel %vm455_vm10, %v357_v39, %v553_v46  ;;  %v359_v52 = vadd.f32 %v1188_v28, %v249_v47  ;;  %v142_v53 = vunpack.c.h.bf16 %v53_v33  ;;  %v143_v54 = vunpack.c.l.bf16 %v54_v44  ;;  %v58_v39 = vld [vmem:[%s1666_s0 + $0x160] sm:$0xff] }
  0x81   :  { %v652_v55 = vsel %vm456_vm11, %v358_v43, %v554_v48  ;;  %v360_v56 = vadd.f32 %v1190_v29, %v250_v49  ;;  %v251_v57 = vmul.f32 %v1184_v26, %v141_v50  ;;  %v144_v58 = vunpack.c.h.bf16 %v54_v44  ;;  %v59_v50 = vld [vmem:[%s1666_s0 + $0x168] sm:$0xff] }
  0x82   :  { %v1110_v60 = vpack.c.bf16 %v652_v55, %v651_v51  ;;  %vm457_vm12 = vcmp.ge.f32.partialorder %v359_v52, 0.0  ;;  %v555_v61 = vmul.f32 0.2, %v359_v52  ;;  %v252_v62 = vmul.f32 %v1186_v27, %v142_v53 }
  0x83   :  { %vm458_vm13 = vcmp.ge.f32.partialorder %v360_v56, 0.0  ;;  %v556_v63 = vmul.f32 0.2, %v360_v56  ;;  %v361_v0 = vadd.f32 %v1188_v28, %v251_v57  ;;  %v253_v1 = vmul.f32 %v1184_v26, %v143_v54 }
  0x84   :  { %1008 = vst [vmem:[%s1669_s3 + $0x128] sm:$0xff] %v1110_v60  ;;  %v653_v2 = vsel %vm457_vm12, %v359_v52, %v555_v61  ;;  %v362_v3 = vadd.f32 %v1190_v29, %v252_v62  ;;  %v254_v4 = vmul.f32 %v1186_v27, %v144_v58  ;;  %v145_v5 = vunpack.c.l.bf16 %v55_v59  ;;  %v60_v60 = vld [vmem:[%s1666_s0 + $0x170] sm:$0xff]  ;;  %v61_v61 = vld [vmem:[%s1666_s0 + $0x178] sm:$0xff] }
  0x85   :  { %v654_v6 = vsel %vm458_vm13, %v360_v56, %v556_v63  ;;  %vm459_vm14 = vcmp.ge.f32.partialorder %v361_v0, 0.0  ;;  %v557_v7 = vmul.f32 0.2, %v361_v0  ;;  %v363_v8 = vadd.f32 %v1188_v28, %v253_v1 }
  0x86   :  { %v1111_v9 = vpack.c.bf16 %v654_v6, %v653_v2  ;;  %vm460_vm15 = vcmp.ge.f32.partialorder %v362_v3, 0.0  ;;  %v558_v10 = vmul.f32 0.2, %v362_v3  ;;  %v364_v11 = vadd.f32 %v1190_v29, %v254_v4 }
  0x87   :  { %v655_v13 = vsel %vm459_vm14, %v361_v0, %v557_v7  ;;  %vm461_vm0 = vcmp.ge.f32.partialorder %v363_v8, 0.0  ;;  %v559_v14 = vmul.f32 0.2, %v363_v8  ;;  %v146_v15 = vunpack.c.h.bf16 %v55_v59 }
  0x88   :  { %1009 = vst [vmem:[%s1669_s3 + $0x130] sm:$0xff] %v1111_v9  ;;  %v656_v17 = vsel %vm460_vm15, %v362_v3, %v558_v10  ;;  %vm462_vm1 = vcmp.ge.f32.partialorder %v364_v11, 0.0  ;;  %v560_v18 = vmul.f32 0.2, %v364_v11  ;;  %v255_v19 = vmul.f32 %v1184_v26, %v145_v5 }
  0x89   :  { %v1112_v20 = vpack.c.bf16 %v656_v17, %v655_v13  ;;  %v657_v22 = vsel %vm461_vm0, %v363_v8, %v559_v14  ;;  %v256_v23 = vmul.f32 %v1186_v27, %v146_v15  ;;  %v147_v24 = vunpack.c.l.bf16 %v56_v12 }
  0x8a   :  { %v658_v25 = vsel %vm462_vm1, %v364_v11, %v560_v18  ;;  %v365_v30 = vadd.f32 %v1188_v28, %v255_v19  ;;  %v148_v31 = vunpack.c.h.bf16 %v56_v12  ;;  %v149_v34 = vunpack.c.l.bf16 %v57_v16 }
  0x8b   :  { %1010 = vst [vmem:[%s1669_s3 + $0x138] sm:$0xff] %v1112_v20  ;;  %v1113_v35 = vpack.c.bf16 %v658_v25, %v657_v22  ;;  %v366_v36 = vadd.f32 %v1190_v29, %v256_v23  ;;  %v257_v37 = vmul.f32 %v1184_v26, %v147_v24  ;;  %v150_v38 = vunpack.c.h.bf16 %v57_v16 }
  0x8c   :  { %vm463_vm2 = vcmp.ge.f32.partialorder %v365_v30, 0.0  ;;  %v561_v32 = vmul.f32 0.2, %v365_v30  ;;  %v258_v21 = vmul.f32 %v1186_v27, %v148_v31  ;;  %v259_v33 = vmul.f32 %v1184_v26, %v149_v34  ;;  %v62_v31 = vld [vmem:[%s1666_s0 + $0x180] sm:$0xff] }
  0x8d   :  { %1011 = vst [vmem:[%s1669_s3 + $0x140] sm:$0xff] %v1113_v35  ;;  %vm464_vm3 = vcmp.ge.f32.partialorder %v366_v36, 0.0  ;;  %v562_v40 = vmul.f32 0.2, %v366_v36  ;;  %v367_v41 = vadd.f32 %v1188_v28, %v257_v37  ;;  %v260_v42 = vmul.f32 %v1186_v27, %v150_v38 }
  0x8e   :  { %v659_v43 = vsel %vm463_vm2, %v365_v30, %v561_v32  ;;  %v368_v44 = vadd.f32 %v1190_v29, %v258_v21  ;;  %v369_v45 = vadd.f32 %v1188_v28, %v259_v33  ;;  %v151_v46 = vunpack.c.l.bf16 %v58_v39 }
  0x8f   :  { %v660_v47 = vsel %vm464_vm3, %v366_v36, %v562_v40  ;;  %vm465_vm4 = vcmp.ge.f32.partialorder %v367_v41, 0.0  ;;  %v563_v48 = vmul.f32 0.2, %v367_v41  ;;  %v370_v49 = vadd.f32 %v1190_v29, %v260_v42 }
  0x90   :  { %v1114_v51 = vpack.c.bf16 %v660_v47, %v659_v43  ;;  %vm466_vm5 = vcmp.ge.f32.partialorder %v368_v44, 0.0  ;;  %v564_v52 = vmul.f32 0.2, %v368_v44  ;;  %vm467_vm6 = vcmp.ge.f32.partialorder %v369_v45, 0.0 }
  0x91   :  { %v661_v53 = vsel %vm465_vm4, %v367_v41, %v563_v48  ;;  %vm468_vm7 = vcmp.ge.f32.partialorder %v370_v49, 0.0  ;;  %v565_v54 = vmul.f32 0.2, %v369_v45  ;;  %v566_v55 = vmul.f32 0.2, %v370_v49 }
  0x92   :  { %1012 = vst [vmem:[%s1669_s3 + $0x148] sm:$0xff] %v1114_v51  ;;  %v662_v56 = vsel %vm466_vm5, %v368_v44, %v564_v52  ;;  %v152_v57 = vunpack.c.h.bf16 %v58_v39  ;;  %v261_v58 = vmul.f32 %v1184_v26, %v151_v46  ;;  %v153_v59 = vunpack.c.l.bf16 %v59_v50 }
  0x93   :  { %v1115_v62 = vpack.c.bf16 %v662_v56, %v661_v53  ;;  %v663_v63 = vsel %vm467_vm6, %v369_v45, %v565_v54  ;;  %v664_v0 = vsel %vm468_vm7, %v370_v49, %v566_v55  ;;  %v154_v1 = vunpack.c.h.bf16 %v59_v50 }
  0x94   :  { %v1116_v2 = vpack.c.bf16 %v664_v0, %v663_v63  ;;  %v262_v3 = vmul.f32 %v1186_v27, %v152_v57  ;;  %v371_v4 = vadd.f32 %v1188_v28, %v261_v58  ;;  %v263_v5 = vmul.f32 %v1184_v26, %v153_v59 }
  0x95   :  { %1013 = vst [vmem:[%s1669_s3 + $0x150] sm:$0xff] %v1115_v62  ;;  %v264_v6 = vmul.f32 %v1186_v27, %v154_v1  ;;  %v155_v7 = vunpack.c.l.bf16 %v60_v60  ;;  %v156_v8 = vunpack.c.h.bf16 %v60_v60  ;;  %v157_v9 = vunpack.c.l.bf16 %v61_v61 }
  0x96   :  { %1014 = vst [vmem:[%s1669_s3 + $0x158] sm:$0xff] %v1116_v2  ;;  %v372_v10 = vadd.f32 %v1190_v29, %v262_v3  ;;  %vm469_vm8 = vcmp.ge.f32.partialorder %v371_v4, 0.0  ;;  %v567_v11 = vmul.f32 0.2, %v371_v4  ;;  %v373_v12 = vadd.f32 %v1188_v28, %v263_v5 }
  0x97   :  { %v374_v13 = vadd.f32 %v1190_v29, %v264_v6  ;;  %v265_v14 = vmul.f32 %v1184_v26, %v155_v7  ;;  %v266_v15 = vmul.f32 %v1186_v27, %v156_v8  ;;  %v158_v16 = vunpack.c.h.bf16 %v61_v61 }
  0x98   :  { %vm470_vm9 = vcmp.ge.f32.partialorder %v372_v10, 0.0  ;;  %v568_v17 = vmul.f32 0.2, %v372_v10  ;;  %v665_v18 = vsel %vm469_vm8, %v371_v4, %v567_v11  ;;  %vm471_vm10 = vcmp.ge.f32.partialorder %v373_v12, 0.0 }
  0x99   :  { %vm472_vm11 = vcmp.ge.f32.partialorder %v374_v13, 0.0  ;;  %v569_v19 = vmul.f32 0.2, %v373_v12  ;;  %v570_v20 = vmul.f32 0.2, %v374_v13  ;;  %v375_v22 = vadd.f32 %v1188_v28, %v265_v14 }
  0x9a   :  { %v666_v23 = vsel %vm470_vm9, %v372_v10, %v568_v17  ;;  %v376_v24 = vadd.f32 %v1190_v29, %v266_v15  ;;  %v267_v25 = vmul.f32 %v1184_v26, %v157_v9  ;;  %v268_v30 = vmul.f32 %v1186_v27, %v158_v16 }
  0x9b   :  { %v1117_v34 = vpack.c.bf16 %v666_v23, %v665_v18  ;;  %v667_v35 = vsel %vm471_vm10, %v373_v12, %v569_v19  ;;  %v668_v36 = vsel %vm472_vm11, %v374_v13, %v570_v20  ;;  %vm473_vm12 = vcmp.ge.f32.partialorder %v375_v22, 0.0 }
  0x9c   :  { %v1118_v37 = vpack.c.bf16 %v668_v36, %v667_v35  ;;  %vm474_vm13 = vcmp.ge.f32.partialorder %v376_v24, 0.0  ;;  %v571_v38 = vmul.f32 0.2, %v375_v22  ;;  %v572_v39 = vmul.f32 0.2, %v376_v24 }
  0x9d   :  { %1015 = vst [vmem:[%s1669_s3 + $0x160] sm:$0xff] %v1117_v34  ;;  %v377_v32 = vadd.f32 %v1188_v28, %v267_v25  ;;  %v378_v21 = vadd.f32 %v1190_v29, %v268_v30  ;;  %v159_v33 = vunpack.c.l.bf16 %v62_v31  ;;  %v160_v40 = vunpack.c.h.bf16 %v62_v31 }
  0x9e   :  { %1016 = vst [vmem:[%s1669_s3 + $0x168] sm:$0xff] %v1118_v37  ;;  %v669_v41 = vsel %vm473_vm12, %v375_v22, %v571_v38  ;;  %v670_v42 = vsel %vm474_vm13, %v376_v24, %v572_v39 }
  0x9f   :  { %v1119_v43 = vpack.c.bf16 %v670_v42, %v669_v41  ;;  %vm475_vm14 = vcmp.ge.f32.partialorder %v377_v32, 0.0  ;;  %vm476_vm15 = vcmp.ge.f32.partialorder %v378_v21, 0.0  ;;  %v573_v44 = vmul.f32 0.2, %v377_v32 }
  0xa0   :  { %v574_v45 = vmul.f32 0.2, %v378_v21  ;;  %v269_v46 = vmul.f32 %v1184_v26, %v159_v33  ;;  %v270_v47 = vmul.f32 %v1186_v27, %v160_v40 }
  0xa1   :  { %1017 = vst [vmem:[%s1669_s3 + $0x170] sm:$0xff] %v1119_v43  ;;  %v671_v48 = vsel %vm475_vm14, %v377_v32, %v573_v44 }
  0xa2   :  { %v672_v49 = vsel %vm476_vm15, %v378_v21, %v574_v45  ;;  %v379_v50 = vadd.f32 %v1188_v28, %v269_v46  ;;  %v380_v51 = vadd.f32 %v1190_v29, %v270_v47 }
  0xa3   :  { %v1120_v52 = vpack.c.bf16 %v672_v49, %v671_v48 }
  0xa4   :  { %vm477_vm0 = vcmp.ge.f32.partialorder %v379_v50, 0.0  ;;  %vm478_vm1 = vcmp.ge.f32.partialorder %v380_v51, 0.0  ;;  %v575_v53 = vmul.f32 0.2, %v379_v50  ;;  %v576_v54 = vmul.f32 0.2, %v380_v51 }
  0xa5   :  { %1018 = vst [vmem:[%s1669_s3 + $0x178] sm:$0xff] %v1120_v52 }
  0xa6   :  { %v673_v26 = vsel %vm477_vm0, %v379_v50, %v575_v53  ;;  %v674_v27 = vsel %vm478_vm1, %v380_v51, %v576_v54 }
  0xa7   :  { %v1121_v55 = vpack.c.bf16 %v674_v27, %v673_v26 }
  0xa9   :  { %1019 = vst [vmem:[%s1669_s3 + $0x180] sm:$0xff] %v1121_v55 }

// kernel: discriminator_forward.15
= control target key start
LH: loop header
LB: loop body
LE: loop exit
PB: predicated region body
PF: predicated region fallthrough
CT: control target
= control target key end

     0   :  { %s2108_s12 = smov 0   ;;  %s2110_s13 = smov 0   ;;  %s2276_s0 = inlined_call_operand.vmem [shape: bf16[8,12544], index: 0, kind: input, shape index: {}]   ;;  %s2277_s1 = inlined_call_operand.vmem [shape: bf16[12544,128], index: 1, kind: input, shape index: {}]   ;;  %s2278_s2 = inlined_call_operand.vmem [shape: f32[1,128], index: 2, kind: input, shape index: {}]   ;;  %s2279_s3 = inlined_call_operand.vmem [shape: f32[8,128], index: 3, kind: output, shape index: {}]  }
   0x1   :  { %s2112_s14 = smov 0  }
   0x2 LB: > { %s25_s15 = sadd.s32 1, %s2081_s13  ;;  %p1623_p0 = scmp.ge.s32.totalorder %s2085_s14, 1  ;;  %s2085_s14 = sphi %s2112_s14, %s13_s14   ;;  %s2081_s13 = sphi %s2110_s13, %s2281_s13   ;;  %s2077_s12 = sphi %s2108_s12, %s2280_s12  }
   0x3   : > { %p26_p1 = scmp.ge.s32.totalorder %s25_s15, 7  ;;  %p189_p2 = scmp.lt.s32.totalorder %s2085_s14, 8 }
   0x5   : > { %s2283_s15 = smov (%p26_p1, %s25_s15), 0  ;;  %p190_p3 = pnand %p1623_p0, %p189_p2 }
   0x6   : > { %s230_s16 = smul.u32 (!%p190_p3), 14, %s2077_s12  ;;  %p1626_p6 = scmp.ne.s32.totalorder (!%p190_p3), %s2077_s12, 0 }
   0x7   : > { %193 = sbr.rel (%p190_p3) target bundleno = 364 (0x16c), region = 32 }
   0x8   : > { %s240_s17 = smul.u32 (!%p190_p3), 224, %s2077_s12  ;;  %p233_p4 = scmp.lt.s32.totalorder (!%p190_p3), %s230_s16, 97 }
   0xa   : > { %p241_p5 = scmp.lt.s32.totalorder (!%p190_p3), %s240_s17, 1567 }
   0xc   : > { %s2285_s16 = smov (!%p233_p4, %s230_s16), 97  ;;  %s2287_s17 = smov (!%p241_p5, %s240_s17), 1567 }
   0xd   : > { %s1624_s18 = sshll.u32 %s2285_s16, 2  ;;  %s1625_s22 = sshll.u32 %s2287_s17, 2 }
   0xe   : > { %s2133_s21 = scalar_lea.vmem %s2276_s0, %s1624_s18  ;;  %s2138_s25 = scalar_lea.vmem %s2277_s1, %s1625_s22 }
   0xf   : > { %263 = sbr.rel (%p1626_p6) target bundleno = 22 (0x16), region = 36 }
  0x14   : > { %v2087_v0 = vmov 0.0  }
  0x15   : > { %264 = vst [vmem:[#allocation2] sm:$0xff] %v2087_v0 }
  0x16 PF: > { %v1937_v1 = vld [vmem:[%s2138_s25 + $0x78] sm:$0xff]   ;;  %v1941_v5 = vld [vmem:[%s2138_s25 + $0x70] sm:$0xff]   ;;  %v1945_v9 = vld [vmem:[%s2138_s25 + $0x68] sm:$0xff]   ;;  %p1753_p7 = scmp.ne.s32.totalorder %s2077_s12, 6 }
  0x17   : > { %v1938_v2 = vld [vmem:[%s2138_s25 + $0xf8] sm:$0xff]   ;;  %1758 = vmatprep.subr.bf16.mxu0 %v1937_v1  ;;  %v1942_v6 = vld [vmem:[%s2138_s25 + $0xf0] sm:$0xff]   ;;  %v1946_v10 = vld [vmem:[%s2138_s25 + $0xe8] sm:$0xff]  }
  0x18   : > { %v1939_v3 = vld [vmem:[%s2138_s25 + $0x38] sm:$0xff]   ;;  %1780 = vmatprep.subr.bf16.mxu1 %v1938_v2  ;;  %v1943_v7 = vld [vmem:[%s2138_s25 + $0x30] sm:$0xff]   ;;  %v1947_v11 = vld [vmem:[%s2138_s25 + $0x28] sm:$0xff]  }
  0x19   : > { %v1940_v4 = vld [vmem:[%s2138_s25 + $0xb8] sm:$0xff]   ;;  %1759 = vmatpush3.bf16.msra.mxu0 %v1939_v3  ;;  %v1944_v8 = vld [vmem:[%s2138_s25 + $0xb0] sm:$0xff]   ;;  %v1948_v12 = vld [vmem:[%s2138_s25 + $0xa8] sm:$0xff]  }
  0x1a   : > { %1781 = vmatpush3.bf16.msra.mxu1 %v1940_v4  ;;  %1760 = vmatprep.subr.bf16.mxu0 %v1941_v5  ;;  %v1949_v13 = vld [vmem:[%s2138_s25 + $0x60] sm:$0xff]   ;;  %v1953_v17 = vld [vmem:[%s2138_s25 + $0x58] sm:$0xff]   ;;  %v1957_v21 = vld [vmem:[%s2138_s25 + $0x50] sm:$0xff]  }
  0x1b   : > { %1782 = vmatprep.subr.bf16.mxu1 %v1942_v6  ;;  %v1950_v14 = vld [vmem:[%s2138_s25 + $0xe0] sm:$0xff]   ;;  %v1954_v18 = vld [vmem:[%s2138_s25 + $0xd8] sm:$0xff]   ;;  %v1958_v22 = vld [vmem:[%s2138_s25 + $0xd0] sm:$0xff]  }
  0x1c   : > { %v1951_v15 = vld [vmem:[%s2138_s25 + $0x20] sm:$0xff]   ;;  %v1955_v19 = vld [vmem:[%s2138_s25 + $0x18] sm:$0xff]   ;;  %v1959_v23 = vld [vmem:[%s2138_s25 + $0x10] sm:$0xff]  }
  0x1d   : > { %1761 = vmatpush3.bf16.msra.mxu0 %v1943_v7  ;;  %v1952_v16 = vld [vmem:[%s2138_s25 + $0xa0] sm:$0xff]   ;;  %v1956_v20 = vld [vmem:[%s2138_s25 + $0x98] sm:$0xff]   ;;  %v1960_v24 = vld [vmem:[%s2138_s25 + $0x90] sm:$0xff]  }
  0x1e   : > { %1783 = vmatpush3.bf16.msra.mxu1 %v1944_v8  ;;  %1762 = vmatprep.subr.bf16.mxu0 %v1945_v9  ;;  %v1961_v25 = vld [vmem:[%s2138_s25 + $0x48] sm:$0xff]   ;;  %v1965_v29 = vld [vmem:[%s2138_s25 + $0x40] sm:$0xff]   ;;  %v1973_v39 = vld [vmem:[%s2138_s25 + $0x178] sm:$0xff]  }
  0x1f   : > { %1784 = vmatprep.subr.bf16.mxu1 %v1946_v10  ;;  %v1962_v26 = vld [vmem:[%s2138_s25 + $0xc8] sm:$0xff]   ;;  %v1966_v30 = vld [vmem:[%s2138_s25 + $0xc0] sm:$0xff]   ;;  %v1974_v40 = vld [vmem:[%s2138_s25 + $0x138] sm:$0xff]  }
  0x20   : > { %v1963_v27 = vld [vmem:[%s2138_s25 + $0x8] sm:$0xff]   ;;  %v1967_v31 = vld [vmem:[%s2138_s25] sm:$0xff]   ;;  %v1975_v41 = vld [vmem:[%s2138_s25 + $0x1f8] sm:$0xff]  }
  0x21   : > { %1763 = vmatpush3.bf16.msra.mxu0 %v1947_v11  ;;  %v1964_v28 = vld [vmem:[%s2138_s25 + $0x88] sm:$0xff]   ;;  %v1968_v32 = vld [vmem:[%s2138_s25 + $0x80] sm:$0xff]   ;;  %v1976_v42 = vld [vmem:[%s2138_s25 + $0x1b8] sm:$0xff]  }
  0x22   : > { %1785 = vmatpush3.bf16.msra.mxu1 %v1948_v12  ;;  %1764 = vmatprep.subr.bf16.mxu0 %v1949_v13  ;;  %v266_v33 = vld [vmem:[%s2133_s21] sm:$0xff]  ;;  %v267_v34 = vld [vmem:[%s2133_s21 + $0x8] sm:$0xff]  ;;  %v1977_v43 = vld [vmem:[%s2138_s25 + $0x170] sm:$0xff]  }
  0x23   : > { %1786 = vmatprep.subr.bf16.mxu1 %v1950_v14  ;;  %v1627_v35 = vcombine.low %v266_v33, %v266_v33  ;;  %v1628_v36 = vcombine.high %v266_v33, %v266_v33  ;;  %v1629_v37 = vcombine.low %v267_v34, %v267_v34  ;;  %v1630_v38 = vcombine.high %v267_v34, %v267_v34  ;;  %v1978_v44 = vld [vmem:[%s2138_s25 + $0x130] sm:$0xff]   ;;  %v1981_v47 = vld [vmem:[%s2138_s25 + $0x168] sm:$0xff]   ;;  %v1985_v51 = vld [vmem:[%s2138_s25 + $0x160] sm:$0xff]  }
  0x24   : > { %v1979_v45 = vld [vmem:[%s2138_s25 + $0x1f0] sm:$0xff]   ;;  %v1982_v48 = vld [vmem:[%s2138_s25 + $0x128] sm:$0xff]   ;;  %v1986_v52 = vld [vmem:[%s2138_s25 + $0x120] sm:$0xff]  }
  0x25   : > { %1765 = vmatpush3.bf16.msra.mxu0 %v1951_v15  ;;  %1250 = vmatprep.mubr.bf16.mxu0 %v1628_v36  ;;  %v1980_v46 = vld [vmem:[%s2138_s25 + $0x1b0] sm:$0xff]   ;;  %v1983_v49 = vld [vmem:[%s2138_s25 + $0x1e8] sm:$0xff]   ;;  %v1987_v53 = vld [vmem:[%s2138_s25 + $0x1e0] sm:$0xff]  }
  0x26   : > { %1787 = vmatpush3.bf16.msra.mxu1 %v1952_v16  ;;  %1766 = vmatprep.subr.bf16.mxu0 %v1953_v17  ;;  %v1984_v50 = vld [vmem:[%s2138_s25 + $0x1a8] sm:$0xff]   ;;  %v1988_v54 = vld [vmem:[%s2138_s25 + $0x1a0] sm:$0xff]   ;;  %v1989_v55 = vld [vmem:[%s2138_s25 + $0x158] sm:$0xff]  }
  0x27   : > { %1788 = vmatprep.subr.bf16.mxu1 %v1954_v18  ;;  %1290 = vmatprep.mubr.bf16.mxu1 %v1630_v38  ;;  %v1990_v56 = vld [vmem:[%s2138_s25 + $0x118] sm:$0xff]   ;;  %v1993_v59 = vld [vmem:[%s2138_s25 + $0x150] sm:$0xff]   ;;  %v1997_v63 = vld [vmem:[%s2138_s25 + $0x148] sm:$0xff]  }
  0x28   : > { %v1991_v57 = vld [vmem:[%s2138_s25 + $0x1d8] sm:$0xff]   ;;  %v1994_v60 = vld [vmem:[%s2138_s25 + $0x110] sm:$0xff]   ;;  %v1998_v0 = vld [vmem:[%s2138_s25 + $0x108] sm:$0xff]  }
  0x29   : > { %1767 = vmatpush3.bf16.msra.mxu0 %v1955_v19  ;;  %v1992_v58 = vld [vmem:[%s2138_s25 + $0x198] sm:$0xff]   ;;  %v1995_v61 = vld [vmem:[%s2138_s25 + $0x1d0] sm:$0xff]   ;;  %v1999_v1 = vld [vmem:[%s2138_s25 + $0x1c8] sm:$0xff]  }
  0x2a   : > { %1789 = vmatpush3.bf16.msra.mxu1 %v1956_v20  ;;  %1768 = vmatprep.subr.bf16.mxu0 %v1957_v21  ;;  %v1996_v62 = vld [vmem:[%s2138_s25 + $0x190] sm:$0xff]   ;;  %v2000_v2 = vld [vmem:[%s2138_s25 + $0x188] sm:$0xff]   ;;  %v2001_v3 = vld [vmem:[%s2138_s25 + $0x140] sm:$0xff]  }
  0x2b   : > { %1790 = vmatprep.subr.bf16.mxu1 %v1958_v22  ;;  %v2002_v4 = vld [vmem:[%s2138_s25 + $0x100] sm:$0xff]   ;;  %v268_v6 = vld [vmem:[%s2133_s21 + $0x10] sm:$0xff]  ;;  %v2007_v10 = vld [vmem:[%s2138_s25 + $0x278] sm:$0xff]  }
  0x2c   : > { %v2003_v5 = vld [vmem:[%s2138_s25 + $0x1c0] sm:$0xff]   ;;  %v1632_v7 = vcombine.high %v268_v6, %v268_v6  ;;  %v1631_v9 = vcombine.low %v268_v6, %v268_v6  ;;  %v269_v11 = vld [vmem:[%s2133_s21 + $0x18] sm:$0xff]  ;;  %v2013_v17 = vld [vmem:[%s2138_s25 + $0x270] sm:$0xff]  }
  0x2d   : > { %1769 = vmatpush3.bf16.msra.mxu0 %v1959_v23  ;;  %v2006_v8 = vld [vmem:[%s2138_s25 + $0x180] sm:$0xff]   ;;  %v1633_v12 = vcombine.low %v269_v11, %v269_v11  ;;  %v1634_v13 = vcombine.high %v269_v11, %v269_v11  ;;  %v2010_v14 = vld [vmem:[%s2138_s25 + $0x238] sm:$0xff]   ;;  %v2014_v18 = vld [vmem:[%s2138_s25 + $0x230] sm:$0xff]  }
  0x2e   : > { %1791 = vmatpush3.bf16.msra.mxu1 %v1960_v24  ;;  %1770 = vmatprep.subr.bf16.mxu0 %v1961_v25  ;;  %v2011_v15 = vld [vmem:[%s2138_s25 + $0x2f8] sm:$0xff]   ;;  %v2015_v19 = vld [vmem:[%s2138_s25 + $0x2f0] sm:$0xff]   ;;  %v2017_v21 = vld [vmem:[%s2138_s25 + $0x268] sm:$0xff]  }
  0x2f   : > { %1792 = vmatprep.subr.bf16.mxu1 %v1962_v26  ;;  %v2012_v16 = vld [vmem:[%s2138_s25 + $0x2b8] sm:$0xff]   ;;  %v2016_v20 = vld [vmem:[%s2138_s25 + $0x2b0] sm:$0xff]   ;;  %v2018_v22 = vld [vmem:[%s2138_s25 + $0x228] sm:$0xff]  }
  0x30   : > { %v2019_v23 = vld [vmem:[%s2138_s25 + $0x2e8] sm:$0xff]   ;;  %v2021_v25 = vld [vmem:[%s2138_s25 + $0x260] sm:$0xff]   ;;  %v2029_v33 = vld [vmem:[%s2138_s25 + $0x250] sm:$0xff]  }
  0x31   : > { %1771 = vmatpush3.bf16.msra.mxu0 %v1963_v27  ;;  %v2020_v24 = vld [vmem:[%s2138_s25 + $0x2a8] sm:$0xff]   ;;  %v2022_v26 = vld [vmem:[%s2138_s25 + $0x220] sm:$0xff]   ;;  %v2030_v34 = vld [vmem:[%s2138_s25 + $0x210] sm:$0xff]  }
  0x32   : > { %1793 = vmatpush3.bf16.msra.mxu1 %v1964_v28  ;;  %1772 = vmatprep.subr.bf16.mxu0 %v1965_v29  ;;  %v2023_v27 = vld [vmem:[%s2138_s25 + $0x2e0] sm:$0xff]   ;;  %v2025_v29 = vld [vmem:[%s2138_s25 + $0x258] sm:$0xff]   ;;  %v2032_v36 = vld [vmem:[%s2138_s25 + $0x290] sm:$0xff]  }
  0x33   : > { %1794 = vmatprep.subr.bf16.mxu1 %v1966_v30  ;;  %v2024_v28 = vld [vmem:[%s2138_s25 + $0x2a0] sm:$0xff]   ;;  %v2026_v30 = vld [vmem:[%s2138_s25 + $0x218] sm:$0xff]   ;;  %v2034_v38 = vld [vmem:[%s2138_s25 + $0x208] sm:$0xff]  }
  0x35   : > { %1773 = vmatpush3.bf16.msra.mxu0 %v1967_v31  ;;  %v2027_v31 = vld [vmem:[%s2138_s25 + $0x2d8] sm:$0xff]  }
  0x36   : > { %1795 = vmatpush3.bf16.msra.mxu1 %v1968_v32  ;;  %1802 = vmatprep.subr.bf16.mxu0 %v1973_v39  ;;  %v2028_v32 = vld [vmem:[%s2138_s25 + $0x298] sm:$0xff]   ;;  %v2035_v39 = vld [vmem:[%s2138_s25 + $0x2c8] sm:$0xff]  }
  0x37   : > { %1824 = vmatprep.subr.bf16.mxu1 %v1975_v41  ;;  %v2037_v41 = vld [vmem:[%s2138_s25 + $0x240] sm:$0xff]  }
  0x38   : > { %1251 = vmatmul.mubr.bf16.vlgmr.msra.gmra.mxu0 %v1627_v35  ;;  %v2031_v35 = vld [vmem:[%s2138_s25 + $0x2d0] sm:$0xff]  }
  0x39   : > { %1291 = vmatmul.mubr.bf16.vlgmr.msra.gmra.mxu1 %v1629_v37  ;;  %1803 = vmatpush3.bf16.msra.mxu0 %v1974_v40  ;;  %v2033_v37 = vld [vmem:[%s2138_s25 + $0x248] sm:$0xff]  }
  0x3a   : > { %1825 = vmatpush3.bf16.msra.mxu1 %v1976_v42  ;;  %1804 = vmatprep.subr.bf16.mxu0 %v1977_v43  ;;  %v2036_v40 = vld [vmem:[%s2138_s25 + $0x288] sm:$0xff]   ;;  %v2038_v42 = vld [vmem:[%s2138_s25 + $0x200] sm:$0xff]  }
  0x3b   : > { %1826 = vmatprep.subr.bf16.mxu1 %v1979_v45  ;;  %1330 = vmatprep.mubr.bf16.mxu0 %v1632_v7  ;;  %v2039_v43 = vld [vmem:[%s2138_s25 + $0x2c0] sm:$0xff]  }
  0x3c   : > { %1370 = vmatprep.mubr.bf16.mxu1 %v1634_v13 }
  0x3d   : > { %1805 = vmatpush3.bf16.msra.mxu0 %v1978_v44  ;;  %v270_v44 = vld [vmem:[%s2133_s21 + $0x20] sm:$0xff] }
  0x3e   : > { %1827 = vmatpush3.bf16.msra.mxu1 %v1980_v46  ;;  %1806 = vmatprep.subr.bf16.mxu0 %v1981_v47  ;;  %v1635_v45 = vcombine.low %v270_v44, %v270_v44  ;;  %v1636_v46 = vcombine.high %v270_v44, %v270_v44  ;;  %v2042_v47 = vld [vmem:[%s2138_s25 + $0x280] sm:$0xff]  }
  0x3f   : > { %1828 = vmatprep.subr.bf16.mxu1 %v1983_v49  ;;  %v271_v49 = vld [vmem:[%s2133_s21 + $0x28] sm:$0xff]  ;;  %v265_v44 = vld [vmem:[#allocation2] sm:$0xff] }
  0x41   : > { %1807 = vmatpush3.bf16.msra.mxu0 %v1982_v48  ;;  %v2043_v48 = vld [vmem:[%s2138_s25 + $0x378] sm:$0xff]  }
  0x42   : > { %1829 = vmatpush3.bf16.msra.mxu1 %v1984_v50  ;;  %1808 = vmatprep.subr.bf16.mxu0 %v1985_v51  ;;  %v1637_v50 = vcombine.low %v271_v49, %v271_v49  ;;  %v1638_v51 = vcombine.high %v271_v49, %v271_v49 }
  0x43   : > { %1830 = vmatprep.subr.bf16.mxu1 %v1987_v53  ;;  %v2047_v53 = vld [vmem:[%s2138_s25 + $0x370] sm:$0xff]  }
  0x45   : > { %1809 = vmatpush3.bf16.msra.mxu0 %v1986_v52  ;;  %v2046_v52 = vld [vmem:[%s2138_s25 + $0x338] sm:$0xff]  }
  0x46   : > { %1831 = vmatpush3.bf16.msra.mxu1 %v1988_v54  ;;  %1810 = vmatprep.subr.bf16.mxu0 %v1989_v55  ;;  %v2048_v54 = vld [vmem:[%s2138_s25 + $0x330] sm:$0xff]   ;;  %v2049_v55 = vld [vmem:[%s2138_s25 + $0x368] sm:$0xff]  }
  0x47   : > { %1832 = vmatprep.subr.bf16.mxu1 %v1991_v57  ;;  %v2051_v57 = vld [vmem:[%s2138_s25 + $0x360] sm:$0xff]  }
  0x49   : > { %1811 = vmatpush3.bf16.msra.mxu0 %v1990_v56  ;;  %v2050_v56 = vld [vmem:[%s2138_s25 + $0x328] sm:$0xff]  }
  0x4a   : > { %1833 = vmatpush3.bf16.msra.mxu1 %v1992_v58  ;;  %1812 = vmatprep.subr.bf16.mxu0 %v1993_v59  ;;  %v2052_v58 = vld [vmem:[%s2138_s25 + $0x320] sm:$0xff]   ;;  %v2053_v59 = vld [vmem:[%s2138_s25 + $0x358] sm:$0xff]  }
  0x4b   : > { %1834 = vmatprep.subr.bf16.mxu1 %v1995_v61  ;;  %v272_v61 = vld [vmem:[%s2133_s21 + $0x30] sm:$0xff] }
  0x4d   : > { %1813 = vmatpush3.bf16.msra.mxu0 %v1994_v60  ;;  %v2054_v60 = vld [vmem:[%s2138_s25 + $0x318] sm:$0xff]  }
  0x4e   : > { %1835 = vmatpush3.bf16.msra.mxu1 %v1996_v62  ;;  %1814 = vmatprep.subr.bf16.mxu0 %v1997_v63  ;;  %v2055_v62 = vld [vmem:[%s2138_s25 + $0x350] sm:$0xff]   ;;  %v1640_v63 = vcombine.high %v272_v61, %v272_v61 }
  0x4f   : > { %1836 = vmatprep.subr.bf16.mxu1 %v1999_v1  ;;  %v2057_v1 = vld [vmem:[%s2138_s25 + $0x348] sm:$0xff]  }
  0x51   : > { %1815 = vmatpush3.bf16.msra.mxu0 %v1998_v0  ;;  %v2056_v0 = vld [vmem:[%s2138_s25 + $0x310] sm:$0xff]  }
  0x52   : > { %1837 = vmatpush3.bf16.msra.mxu1 %v2000_v2  ;;  %1816 = vmatprep.subr.bf16.mxu0 %v2001_v3  ;;  %v2058_v2 = vld [vmem:[%s2138_s25 + $0x308] sm:$0xff]   ;;  %v2059_v3 = vld [vmem:[%s2138_s25 + $0x340] sm:$0xff]  }
  0x53   : > { %1838 = vmatprep.subr.bf16.mxu1 %v2003_v5  ;;  %v1639_v5 = vcombine.low %v272_v61, %v272_v61 }
  0x55   : > { %1817 = vmatpush3.bf16.msra.mxu0 %v2002_v4  ;;  %v2060_v4 = vld [vmem:[%s2138_s25 + $0x300] sm:$0xff]  }
  0x56   : > { %1839 = vmatpush3.bf16.msra.mxu1 %v2006_v8  ;;  %1846 = vmatprep.subr.bf16.mxu0 %v2007_v10 }
  0x57   : > { %1868 = vmatprep.subr.bf16.mxu1 %v2011_v15 }
  0x58   : > { %1331 = vmatmul.mubr.bf16.vlgmr.msra.gmra.mxu0 %v1631_v9 }
  0x59   : > { %1847 = vmatpush3.bf16.msra.mxu0 %v2010_v14  ;;  %1371 = vmatmul.mubr.bf16.vlgmr.msra.gmra.mxu1 %v1633_v12 }
  0x5a   : > { %1869 = vmatpush3.bf16.msra.mxu1 %v2012_v16  ;;  %1848 = vmatprep.subr.bf16.mxu0 %v2013_v17 }
  0x5b   : > { %1870 = vmatprep.subr.bf16.mxu1 %v2015_v19  ;;  %1410 = vmatprep.mubr.bf16.mxu0 %v1636_v46 }
  0x5c   : > { %1450 = vmatprep.mubr.bf16.mxu1 %v1638_v51 }
  0x5d   : > { %1849 = vmatpush3.bf16.msra.mxu0 %v2014_v18 }
  0x5e   : > { %1871 = vmatpush3.bf16.msra.mxu1 %v2016_v20  ;;  %1850 = vmatprep.subr.bf16.mxu0 %v2017_v21 }
  0x5f   : > { %1872 = vmatprep.subr.bf16.mxu1 %v2019_v23 }
  0x61   : > { %1851 = vmatpush3.bf16.msra.mxu0 %v2018_v22 }
  0x62   : > { %1873 = vmatpush3.bf16.msra.mxu1 %v2020_v24  ;;  %1852 = vmatprep.subr.bf16.mxu0 %v2021_v25 }
  0x63   : > { %1874 = vmatprep.subr.bf16.mxu1 %v2023_v27 }
  0x65   : > { %1853 = vmatpush3.bf16.msra.mxu0 %v2022_v26 }
  0x66   : > { %1875 = vmatpush3.bf16.msra.mxu1 %v2024_v28  ;;  %1854 = vmatprep.subr.bf16.mxu0 %v2025_v29 }
  0x67   : > { %1876 = vmatprep.subr.bf16.mxu1 %v2027_v31 }
  0x69   : > { %1855 = vmatpush3.bf16.msra.mxu0 %v2026_v30 }
  0x6a   : > { %1877 = vmatpush3.bf16.msra.mxu1 %v2028_v32  ;;  %1856 = vmatprep.subr.bf16.mxu0 %v2029_v33 }
  0x6b   : > { %1878 = vmatprep.subr.bf16.mxu1 %v2031_v35 }
  0x6d   : > { %1857 = vmatpush3.bf16.msra.mxu0 %v2030_v34 }
  0x6e   : > { %1879 = vmatpush3.bf16.msra.mxu1 %v2032_v36  ;;  %1858 = vmatprep.subr.bf16.mxu0 %v2033_v37 }
  0x6f   : > { %1880 = vmatprep.subr.bf16.mxu1 %v2035_v39 }
  0x71   : > { %1859 = vmatpush3.bf16.msra.mxu0 %v2034_v38 }
  0x72   : > { %1881 = vmatpush3.bf16.msra.mxu1 %v2036_v40  ;;  %1860 = vmatprep.subr.bf16.mxu0 %v2037_v41 }
  0x73   : > { %1882 = vmatprep.subr.bf16.mxu1 %v2039_v43 }
  0x75   : > { %1861 = vmatpush3.bf16.msra.mxu0 %v2038_v42 }
  0x76   : > { %1883 = vmatpush3.bf16.msra.mxu1 %v2042_v47  ;;  %1890 = vmatprep.subr.bf16.mxu0 %v2043_v48 }
  0x78   : > { %1411 = vmatmul.mubr.bf16.vlgmr.msra.gmra.mxu0 %v1635_v45 }
  0x79   : > { %1891 = vmatpush3.bf16.msra.mxu0 %v2046_v52  ;;  %1451 = vmatmul.mubr.bf16.vlgmr.msra.gmra.mxu1 %v1637_v50 }
  0x7a   : > { %1892 = vmatprep.subr.bf16.mxu0 %v2047_v53  ;;  %1490 = vmatprep.mubr.bf16.mxu0 %v1640_v63 }
  0x7d   : > { %1893 = vmatpush3.bf16.msra.mxu0 %v2048_v54 }
  0x7e   : > { %1894 = vmatprep.subr.bf16.mxu0 %v2049_v55 }
  0x81   : > { %1895 = vmatpush3.bf16.msra.mxu0 %v2050_v56 }
  0x82   : > { %1896 = vmatprep.subr.bf16.mxu0 %v2051_v57 }
  0x85   : > { %1897 = vmatpush3.bf16.msra.mxu0 %v2052_v58 }
  0x86   : > { %1898 = vmatprep.subr.bf16.mxu0 %v2053_v59 }
  0x89   : > { %1899 = vmatpush3.bf16.msra.mxu0 %v2054_v60 }
  0x8a   : > { %1900 = vmatprep.subr.bf16.mxu0 %v2055_v62 }
  0x8d   : > { %1901 = vmatpush3.bf16.msra.mxu0 %v2056_v0 }
  0x8e   : > { %1902 = vmatprep.subr.bf16.mxu0 %v2057_v1 }
  0x91   : > { %1903 = vmatpush3.bf16.msra.mxu0 %v2058_v2 }
  0x92   : > { %1904 = vmatprep.subr.bf16.mxu0 %v2059_v3 }
  0x95   : > { %1905 = vmatpush3.bf16.msra.mxu0 %v2060_v4 }
  0x98   : > { %1491 = vmatmul.mubr.bf16.vlgmr.msra.gmra.mxu0 %v1639_v5 }
  0xf8   : > { %v1774_v6 = vpop.f32.mrf.mxu0 }
  0xf9   : > { %v1796_v7 = vpop.f32.mrf.mxu1 }
  0xfa   : > { %v1775_v8 = vpop.f32.mrf.mxu0 }
  0xfb   : > { %v1797_v9 = vpop.f32.mrf.mxu1  ;;  %v1776_v10 = vadd.f32 %v1775_v8, %v1774_v6 }
  0xfc   : > { %v1798_v11 = vadd.f32 %v1797_v9, %v1796_v7  ;;  %v1777_v12 = vpop.f32.mrf.mxu0 }
  0xfd   : > { %v1799_v13 = vpop.f32.mrf.mxu1 }
  0xfe   : > { %v1293_v14 = vadd.f32 %v1798_v11, %v1776_v10  ;;  %v1778_v15 = vpop.f32.mrf.mxu0 }
  0xff   : > { %v1800_v16 = vpop.f32.mrf.mxu1 }
 0x118   : > { %v1818_v17 = vpop.f32.mrf.mxu0 }
 0x119   : > { %v1840_v18 = vpop.f32.mrf.mxu1 }
 0x11a   : > { %v1819_v19 = vpop.f32.mrf.mxu0 }
 0x11b   : > { %v1841_v20 = vpop.f32.mrf.mxu1  ;;  %v1820_v33 = vadd.f32 %v1819_v19, %v1818_v17 }
 0x11c   : > { %v1821_v21 = vpop.f32.mrf.mxu0  ;;  %v1842_v35 = vadd.f32 %v1841_v20, %v1840_v18 }
 0x11d   : > { %v1843_v22 = vpop.f32.mrf.mxu1  ;;  %v1333_v34 = vadd.f32 %v1820_v33, %v1293_v14 }
 0x11e   : > { %v1822_v23 = vpop.f32.mrf.mxu0 }
 0x11f   : > { %v1844_v24 = vpop.f32.mrf.mxu1  ;;  %v1373_v37 = vadd.f32 %v1842_v35, %v1333_v34 }
 0x138   : > { %v1862_v25 = vpop.f32.mrf.mxu0 }
 0x139   : > { %v1884_v27 = vpop.f32.mrf.mxu1 }
 0x13a   : > { %v1863_v26 = vpop.f32.mrf.mxu0 }
 0x13b   : > { %v1885_v29 = vpop.f32.mrf.mxu1  ;;  %v1864_v36 = vadd.f32 %v1863_v26, %v1862_v25 }
 0x13c   : > { %v1865_v28 = vpop.f32.mrf.mxu0  ;;  %v1886_v39 = vadd.f32 %v1885_v29, %v1884_v27 }
 0x13d   : > { %v1887_v31 = vpop.f32.mrf.mxu1  ;;  %v1413_v38 = vadd.f32 %v1864_v36, %v1373_v37 }
 0x13e   : > { %v1866_v30 = vpop.f32.mrf.mxu0 }
 0x13f   : > { %v1888_v32 = vpop.f32.mrf.mxu1  ;;  %v1453_v42 = vadd.f32 %v1886_v39, %v1413_v38 }
 0x158   : > { %v1906_v40 = vpop.f32.mrf.mxu0 }
 0x15a   : > { %v1907_v41 = vpop.f32.mrf.mxu0 }
 0x15b   : > { %v1908_v43 = vadd.f32 %v1907_v41, %v1906_v40 }
 0x15c   : > { %v1909_v45 = vpop.f32.mrf.mxu0 }
 0x15d   : > { %v1493_v46 = vadd.f32 %v1908_v43, %v1453_v42  ;;  %1503 = sbr.rel (%p1753_p7) target bundleno = 364 (0x16c), region = 40 }
 0x15e   : > { %v1910_v47 = vpop.f32.mrf.mxu0 }
 0x15f   : > { %v1498_v48 = vadd.f32 %v1493_v46, %v265_v44 }
 0x161   : > { %1499 = vst [vmem:[#allocation2] sm:$0xff] %v1498_v48 }
 0x162   : > { %v1754_v50 = vld [vmem:[%s2278_s2] ss:$0 sm:$0xff] }
 0x168   : > { %v1504_v49 = vld [vmem:[#allocation2] sm:$0xff] }
 0x169   : > { %v1512_v51 = vadd.f32 %v1754_v50, %v1504_v49 }
 0x16b   : > { %1513 = vst [vmem:[%s2279_s3] sm:$0xff] %v1512_v51 }
 0x16c PF: > { %s13_s14 = sadd.s32 1, %s2085_s14   ;;  %s2280_s12 = smov %s2081_s13 }
 0x16d   : > { %p10_p8 = scmp.ge.s32.totalorder %s13_s14, 9   ;;  %s2281_s13 = smov %s2283_s15 }
 0x16f   :  { %12 = sbr.rel (!%p10_p8) target bundleno = 2 (0x2), region = 76 }

// kernel: discriminator_forward.13
= control target key start
LH: loop header
LB: loop body
LE: loop exit
PB: predicated region body
PF: predicated region fallthrough
CT: control target
= control target key end

     0   :  { %s7270_s1 = inlined_call_operand.vmem [shape: bf16[1152,256], index: 1, kind: input, shape index: {}]   ;;  %s7271_s0 = inlined_call_operand.vmem [shape: bf16[392,1152], index: 0, kind: input, shape index: {}]   ;;  %s7272_s2 = inlined_call_operand.vmem [shape: bf16[392,256], index: 2, kind: output, shape index: {0}]   ;;  %s7273_s3 = inlined_call_operand.vmem [shape: f32[1,8,256], index: 3, kind: output, shape index: {1}]   ;;  %s7274_s4 = inlined_call_operand.vmem [shape: f32[1,8,256], index: 4, kind: output, shape index: {2}]  }
   0x1   :  { %v4840_v0 = vld [vmem:[%s7270_s1 + $0x74] ss:$8 sps:$4 sm:$0xff]   ;;  %v4842_v1 = vld [vmem:[%s7270_s1 + $0x70] ss:$8 sps:$4 sm:$0xff]   ;;  %v4843_v2 = vld [vmem:[%s7270_s1 + $0x64] ss:$8 sps:$4 sm:$0xff]  }
   0x2   :  { %2260 = vmatprep.subr.bf16.mxu0 %v4840_v0  ;;  %4807 = vmatprep.subr.bf16.mxu1 %v4840_v0  ;;  %v4845_v3 = vld [vmem:[%s7270_s1 + $0x60] ss:$8 sps:$4 sm:$0xff]   ;;  %v4846_v4 = vld [vmem:[%s7270_s1 + $0x54] ss:$8 sps:$4 sm:$0xff]   ;;  %v4848_v5 = vld [vmem:[%s7270_s1 + $0x50] ss:$8 sps:$4 sm:$0xff]  }
   0x3   :  { %2261 = vmatpush1.bf16.msra.mxu0 %v4842_v1  ;;  %4823 = vmatpush1.bf16.msra.mxu1 %v4842_v1  ;;  %v4849_v6 = vld [vmem:[%s7270_s1 + $0x44] ss:$8 sps:$4 sm:$0xff]   ;;  %v4851_v7 = vld [vmem:[%s7270_s1 + $0x40] ss:$8 sps:$4 sm:$0xff]   ;;  %v4852_v8 = vld [vmem:[%s7270_s1 + $0x34] ss:$8 sps:$4 sm:$0xff]  }
   0x4   :  { %2262 = vmatprep.subr.bf16.mxu0 %v4843_v2  ;;  %4808 = vmatprep.subr.bf16.mxu1 %v4843_v2  ;;  %v4854_v9 = vld [vmem:[%s7270_s1 + $0x30] ss:$8 sps:$4 sm:$0xff]   ;;  %v4855_v10 = vld [vmem:[%s7270_s1 + $0x24] ss:$8 sps:$4 sm:$0xff]   ;;  %v4857_v11 = vld [vmem:[%s7270_s1 + $0x20] ss:$8 sps:$4 sm:$0xff]  }
   0x5   :  { %v4858_v12 = vld [vmem:[%s7270_s1 + $0x14] ss:$8 sps:$4 sm:$0xff]   ;;  %v4890_v13 = vld [vmem:[%s7271_s0 + $0x4] ss:$36 sps:$4 sm:$0xff]   ;;  %v4860_v14 = vld [vmem:[%s7270_s1 + $0x10] ss:$8 sps:$4 sm:$0xff]  }
   0x6   :  { %v4893_v15 = vld [vmem:[%s7271_s0 + $0x3ac] ss:$36 sps:$4 sm:$0xff]   ;;  %2292 = vmatprep.mubr.bf16.mxu0 %v4890_v13  ;;  %v4863_v17 = vld [vmem:[%s7270_s1] ss:$8 sps:$4 sm:$0xff]   ;;  %v4864_v18 = vld [vmem:[%s7270_s1 + $0xf4] ss:$8 sps:$4 sm:$0xff]  }
   0x7   :  { %2263 = vmatpush1.bf16.msra.mxu0 %v4845_v3  ;;  %4824 = vmatpush1.bf16.msra.mxu1 %v4845_v3  ;;  %v4861_v16 = vld [vmem:[%s7270_s1 + $0x4] ss:$8 sps:$4 sm:$0xff]   ;;  %v4866_v19 = vld [vmem:[%s7270_s1 + $0xf0] ss:$8 sps:$4 sm:$0xff]   ;;  %v4869_v21 = vld [vmem:[%s7270_s1 + $0xe0] ss:$8 sps:$4 sm:$0xff]  }
   0x8   :  { %2264 = vmatprep.subr.bf16.mxu0 %v4846_v4  ;;  %4809 = vmatprep.subr.bf16.mxu1 %v4846_v4  ;;  %v4867_v20 = vld [vmem:[%s7270_s1 + $0xe4] ss:$8 sps:$4 sm:$0xff]   ;;  %v4870_v22 = vld [vmem:[%s7270_s1 + $0xd4] ss:$8 sps:$4 sm:$0xff]   ;;  %v4872_v23 = vld [vmem:[%s7270_s1 + $0xd0] ss:$8 sps:$4 sm:$0xff]  }
   0x9   :  { %2422 = vmatprep.mubr.bf16.mxu1 %v4893_v15  ;;  %v4873_v24 = vld [vmem:[%s7270_s1 + $0xc4] ss:$8 sps:$4 sm:$0xff]   ;;  %v4875_v25 = vld [vmem:[%s7270_s1 + $0xc0] ss:$8 sps:$4 sm:$0xff]   ;;  %v4876_v26 = vld [vmem:[%s7270_s1 + $0xb4] ss:$8 sps:$4 sm:$0xff]  }
   0xa   :  { %v4878_v27 = vld [vmem:[%s7270_s1 + $0xb0] ss:$8 sps:$4 sm:$0xff]   ;;  %v4879_v28 = vld [vmem:[%s7270_s1 + $0xa4] ss:$8 sps:$4 sm:$0xff]   ;;  %v4881_v29 = vld [vmem:[%s7270_s1 + $0xa0] ss:$8 sps:$4 sm:$0xff]  }
   0xb   :  { %2265 = vmatpush1.bf16.msra.mxu0 %v4848_v5  ;;  %4825 = vmatpush1.bf16.msra.mxu1 %v4848_v5  ;;  %v4882_v30 = vld [vmem:[%s7270_s1 + $0x94] ss:$8 sps:$4 sm:$0xff]   ;;  %v4884_v31 = vld [vmem:[%s7270_s1 + $0x90] ss:$8 sps:$4 sm:$0xff]   ;;  %v4885_v32 = vld [vmem:[%s7270_s1 + $0x84] ss:$8 sps:$4 sm:$0xff]  }
   0xc   :  { %2266 = vmatprep.subr.bf16.mxu0 %v4849_v6  ;;  %4810 = vmatprep.subr.bf16.mxu1 %v4849_v6  ;;  %v4887_v33 = vld [vmem:[%s7270_s1 + $0x80] ss:$8 sps:$4 sm:$0xff]   ;;  %v4896_v34 = vld [vmem:[%s7270_s1 + $0x274] ss:$8 sps:$4 sm:$0xff]   ;;  %v4894_v38 = vld [vmem:[%s7270_s1 + $0x270] ss:$8 sps:$4 sm:$0xff]  }
   0xd   :  { %v4888_v35 = vld [vmem:[%s7271_s0] ss:$36 sps:$4 sm:$0xff]   ;;  %v4899_v36 = vld [vmem:[%s7270_s1 + $0x174] ss:$8 sps:$4 sm:$0xff]   ;;  %v4891_v37 = vld [vmem:[%s7271_s0 + $0x3a8] ss:$36 sps:$4 sm:$0xff]  }
   0xe   :  { %v4897_v39 = vld [vmem:[%s7270_s1 + $0x170] ss:$8 sps:$4 sm:$0xff]   ;;  %v4906_v42 = vld [vmem:[%s7270_s1 + $0x264] ss:$8 sps:$4 sm:$0xff]   ;;  %v4904_v44 = vld [vmem:[%s7270_s1 + $0x260] ss:$8 sps:$4 sm:$0xff]  }
   0xf   :  { %2267 = vmatpush1.bf16.msra.mxu0 %v4851_v7  ;;  %4826 = vmatpush1.bf16.msra.mxu1 %v4851_v7  ;;  %v4900_v40 = vld [vmem:[%s7271_s0 + $0x4c] ss:$36 sps:$4 sm:$0xff]   ;;  %v4902_v41 = vld [vmem:[%s7271_s0 + $0x3f4] ss:$36 sps:$4 sm:$0xff]   ;;  %v4909_v45 = vld [vmem:[%s7270_s1 + $0x160] ss:$8 sps:$4 sm:$0xff]  }
  0x10   :  { %2268 = vmatprep.subr.bf16.mxu0 %v4852_v8  ;;  %4811 = vmatprep.subr.bf16.mxu1 %v4852_v8  ;;  %v4911_v43 = vld [vmem:[%s7270_s1 + $0x164] ss:$8 sps:$4 sm:$0xff]   ;;  %v4908_v47 = vld [vmem:[%s7271_s0 + $0x3f0] ss:$36 sps:$4 sm:$0xff]   ;;  %v4917_v52 = vld [vmem:[%s7271_s0 + $0x43c] ss:$36 sps:$4 sm:$0xff]  }
  0x11   :  { %v4907_v46 = vld [vmem:[%s7271_s0 + $0x48] ss:$36 sps:$4 sm:$0xff]   ;;  %v4914_v48 = vld [vmem:[%s7270_s1 + $0x254] ss:$8 sps:$4 sm:$0xff]   ;;  %v4912_v50 = vld [vmem:[%s7270_s1 + $0x250] ss:$8 sps:$4 sm:$0xff]  }
  0x12   :  { %v4923_v49 = vld [vmem:[%s7270_s1 + $0x154] ss:$8 sps:$4 sm:$0xff]   ;;  %v4921_v53 = vld [vmem:[%s7270_s1 + $0x150] ss:$8 sps:$4 sm:$0xff]   ;;  %v4926_v54 = vld [vmem:[%s7270_s1 + $0x244] ss:$8 sps:$4 sm:$0xff]  }
  0x13   :  { %2269 = vmatpush1.bf16.msra.mxu0 %v4854_v9  ;;  %4827 = vmatpush1.bf16.msra.mxu1 %v4854_v9  ;;  %v4915_v51 = vld [vmem:[%s7271_s0 + $0x94] ss:$36 sps:$4 sm:$0xff]   ;;  %v4935_v55 = vld [vmem:[%s7270_s1 + $0x144] ss:$8 sps:$4 sm:$0xff]   ;;  %v4924_v56 = vld [vmem:[%s7270_s1 + $0x240] ss:$8 sps:$4 sm:$0xff]  }
  0x14   :  { %2270 = vmatprep.subr.bf16.mxu0 %v4855_v10  ;;  %4812 = vmatprep.subr.bf16.mxu1 %v4855_v10  ;;  %v4919_v57 = vld [vmem:[%s7271_s0 + $0x90] ss:$36 sps:$4 sm:$0xff]   ;;  %v4920_v58 = vld [vmem:[%s7271_s0 + $0x438] ss:$36 sps:$4 sm:$0xff]   ;;  %v4933_v59 = vld [vmem:[%s7270_s1 + $0x140] ss:$8 sps:$4 sm:$0xff]  }
  0x15   :  { %v4938_v60 = vld [vmem:[%s7270_s1 + $0x234] ss:$8 sps:$4 sm:$0xff]   ;;  %v4929_v63 = vld [vmem:[%s7271_s0 + $0x484] ss:$36 sps:$4 sm:$0xff]   ;;  %v4936_v0 = vld [vmem:[%s7270_s1 + $0x230] ss:$8 sps:$4 sm:$0xff]  }
  0x16   :  { %v4941_v61 = vld [vmem:[%s7270_s1 + $0x134] ss:$8 sps:$4 sm:$0xff]   ;;  %v4939_v1 = vld [vmem:[%s7270_s1 + $0x130] ss:$8 sps:$4 sm:$0xff]   ;;  %v4950_v2 = vld [vmem:[%s7270_s1 + $0x224] ss:$8 sps:$4 sm:$0xff]  }
  0x17   :  { %2271 = vmatpush1.bf16.msra.mxu0 %v4857_v11  ;;  %4828 = vmatpush1.bf16.msra.mxu1 %v4857_v11  ;;  %v4927_v62 = vld [vmem:[%s7271_s0 + $0xdc] ss:$36 sps:$4 sm:$0xff]   ;;  %v4953_v3 = vld [vmem:[%s7270_s1 + $0x124] ss:$8 sps:$4 sm:$0xff]   ;;  %v4963_v13 = vld [vmem:[%s7270_s1 + $0x110] ss:$8 sps:$4 sm:$0xff]  }
  0x18   :  { %2272 = vmatprep.subr.bf16.mxu0 %v4858_v12  ;;  %4813 = vmatprep.subr.bf16.mxu1 %v4858_v12  ;;  %v4948_v4 = vld [vmem:[%s7270_s1 + $0x220] ss:$8 sps:$4 sm:$0xff]   ;;  %v4931_v5 = vld [vmem:[%s7271_s0 + $0xd8] ss:$36 sps:$4 sm:$0xff]   ;;  %v4944_v11 = vld [vmem:[%s7271_s0 + $0x4cc] ss:$36 sps:$4 sm:$0xff]  }
  0x19   :  { %v4951_v6 = vld [vmem:[%s7270_s1 + $0x120] ss:$8 sps:$4 sm:$0xff]   ;;  %v4960_v7 = vld [vmem:[%s7270_s1 + $0x214] ss:$8 sps:$4 sm:$0xff]   ;;  %v4958_v12 = vld [vmem:[%s7270_s1 + $0x210] ss:$8 sps:$4 sm:$0xff]  }
  0x1a   :  { %v4965_v8 = vld [vmem:[%s7270_s1 + $0x114] ss:$8 sps:$4 sm:$0xff]   ;;  %v4932_v9 = vld [vmem:[%s7271_s0 + $0x480] ss:$36 sps:$4 sm:$0xff]  }
  0x1b   :  { %2273 = vmatpush1.bf16.msra.mxu0 %v4860_v14  ;;  %4829 = vmatpush1.bf16.msra.mxu1 %v4860_v14  ;;  %v4942_v10 = vld [vmem:[%s7271_s0 + $0x124] ss:$36 sps:$4 sm:$0xff]  }
  0x1c   :  { %2274 = vmatprep.subr.bf16.mxu0 %v4861_v16  ;;  %4814 = vmatprep.subr.bf16.mxu1 %v4861_v16  ;;  %v4968_v14 = vld [vmem:[%s7270_s1 + $0x204] ss:$8 sps:$4 sm:$0xff]   ;;  %v4966_v16 = vld [vmem:[%s7270_s1 + $0x200] ss:$8 sps:$4 sm:$0xff]  }
  0x1d   :  { %v4977_v15 = vld [vmem:[%s7270_s1 + $0x104] ss:$8 sps:$4 sm:$0xff]  }
  0x1f   :  { %2275 = vmatpush1.bf16.msra.mxu0 %v4863_v17  ;;  %4830 = vmatpush1.bf16.msra.mxu1 %v4863_v17  ;;  %v4946_v17 = vld [vmem:[%s7271_s0 + $0x120] ss:$36 sps:$4 sm:$0xff]  }
  0x20   :  { %2276 = vmatprep.subr.bf16.mxu0 %v4864_v18  ;;  %4815 = vmatprep.subr.bf16.mxu1 %v4864_v18  ;;  %v4947_v18 = vld [vmem:[%s7271_s0 + $0x4c8] ss:$36 sps:$4 sm:$0xff]  }
  0x23   :  { %2277 = vmatpush2.bf16.msra.mxu0 %v4866_v19  ;;  %4831 = vmatpush2.bf16.msra.mxu1 %v4866_v19  ;;  %v4975_v19 = vld [vmem:[%s7270_s1 + $0x100] ss:$8 sps:$4 sm:$0xff]  }
  0x24   :  { %2278 = vmatprep.subr.bf16.mxu0 %v4867_v20  ;;  %4816 = vmatprep.subr.bf16.mxu1 %v4867_v20  ;;  %v4980_v20 = vld [vmem:[%s7270_s1 + $0x2f4] ss:$8 sps:$4 sm:$0xff]  }
  0x27   :  { %2279 = vmatpush2.bf16.msra.mxu0 %v4869_v21  ;;  %4832 = vmatpush2.bf16.msra.mxu1 %v4869_v21  ;;  %v4983_v21 = vld [vmem:[%s7270_s1 + $0x1f4] ss:$8 sps:$4 sm:$0xff]  }
  0x28   :  { %2280 = vmatprep.subr.bf16.mxu0 %v4870_v22  ;;  %4817 = vmatprep.subr.bf16.mxu1 %v4870_v22  ;;  %v4954_v22 = vld [vmem:[%s7271_s0 + $0x16c] ss:$36 sps:$4 sm:$0xff]  }
  0x2b   :  { %2281 = vmatpush2.bf16.msra.mxu0 %v4872_v23  ;;  %4833 = vmatpush2.bf16.msra.mxu1 %v4872_v23  ;;  %v4956_v23 = vld [vmem:[%s7271_s0 + $0x514] ss:$36 sps:$4 sm:$0xff]  }
  0x2c   :  { %2282 = vmatprep.subr.bf16.mxu0 %v4873_v24  ;;  %4818 = vmatprep.subr.bf16.mxu1 %v4873_v24  ;;  %v4978_v24 = vld [vmem:[%s7270_s1 + $0x2f0] ss:$8 sps:$4 sm:$0xff]  }
  0x2f   :  { %2283 = vmatpush2.bf16.msra.mxu0 %v4875_v25  ;;  %4834 = vmatpush2.bf16.msra.mxu1 %v4875_v25  ;;  %v4981_v25 = vld [vmem:[%s7270_s1 + $0x1f0] ss:$8 sps:$4 sm:$0xff]  }
  0x30   :  { %2284 = vmatprep.subr.bf16.mxu0 %v4876_v26  ;;  %4819 = vmatprep.subr.bf16.mxu1 %v4876_v26  ;;  %v4992_v26 = vld [vmem:[%s7270_s1 + $0x2e4] ss:$8 sps:$4 sm:$0xff]  }
  0x33   :  { %2285 = vmatpush2.bf16.msra.mxu0 %v4878_v27  ;;  %4835 = vmatpush2.bf16.msra.mxu1 %v4878_v27  ;;  %v4995_v27 = vld [vmem:[%s7270_s1 + $0x1e4] ss:$8 sps:$4 sm:$0xff]  }
  0x34   :  { %2286 = vmatprep.subr.bf16.mxu0 %v4879_v28  ;;  %4820 = vmatprep.subr.bf16.mxu1 %v4879_v28  ;;  %v4990_v28 = vld [vmem:[%s7270_s1 + $0x2e0] ss:$8 sps:$4 sm:$0xff]  }
  0x37   :  { %2287 = vmatpush2.bf16.msra.mxu0 %v4881_v29  ;;  %4836 = vmatpush2.bf16.msra.mxu1 %v4881_v29  ;;  %v4961_v29 = vld [vmem:[%s7271_s0 + $0x168] ss:$36 sps:$4 sm:$0xff]  }
  0x38   :  { %2288 = vmatprep.subr.bf16.mxu0 %v4882_v30  ;;  %4821 = vmatprep.subr.bf16.mxu1 %v4882_v30  ;;  %v4962_v30 = vld [vmem:[%s7271_s0 + $0x510] ss:$36 sps:$4 sm:$0xff]  }
  0x3b   :  { %2289 = vmatpush2.bf16.msra.mxu0 %v4884_v31  ;;  %4837 = vmatpush2.bf16.msra.mxu1 %v4884_v31  ;;  %v4993_v31 = vld [vmem:[%s7270_s1 + $0x1e0] ss:$8 sps:$4 sm:$0xff]  }
  0x3c   :  { %2290 = vmatprep.subr.bf16.mxu0 %v4885_v32  ;;  %4822 = vmatprep.subr.bf16.mxu1 %v4885_v32  ;;  %v5004_v32 = vld [vmem:[%s7270_s1 + $0x2d4] ss:$8 sps:$4 sm:$0xff]  }
  0x3f   :  { %2291 = vmatpush2.bf16.msra.mxu0 %v4887_v33  ;;  %4838 = vmatpush2.bf16.msra.mxu1 %v4887_v33  ;;  %v5007_v33 = vld [vmem:[%s7270_s1 + $0x1d4] ss:$8 sps:$4 sm:$0xff]  }
  0x40   :  { %2822 = vmatprep.subr.bf16.mxu0 %v4896_v34  ;;  %2541 = vmatprep.subr.bf16.mxu1 %v4899_v36  ;;  %v4969_v34 = vld [vmem:[%s7271_s0 + $0x1b4] ss:$36 sps:$4 sm:$0xff]  }
  0x41   :  { %v5002_v36 = vld [vmem:[%s7270_s1 + $0x2d0] ss:$8 sps:$4 sm:$0xff]  }
  0x42   :  { %2293 = vmatmul.mubr.bf16.vlgmr.msra.gmra.mxu0 %v4888_v35  ;;  %2423 = vmatmul.mubr.bf16.vlgmr.msra.gmra.mxu1 %v4891_v37  ;;  %v4971_v35 = vld [vmem:[%s7271_s0 + $0x55c] ss:$36 sps:$4 sm:$0xff]   ;;  %v5005_v37 = vld [vmem:[%s7270_s1 + $0x1d0] ss:$8 sps:$4 sm:$0xff]  }
  0x43   :  { %2823 = vmatpush1.bf16.msra.mxu0 %v4894_v38  ;;  %2302 = vmatprep.mubr.bf16.mxu0 %v4900_v40  ;;  %v5016_v38 = vld [vmem:[%s7270_s1 + $0x1c4] ss:$8 sps:$4 sm:$0xff]   ;;  %v5014_v40 = vld [vmem:[%s7270_s1 + $0x1c0] ss:$8 sps:$4 sm:$0xff]  }
  0x44   :  { %2432 = vmatprep.mubr.bf16.mxu1 %v4902_v41  ;;  %2542 = vmatpush1.bf16.msra.mxu1 %v4897_v39  ;;  %v5019_v39 = vld [vmem:[%s7270_s1 + $0x2c4] ss:$8 sps:$4 sm:$0xff]   ;;  %v4973_v41 = vld [vmem:[%s7271_s0 + $0x1b0] ss:$36 sps:$4 sm:$0xff]  }
  0x45   :  { %2824 = vmatprep.subr.bf16.mxu0 %v4906_v42  ;;  %2543 = vmatprep.subr.bf16.mxu1 %v4911_v43  ;;  %v4974_v42 = vld [vmem:[%s7271_s0 + $0x558] ss:$36 sps:$4 sm:$0xff]   ;;  %v5017_v43 = vld [vmem:[%s7270_s1 + $0x2c0] ss:$8 sps:$4 sm:$0xff]  }
  0x47   :  { %2825 = vmatpush1.bf16.msra.mxu0 %v4904_v44  ;;  %v5022_v44 = vld [vmem:[%s7270_s1 + $0x1b4] ss:$8 sps:$4 sm:$0xff]  }
  0x48   :  { %2544 = vmatpush1.bf16.msra.mxu1 %v4909_v45  ;;  %2826 = vmatprep.subr.bf16.mxu0 %v4914_v48  ;;  %v5025_v45 = vld [vmem:[%s7270_s1 + $0x2b4] ss:$8 sps:$4 sm:$0xff]   ;;  %v5020_v48 = vld [vmem:[%s7270_s1 + $0x1b0] ss:$8 sps:$4 sm:$0xff]  }
  0x49   :  { %2545 = vmatprep.subr.bf16.mxu1 %v4923_v49  ;;  %v5023_v49 = vld [vmem:[%s7270_s1 + $0x2b0] ss:$8 sps:$4 sm:$0xff]  }
  0x4a   :  { %2303 = vmatmul.mubr.bf16.gmra.mxu0 %v4907_v46  ;;  %2433 = vmatmul.mubr.bf16.gmra.mxu1 %v4908_v47  ;;  %v4984_v46 = vld [vmem:[%s7271_s0 + $0x1fc] ss:$36 sps:$4 sm:$0xff]   ;;  %v4986_v47 = vld [vmem:[%s7271_s0 + $0x5a4] ss:$36 sps:$4 sm:$0xff]  }
  0x4b   :  { %2827 = vmatpush1.bf16.msra.mxu0 %v4912_v50  ;;  %2312 = vmatprep.mubr.bf16.mxu0 %v4915_v51  ;;  %v5034_v50 = vld [vmem:[%s7270_s1 + $0x1a4] ss:$8 sps:$4 sm:$0xff]  }
  0x4c   :  { %2442 = vmatprep.mubr.bf16.mxu1 %v4917_v52  ;;  %2546 = vmatpush1.bf16.msra.mxu1 %v4921_v53  ;;  %v5037_v51 = vld [vmem:[%s7270_s1 + $0x2a4] ss:$8 sps:$4 sm:$0xff]   ;;  %v5032_v52 = vld [vmem:[%s7270_s1 + $0x1a0] ss:$8 sps:$4 sm:$0xff]   ;;  %v4988_v53 = vld [vmem:[%s7271_s0 + $0x1f8] ss:$36 sps:$4 sm:$0xff]  }
  0x4d   :  { %2828 = vmatprep.subr.bf16.mxu0 %v4926_v54  ;;  %2547 = vmatprep.subr.bf16.mxu1 %v4935_v55  ;;  %v4989_v54 = vld [vmem:[%s7271_s0 + $0x5a0] ss:$36 sps:$4 sm:$0xff]  }
  0x4e   :  { %v5035_v55 = vld [vmem:[%s7270_s1 + $0x2a0] ss:$8 sps:$4 sm:$0xff]  }
  0x4f   :  { %2829 = vmatpush1.bf16.msra.mxu0 %v4924_v56  ;;  %v5045_v56 = vld [vmem:[%s7270_s1 + $0x194] ss:$8 sps:$4 sm:$0xff]  }
  0x50   :  { %2548 = vmatpush1.bf16.msra.mxu1 %v4933_v59  ;;  %2830 = vmatprep.subr.bf16.mxu0 %v4938_v60  ;;  %v4998_v59 = vld [vmem:[%s7271_s0 + $0x5ec] ss:$36 sps:$4 sm:$0xff]  }
  0x51   :  { %2549 = vmatprep.subr.bf16.mxu1 %v4941_v61  ;;  %v5043_v60 = vld [vmem:[%s7270_s1 + $0x190] ss:$8 sps:$4 sm:$0xff]  }
  0x52   :  { %2313 = vmatmul.mubr.bf16.gmra.mxu0 %v4919_v57  ;;  %2443 = vmatmul.mubr.bf16.gmra.mxu1 %v4920_v58  ;;  %v5048_v57 = vld [vmem:[%s7270_s1 + $0x294] ss:$8 sps:$4 sm:$0xff]   ;;  %v4996_v58 = vld [vmem:[%s7271_s0 + $0x244] ss:$36 sps:$4 sm:$0xff]   ;;  %v5046_v61 = vld [vmem:[%s7270_s1 + $0x290] ss:$8 sps:$4 sm:$0xff]  }
  0x53   :  { %2322 = vmatprep.mubr.bf16.mxu0 %v4927_v62  ;;  %2452 = vmatprep.mubr.bf16.mxu1 %v4929_v63  ;;  %v5051_v62 = vld [vmem:[%s7270_s1 + $0x184] ss:$8 sps:$4 sm:$0xff]  }
  0x54   :  { %2831 = vmatpush1.bf16.msra.mxu0 %v4936_v0  ;;  %2550 = vmatpush1.bf16.msra.mxu1 %v4939_v1  ;;  %v5060_v63 = vld [vmem:[%s7270_s1 + $0x284] ss:$8 sps:$4 sm:$0xff]   ;;  %v5049_v0 = vld [vmem:[%s7270_s1 + $0x180] ss:$8 sps:$4 sm:$0xff]  }
  0x55   :  { %2832 = vmatprep.subr.bf16.mxu0 %v4950_v2  ;;  %2551 = vmatprep.subr.bf16.mxu1 %v4953_v3  ;;  %v5000_v1 = vld [vmem:[%s7271_s0 + $0x240] ss:$36 sps:$4 sm:$0xff]   ;;  %v5063_v3 = vld [vmem:[%s7270_s1 + $0x374] ss:$8 sps:$4 sm:$0xff]  }
  0x56   :  { %v5058_v2 = vld [vmem:[%s7270_s1 + $0x280] ss:$8 sps:$4 sm:$0xff]  }
  0x58   :  { %2833 = vmatpush1.bf16.msra.mxu0 %v4948_v4  ;;  %2552 = vmatpush1.bf16.msra.mxu1 %v4951_v6  ;;  %v5072_v4 = vld [vmem:[%s7270_s1 + $0x474] ss:$8 sps:$4 sm:$0xff]   ;;  %v5008_v6 = vld [vmem:[%s7271_s0 + $0x28c] ss:$36 sps:$4 sm:$0xff]  }
  0x59   :  { %2834 = vmatprep.subr.bf16.mxu0 %v4960_v7  ;;  %2553 = vmatprep.subr.bf16.mxu1 %v4965_v8  ;;  %v5010_v7 = vld [vmem:[%s7271_s0 + $0x634] ss:$36 sps:$4 sm:$0xff]   ;;  %v5012_v8 = vld [vmem:[%s7271_s0 + $0x288] ss:$36 sps:$4 sm:$0xff]  }
  0x5a   :  { %2323 = vmatmul.mubr.bf16.gmra.mxu0 %v4931_v5  ;;  %2453 = vmatmul.mubr.bf16.gmra.mxu1 %v4932_v9  ;;  %v5001_v5 = vld [vmem:[%s7271_s0 + $0x5e8] ss:$36 sps:$4 sm:$0xff]   ;;  %v5013_v9 = vld [vmem:[%s7271_s0 + $0x630] ss:$36 sps:$4 sm:$0xff]  }
  0x5b   :  { %2332 = vmatprep.mubr.bf16.mxu0 %v4942_v10  ;;  %2462 = vmatprep.mubr.bf16.mxu1 %v4944_v11  ;;  %v5026_v10 = vld [vmem:[%s7271_s0 + $0x2d4] ss:$36 sps:$4 sm:$0xff]   ;;  %v5028_v11 = vld [vmem:[%s7271_s0 + $0x67c] ss:$36 sps:$4 sm:$0xff]  }
  0x5c   :  { %2835 = vmatpush1.bf16.msra.mxu0 %v4958_v12  ;;  %2554 = vmatpush1.bf16.msra.mxu1 %v4963_v13  ;;  %v255_v12 = vld [vmem:[%s7271_s0 + $0x6c0] sm:$0xff]  ;;  %v5030_v13 = vld [vmem:[%s7271_s0 + $0x2d0] ss:$36 sps:$4 sm:$0xff]  }
  0x5d   :  { %2836 = vmatprep.subr.bf16.mxu0 %v4968_v14  ;;  %2555 = vmatprep.subr.bf16.mxu1 %v4977_v15  ;;  %v5031_v14 = vld [vmem:[%s7271_s0 + $0x678] ss:$36 sps:$4 sm:$0xff]  }
  0x5e   :  { %v5038_v15 = vld [vmem:[%s7271_s0 + $0x31c] ss:$36 sps:$4 sm:$0xff]  }
  0x60   :  { %2837 = vmatpush1.bf16.msra.mxu0 %v4966_v16  ;;  %2556 = vmatpush1.bf16.msra.mxu1 %v4975_v19  ;;  %v4557_v16 = vcombine.high %v255_v12, %v255_v12  ;;  %v5052_v19 = vld [vmem:[%s7271_s0 + $0x364] ss:$36 sps:$4 sm:$0xff]  }
  0x61   :  { %2838 = vmatprep.subr.bf16.mxu0 %v4980_v20  ;;  %2557 = vmatprep.subr.bf16.mxu1 %v4983_v21  ;;  %v5056_v20 = vld [vmem:[%s7271_s0 + $0xc] ss:$36 sps:$4 sm:$0xff]  }
  0x62   :  { %2333 = vmatmul.mubr.bf16.gmra.mxu0 %v4946_v17  ;;  %2463 = vmatmul.mubr.bf16.gmra.mxu1 %v4947_v18  ;;  %v5041_v17 = vld [vmem:[%s7271_s0 + $0x318] ss:$36 sps:$4 sm:$0xff]   ;;  %v4556_v18 = vcombine.low %v255_v12, %v255_v12  ;;  %v5054_v21 = vld [vmem:[%s7271_s0 + $0x8] ss:$36 sps:$4 sm:$0xff]  }
  0x63   :  { %2342 = vmatprep.mubr.bf16.mxu0 %v4954_v22  ;;  %2472 = vmatprep.mubr.bf16.mxu1 %v4956_v23  ;;  %v5057_v22 = vld [vmem:[%s7271_s0 + $0x360] ss:$36 sps:$4 sm:$0xff]   ;;  %v5064_v23 = vld [vmem:[%s7271_s0 + $0x54] ss:$36 sps:$4 sm:$0xff]  }
  0x64   :  { %2839 = vmatpush2.bf16.msra.mxu0 %v4978_v24  ;;  %2558 = vmatpush2.bf16.msra.mxu1 %v4981_v25  ;;  %v5068_v24 = vld [vmem:[%s7271_s0 + $0x14] ss:$36 sps:$4 sm:$0xff]   ;;  %v5109_v12 = vld [vmem:[%s7271_s0 + $0x1bc] ss:$36 sps:$4 sm:$0xff]  }
  0x65   :  { %2840 = vmatprep.subr.bf16.mxu0 %v4992_v26  ;;  %2559 = vmatprep.subr.bf16.mxu1 %v4995_v27  ;;  %v5061_v25 = vld [vmem:[%s7270_s1 + $0x370] ss:$8 sps:$4 sm:$0xff]   ;;  %v5081_v26 = vld [vmem:[%s7270_s1 + $0x364] ss:$8 sps:$4 sm:$0xff]  }
  0x66   :  { %v5066_v27 = vld [vmem:[%s7271_s0 + $0x10] ss:$36 sps:$4 sm:$0xff]  }
  0x68   :  { %2841 = vmatpush2.bf16.msra.mxu0 %v4990_v28  ;;  %2560 = vmatpush2.bf16.msra.mxu1 %v4993_v31  ;;  %v5069_v28 = vld [vmem:[%s7271_s0 + $0x50] ss:$36 sps:$4 sm:$0xff]  }
  0x69   :  { %2842 = vmatprep.subr.bf16.mxu0 %v5004_v32  ;;  %2561 = vmatprep.subr.bf16.mxu1 %v5007_v33  ;;  %v5070_v31 = vld [vmem:[%s7270_s1 + $0x470] ss:$8 sps:$4 sm:$0xff]   ;;  %v5073_v32 = vld [vmem:[%s7271_s0 + $0x9c] ss:$36 sps:$4 sm:$0xff]  }
  0x6a   :  { %2343 = vmatmul.mubr.bf16.gmra.mxu0 %v4961_v29  ;;  %2473 = vmatmul.mubr.bf16.gmra.mxu1 %v4962_v30  ;;  %v5079_v29 = vld [vmem:[%s7270_s1 + $0x360] ss:$8 sps:$4 sm:$0xff]   ;;  %v5094_v30 = vld [vmem:[%s7270_s1 + $0x354] ss:$8 sps:$4 sm:$0xff]  }
  0x6b   :  { %2352 = vmatprep.mubr.bf16.mxu0 %v4969_v34  ;;  %2482 = vmatprep.mubr.bf16.mxu1 %v4971_v35  ;;  %v5075_v33 = vld [vmem:[%s7271_s0 + $0x5c] ss:$36 sps:$4 sm:$0xff]   ;;  %v5092_v34 = vld [vmem:[%s7270_s1 + $0x350] ss:$8 sps:$4 sm:$0xff]   ;;  %v5099_v35 = vld [vmem:[%s7270_s1 + $0x464] ss:$8 sps:$4 sm:$0xff]  }
  0x6c   :  { %2843 = vmatpush2.bf16.msra.mxu0 %v5002_v36  ;;  %2562 = vmatpush2.bf16.msra.mxu1 %v5005_v37  ;;  %v5108_v36 = vld [vmem:[%s7270_s1 + $0x344] ss:$8 sps:$4 sm:$0xff]   ;;  %v5097_v37 = vld [vmem:[%s7270_s1 + $0x460] ss:$8 sps:$4 sm:$0xff]  }
  0x6d   :  { %2563 = vmatprep.subr.bf16.mxu1 %v5016_v38  ;;  %2844 = vmatprep.subr.bf16.mxu0 %v5019_v39  ;;  %v5106_v38 = vld [vmem:[%s7270_s1 + $0x340] ss:$8 sps:$4 sm:$0xff]   ;;  %v5126_v39 = vld [vmem:[%s7270_s1 + $0x454] ss:$8 sps:$4 sm:$0xff]  }
  0x70   :  { %2564 = vmatpush2.bf16.msra.mxu1 %v5014_v40  ;;  %2845 = vmatpush2.bf16.msra.mxu0 %v5017_v43  ;;  %v5123_v40 = vld [vmem:[%s7270_s1 + $0x334] ss:$8 sps:$4 sm:$0xff]   ;;  %v5082_v43 = vld [vmem:[%s7271_s0 + $0xe4] ss:$36 sps:$4 sm:$0xff]  }
  0x71   :  { %2565 = vmatprep.subr.bf16.mxu1 %v5022_v44  ;;  %2846 = vmatprep.subr.bf16.mxu0 %v5025_v45  ;;  %v5084_v44 = vld [vmem:[%s7271_s0 + $0xa4] ss:$36 sps:$4 sm:$0xff]   ;;  %v5121_v45 = vld [vmem:[%s7270_s1 + $0x330] ss:$8 sps:$4 sm:$0xff]  }
  0x72   :  { %2353 = vmatmul.mubr.bf16.gmra.mxu0 %v4973_v41  ;;  %2483 = vmatmul.mubr.bf16.gmra.mxu1 %v4974_v42  ;;  %v5077_v41 = vld [vmem:[%s7271_s0 + $0x98] ss:$36 sps:$4 sm:$0xff]  }
  0x73   :  { %2362 = vmatprep.mubr.bf16.mxu0 %v4984_v46  ;;  %2492 = vmatprep.mubr.bf16.mxu1 %v4986_v47  ;;  %v5078_v42 = vld [vmem:[%s7271_s0 + $0x58] ss:$36 sps:$4 sm:$0xff]   ;;  %v5135_v47 = vld [vmem:[%s7270_s1 + $0x324] ss:$8 sps:$4 sm:$0xff]  }
  0x74   :  { %2566 = vmatpush2.bf16.msra.mxu1 %v5020_v48  ;;  %2847 = vmatpush2.bf16.msra.mxu0 %v5023_v49  ;;  %v5124_v46 = vld [vmem:[%s7270_s1 + $0x450] ss:$8 sps:$4 sm:$0xff]   ;;  %v5153_v48 = vld [vmem:[%s7270_s1 + $0x444] ss:$8 sps:$4 sm:$0xff]   ;;  %v5133_v49 = vld [vmem:[%s7270_s1 + $0x320] ss:$8 sps:$4 sm:$0xff]  }
  0x75   :  { %2567 = vmatprep.subr.bf16.mxu1 %v5034_v50  ;;  %2848 = vmatprep.subr.bf16.mxu0 %v5037_v51  ;;  %v5151_v50 = vld [vmem:[%s7270_s1 + $0x440] ss:$8 sps:$4 sm:$0xff]   ;;  %v5150_v51 = vld [vmem:[%s7270_s1 + $0x314] ss:$8 sps:$4 sm:$0xff]  }
  0x78   :  { %2568 = vmatpush2.bf16.msra.mxu1 %v5032_v52  ;;  %2849 = vmatpush2.bf16.msra.mxu0 %v5035_v55  ;;  %v5180_v52 = vld [vmem:[%s7270_s1 + $0x434] ss:$8 sps:$4 sm:$0xff]   ;;  %v5088_v55 = vld [vmem:[%s7271_s0 + $0x12c] ss:$36 sps:$4 sm:$0xff]  }
  0x79   :  { %2569 = vmatprep.subr.bf16.mxu1 %v5045_v56  ;;  %2850 = vmatprep.subr.bf16.mxu0 %v5048_v57  ;;  %v5090_v56 = vld [vmem:[%s7271_s0 + $0xec] ss:$36 sps:$4 sm:$0xff]  }
  0x7a   :  { %2363 = vmatmul.mubr.bf16.gmra.mxu0 %v4988_v53  ;;  %2493 = vmatmul.mubr.bf16.gmra.mxu1 %v4989_v54  ;;  %v5086_v53 = vld [vmem:[%s7271_s0 + $0xe0] ss:$36 sps:$4 sm:$0xff]   ;;  %v5148_v57 = vld [vmem:[%s7270_s1 + $0x310] ss:$8 sps:$4 sm:$0xff]  }
  0x7b   :  { %2372 = vmatprep.mubr.bf16.mxu0 %v4996_v58  ;;  %2502 = vmatprep.mubr.bf16.mxu1 %v4998_v59  ;;  %v5087_v54 = vld [vmem:[%s7271_s0 + $0xa0] ss:$36 sps:$4 sm:$0xff]   ;;  %v5178_v59 = vld [vmem:[%s7270_s1 + $0x430] ss:$8 sps:$4 sm:$0xff]  }
  0x7c   :  { %2570 = vmatpush2.bf16.msra.mxu1 %v5043_v60  ;;  %2851 = vmatpush2.bf16.msra.mxu0 %v5046_v61  ;;  %v5162_v58 = vld [vmem:[%s7270_s1 + $0x304] ss:$8 sps:$4 sm:$0xff]   ;;  %v5160_v61 = vld [vmem:[%s7270_s1 + $0x300] ss:$8 sps:$4 sm:$0xff]  }
  0x7d   :  { %2571 = vmatprep.subr.bf16.mxu1 %v5051_v62  ;;  %2852 = vmatprep.subr.bf16.mxu0 %v5060_v63  ;;  %v5207_v60 = vld [vmem:[%s7270_s1 + $0x424] ss:$8 sps:$4 sm:$0xff]   ;;  %v5205_v62 = vld [vmem:[%s7270_s1 + $0x420] ss:$8 sps:$4 sm:$0xff]   ;;  %v5177_v63 = vld [vmem:[%s7270_s1 + $0x3f4] ss:$8 sps:$4 sm:$0xff]  }
  0x80   :  { %2572 = vmatpush2.bf16.msra.mxu1 %v5049_v0  ;;  %2853 = vmatpush2.bf16.msra.mxu0 %v5058_v2  ;;  %v5095_v0 = vld [vmem:[%s7271_s0 + $0x128] ss:$36 sps:$4 sm:$0xff]   ;;  %v5100_v2 = vld [vmem:[%s7271_s0 + $0x174] ss:$36 sps:$4 sm:$0xff]  }
  0x81   :  { %3103 = vmatprep.subr.bf16.mxu1 %v5063_v3  ;;  %3384 = vmatprep.subr.bf16.mxu0 %v5072_v4  ;;  %v5102_v3 = vld [vmem:[%s7271_s0 + $0x134] ss:$36 sps:$4 sm:$0xff]  }
  0x82   :  { %2373 = vmatmul.mubr.bf16.gmra.mxu0 %v5000_v1  ;;  %2503 = vmatmul.mubr.bf16.gmra.mxu1 %v5001_v5  ;;  %v5096_v1 = vld [vmem:[%s7271_s0 + $0xe8] ss:$36 sps:$4 sm:$0xff]   ;;  %v5175_v4 = vld [vmem:[%s7270_s1 + $0x3f0] ss:$8 sps:$4 sm:$0xff]  }
  0x83   :  { %2382 = vmatprep.mubr.bf16.mxu0 %v5008_v6  ;;  %2512 = vmatprep.mubr.bf16.mxu1 %v5010_v7  ;;  %v5193_v5 = vld [vmem:[%s7270_s1 + $0x3e4] ss:$8 sps:$4 sm:$0xff]   ;;  %v5234_v6 = vld [vmem:[%s7270_s1 + $0x414] ss:$8 sps:$4 sm:$0xff]   ;;  %v5232_v7 = vld [vmem:[%s7270_s1 + $0x410] ss:$8 sps:$4 sm:$0xff]  }
  0x8a   :  { %2383 = vmatmul.mubr.bf16.gmra.mxu0 %v5012_v8  ;;  %2513 = vmatmul.mubr.bf16.gmra.mxu1 %v5013_v9  ;;  %v5191_v8 = vld [vmem:[%s7270_s1 + $0x3e0] ss:$8 sps:$4 sm:$0xff]   ;;  %v5204_v9 = vld [vmem:[%s7270_s1 + $0x3d4] ss:$8 sps:$4 sm:$0xff]  }
  0x8b   :  { %2392 = vmatprep.mubr.bf16.mxu0 %v5026_v10  ;;  %2522 = vmatprep.mubr.bf16.mxu1 %v5028_v11  ;;  %v5104_v10 = vld [vmem:[%s7271_s0 + $0x170] ss:$36 sps:$4 sm:$0xff]  }
  0x8c   :  { %v5105_v11 = vld [vmem:[%s7271_s0 + $0x130] ss:$36 sps:$4 sm:$0xff]  }
  0x92   :  { %2393 = vmatmul.mubr.bf16.gmra.mxu0 %v5030_v13  ;;  %2523 = vmatmul.mubr.bf16.gmra.mxu1 %v5031_v14  ;;  %v5111_v13 = vld [vmem:[%s7271_s0 + $0x17c] ss:$36 sps:$4 sm:$0xff]   ;;  %v5202_v14 = vld [vmem:[%s7270_s1 + $0x3d0] ss:$8 sps:$4 sm:$0xff]  }
  0x93   :  { %2402 = vmatprep.mubr.bf16.mxu0 %v5038_v15  ;;  %2532 = vmatprep.mubr.bf16.mxu1 %v4557_v16  ;;  %v5222_v15 = vld [vmem:[%s7270_s1 + $0x3c4] ss:$8 sps:$4 sm:$0xff]   ;;  %v5220_v16 = vld [vmem:[%s7270_s1 + $0x3c0] ss:$8 sps:$4 sm:$0xff]  }
  0x9a   :  { %2403 = vmatmul.mubr.bf16.gmra.mxu0 %v5041_v17  ;;  %2533 = vmatmul.mubr.bf16.gmra.mxu1 %v4556_v18  ;;  %v5231_v17 = vld [vmem:[%s7270_s1 + $0x3b4] ss:$8 sps:$4 sm:$0xff]  }
  0x9b   :  { %2412 = vmatprep.mubr.bf16.mxu0 %v5052_v19  ;;  %2573 = vmatprep.mubr.bf16.mxu1 %v5056_v20  ;;  %v5113_v18 = vld [vmem:[%s7271_s0 + $0x1b8] ss:$36 sps:$4 sm:$0xff]   ;;  %v5115_v20 = vld [vmem:[%s7271_s0 + $0x204] ss:$36 sps:$4 sm:$0xff]  }
  0x9c   :  { %v5114_v19 = vld [vmem:[%s7271_s0 + $0x178] ss:$36 sps:$4 sm:$0xff]  }
  0xa2   :  { %2413 = vmatmul.mubr.bf16.gmra.mxu0 %v5057_v22  ;;  %2574 = vmatmul.mubr.bf16.vlgmr.msra.gmra.mxu1 %v5054_v21  ;;  %v5117_v21 = vld [vmem:[%s7271_s0 + $0x1c4] ss:$36 sps:$4 sm:$0xff]   ;;  %v5229_v22 = vld [vmem:[%s7270_s1 + $0x3b0] ss:$8 sps:$4 sm:$0xff]  }
  0xa3   :  { %2583 = vmatprep.mubr.bf16.mxu1 %v5064_v23  ;;  %2854 = vmatprep.mubr.bf16.mxu0 %v5068_v24  ;;  %v5249_v23 = vld [vmem:[%s7270_s1 + $0x3a4] ss:$8 sps:$4 sm:$0xff]   ;;  %v5247_v24 = vld [vmem:[%s7270_s1 + $0x3a0] ss:$8 sps:$4 sm:$0xff]  }
  0xa4   :  { %3104 = vmatpush1.bf16.msra.mxu1 %v5061_v25  ;;  %v5119_v25 = vld [vmem:[%s7271_s0 + $0x200] ss:$36 sps:$4 sm:$0xff]  }
  0xa5   :  { %3105 = vmatprep.subr.bf16.mxu1 %v5081_v26  ;;  %v5120_v26 = vld [vmem:[%s7271_s0 + $0x1c0] ss:$36 sps:$4 sm:$0xff]  }
  0xa8   :  { %3106 = vmatpush1.bf16.msra.mxu1 %v5079_v29  ;;  %v5129_v29 = vld [vmem:[%s7271_s0 + $0x20c] ss:$36 sps:$4 sm:$0xff]  }
  0xa9   :  { %3107 = vmatprep.subr.bf16.mxu1 %v5094_v30  ;;  %v5256_v30 = vld [vmem:[%s7270_s1 + $0x390] ss:$8 sps:$4 sm:$0xff]  }
  0xaa   :  { %2584 = vmatmul.mubr.bf16.gmra.mxu1 %v5069_v28  ;;  %2855 = vmatmul.mubr.bf16.vlgmr.msra.gmra.mxu0 %v5066_v27  ;;  %v5258_v27 = vld [vmem:[%s7270_s1 + $0x394] ss:$8 sps:$4 sm:$0xff]   ;;  %v5127_v28 = vld [vmem:[%s7271_s0 + $0x24c] ss:$36 sps:$4 sm:$0xff]  }
  0xab   :  { %3385 = vmatpush1.bf16.msra.mxu0 %v5070_v31  ;;  %2593 = vmatprep.mubr.bf16.mxu1 %v5073_v32  ;;  %v5265_v31 = vld [vmem:[%s7270_s1 + $0x400] ss:$8 sps:$4 sm:$0xff]   ;;  %v5267_v32 = vld [vmem:[%s7270_s1 + $0x404] ss:$8 sps:$4 sm:$0xff]  }
  0xac   :  { %2864 = vmatprep.mubr.bf16.mxu0 %v5075_v33  ;;  %3108 = vmatpush1.bf16.msra.mxu1 %v5092_v34  ;;  %v5131_v33 = vld [vmem:[%s7271_s0 + $0x248] ss:$36 sps:$4 sm:$0xff]  }
  0xad   :  { %3386 = vmatprep.subr.bf16.mxu0 %v5099_v35  ;;  %3109 = vmatprep.subr.bf16.mxu1 %v5108_v36  ;;  %v5132_v34 = vld [vmem:[%s7271_s0 + $0x208] ss:$36 sps:$4 sm:$0xff]   ;;  %v5136_v35 = vld [vmem:[%s7271_s0 + $0x294] ss:$36 sps:$4 sm:$0xff]  }
  0xae   :  { %v5138_v36 = vld [vmem:[%s7271_s0 + $0x254] ss:$36 sps:$4 sm:$0xff]  }
  0xaf   :  { %3387 = vmatpush1.bf16.msra.mxu0 %v5097_v37  ;;  %v5275_v37 = vld [vmem:[%s7270_s1 + $0x384] ss:$8 sps:$4 sm:$0xff]  }
  0xb0   :  { %3110 = vmatpush1.bf16.msra.mxu1 %v5106_v38  ;;  %3388 = vmatprep.subr.bf16.mxu0 %v5126_v39  ;;  %v5273_v38 = vld [vmem:[%s7270_s1 + $0x380] ss:$8 sps:$4 sm:$0xff]   ;;  %v5140_v39 = vld [vmem:[%s7271_s0 + $0x290] ss:$36 sps:$4 sm:$0xff]  }
  0xb1   :  { %3111 = vmatprep.subr.bf16.mxu1 %v5123_v40  ;;  %v5141_v40 = vld [vmem:[%s7271_s0 + $0x250] ss:$36 sps:$4 sm:$0xff]  }
  0xb2   :  { %2594 = vmatmul.mubr.bf16.gmra.mxu1 %v5077_v41  ;;  %2865 = vmatmul.mubr.bf16.gmra.mxu0 %v5078_v42  ;;  %v5142_v41 = vld [vmem:[%s7271_s0 + $0x2dc] ss:$36 sps:$4 sm:$0xff]  }
  0xb3   :  { %2603 = vmatprep.mubr.bf16.mxu1 %v5082_v43  ;;  %2874 = vmatprep.mubr.bf16.mxu0 %v5084_v44  ;;  %v5144_v42 = vld [vmem:[%s7271_s0 + $0x29c] ss:$36 sps:$4 sm:$0xff]  }
  0xb4   :  { %3112 = vmatpush1.bf16.msra.mxu1 %v5121_v45  ;;  %3389 = vmatpush1.bf16.msra.mxu0 %v5124_v46  ;;  %v5146_v43 = vld [vmem:[%s7271_s0 + $0x2d8] ss:$36 sps:$4 sm:$0xff]   ;;  %v5154_v45 = vld [vmem:[%s7271_s0 + $0x324] ss:$36 sps:$4 sm:$0xff]  }
  0xb5   :  { %3113 = vmatprep.subr.bf16.mxu1 %v5135_v47  ;;  %3390 = vmatprep.subr.bf16.mxu0 %v5153_v48  ;;  %v5147_v44 = vld [vmem:[%s7271_s0 + $0x298] ss:$36 sps:$4 sm:$0xff]   ;;  %v5156_v46 = vld [vmem:[%s7271_s0 + $0x2e4] ss:$36 sps:$4 sm:$0xff]  }
  0xb6   :  { %v5158_v47 = vld [vmem:[%s7271_s0 + $0x320] ss:$36 sps:$4 sm:$0xff]  }
  0xb7   :  { %v5159_v48 = vld [vmem:[%s7271_s0 + $0x2e0] ss:$36 sps:$4 sm:$0xff]  }
  0xb8   :  { %3114 = vmatpush1.bf16.msra.mxu1 %v5133_v49  ;;  %3391 = vmatpush1.bf16.msra.mxu0 %v5151_v50  ;;  %v5163_v49 = vld [vmem:[%s7271_s0 + $0x36c] ss:$36 sps:$4 sm:$0xff]  }
  0xb9   :  { %3115 = vmatprep.subr.bf16.mxu1 %v5150_v51  ;;  %3392 = vmatprep.subr.bf16.mxu0 %v5180_v52  ;;  %v5165_v50 = vld [vmem:[%s7271_s0 + $0x32c] ss:$36 sps:$4 sm:$0xff]  }
  0xba   :  { %2604 = vmatmul.mubr.bf16.gmra.mxu1 %v5086_v53  ;;  %2875 = vmatmul.mubr.bf16.gmra.mxu0 %v5087_v54  ;;  %v5167_v51 = vld [vmem:[%s7271_s0 + $0x368] ss:$36 sps:$4 sm:$0xff]   ;;  %v5169_v53 = vld [vmem:[%s7271_s0 + $0x3b4] ss:$36 sps:$4 sm:$0xff]  }
  0xbb   :  { %2613 = vmatprep.mubr.bf16.mxu1 %v5088_v55  ;;  %2884 = vmatprep.mubr.bf16.mxu0 %v5090_v56  ;;  %v5168_v52 = vld [vmem:[%s7271_s0 + $0x328] ss:$36 sps:$4 sm:$0xff]   ;;  %v5171_v54 = vld [vmem:[%s7271_s0 + $0x374] ss:$36 sps:$4 sm:$0xff]  }
  0xbc   :  { %3116 = vmatpush1.bf16.msra.mxu1 %v5148_v57  ;;  %3393 = vmatpush1.bf16.msra.mxu0 %v5178_v59 }
  0xbd   :  { %3117 = vmatprep.subr.bf16.mxu1 %v5162_v58  ;;  %3394 = vmatprep.subr.bf16.mxu0 %v5207_v60 }
  0xc0   :  { %3118 = vmatpush1.bf16.msra.mxu1 %v5160_v61  ;;  %3395 = vmatpush1.bf16.msra.mxu0 %v5205_v62  ;;  %v5173_v61 = vld [vmem:[%s7271_s0 + $0x3b0] ss:$36 sps:$4 sm:$0xff]  }
  0xc1   :  { %3119 = vmatprep.subr.bf16.mxu1 %v5177_v63  ;;  %3396 = vmatprep.subr.bf16.mxu0 %v5234_v6  ;;  %v5174_v62 = vld [vmem:[%s7271_s0 + $0x370] ss:$36 sps:$4 sm:$0xff]   ;;  %v5181_v63 = vld [vmem:[%s7271_s0 + $0x3fc] ss:$36 sps:$4 sm:$0xff]  }
  0xc2   :  { %2614 = vmatmul.mubr.bf16.gmra.mxu1 %v5095_v0  ;;  %2885 = vmatmul.mubr.bf16.gmra.mxu0 %v5096_v1  ;;  %v5183_v0 = vld [vmem:[%s7271_s0 + $0x3bc] ss:$36 sps:$4 sm:$0xff]  }
  0xc3   :  { %2623 = vmatprep.mubr.bf16.mxu1 %v5100_v2  ;;  %2894 = vmatprep.mubr.bf16.mxu0 %v5102_v3 }
  0xc4   :  { %3120 = vmatpush2.bf16.msra.mxu1 %v5175_v4  ;;  %3397 = vmatpush1.bf16.msra.mxu0 %v5232_v7 }
  0xc5   :  { %3121 = vmatprep.subr.bf16.mxu1 %v5193_v5  ;;  %3398 = vmatprep.subr.bf16.mxu0 %v5267_v32 }
  0xc8   :  { %3122 = vmatpush2.bf16.msra.mxu1 %v5191_v8  ;;  %3399 = vmatpush1.bf16.msra.mxu0 %v5265_v31 }
  0xc9   :  { %3123 = vmatprep.subr.bf16.mxu1 %v5204_v9  ;;  %v5185_v9 = vld [vmem:[%s7271_s0 + $0x3f8] ss:$36 sps:$4 sm:$0xff]  }
  0xca   :  { %2624 = vmatmul.mubr.bf16.gmra.mxu1 %v5104_v10  ;;  %2895 = vmatmul.mubr.bf16.gmra.mxu0 %v5105_v11  ;;  %v5186_v10 = vld [vmem:[%s7271_s0 + $0x3b8] ss:$36 sps:$4 sm:$0xff]   ;;  %v5187_v11 = vld [vmem:[%s7271_s0 + $0x444] ss:$36 sps:$4 sm:$0xff]  }
  0xcb   :  { %2633 = vmatprep.mubr.bf16.mxu1 %v5109_v12  ;;  %2904 = vmatprep.mubr.bf16.mxu0 %v5111_v13  ;;  %v5189_v12 = vld [vmem:[%s7271_s0 + $0x404] ss:$36 sps:$4 sm:$0xff]  }
  0xcc   :  { %3124 = vmatpush2.bf16.msra.mxu1 %v5202_v14 }
  0xcd   :  { %3125 = vmatprep.subr.bf16.mxu1 %v5222_v15 }
  0xd0   :  { %3126 = vmatpush2.bf16.msra.mxu1 %v5220_v16 }
  0xd1   :  { %3127 = vmatprep.subr.bf16.mxu1 %v5231_v17 }
  0xd2   :  { %2634 = vmatmul.mubr.bf16.gmra.mxu1 %v5113_v18  ;;  %2905 = vmatmul.mubr.bf16.gmra.mxu0 %v5114_v19 }
  0xd3   :  { %2643 = vmatprep.mubr.bf16.mxu1 %v5115_v20  ;;  %2914 = vmatprep.mubr.bf16.mxu0 %v5117_v21  ;;  %v5194_v21 = vld [vmem:[%s7271_s0 + $0x440] ss:$36 sps:$4 sm:$0xff]  }
  0xd4   :  { %3128 = vmatpush2.bf16.msra.mxu1 %v5229_v22  ;;  %v5195_v22 = vld [vmem:[%s7271_s0 + $0x400] ss:$36 sps:$4 sm:$0xff]  }
  0xd5   :  { %3129 = vmatprep.subr.bf16.mxu1 %v5249_v23  ;;  %v5198_v23 = vld [vmem:[%s7271_s0 + $0x48c] ss:$36 sps:$4 sm:$0xff]  }
  0xd8   :  { %3130 = vmatpush2.bf16.msra.mxu1 %v5247_v24  ;;  %v5201_v24 = vld [vmem:[%s7271_s0 + $0x44c] ss:$36 sps:$4 sm:$0xff]  }
  0xd9   :  { %3131 = vmatprep.subr.bf16.mxu1 %v5258_v27 }
  0xda   :  { %2644 = vmatmul.mubr.bf16.gmra.mxu1 %v5119_v25  ;;  %2915 = vmatmul.mubr.bf16.gmra.mxu0 %v5120_v26 }
  0xdb   :  { %2653 = vmatprep.mubr.bf16.mxu1 %v5127_v28  ;;  %2924 = vmatprep.mubr.bf16.mxu0 %v5129_v29 }
  0xdc   :  { %3132 = vmatpush2.bf16.msra.mxu1 %v5256_v30 }
  0xdd   :  { %3133 = vmatprep.subr.bf16.mxu1 %v5275_v37 }
  0xe0   :  { %3134 = vmatpush2.bf16.msra.mxu1 %v5273_v38 }
  0xe2   :  { %2654 = vmatmul.mubr.bf16.gmra.mxu1 %v5131_v33  ;;  %2925 = vmatmul.mubr.bf16.gmra.mxu0 %v5132_v34  ;;  %v5196_v33 = vld [vmem:[%s7271_s0 + $0x488] ss:$36 sps:$4 sm:$0xff]  }
  0xe3   :  { %2663 = vmatprep.mubr.bf16.mxu1 %v5136_v35  ;;  %2934 = vmatprep.mubr.bf16.mxu0 %v5138_v36  ;;  %v5199_v34 = vld [vmem:[%s7271_s0 + $0x448] ss:$36 sps:$4 sm:$0xff]   ;;  %v5210_v35 = vld [vmem:[%s7271_s0 + $0x4d4] ss:$36 sps:$4 sm:$0xff]  }
  0xe4   :  { %v5213_v36 = vld [vmem:[%s7271_s0 + $0x494] ss:$36 sps:$4 sm:$0xff]  }
  0xea   :  { %2664 = vmatmul.mubr.bf16.gmra.mxu1 %v5140_v39  ;;  %2935 = vmatmul.mubr.bf16.gmra.mxu0 %v5141_v40 }
  0xeb   :  { %2673 = vmatprep.mubr.bf16.mxu1 %v5142_v41  ;;  %2944 = vmatprep.mubr.bf16.mxu0 %v5144_v42 }
  0xf2   :  { %2674 = vmatmul.mubr.bf16.gmra.mxu1 %v5146_v43  ;;  %2945 = vmatmul.mubr.bf16.gmra.mxu0 %v5147_v44 }
  0xf3   :  { %2683 = vmatprep.mubr.bf16.mxu1 %v5154_v45  ;;  %2954 = vmatprep.mubr.bf16.mxu0 %v5156_v46  ;;  %v5208_v45 = vld [vmem:[%s7271_s0 + $0x4d0] ss:$36 sps:$4 sm:$0xff]  }
  0xf4   :  { %v5211_v46 = vld [vmem:[%s7271_s0 + $0x490] ss:$36 sps:$4 sm:$0xff]  }
  0xfa   :  { %2684 = vmatmul.mubr.bf16.gmra.mxu1 %v5158_v47  ;;  %2955 = vmatmul.mubr.bf16.gmra.mxu0 %v5159_v48  ;;  %v5216_v47 = vld [vmem:[%s7271_s0 + $0x51c] ss:$36 sps:$4 sm:$0xff]  }
  0xfb   :  { %2693 = vmatprep.mubr.bf16.mxu1 %v5163_v49  ;;  %2964 = vmatprep.mubr.bf16.mxu0 %v5165_v50  ;;  %v5219_v48 = vld [vmem:[%s7271_s0 + $0x4dc] ss:$36 sps:$4 sm:$0xff]  }
 0x102   :  { %v6138_v55 = vpop.f32.mrf.mxu0  ;;  %v6140_v56 = vpop.f32.mrf.mxu1  ;;  %2694 = vmatmul.mubr.bf16.gmra.mxu1 %v5167_v51  ;;  %2965 = vmatmul.mubr.bf16.gmra.mxu0 %v5168_v52 }
 0x103   :  { %7277 = vst [vmem:[#allocation2_spill] sm:$0xff] %v6140_v56  ;;  %2703 = vmatprep.mubr.bf16.mxu1 %v5169_v53  ;;  %2974 = vmatprep.mubr.bf16.mxu0 %v5171_v54 }
 0x104   :  { %v6142_v57 = vpop.f32.mrf.mxu0  ;;  %v6144_v58 = vpop.f32.mrf.mxu1 }
 0x105   :  { %7278 = vst [vmem:[#allocation3_spill] sm:$0xff] %v6144_v58 }
 0x106   :  { %v6146_v59 = vpop.f32.mrf.mxu0  ;;  %v6148_v60 = vpop.f32.mrf.mxu1 }
 0x107   :  { %7279 = vst [vmem:[#allocation4_spill] sm:$0xff] %v6148_v60  ;;  %v5278_v60 = vld [vmem:[%s7271_s0 + $0x18] ss:$36 sps:$4 sm:$0xff]  }
 0x108   :  { %v6162_v1 = vpop.f32.mrf.mxu0  ;;  %v6164_v2 = vpop.f32.mrf.mxu1 }
 0x109   :  { %7280 = vst [vmem:[#allocation5_spill] sm:$0xff] %v6164_v2 }
 0x10a   :  { %v6166_v3 = vpop.f32.mrf.mxu0  ;;  %v6168_v4 = vpop.f32.mrf.mxu1  ;;  %2704 = vmatmul.mubr.bf16.gmra.mxu1 %v5173_v61  ;;  %2975 = vmatmul.mubr.bf16.gmra.mxu0 %v5174_v62 }
 0x10b   :  { %7281 = vst [vmem:[#allocation6_spill] sm:$0xff] %v6168_v4  ;;  %2713 = vmatprep.mubr.bf16.mxu1 %v5181_v63  ;;  %2984 = vmatprep.mubr.bf16.mxu0 %v5183_v0  ;;  %v5214_v63 = vld [vmem:[%s7271_s0 + $0x518] ss:$36 sps:$4 sm:$0xff]  }
 0x10c   :  { %v6170_v5 = vpop.f32.mrf.mxu0  ;;  %v6172_v6 = vpop.f32.mrf.mxu1  ;;  %v5217_v0 = vld [vmem:[%s7271_s0 + $0x4d8] ss:$36 sps:$4 sm:$0xff]  }
 0x10d   :  { %7282 = vst [vmem:[#allocation7_spill] sm:$0xff] %v6172_v6 }
 0x10e   :  { %v6174_v7 = vpop.f32.mrf.mxu0  ;;  %v6176_v8 = vpop.f32.mrf.mxu1 }
 0x10f   :  { %7283 = vst [vmem:[#allocation8_spill] sm:$0xff] %v6176_v8 }
 0x110   :  { %v6190_v13 = vpop.f32.mrf.mxu0  ;;  %v6192_v14 = vpop.f32.mrf.mxu1 }
 0x111   :  { %7284 = vst [vmem:[#allocation9_spill] sm:$0xff] %v6192_v14 }
 0x112   :  { %v6194_v15 = vpop.f32.mrf.mxu0  ;;  %v6196_v16 = vpop.f32.mrf.mxu1  ;;  %2714 = vmatmul.mubr.bf16.gmra.mxu1 %v5185_v9  ;;  %2985 = vmatmul.mubr.bf16.gmra.mxu0 %v5186_v10  ;;  %v5225_v9 = vld [vmem:[%s7271_s0 + $0x564] ss:$36 sps:$4 sm:$0xff]  }
 0x113   :  { %7285 = vst [vmem:[#allocation10_spill] sm:$0xff] %v6196_v16  ;;  %2723 = vmatprep.mubr.bf16.mxu1 %v5187_v11  ;;  %2994 = vmatprep.mubr.bf16.mxu0 %v5189_v12  ;;  %v5228_v10 = vld [vmem:[%s7271_s0 + $0x524] ss:$36 sps:$4 sm:$0xff]  }
 0x114   :  { %v6198_v17 = vpop.f32.mrf.mxu0  ;;  %v6200_v18 = vpop.f32.mrf.mxu1 }
 0x115   :  { %7286 = vst [vmem:[#allocation11_spill] sm:$0xff] %v6200_v18  ;;  %v257_v18 = vld [vmem:[%s7271_s0 + $0x6d0] sm:$0xff] }
 0x116   :  { %v6202_v19 = vpop.f32.mrf.mxu0  ;;  %v6204_v20 = vpop.f32.mrf.mxu1  ;;  %v4560_v2 = vcombine.low %v257_v18, %v257_v18 }
 0x117   :  { %7287 = vst [vmem:[#allocation12_spill] sm:$0xff] %v6204_v20 }
 0x118   :  { %v6218_v25 = vpop.f32.mrf.mxu0  ;;  %v6220_v26 = vpop.f32.mrf.mxu1 }
 0x119   :  { %7288 = vst [vmem:[#allocation13_spill] sm:$0xff] %v6220_v26 }
 0x11a   :  { %v6222_v27 = vpop.f32.mrf.mxu0  ;;  %v6224_v28 = vpop.f32.mrf.mxu1  ;;  %2724 = vmatmul.mubr.bf16.gmra.mxu1 %v5194_v21  ;;  %2995 = vmatmul.mubr.bf16.gmra.mxu0 %v5195_v22 }
 0x11b   :  { %7289 = vst [vmem:[#allocation14_spill] sm:$0xff] %v6224_v28  ;;  %2733 = vmatprep.mubr.bf16.mxu1 %v5198_v23  ;;  %3004 = vmatprep.mubr.bf16.mxu0 %v5201_v24 }
 0x11c   :  { %v6226_v29 = vpop.f32.mrf.mxu0  ;;  %v6228_v30 = vpop.f32.mrf.mxu1 }
 0x11d   :  { %7290 = vst [vmem:[#allocation15_spill] sm:$0xff] %v6228_v30 }
 0x11e   :  { %v6230_v31 = vpop.f32.mrf.mxu0  ;;  %v6232_v32 = vpop.f32.mrf.mxu1 }
 0x11f   :  { %7291 = vst [vmem:[#allocation16_spill] sm:$0xff] %v6232_v32  ;;  %v256_v32 = vld [vmem:[%s7271_s0 + $0x6c8] sm:$0xff] }
 0x120   :  { %v6246_v37 = vpop.f32.mrf.mxu0  ;;  %v6248_v38 = vpop.f32.mrf.mxu1 }
 0x121   :  { %7292 = vst [vmem:[#allocation17_spill] sm:$0xff] %v6248_v38 }
 0x122   :  { %v6250_v39 = vpop.f32.mrf.mxu0  ;;  %v6252_v40 = vpop.f32.mrf.mxu1  ;;  %2734 = vmatmul.mubr.bf16.gmra.mxu1 %v5196_v33  ;;  %3005 = vmatmul.mubr.bf16.gmra.mxu0 %v5199_v34 }
 0x123   :  { %7293 = vst [vmem:[#allocation18_spill] sm:$0xff] %v6252_v40  ;;  %2743 = vmatprep.mubr.bf16.mxu1 %v5210_v35  ;;  %3014 = vmatprep.mubr.bf16.mxu0 %v5213_v36  ;;  %v5223_v35 = vld [vmem:[%s7271_s0 + $0x560] ss:$36 sps:$4 sm:$0xff]  }
 0x124   :  { %v6254_v41 = vpop.f32.mrf.mxu0  ;;  %v6256_v42 = vpop.f32.mrf.mxu1  ;;  %v5226_v36 = vld [vmem:[%s7271_s0 + $0x520] ss:$36 sps:$4 sm:$0xff]  }
 0x125   :  { %7294 = vst [vmem:[#allocation19_spill] sm:$0xff] %v6256_v42 }
 0x126   :  { %v6258_v43 = vpop.f32.mrf.mxu0  ;;  %v6260_v44 = vpop.f32.mrf.mxu1 }
 0x127   :  { %7295 = vst [vmem:[#allocation20_spill] sm:$0xff] %v6260_v44 }
 0x128   :  { %v6274_v49 = vpop.f32.mrf.mxu0  ;;  %v6276_v50 = vpop.f32.mrf.mxu1 }
 0x129   :  { %7296 = vst [vmem:[#allocation21_spill] sm:$0xff] %v6276_v50 }
 0x12a   :  { %v6278_v51 = vpop.f32.mrf.mxu0  ;;  %v6280_v52 = vpop.f32.mrf.mxu1  ;;  %2744 = vmatmul.mubr.bf16.gmra.mxu1 %v5208_v45  ;;  %3015 = vmatmul.mubr.bf16.gmra.mxu0 %v5211_v46  ;;  %v5237_v45 = vld [vmem:[%s7271_s0 + $0x5ac] ss:$36 sps:$4 sm:$0xff]  }
 0x12b   :  { %7297 = vst [vmem:[#allocation22_spill] sm:$0xff] %v6280_v52  ;;  %2753 = vmatprep.mubr.bf16.mxu1 %v5216_v47  ;;  %3024 = vmatprep.mubr.bf16.mxu0 %v5219_v48  ;;  %v5240_v46 = vld [vmem:[%s7271_s0 + $0x56c] ss:$36 sps:$4 sm:$0xff]  }
 0x12c   :  { %v6282_v53 = vpop.f32.mrf.mxu0  ;;  %v6284_v54 = vpop.f32.mrf.mxu1 }
 0x12d   :  { %7298 = vst [vmem:[#allocation23_spill] sm:$0xff] %v6284_v54 }
 0x12e   :  { %v6286_v61 = vpop.f32.mrf.mxu0  ;;  %v6288_v62 = vpop.f32.mrf.mxu1 }
 0x12f   :  { %7299 = vst [vmem:[#allocation24_spill] sm:$0xff] %v6288_v62 }
 0x130   :  { %v6302_v11 = vpop.f32.mrf.mxu0  ;;  %v6304_v12 = vpop.f32.mrf.mxu1 }
 0x131   :  { %7300 = vst [vmem:[#allocation25_spill] sm:$0xff] %v6304_v12 }
 0x132   :  { %v6306_v21 = vpop.f32.mrf.mxu0  ;;  %v6308_v22 = vpop.f32.mrf.mxu1  ;;  %2754 = vmatmul.mubr.bf16.gmra.mxu1 %v5214_v63  ;;  %3025 = vmatmul.mubr.bf16.gmra.mxu0 %v5217_v0 }
 0x133   :  { %7301 = vst [vmem:[#allocation26_spill] sm:$0xff] %v6308_v22  ;;  %2763 = vmatprep.mubr.bf16.mxu1 %v5225_v9  ;;  %3034 = vmatprep.mubr.bf16.mxu0 %v5228_v10 }
 0x134   :  { %v6310_v23 = vpop.f32.mrf.mxu0  ;;  %v6312_v24 = vpop.f32.mrf.mxu1 }
 0x135   :  { %7302 = vst [vmem:[#allocation27_spill] sm:$0xff] %v6312_v24 }
 0x136   :  { %v6314_v33 = vpop.f32.mrf.mxu0  ;;  %v6316_v34 = vpop.f32.mrf.mxu1 }
 0x137   :  { %7303 = vst [vmem:[#allocation28_spill] sm:$0xff] %v6316_v34 }
 0x138   :  { %v6330_v47 = vpop.f32.mrf.mxu0  ;;  %v6332_v48 = vpop.f32.mrf.mxu1 }
 0x139   :  { %7304 = vst [vmem:[#allocation29_spill] sm:$0xff] %v6332_v48  ;;  %v5235_v48 = vld [vmem:[%s7271_s0 + $0x5a8] ss:$36 sps:$4 sm:$0xff]  }
 0x13a   :  { %v6334_v63 = vpop.f32.mrf.mxu0  ;;  %v6336_v0 = vpop.f32.mrf.mxu1  ;;  %2764 = vmatmul.mubr.bf16.gmra.mxu1 %v5223_v35  ;;  %3035 = vmatmul.mubr.bf16.gmra.mxu0 %v5226_v36  ;;  %v5243_v35 = vld [vmem:[%s7271_s0 + $0x5f4] ss:$36 sps:$4 sm:$0xff]  }
 0x13b   :  { %7305 = vst [vmem:[#allocation30_spill] sm:$0xff] %v6336_v0  ;;  %2773 = vmatprep.mubr.bf16.mxu1 %v5237_v45  ;;  %3044 = vmatprep.mubr.bf16.mxu0 %v5240_v46  ;;  %v5238_v0 = vld [vmem:[%s7271_s0 + $0x568] ss:$36 sps:$4 sm:$0xff]   ;;  %v5246_v36 = vld [vmem:[%s7271_s0 + $0x5b4] ss:$36 sps:$4 sm:$0xff]  }
 0x13c   :  { %v6338_v9 = vpop.f32.mrf.mxu0  ;;  %v6340_v10 = vpop.f32.mrf.mxu1 }
 0x13d   :  { %7306 = vst [vmem:[#allocation31_spill] sm:$0xff] %v6340_v10 }
 0x13e   :  { %v6342_v34 = vpop.f32.mrf.mxu0  ;;  %v6344_v24 = vpop.f32.mrf.mxu1 }
 0x13f   :  { %7307 = vst [vmem:[#allocation32_spill] sm:$0xff] %v6344_v24 }
 0x140   :  { %v6358_v45 = vpop.f32.mrf.mxu0  ;;  %v6360_v46 = vpop.f32.mrf.mxu1 }
 0x141   :  { %7308 = vst [vmem:[#allocation33_spill] sm:$0xff] %v6360_v46  ;;  %v5241_v46 = vld [vmem:[%s7271_s0 + $0x5f0] ss:$36 sps:$4 sm:$0xff]  }
 0x142   :  { %v6362_v24 = vpop.f32.mrf.mxu0  ;;  %v6364_v10 = vpop.f32.mrf.mxu1  ;;  %2774 = vmatmul.mubr.bf16.gmra.mxu1 %v5235_v48  ;;  %3045 = vmatmul.mubr.bf16.gmra.mxu0 %v5238_v0  ;;  %v5252_v48 = vld [vmem:[%s7271_s0 + $0x63c] ss:$36 sps:$4 sm:$0xff]  }
 0x143   :  { %7309 = vst [vmem:[#allocation34_spill] sm:$0xff] %v6364_v10  ;;  %2783 = vmatprep.mubr.bf16.mxu1 %v5243_v35  ;;  %3054 = vmatprep.mubr.bf16.mxu0 %v5246_v36  ;;  %v5244_v10 = vld [vmem:[%s7271_s0 + $0x5b0] ss:$36 sps:$4 sm:$0xff]   ;;  %v5255_v0 = vld [vmem:[%s7271_s0 + $0x5fc] ss:$36 sps:$4 sm:$0xff]  }
 0x144   :  { %v6366_v22 = vpop.f32.mrf.mxu0  ;;  %v6368_v12 = vpop.f32.mrf.mxu1 }
 0x145   :  { %7310 = vst [vmem:[#allocation35_spill] sm:$0xff] %v6368_v12 }
 0x146   :  { %v6370_v62 = vpop.f32.mrf.mxu0  ;;  %v6372_v54 = vpop.f32.mrf.mxu1 }
 0x147   :  { %7311 = vst [vmem:[#allocation36_spill] sm:$0xff] %v6372_v54 }
 0x148   :  { %v6386_v35 = vpop.f32.mrf.mxu0  ;;  %v6388_v36 = vpop.f32.mrf.mxu1 }
 0x149   :  { %7312 = vst [vmem:[#allocation37_spill] sm:$0xff] %v6388_v36  ;;  %v5250_v36 = vld [vmem:[%s7271_s0 + $0x638] ss:$36 sps:$4 sm:$0xff]  }
 0x14a   :  { %v6390_v54 = vpop.f32.mrf.mxu0  ;;  %v6392_v12 = vpop.f32.mrf.mxu1  ;;  %2784 = vmatmul.mubr.bf16.gmra.mxu1 %v5241_v46  ;;  %3055 = vmatmul.mubr.bf16.gmra.mxu0 %v5244_v10  ;;  %v5261_v10 = vld [vmem:[%s7271_s0 + $0x684] ss:$36 sps:$4 sm:$0xff]  }
 0x14b   :  { %7313 = vst [vmem:[#allocation38_spill] sm:$0xff] %v6392_v12  ;;  %2793 = vmatprep.mubr.bf16.mxu1 %v5252_v48  ;;  %3064 = vmatprep.mubr.bf16.mxu0 %v5255_v0  ;;  %v5253_v12 = vld [vmem:[%s7271_s0 + $0x5f8] ss:$36 sps:$4 sm:$0xff]   ;;  %v5264_v46 = vld [vmem:[%s7271_s0 + $0x644] ss:$36 sps:$4 sm:$0xff]  }
 0x14c   :  { %v6394_v52 = vpop.f32.mrf.mxu0  ;;  %v6396_v50 = vpop.f32.mrf.mxu1 }
 0x14d   :  { %7314 = vst [vmem:[#allocation39_spill] sm:$0xff] %v6396_v50 }
 0x14e   :  { %v6398_v44 = vpop.f32.mrf.mxu0  ;;  %v6400_v42 = vpop.f32.mrf.mxu1 }
 0x14f   :  { %7315 = vst [vmem:[#allocation40_spill] sm:$0xff] %v6400_v42 }
 0x150   :  { %v6414_v48 = vpop.f32.mrf.mxu0  ;;  %v6416_v0 = vpop.f32.mrf.mxu1 }
 0x151   :  { %7316 = vst [vmem:[#allocation41_spill] sm:$0xff] %v6416_v0 }
 0x152   :  { %v6418_v42 = vpop.f32.mrf.mxu0  ;;  %v6420_v50 = vpop.f32.mrf.mxu1  ;;  %2794 = vmatmul.mubr.bf16.gmra.mxu1 %v5250_v36  ;;  %3065 = vmatmul.mubr.bf16.gmra.mxu0 %v5253_v12  ;;  %v5262_v12 = vld [vmem:[%s7271_s0 + $0x640] ss:$36 sps:$4 sm:$0xff]   ;;  %v4559_v36 = vcombine.high %v256_v32, %v256_v32 }
 0x153   :  { %7317 = vst [vmem:[#allocation42_spill] sm:$0xff] %v6420_v50  ;;  %2803 = vmatprep.mubr.bf16.mxu1 %v5261_v10  ;;  %3074 = vmatprep.mubr.bf16.mxu0 %v5264_v46  ;;  %v5259_v50 = vld [vmem:[%s7271_s0 + $0x680] ss:$36 sps:$4 sm:$0xff]   ;;  %v5272_v10 = vld [vmem:[%s7271_s0 + $0x68c] ss:$36 sps:$4 sm:$0xff]  }
 0x154   :  { %v6422_v40 = vpop.f32.mrf.mxu0  ;;  %v6424_v38 = vpop.f32.mrf.mxu1 }
 0x155   :  { %7318 = vst [vmem:[#allocation43_spill] sm:$0xff] %v6424_v38 }
 0x156   :  { %v6429_v30 = vpop.f32.mrf.mxu0  ;;  %v6431_v28 = vpop.f32.mrf.mxu1 }
 0x157   :  { %7319 = vst [vmem:[#allocation44_spill] sm:$0xff] %v6431_v28 }
 0x158   :  { %v6442_v46 = vpop.f32.mrf.mxu0  ;;  %v6444_v38 = vpop.f32.mrf.mxu1 }
 0x159   :  { %7320 = vst [vmem:[#allocation45_spill] sm:$0xff] %v6444_v38  ;;  %v4558_v38 = vcombine.low %v256_v32, %v256_v32 }
 0x15a   :  { %v6446_v0 = vpop.f32.mrf.mxu0  ;;  %v6448_v28 = vpop.f32.mrf.mxu1  ;;  %2804 = vmatmul.mubr.bf16.gmra.mxu1 %v5259_v50  ;;  %3075 = vmatmul.mubr.bf16.gmra.mxu0 %v5262_v12  ;;  %v4561_v50 = vcombine.high %v257_v18, %v257_v18  ;;  %v5280_v12 = vld [vmem:[%s7271_s0 + $0x1c] ss:$36 sps:$4 sm:$0xff]  }
 0x15b   :  { %7321 = vst [vmem:[#allocation46_spill] sm:$0xff] %v6448_v28  ;;  %2813 = vmatprep.mubr.bf16.mxu1 %v4559_v36  ;;  %3084 = vmatprep.mubr.bf16.mxu0 %v5272_v10  ;;  %v5270_v28 = vld [vmem:[%s7271_s0 + $0x688] ss:$36 sps:$4 sm:$0xff]  }
 0x15c   :  { %v6450_v26 = vpop.f32.mrf.mxu0  ;;  %v6452_v20 = vpop.f32.mrf.mxu1 }
 0x15d   :  { %7322 = vst [vmem:[#allocation47_spill] sm:$0xff] %v6452_v20 }
 0x15e   :  { %v6457_v16 = vpop.f32.mrf.mxu0  ;;  %v2538_v14 = vpop.f32.mrf.mxu1 }
 0x15f   :  { %7323 = vst [vmem:[#allocation48_spill] sm:$0xff] %v6457_v16 }
 0x160   :  { %v6465_v36 = vpop.f32.mrf.mxu0  ;;  %v2539_v10 = vpop.f32.mrf.mxu1 }
 0x161   :  { %7324 = vst [vmem:[#allocation49_spill] sm:$0xff] %v6465_v36  ;;  %v5283_v10 = vld [vmem:[%s7271_s0 + $0x64] ss:$36 sps:$4 sm:$0xff]  }
 0x162   :  { %v6467_v20 = vpop.f32.mrf.mxu0  ;;  %v2575_v8 = vpop.f32.mrf.mxu1  ;;  %2814 = vmatmul.mubr.bf16.gmra.mxu1 %v4558_v38  ;;  %3085 = vmatmul.mubr.bf16.gmra.mxu0 %v5270_v28 }
 0x163   :  { %7325 = vst [vmem:[#allocation50_spill] sm:$0xff] %v6467_v20  ;;  %3094 = vmatprep.mubr.bf16.mxu0 %v4561_v50  ;;  %3135 = vmatprep.mubr.bf16.mxu1 %v5280_v12  ;;  %v2576_v38 = vadd.f32 %v2575_v8, %v6138_v55 }
 0x164   :  { %v6469_v14 = vpop.f32.mrf.mxu0  ;;  %v2577_v32 = vpop.f32.mrf.mxu1 }
 0x165   :  { %7326 = vst [vmem:[#allocation51_spill] sm:$0xff] %v6469_v14  ;;  %v2578_v56 = vadd.f32 %v2577_v32, %v6142_v57  ;;  %v5284_v57 = vld [vmem:[%s7271_s0 + $0x20] ss:$36 sps:$4 sm:$0xff]  }
 0x166   :  { %v6471_v6 = vpop.f32.mrf.mxu0  ;;  %v2579_v4 = vpop.f32.mrf.mxu1 }
 0x167   :  { %7327 = vst [vmem:[#allocation52_spill] sm:$0xff] %v6471_v6  ;;  %v7275_v6 = vmov 0   ;;  %v2580_v36 = vadd.f32 %v2579_v4, %v6146_v59  ;;  %v5287_v59 = vld [vmem:[%s7271_s0 + $0xac] ss:$36 sps:$4 sm:$0xff]  }
 0x168   :  { %v6479_v58 = vpop.f32.mrf.mxu0  ;;  %v2581_v28 = vpop.f32.mrf.mxu1 }
 0x169   :  { %7328 = vst [vmem:[#allocation53_spill] sm:$0xff] %v6479_v58 }
 0x16a   :  { %v2585_v50 = vpop.f32.mrf.mxu1  ;;  %v2856_v12 = vpop.f32.mrf.mxu0  ;;  %3095 = vmatmul.mubr.bf16.gmra.mxu0 %v4560_v2  ;;  %3136 = vmatmul.mubr.bf16.vlgmr.msra.gmra.mxu1 %v5278_v60  ;;  %v5281_v60 = vld [vmem:[%s7271_s0 + $0x60] ss:$36 sps:$4 sm:$0xff]   ;;  %v2582_v2 = vadd.f32 %v2581_v28, %v6162_v1  ;;  %v7330_v1 = vmov 0  }
 0x16b   :  { %v6483_v18 = vadd.f32 %v2856_v12, %v2576_v38  ;;  %3145 = vmatprep.mubr.bf16.mxu1 %v5283_v10  ;;  %3416 = vmatprep.mubr.bf16.mxu0 %v7275_v6 }
 0x16c   :  { %v2587_v14 = vpop.f32.mrf.mxu1  ;;  %v2858_v20 = vpop.f32.mrf.mxu0 }
 0x16d   :  { %v6487_v58 = vadd.f32 %v2858_v20, %v2578_v56  ;;  %v2586_v20 = vadd.f32 %v2585_v50, %v6166_v3  ;;  %v2588_v12 = vadd.f32 %v2587_v14, %v6170_v5  ;;  %v5288_v5 = vld [vmem:[%s7271_s0 + $0x68] ss:$36 sps:$4 sm:$0xff]  }
 0x16e   :  { %v2589_v16 = vpop.f32.mrf.mxu1  ;;  %v2860_v55 = vpop.f32.mrf.mxu0 }
 0x16f   :  { %v6496_v8 = vadd.f32 %v2860_v55, %v2580_v36  ;;  %v2590_v55 = vadd.f32 %v2589_v16, %v6174_v7  ;;  %v5291_v7 = vld [vmem:[%s7271_s0 + $0xf4] ss:$36 sps:$4 sm:$0xff]  }
 0x170   :  { %v2591_v56 = vpop.f32.mrf.mxu1  ;;  %v2862_v4 = vpop.f32.mrf.mxu0 }
 0x171   :  { %7329 = vst [vmem:[#allocation54_spill] sm:$0xff] %v6496_v8  ;;  %v6502_v32 = vadd.f32 %v2862_v4, %v2582_v2  ;;  %v2592_v14 = vadd.f32 %v2591_v56, %v6190_v13 }
 0x172   :  { %v2595_v10 = vpop.f32.mrf.mxu1  ;;  %v2866_v38 = vpop.f32.mrf.mxu0  ;;  %3146 = vmatmul.mubr.bf16.gmra.mxu1 %v5281_v60  ;;  %3417 = vmatmul.mubr.bf16.vlgmr.msra.gmra.mxu0 %v5284_v57  ;;  %v5285_v60 = vld [vmem:[%s7271_s0 + $0xa8] ss:$36 sps:$4 sm:$0xff]  }
 0x173   :  { %v6505_v6 = vadd.f32 %v2866_v38, %v2586_v20  ;;  %3155 = vmatprep.mubr.bf16.mxu1 %v5287_v59  ;;  %3426 = vmatprep.mubr.bf16.mxu0 %v7330_v1  ;;  %v2596_v59 = vadd.f32 %v2595_v10, %v6194_v15 }
 0x174   :  { %v2597_v36 = vpop.f32.mrf.mxu1  ;;  %v2868_v28 = vpop.f32.mrf.mxu0 }
 0x175   :  { %v6509_v8 = vadd.f32 %v2868_v28, %v2588_v12  ;;  %v2598_v12 = vadd.f32 %v2597_v36, %v6198_v17  ;;  %v5292_v17 = vld [vmem:[%s7271_s0 + $0xb0] ss:$36 sps:$4 sm:$0xff]  }
 0x176   :  { %v2599_v3 = vpop.f32.mrf.mxu1  ;;  %v2870_v50 = vpop.f32.mrf.mxu0 }
 0x177   :  { %v6518_v57 = vadd.f32 %v2870_v50, %v2590_v55  ;;  %v2600_v55 = vadd.f32 %v2599_v3, %v6202_v19  ;;  %v5295_v19 = vld [vmem:[%s7271_s0 + $0x13c] ss:$36 sps:$4 sm:$0xff]  }
 0x178   :  { %v2601_v16 = vpop.f32.mrf.mxu1  ;;  %v2872_v2 = vpop.f32.mrf.mxu0 }
 0x179   :  { %v6524_v4 = vadd.f32 %v2872_v2, %v2592_v14  ;;  %v2602_v36 = vadd.f32 %v2601_v16, %v6218_v25 }
 0x17a   :  { %v2605_v20 = vpop.f32.mrf.mxu1  ;;  %v2876_v38 = vpop.f32.mrf.mxu0  ;;  %3156 = vmatmul.mubr.bf16.gmra.mxu1 %v5285_v60  ;;  %3427 = vmatmul.mubr.bf16.gmra.mxu0 %v5288_v5  ;;  %v5289_v60 = vld [vmem:[%s7271_s0 + $0xf0] ss:$36 sps:$4 sm:$0xff]  }
 0x17b   :  { %v6527_v28 = vadd.f32 %v2876_v38, %v2596_v59  ;;  %3165 = vmatprep.mubr.bf16.mxu1 %v5291_v7  ;;  %3436 = vmatprep.mubr.bf16.mxu0 %v7330_v1  ;;  %v2606_v7 = vadd.f32 %v2605_v20, %v6222_v27 }
 0x17c   :  { %v2607_v13 = vpop.f32.mrf.mxu1  ;;  %v2878_v56 = vpop.f32.mrf.mxu0 }
 0x17d   :  { %v6531_v50 = vadd.f32 %v2878_v56, %v2598_v12  ;;  %v2608_v12 = vadd.f32 %v2607_v13, %v6226_v29  ;;  %v5296_v29 = vld [vmem:[%s7271_s0 + $0xf8] ss:$36 sps:$4 sm:$0xff]  }
 0x17e   :  { %v2609_v15 = vpop.f32.mrf.mxu1  ;;  %v2880_v10 = vpop.f32.mrf.mxu0 }
 0x17f   :  { %v6540_v5 = vadd.f32 %v2880_v10, %v2600_v55  ;;  %v2610_v55 = vadd.f32 %v2609_v15, %v6230_v31  ;;  %v5299_v31 = vld [vmem:[%s7271_s0 + $0x184] ss:$36 sps:$4 sm:$0xff]  }
 0x180   :  { %v2611_v3 = vpop.f32.mrf.mxu1  ;;  %v2882_v14 = vpop.f32.mrf.mxu0 }
 0x181   :  { %v6546_v2 = vadd.f32 %v2882_v14, %v2602_v36  ;;  %v2612_v13 = vadd.f32 %v2611_v3, %v6246_v37 }
 0x182   :  { %v2615_v59 = vpop.f32.mrf.mxu1  ;;  %v2886_v38 = vpop.f32.mrf.mxu0  ;;  %3166 = vmatmul.mubr.bf16.gmra.mxu1 %v5289_v60  ;;  %3437 = vmatmul.mubr.bf16.gmra.mxu0 %v5292_v17  ;;  %v5293_v60 = vld [vmem:[%s7271_s0 + $0x138] ss:$36 sps:$4 sm:$0xff]  }
 0x183   :  { %v6549_v56 = vadd.f32 %v2886_v38, %v2606_v7  ;;  %3175 = vmatprep.mubr.bf16.mxu1 %v5295_v19  ;;  %3446 = vmatprep.mubr.bf16.mxu0 %v7330_v1  ;;  %v2616_v19 = vadd.f32 %v2615_v59, %v6250_v39 }
 0x184   :  { %v2617_v25 = vpop.f32.mrf.mxu1  ;;  %v2888_v16 = vpop.f32.mrf.mxu0 }
 0x185   :  { %v6553_v10 = vadd.f32 %v2888_v16, %v2608_v12  ;;  %v2618_v12 = vadd.f32 %v2617_v25, %v6254_v41  ;;  %v5300_v41 = vld [vmem:[%s7271_s0 + $0x140] ss:$36 sps:$4 sm:$0xff]  }
 0x186   :  { %v2619_v27 = vpop.f32.mrf.mxu1  ;;  %v2890_v20 = vpop.f32.mrf.mxu0 }
 0x187   :  { %v6562_v17 = vadd.f32 %v2890_v20, %v2610_v55  ;;  %v2620_v55 = vadd.f32 %v2619_v27, %v6258_v43  ;;  %v5303_v43 = vld [vmem:[%s7271_s0 + $0x1cc] ss:$36 sps:$4 sm:$0xff]  }
 0x188   :  { %v2621_v15 = vpop.f32.mrf.mxu1  ;;  %v2892_v36 = vpop.f32.mrf.mxu0 }
 0x189   :  { %v6568_v14 = vadd.f32 %v2892_v36, %v2612_v13  ;;  %v2622_v25 = vadd.f32 %v2621_v15, %v6274_v49 }
 0x18a   :  { %v2625_v7 = vpop.f32.mrf.mxu1  ;;  %v2896_v38 = vpop.f32.mrf.mxu0  ;;  %3176 = vmatmul.mubr.bf16.gmra.mxu1 %v5293_v60  ;;  %3447 = vmatmul.mubr.bf16.gmra.mxu0 %v5296_v29  ;;  %v5297_v60 = vld [vmem:[%s7271_s0 + $0x180] ss:$36 sps:$4 sm:$0xff]  }
 0x18b   :  { %v6571_v16 = vadd.f32 %v2896_v38, %v2616_v19  ;;  %3185 = vmatprep.mubr.bf16.mxu1 %v5299_v31  ;;  %3456 = vmatprep.mubr.bf16.mxu0 %v7330_v1  ;;  %v2626_v31 = vadd.f32 %v2625_v7, %v6278_v51 }
 0x18c   :  { %v2627_v37 = vpop.f32.mrf.mxu1  ;;  %v2898_v3 = vpop.f32.mrf.mxu0 }
 0x18d   :  { %v6575_v20 = vadd.f32 %v2898_v3, %v2618_v12  ;;  %v2628_v12 = vadd.f32 %v2627_v37, %v6282_v53  ;;  %v5304_v53 = vld [vmem:[%s7271_s0 + $0x188] ss:$36 sps:$4 sm:$0xff]  }
 0x18e   :  { %v2629_v39 = vpop.f32.mrf.mxu1  ;;  %v2900_v59 = vpop.f32.mrf.mxu0 }
 0x18f   :  { %v6584_v29 = vadd.f32 %v2900_v59, %v2620_v55  ;;  %v2630_v55 = vadd.f32 %v2629_v39, %v6286_v61  ;;  %v5307_v61 = vld [vmem:[%s7271_s0 + $0x214] ss:$36 sps:$4 sm:$0xff]  }
 0x190   :  { %v2631_v27 = vpop.f32.mrf.mxu1  ;;  %v2902_v13 = vpop.f32.mrf.mxu0 }
 0x191   :  { %v6590_v36 = vadd.f32 %v2902_v13, %v2622_v25  ;;  %v2632_v37 = vadd.f32 %v2631_v27, %v6302_v11 }
 0x192   :  { %v2635_v19 = vpop.f32.mrf.mxu1  ;;  %v2906_v38 = vpop.f32.mrf.mxu0  ;;  %3186 = vmatmul.mubr.bf16.gmra.mxu1 %v5297_v60  ;;  %3457 = vmatmul.mubr.bf16.gmra.mxu0 %v5300_v41  ;;  %v5301_v60 = vld [vmem:[%s7271_s0 + $0x1c8] ss:$36 sps:$4 sm:$0xff]  }
 0x193   :  { %v6593_v3 = vadd.f32 %v2906_v38, %v2626_v31  ;;  %3195 = vmatprep.mubr.bf16.mxu1 %v5303_v43  ;;  %3466 = vmatprep.mubr.bf16.mxu0 %v7330_v1  ;;  %v2636_v43 = vadd.f32 %v2635_v19, %v6306_v21 }
 0x194   :  { %v2637_v49 = vpop.f32.mrf.mxu1  ;;  %v2908_v15 = vpop.f32.mrf.mxu0 }
 0x195   :  { %v6597_v59 = vadd.f32 %v2908_v15, %v2628_v12  ;;  %v2638_v12 = vadd.f32 %v2637_v49, %v6310_v23  ;;  %v5308_v23 = vld [vmem:[%s7271_s0 + $0x1d0] ss:$36 sps:$4 sm:$0xff]  }
 0x196   :  { %v2639_v51 = vpop.f32.mrf.mxu1  ;;  %v2910_v7 = vpop.f32.mrf.mxu0 }
 0x197   :  { %v6606_v41 = vadd.f32 %v2910_v7, %v2630_v55  ;;  %v2640_v55 = vadd.f32 %v2639_v51, %v6314_v33  ;;  %v5311_v33 = vld [vmem:[%s7271_s0 + $0x25c] ss:$36 sps:$4 sm:$0xff]  }
 0x198   :  { %v2641_v39 = vpop.f32.mrf.mxu1  ;;  %v2912_v25 = vpop.f32.mrf.mxu0 }
 0x199   :  { %v6612_v13 = vadd.f32 %v2912_v25, %v2632_v37  ;;  %v2642_v49 = vadd.f32 %v2641_v39, %v6330_v47 }
 0x19a   :  { %v2645_v31 = vpop.f32.mrf.mxu1  ;;  %v2916_v38 = vpop.f32.mrf.mxu0  ;;  %3196 = vmatmul.mubr.bf16.gmra.mxu1 %v5301_v60  ;;  %3467 = vmatmul.mubr.bf16.gmra.mxu0 %v5304_v53  ;;  %v5305_v60 = vld [vmem:[%s7271_s0 + $0x210] ss:$36 sps:$4 sm:$0xff]  }
 0x19b   :  { %v6615_v15 = vadd.f32 %v2916_v38, %v2636_v43  ;;  %3205 = vmatprep.mubr.bf16.mxu1 %v5307_v61  ;;  %3476 = vmatprep.mubr.bf16.mxu0 %v7330_v1  ;;  %v2646_v61 = vadd.f32 %v2645_v31, %v6334_v63 }
 0x19c   :  { %v2647_v11 = vpop.f32.mrf.mxu1  ;;  %v2918_v27 = vpop.f32.mrf.mxu0 }
 0x19d   :  { %v6619_v7 = vadd.f32 %v2918_v27, %v2638_v12  ;;  %v2648_v12 = vadd.f32 %v2647_v11, %v6338_v9  ;;  %v5312_v9 = vld [vmem:[%s7271_s0 + $0x218] ss:$36 sps:$4 sm:$0xff]  }
 0x19e   :  { %v2649_v21 = vpop.f32.mrf.mxu1  ;;  %v2920_v19 = vpop.f32.mrf.mxu0 }
 0x19f   :  { %v6628_v53 = vadd.f32 %v2920_v19, %v2640_v55  ;;  %v2650_v55 = vadd.f32 %v2649_v21, %v6342_v34  ;;  %v5315_v34 = vld [vmem:[%s7271_s0 + $0x2a4] ss:$36 sps:$4 sm:$0xff]  }
 0x1a0   :  { %v2651_v51 = vpop.f32.mrf.mxu1  ;;  %v2922_v37 = vpop.f32.mrf.mxu0 }
 0x1a1   :  { %v6634_v25 = vadd.f32 %v2922_v37, %v2642_v49  ;;  %v2652_v11 = vadd.f32 %v2651_v51, %v6358_v45 }
 0x1a2   :  { %v2655_v43 = vpop.f32.mrf.mxu1  ;;  %v2926_v38 = vpop.f32.mrf.mxu0  ;;  %3206 = vmatmul.mubr.bf16.gmra.mxu1 %v5305_v60  ;;  %3477 = vmatmul.mubr.bf16.gmra.mxu0 %v5308_v23  ;;  %v5309_v60 = vld [vmem:[%s7271_s0 + $0x258] ss:$36 sps:$4 sm:$0xff]  }
 0x1a3   :  { %v6637_v27 = vadd.f32 %v2926_v38, %v2646_v61  ;;  %3215 = vmatprep.mubr.bf16.mxu1 %v5311_v33  ;;  %3486 = vmatprep.mubr.bf16.mxu0 %v7330_v1  ;;  %v2656_v33 = vadd.f32 %v2655_v43, %v6362_v24 }
 0x1a4   :  { %v2657_v47 = vpop.f32.mrf.mxu1  ;;  %v2928_v39 = vpop.f32.mrf.mxu0 }
 0x1a5   :  { %v6641_v19 = vadd.f32 %v2928_v39, %v2648_v12  ;;  %v2658_v12 = vadd.f32 %v2657_v47, %v6366_v22  ;;  %v5316_v22 = vld [vmem:[%s7271_s0 + $0x260] ss:$36 sps:$4 sm:$0xff]  }
 0x1a6   :  { %v2659_v63 = vpop.f32.mrf.mxu1  ;;  %v2930_v31 = vpop.f32.mrf.mxu0 }
 0x1a7   :  { %v6650_v23 = vadd.f32 %v2930_v31, %v2650_v55  ;;  %v2660_v55 = vadd.f32 %v2659_v63, %v6370_v62  ;;  %v5319_v62 = vld [vmem:[%s7271_s0 + $0x2ec] ss:$36 sps:$4 sm:$0xff]  }
 0x1a8   :  { %v2661_v21 = vpop.f32.mrf.mxu1  ;;  %v2932_v49 = vpop.f32.mrf.mxu0 }
 0x1a9   :  { %v6656_v37 = vadd.f32 %v2932_v49, %v2652_v11  ;;  %v2662_v47 = vadd.f32 %v2661_v21, %v6386_v35 }
 0x1aa   :  { %v2665_v61 = vpop.f32.mrf.mxu1  ;;  %v2936_v38 = vpop.f32.mrf.mxu0  ;;  %3216 = vmatmul.mubr.bf16.gmra.mxu1 %v5309_v60  ;;  %3487 = vmatmul.mubr.bf16.gmra.mxu0 %v5312_v9  ;;  %v5313_v60 = vld [vmem:[%s7271_s0 + $0x2a0] ss:$36 sps:$4 sm:$0xff]  }
 0x1ab   :  { %v6659_v39 = vadd.f32 %v2936_v38, %v2656_v33  ;;  %3225 = vmatprep.mubr.bf16.mxu1 %v5315_v34  ;;  %3496 = vmatprep.mubr.bf16.mxu0 %v7330_v1  ;;  %v2666_v34 = vadd.f32 %v2665_v61, %v6390_v54 }
 0x1ac   :  { %v2667_v45 = vpop.f32.mrf.mxu1  ;;  %v2938_v51 = vpop.f32.mrf.mxu0 }
 0x1ad   :  { %v6663_v31 = vadd.f32 %v2938_v51, %v2658_v12  ;;  %v2668_v12 = vadd.f32 %v2667_v45, %v6394_v52  ;;  %v5320_v52 = vld [vmem:[%s7271_s0 + $0x2a8] ss:$36 sps:$4 sm:$0xff]  }
 0x1ae   :  { %v2669_v24 = vpop.f32.mrf.mxu1  ;;  %v2940_v43 = vpop.f32.mrf.mxu0 }
 0x1af   :  { %v6672_v9 = vadd.f32 %v2940_v43, %v2660_v55  ;;  %v2670_v55 = vadd.f32 %v2669_v24, %v6398_v44  ;;  %v5323_v44 = vld [vmem:[%s7271_s0 + $0x334] ss:$36 sps:$4 sm:$0xff]  }
 0x1b0   :  { %v2671_v63 = vpop.f32.mrf.mxu1  ;;  %v2942_v11 = vpop.f32.mrf.mxu0 }
 0x1b1   :  { %v6678_v49 = vadd.f32 %v2942_v11, %v2662_v47  ;;  %v2672_v45 = vadd.f32 %v2671_v63, %v6414_v48 }
 0x1b2   :  { %v2675_v33 = vpop.f32.mrf.mxu1  ;;  %v2946_v38 = vpop.f32.mrf.mxu0  ;;  %3226 = vmatmul.mubr.bf16.gmra.mxu1 %v5313_v60  ;;  %3497 = vmatmul.mubr.bf16.gmra.mxu0 %v5316_v22  ;;  %v5317_v60 = vld [vmem:[%s7271_s0 + $0x2e8] ss:$36 sps:$4 sm:$0xff]  }
 0x1b3   :  { %v6681_v51 = vadd.f32 %v2946_v38, %v2666_v34  ;;  %3235 = vmatprep.mubr.bf16.mxu1 %v5319_v62  ;;  %3506 = vmatprep.mubr.bf16.mxu0 %v7330_v1  ;;  %v2676_v62 = vadd.f32 %v2675_v33, %v6418_v42 }
 0x1b4   :  { %v2677_v35 = vpop.f32.mrf.mxu1  ;;  %v2948_v21 = vpop.f32.mrf.mxu0 }
 0x1b5   :  { %v6685_v43 = vadd.f32 %v2948_v21, %v2668_v12  ;;  %v2678_v12 = vadd.f32 %v2677_v35, %v6422_v40  ;;  %v5324_v40 = vld [vmem:[%s7271_s0 + $0x2f0] ss:$36 sps:$4 sm:$0xff]  }
 0x1b6   :  { %v2679_v54 = vpop.f32.mrf.mxu1  ;;  %v2950_v61 = vpop.f32.mrf.mxu0 }
 0x1b7   :  { %v6694_v22 = vadd.f32 %v2950_v61, %v2670_v55  ;;  %v2680_v55 = vadd.f32 %v2679_v54, %v6429_v30  ;;  %v5327_v30 = vld [vmem:[%s7271_s0 + $0x37c] ss:$36 sps:$4 sm:$0xff]  }
 0x1b8   :  { %v2681_v24 = vpop.f32.mrf.mxu1  ;;  %v2952_v47 = vpop.f32.mrf.mxu0 }
 0x1b9   :  { %v6700_v11 = vadd.f32 %v2952_v47, %v2672_v45  ;;  %v2682_v35 = vadd.f32 %v2681_v24, %v6442_v46 }
 0x1ba   :  { %v2685_v34 = vpop.f32.mrf.mxu1  ;;  %v2956_v38 = vpop.f32.mrf.mxu0  ;;  %3236 = vmatmul.mubr.bf16.gmra.mxu1 %v5317_v60  ;;  %3507 = vmatmul.mubr.bf16.gmra.mxu0 %v5320_v52  ;;  %v5321_v60 = vld [vmem:[%s7271_s0 + $0x330] ss:$36 sps:$4 sm:$0xff]  }
 0x1bb   :  { %v6703_v21 = vadd.f32 %v2956_v38, %v2676_v62  ;;  %3245 = vmatprep.mubr.bf16.mxu1 %v5323_v44  ;;  %3516 = vmatprep.mubr.bf16.mxu0 %v7330_v1  ;;  %v2686_v44 = vadd.f32 %v2685_v34, %v6446_v0 }
 0x1bc   :  { %v2687_v48 = vpop.f32.mrf.mxu1  ;;  %v2958_v63 = vpop.f32.mrf.mxu0 }
 0x1bd   :  { %v6707_v61 = vadd.f32 %v2958_v63, %v2678_v12  ;;  %v2688_v12 = vadd.f32 %v2687_v48, %v6450_v26  ;;  %v5328_v26 = vld [vmem:[%s7271_s0 + $0x338] ss:$36 sps:$4 sm:$0xff]  }
 0x1be   :  { %v2689_v42 = vpop.f32.mrf.mxu1  ;;  %v2960_v33 = vpop.f32.mrf.mxu0  ;;  %v7337_v48 = vld [vmem:[#allocation49_spill] sm:$0xff] }
 0x1bf   :  { %7331 = vst [vmem:[#allocation55_spill] sm:$0xff] %v6707_v61  ;;  %v6716_v52 = vadd.f32 %v2960_v33, %v2680_v55  ;;  %v7335_v55 = vld [vmem:[#allocation48_spill] sm:$0xff] }
 0x1c0   :  { %v2691_v54 = vpop.f32.mrf.mxu1  ;;  %v2962_v45 = vpop.f32.mrf.mxu0  ;;  %v2690_v33 = vadd.f32 %v2689_v42, %v7335_v55  ;;  %v5331_v42 = vld [vmem:[%s7271_s0 + $0x3c4] ss:$36 sps:$4 sm:$0xff]  }
 0x1c1   :  { %7332 = vst [vmem:[#allocation56_spill] sm:$0xff] %v6716_v52  ;;  %v6722_v47 = vadd.f32 %v2962_v45, %v2682_v35 }
 0x1c2   :  { %v2695_v62 = vpop.f32.mrf.mxu1  ;;  %v2966_v38 = vpop.f32.mrf.mxu0  ;;  %3246 = vmatmul.mubr.bf16.gmra.mxu1 %v5321_v60  ;;  %3517 = vmatmul.mubr.bf16.gmra.mxu0 %v5324_v40  ;;  %v5325_v60 = vld [vmem:[%s7271_s0 + $0x378] ss:$36 sps:$4 sm:$0xff]   ;;  %v2692_v40 = vadd.f32 %v2691_v54, %v7337_v48 }
 0x1c3   :  { %7333 = vst [vmem:[#allocation57_spill] sm:$0xff] %v6722_v47  ;;  %v6725_v63 = vadd.f32 %v2966_v38, %v2686_v44  ;;  %3255 = vmatprep.mubr.bf16.mxu1 %v5327_v30  ;;  %3526 = vmatprep.mubr.bf16.mxu0 %v7330_v1  ;;  %v7339_v44 = vld [vmem:[#allocation50_spill] sm:$0xff] }
 0x1c4   :  { %v2697_v46 = vpop.f32.mrf.mxu1  ;;  %v2968_v24 = vpop.f32.mrf.mxu0  ;;  %v2696_v38 = vadd.f32 %v2695_v62, %v7339_v44  ;;  %v7347_v44 = vld [vmem:[#allocation2_spill] sm:$0xff] }
 0x1c5   :  { %7334 = vst [vmem:[#allocation58_spill] sm:$0xff] %v6725_v63  ;;  %v6729_v52 = vadd.f32 %v2968_v24, %v2688_v12 }
 0x1c6   :  { %v2699_v0 = vpop.f32.mrf.mxu1  ;;  %v2970_v34 = vpop.f32.mrf.mxu0 }
 0x1c7   :  { %7336 = vst [vmem:[#allocation48_spill] sm:$0xff] %v6729_v52  ;;  %v6738_v35 = vadd.f32 %v2970_v34, %v2690_v33  ;;  %v7341_v52 = vld [vmem:[#allocation51_spill] sm:$0xff]  ;;  %v7343_v34 = vld [vmem:[#allocation52_spill] sm:$0xff] }
 0x1c8   :  { %v2701_v30 = vpop.f32.mrf.mxu1  ;;  %v2972_v45 = vpop.f32.mrf.mxu0  ;;  %v2698_v63 = vadd.f32 %v2697_v46, %v7341_v52  ;;  %v2700_v48 = vadd.f32 %v2699_v0, %v7343_v34  ;;  %v5332_v52 = vld [vmem:[%s7271_s0 + $0x380] ss:$36 sps:$4 sm:$0xff]   ;;  %v7345_v46 = vld [vmem:[#allocation53_spill] sm:$0xff]  ;;  %v5335_v0 = vld [vmem:[%s7271_s0 + $0x40c] ss:$36 sps:$4 sm:$0xff]  }
 0x1c9   :  { %7338 = vst [vmem:[#allocation49_spill] sm:$0xff] %v6738_v35  ;;  %v6744_v12 = vadd.f32 %v2972_v45, %v2692_v40 }
 0x1ca   :  { %v2705_v24 = vpop.f32.mrf.mxu1  ;;  %v2976_v55 = vpop.f32.mrf.mxu0  ;;  %3256 = vmatmul.mubr.bf16.gmra.mxu1 %v5325_v60  ;;  %3527 = vmatmul.mubr.bf16.gmra.mxu0 %v5328_v26  ;;  %v5329_v60 = vld [vmem:[%s7271_s0 + $0x3c0] ss:$36 sps:$4 sm:$0xff]   ;;  %v2702_v26 = vadd.f32 %v2701_v30, %v7345_v46 }
 0x1cb   :  { %7340 = vst [vmem:[#allocation50_spill] sm:$0xff] %v6744_v12  ;;  %v6747_v47 = vadd.f32 %v2976_v55, %v2696_v38  ;;  %3265 = vmatprep.mubr.bf16.mxu1 %v5331_v42  ;;  %3536 = vmatprep.mubr.bf16.mxu0 %v7330_v1  ;;  %v2706_v38 = vadd.f32 %v2705_v24, %v7347_v44  ;;  %v7355_v44 = vld [vmem:[#allocation6_spill] sm:$0xff] }
 0x1cc   :  { %v2707_v54 = vpop.f32.mrf.mxu1  ;;  %v2978_v33 = vpop.f32.mrf.mxu0 }
 0x1cd   :  { %7342 = vst [vmem:[#allocation51_spill] sm:$0xff] %v6747_v47  ;;  %v6751_v35 = vadd.f32 %v2978_v33, %v2698_v63 }
 0x1ce   :  { %v2709_v62 = vpop.f32.mrf.mxu1  ;;  %v2980_v40 = vpop.f32.mrf.mxu0 }
 0x1cf   :  { %7344 = vst [vmem:[#allocation52_spill] sm:$0xff] %v6751_v35  ;;  %v6760_v42 = vadd.f32 %v2980_v40, %v2700_v48  ;;  %v7349_v35 = vld [vmem:[#allocation3_spill] sm:$0xff]  ;;  %v7351_v40 = vld [vmem:[#allocation4_spill] sm:$0xff] }
 0x1d0   :  { %v2711_v63 = vpop.f32.mrf.mxu1  ;;  %v2982_v45 = vpop.f32.mrf.mxu0  ;;  %v2708_v47 = vadd.f32 %v2707_v54, %v7349_v35  ;;  %v2710_v46 = vadd.f32 %v2709_v62, %v7351_v40  ;;  %v5336_v35 = vld [vmem:[%s7271_s0 + $0x3c8] ss:$36 sps:$4 sm:$0xff]   ;;  %v7353_v54 = vld [vmem:[#allocation5_spill] sm:$0xff] }
 0x1d1   :  { %7346 = vst [vmem:[#allocation53_spill] sm:$0xff] %v6760_v42  ;;  %v6766_v55 = vadd.f32 %v2982_v45, %v2702_v26  ;;  %v5339_v62 = vld [vmem:[%s7271_s0 + $0x454] ss:$36 sps:$4 sm:$0xff]  }
 0x1d2   :  { %v2715_v33 = vpop.f32.mrf.mxu1  ;;  %v2986_v34 = vpop.f32.mrf.mxu0  ;;  %3266 = vmatmul.mubr.bf16.gmra.mxu1 %v5329_v60  ;;  %3537 = vmatmul.mubr.bf16.gmra.mxu0 %v5332_v52  ;;  %v5333_v60 = vld [vmem:[%s7271_s0 + $0x408] ss:$36 sps:$4 sm:$0xff]   ;;  %v2712_v52 = vadd.f32 %v2711_v63, %v7353_v54 }
 0x1d3   :  { %7348 = vst [vmem:[#allocation2_spill] sm:$0xff] %v6766_v55  ;;  %v6769_v12 = vadd.f32 %v2986_v34, %v2706_v38  ;;  %3275 = vmatprep.mubr.bf16.mxu1 %v5335_v0  ;;  %3546 = vmatprep.mubr.bf16.mxu0 %v7330_v1  ;;  %v2716_v38 = vadd.f32 %v2715_v33, %v7355_v44  ;;  %v7363_v44 = vld [vmem:[#allocation10_spill] sm:$0xff] }
 0x1d4   :  { %v2717_v30 = vpop.f32.mrf.mxu1  ;;  %v2988_v48 = vpop.f32.mrf.mxu0 }
 0x1d5   :  { %7350 = vst [vmem:[#allocation3_spill] sm:$0xff] %v6769_v12  ;;  %v6773_v42 = vadd.f32 %v2988_v48, %v2708_v47 }
 0x1d6   :  { %v2719_v24 = vpop.f32.mrf.mxu1  ;;  %v2990_v26 = vpop.f32.mrf.mxu0 }
 0x1d7   :  { %7352 = vst [vmem:[#allocation4_spill] sm:$0xff] %v6773_v42  ;;  %v6782_v0 = vadd.f32 %v2990_v26, %v2710_v46  ;;  %v7357_v42 = vld [vmem:[#allocation7_spill] sm:$0xff]  ;;  %v7359_v26 = vld [vmem:[#allocation8_spill] sm:$0xff] }
 0x1d8   :  { %v2721_v47 = vpop.f32.mrf.mxu1  ;;  %v2992_v45 = vpop.f32.mrf.mxu0  ;;  %v2718_v12 = vadd.f32 %v2717_v30, %v7357_v42  ;;  %v2720_v54 = vadd.f32 %v2719_v24, %v7359_v26  ;;  %v5340_v42 = vld [vmem:[%s7271_s0 + $0x410] ss:$36 sps:$4 sm:$0xff]   ;;  %v7361_v30 = vld [vmem:[#allocation9_spill] sm:$0xff] }
 0x1d9   :  { %7354 = vst [vmem:[#allocation5_spill] sm:$0xff] %v6782_v0  ;;  %v6788_v34 = vadd.f32 %v2992_v45, %v2712_v52  ;;  %v5343_v24 = vld [vmem:[%s7271_s0 + $0x49c] ss:$36 sps:$4 sm:$0xff]  }
 0x1da   :  { %v2725_v48 = vpop.f32.mrf.mxu1  ;;  %v2996_v40 = vpop.f32.mrf.mxu0  ;;  %3276 = vmatmul.mubr.bf16.gmra.mxu1 %v5333_v60  ;;  %3547 = vmatmul.mubr.bf16.gmra.mxu0 %v5336_v35  ;;  %v5337_v60 = vld [vmem:[%s7271_s0 + $0x450] ss:$36 sps:$4 sm:$0xff]   ;;  %v2722_v35 = vadd.f32 %v2721_v47, %v7361_v30 }
 0x1db   :  { %7356 = vst [vmem:[#allocation6_spill] sm:$0xff] %v6788_v34  ;;  %v6791_v55 = vadd.f32 %v2996_v40, %v2716_v38  ;;  %3285 = vmatprep.mubr.bf16.mxu1 %v5339_v62  ;;  %3556 = vmatprep.mubr.bf16.mxu0 %v7330_v1  ;;  %v2726_v38 = vadd.f32 %v2725_v48, %v7363_v44  ;;  %v7371_v44 = vld [vmem:[#allocation14_spill] sm:$0xff] }
 0x1dc   :  { %v2727_v63 = vpop.f32.mrf.mxu1  ;;  %v2998_v46 = vpop.f32.mrf.mxu0 }
 0x1dd   :  { %7358 = vst [vmem:[#allocation7_spill] sm:$0xff] %v6791_v55  ;;  %v6795_v0 = vadd.f32 %v2998_v46, %v2718_v12 }
 0x1de   :  { %v2729_v33 = vpop.f32.mrf.mxu1  ;;  %v3000_v52 = vpop.f32.mrf.mxu0 }
 0x1df   :  { %7360 = vst [vmem:[#allocation8_spill] sm:$0xff] %v6795_v0  ;;  %v6804_v62 = vadd.f32 %v3000_v52, %v2720_v54  ;;  %v7365_v0 = vld [vmem:[#allocation11_spill] sm:$0xff]  ;;  %v7367_v52 = vld [vmem:[#allocation12_spill] sm:$0xff] }
 0x1e0   :  { %v2731_v12 = vpop.f32.mrf.mxu1  ;;  %v3002_v45 = vpop.f32.mrf.mxu0  ;;  %v2728_v55 = vadd.f32 %v2727_v63, %v7365_v0  ;;  %v2730_v30 = vadd.f32 %v2729_v33, %v7367_v52  ;;  %v5344_v0 = vld [vmem:[%s7271_s0 + $0x458] ss:$36 sps:$4 sm:$0xff]   ;;  %v5347_v33 = vld [vmem:[%s7271_s0 + $0x4e4] ss:$36 sps:$4 sm:$0xff]  }
 0x1e1   :  { %7362 = vst [vmem:[#allocation9_spill] sm:$0xff] %v6804_v62  ;;  %v6810_v40 = vadd.f32 %v3002_v45, %v2722_v35  ;;  %v7369_v63 = vld [vmem:[#allocation13_spill] sm:$0xff] }
 0x1e2   :  { %v2735_v46 = vpop.f32.mrf.mxu1  ;;  %v3006_v26 = vpop.f32.mrf.mxu0  ;;  %3286 = vmatmul.mubr.bf16.gmra.mxu1 %v5337_v60  ;;  %3557 = vmatmul.mubr.bf16.gmra.mxu0 %v5340_v42  ;;  %v5341_v60 = vld [vmem:[%s7271_s0 + $0x498] ss:$36 sps:$4 sm:$0xff]   ;;  %v2732_v42 = vadd.f32 %v2731_v12, %v7369_v63 }
 0x1e3   :  { %7364 = vst [vmem:[#allocation10_spill] sm:$0xff] %v6810_v40  ;;  %v6813_v34 = vadd.f32 %v3006_v26, %v2726_v38  ;;  %3295 = vmatprep.mubr.bf16.mxu1 %v5343_v24  ;;  %3566 = vmatprep.mubr.bf16.mxu0 %v7330_v1  ;;  %v2736_v38 = vadd.f32 %v2735_v46, %v7371_v44  ;;  %v7379_v44 = vld [vmem:[#allocation18_spill] sm:$0xff] }
 0x1e4   :  { %v2737_v47 = vpop.f32.mrf.mxu1  ;;  %v3008_v54 = vpop.f32.mrf.mxu0 }
 0x1e5   :  { %7366 = vst [vmem:[#allocation11_spill] sm:$0xff] %v6813_v34  ;;  %v6817_v62 = vadd.f32 %v3008_v54, %v2728_v55 }
 0x1e6   :  { %v2739_v48 = vpop.f32.mrf.mxu1  ;;  %v3010_v35 = vpop.f32.mrf.mxu0 }
 0x1e7   :  { %7368 = vst [vmem:[#allocation12_spill] sm:$0xff] %v6817_v62  ;;  %v6826_v24 = vadd.f32 %v3010_v35, %v2730_v30  ;;  %v7373_v62 = vld [vmem:[#allocation15_spill] sm:$0xff]  ;;  %v7375_v35 = vld [vmem:[#allocation16_spill] sm:$0xff] }
 0x1e8   :  { %v2741_v55 = vpop.f32.mrf.mxu1  ;;  %v3012_v45 = vpop.f32.mrf.mxu0  ;;  %v2738_v34 = vadd.f32 %v2737_v47, %v7373_v62  ;;  %v2740_v63 = vadd.f32 %v2739_v48, %v7375_v35  ;;  %v5348_v62 = vld [vmem:[%s7271_s0 + $0x4a0] ss:$36 sps:$4 sm:$0xff]   ;;  %v7377_v47 = vld [vmem:[#allocation17_spill] sm:$0xff]  ;;  %v5351_v48 = vld [vmem:[%s7271_s0 + $0x52c] ss:$36 sps:$4 sm:$0xff]  }
 0x1e9   :  { %7370 = vst [vmem:[#allocation13_spill] sm:$0xff] %v6826_v24  ;;  %v6832_v26 = vadd.f32 %v3012_v45, %v2732_v42 }
 0x1ea   :  { %v2745_v54 = vpop.f32.mrf.mxu1  ;;  %v3016_v52 = vpop.f32.mrf.mxu0  ;;  %3296 = vmatmul.mubr.bf16.gmra.mxu1 %v5341_v60  ;;  %3567 = vmatmul.mubr.bf16.gmra.mxu0 %v5344_v0  ;;  %v5345_v60 = vld [vmem:[%s7271_s0 + $0x4e0] ss:$36 sps:$4 sm:$0xff]   ;;  %v2742_v0 = vadd.f32 %v2741_v55, %v7377_v47 }
 0x1eb   :  { %7372 = vst [vmem:[#allocation14_spill] sm:$0xff] %v6832_v26  ;;  %v6835_v40 = vadd.f32 %v3016_v52, %v2736_v38  ;;  %3305 = vmatprep.mubr.bf16.mxu1 %v5347_v33  ;;  %3576 = vmatprep.mubr.bf16.mxu0 %v7330_v1  ;;  %v2746_v38 = vadd.f32 %v2745_v54, %v7379_v44  ;;  %v7387_v44 = vld [vmem:[#allocation22_spill] sm:$0xff] }
 0x1ec   :  { %v2747_v12 = vpop.f32.mrf.mxu1  ;;  %v3018_v30 = vpop.f32.mrf.mxu0 }
 0x1ed   :  { %7374 = vst [vmem:[#allocation15_spill] sm:$0xff] %v6835_v40  ;;  %v6839_v24 = vadd.f32 %v3018_v30, %v2738_v34 }
 0x1ee   :  { %v2749_v46 = vpop.f32.mrf.mxu1  ;;  %v3020_v42 = vpop.f32.mrf.mxu0 }
 0x1ef   :  { %7376 = vst [vmem:[#allocation16_spill] sm:$0xff] %v6839_v24  ;;  %v6848_v33 = vadd.f32 %v3020_v42, %v2740_v63  ;;  %v7381_v24 = vld [vmem:[#allocation19_spill] sm:$0xff]  ;;  %v7383_v42 = vld [vmem:[#allocation20_spill] sm:$0xff] }
 0x1f0   :  { %v2751_v34 = vpop.f32.mrf.mxu1  ;;  %v3022_v45 = vpop.f32.mrf.mxu0  ;;  %v2748_v40 = vadd.f32 %v2747_v12, %v7381_v24  ;;  %v2750_v47 = vadd.f32 %v2749_v46, %v7383_v42  ;;  %v5352_v24 = vld [vmem:[%s7271_s0 + $0x4e8] ss:$36 sps:$4 sm:$0xff]   ;;  %v7385_v12 = vld [vmem:[#allocation21_spill] sm:$0xff] }
 0x1f1   :  { %7378 = vst [vmem:[#allocation17_spill] sm:$0xff] %v6848_v33  ;;  %v6854_v52 = vadd.f32 %v3022_v45, %v2742_v0  ;;  %v5355_v46 = vld [vmem:[%s7271_s0 + $0x574] ss:$36 sps:$4 sm:$0xff]  }
 0x1f2   :  { %v2755_v30 = vpop.f32.mrf.mxu1  ;;  %v3026_v35 = vpop.f32.mrf.mxu0  ;;  %3306 = vmatmul.mubr.bf16.gmra.mxu1 %v5345_v60  ;;  %3577 = vmatmul.mubr.bf16.gmra.mxu0 %v5348_v62  ;;  %v5349_v60 = vld [vmem:[%s7271_s0 + $0x528] ss:$36 sps:$4 sm:$0xff]   ;;  %v2752_v62 = vadd.f32 %v2751_v34, %v7385_v12 }
 0x1f3   :  { %7380 = vst [vmem:[#allocation18_spill] sm:$0xff] %v6854_v52  ;;  %v6857_v26 = vadd.f32 %v3026_v35, %v2746_v38  ;;  %3315 = vmatprep.mubr.bf16.mxu1 %v5351_v48  ;;  %3586 = vmatprep.mubr.bf16.mxu0 %v7330_v1  ;;  %v2756_v38 = vadd.f32 %v2755_v30, %v7387_v44  ;;  %v7395_v44 = vld [vmem:[#allocation26_spill] sm:$0xff] }
 0x1f4   :  { %v2757_v55 = vpop.f32.mrf.mxu1  ;;  %v3028_v63 = vpop.f32.mrf.mxu0 }
 0x1f5   :  { %7382 = vst [vmem:[#allocation19_spill] sm:$0xff] %v6857_v26  ;;  %v6861_v33 = vadd.f32 %v3028_v63, %v2748_v40 }
 0x1f6   :  { %v2759_v54 = vpop.f32.mrf.mxu1  ;;  %v3030_v0 = vpop.f32.mrf.mxu0 }
 0x1f7   :  { %7384 = vst [vmem:[#allocation20_spill] sm:$0xff] %v6861_v33  ;;  %v6870_v48 = vadd.f32 %v3030_v0, %v2750_v47  ;;  %v7389_v33 = vld [vmem:[#allocation23_spill] sm:$0xff]  ;;  %v7391_v0 = vld [vmem:[#allocation24_spill] sm:$0xff] }
 0x1f8   :  { %v2761_v40 = vpop.f32.mrf.mxu1  ;;  %v3032_v45 = vpop.f32.mrf.mxu0  ;;  %v2758_v26 = vadd.f32 %v2757_v55, %v7389_v33  ;;  %v2760_v12 = vadd.f32 %v2759_v54, %v7391_v0  ;;  %v5356_v33 = vld [vmem:[%s7271_s0 + $0x530] ss:$36 sps:$4 sm:$0xff]   ;;  %v7393_v55 = vld [vmem:[#allocation25_spill] sm:$0xff] }
 0x1f9   :  { %7386 = vst [vmem:[#allocation21_spill] sm:$0xff] %v6870_v48  ;;  %v6876_v35 = vadd.f32 %v3032_v45, %v2752_v62  ;;  %v5359_v54 = vld [vmem:[%s7271_s0 + $0x5bc] ss:$36 sps:$4 sm:$0xff]  }
 0x1fa   :  { %v2765_v63 = vpop.f32.mrf.mxu1  ;;  %v3036_v42 = vpop.f32.mrf.mxu0  ;;  %3316 = vmatmul.mubr.bf16.gmra.mxu1 %v5349_v60  ;;  %3587 = vmatmul.mubr.bf16.gmra.mxu0 %v5352_v24  ;;  %v5353_v60 = vld [vmem:[%s7271_s0 + $0x570] ss:$36 sps:$4 sm:$0xff]   ;;  %v2762_v24 = vadd.f32 %v2761_v40, %v7393_v55 }
 0x1fb   :  { %7388 = vst [vmem:[#allocation22_spill] sm:$0xff] %v6876_v35  ;;  %v6879_v52 = vadd.f32 %v3036_v42, %v2756_v38  ;;  %3325 = vmatprep.mubr.bf16.mxu1 %v5355_v46  ;;  %3596 = vmatprep.mubr.bf16.mxu0 %v7330_v1  ;;  %v2766_v38 = vadd.f32 %v2765_v63, %v7395_v44  ;;  %v7403_v44 = vld [vmem:[#allocation30_spill] sm:$0xff] }
 0x1fc   :  { %v2767_v34 = vpop.f32.mrf.mxu1  ;;  %v3038_v47 = vpop.f32.mrf.mxu0 }
 0x1fd   :  { %7390 = vst [vmem:[#allocation23_spill] sm:$0xff] %v6879_v52  ;;  %v6883_v48 = vadd.f32 %v3038_v47, %v2758_v26 }
 0x1fe   :  { %v2769_v30 = vpop.f32.mrf.mxu1  ;;  %v3040_v62 = vpop.f32.mrf.mxu0 }
 0x1ff   :  { %7392 = vst [vmem:[#allocation24_spill] sm:$0xff] %v6883_v48  ;;  %v6892_v46 = vadd.f32 %v3040_v62, %v2760_v12  ;;  %v7397_v48 = vld [vmem:[#allocation27_spill] sm:$0xff]  ;;  %v7399_v62 = vld [vmem:[#allocation28_spill] sm:$0xff] }
 0x200   :  { %v2771_v26 = vpop.f32.mrf.mxu1  ;;  %v3042_v45 = vpop.f32.mrf.mxu0  ;;  %v2768_v52 = vadd.f32 %v2767_v34, %v7397_v48  ;;  %v2770_v55 = vadd.f32 %v2769_v30, %v7399_v62  ;;  %v5360_v48 = vld [vmem:[%s7271_s0 + $0x578] ss:$36 sps:$4 sm:$0xff]   ;;  %v5363_v30 = vld [vmem:[%s7271_s0 + $0x604] ss:$36 sps:$4 sm:$0xff]  }
 0x201   :  { %7394 = vst [vmem:[#allocation25_spill] sm:$0xff] %v6892_v46  ;;  %v6898_v42 = vadd.f32 %v3042_v45, %v2762_v24  ;;  %v7401_v34 = vld [vmem:[#allocation29_spill] sm:$0xff] }
 0x202   :  { %v2775_v47 = vpop.f32.mrf.mxu1  ;;  %v3046_v0 = vpop.f32.mrf.mxu0  ;;  %3326 = vmatmul.mubr.bf16.gmra.mxu1 %v5353_v60  ;;  %3597 = vmatmul.mubr.bf16.gmra.mxu0 %v5356_v33  ;;  %v5357_v60 = vld [vmem:[%s7271_s0 + $0x5b8] ss:$36 sps:$4 sm:$0xff]   ;;  %v2772_v33 = vadd.f32 %v2771_v26, %v7401_v34 }
 0x203   :  { %7396 = vst [vmem:[#allocation26_spill] sm:$0xff] %v6898_v42  ;;  %v6901_v35 = vadd.f32 %v3046_v0, %v2766_v38  ;;  %3335 = vmatprep.mubr.bf16.mxu1 %v5359_v54  ;;  %3606 = vmatprep.mubr.bf16.mxu0 %v7330_v1  ;;  %v2776_v38 = vadd.f32 %v2775_v47, %v7403_v44  ;;  %v7411_v44 = vld [vmem:[#allocation34_spill] sm:$0xff] }
 0x204   :  { %v2777_v40 = vpop.f32.mrf.mxu1  ;;  %v3048_v12 = vpop.f32.mrf.mxu0 }
 0x205   :  { %7398 = vst [vmem:[#allocation27_spill] sm:$0xff] %v6901_v35  ;;  %v6905_v46 = vadd.f32 %v3048_v12, %v2768_v52 }
 0x206   :  { %v2779_v63 = vpop.f32.mrf.mxu1  ;;  %v3050_v24 = vpop.f32.mrf.mxu0 }
 0x207   :  { %7400 = vst [vmem:[#allocation28_spill] sm:$0xff] %v6905_v46  ;;  %v6914_v54 = vadd.f32 %v3050_v24, %v2770_v55  ;;  %v7405_v46 = vld [vmem:[#allocation31_spill] sm:$0xff]  ;;  %v7407_v24 = vld [vmem:[#allocation32_spill] sm:$0xff] }
 0x208   :  { %v2781_v52 = vpop.f32.mrf.mxu1  ;;  %v3052_v45 = vpop.f32.mrf.mxu0  ;;  %v2778_v35 = vadd.f32 %v2777_v40, %v7405_v46  ;;  %v2780_v34 = vadd.f32 %v2779_v63, %v7407_v24  ;;  %v5364_v46 = vld [vmem:[%s7271_s0 + $0x5c0] ss:$36 sps:$4 sm:$0xff]   ;;  %v7409_v40 = vld [vmem:[#allocation33_spill] sm:$0xff]  ;;  %v5367_v63 = vld [vmem:[%s7271_s0 + $0x64c] ss:$36 sps:$4 sm:$0xff]  }
 0x209   :  { %7402 = vst [vmem:[#allocation29_spill] sm:$0xff] %v6914_v54  ;;  %v6920_v0 = vadd.f32 %v3052_v45, %v2772_v33 }
 0x20a   :  { %v2785_v12 = vpop.f32.mrf.mxu1  ;;  %v3056_v62 = vpop.f32.mrf.mxu0  ;;  %3336 = vmatmul.mubr.bf16.gmra.mxu1 %v5357_v60  ;;  %3607 = vmatmul.mubr.bf16.gmra.mxu0 %v5360_v48  ;;  %v5361_v60 = vld [vmem:[%s7271_s0 + $0x600] ss:$36 sps:$4 sm:$0xff]   ;;  %v2782_v48 = vadd.f32 %v2781_v52, %v7409_v40 }
 0x20b   :  { %7404 = vst [vmem:[#allocation30_spill] sm:$0xff] %v6920_v0  ;;  %v6923_v42 = vadd.f32 %v3056_v62, %v2776_v38  ;;  %3345 = vmatprep.mubr.bf16.mxu1 %v5363_v30  ;;  %3616 = vmatprep.mubr.bf16.mxu0 %v7330_v1  ;;  %v2786_v38 = vadd.f32 %v2785_v12, %v7411_v44  ;;  %v7419_v44 = vld [vmem:[#allocation38_spill] sm:$0xff] }
 0x20c   :  { %v2787_v26 = vpop.f32.mrf.mxu1  ;;  %v3058_v55 = vpop.f32.mrf.mxu0 }
 0x20d   :  { %7406 = vst [vmem:[#allocation31_spill] sm:$0xff] %v6923_v42  ;;  %v6927_v54 = vadd.f32 %v3058_v55, %v2778_v35 }
 0x20e   :  { %v2789_v47 = vpop.f32.mrf.mxu1  ;;  %v3060_v33 = vpop.f32.mrf.mxu0 }
 0x20f   :  { %7408 = vst [vmem:[#allocation32_spill] sm:$0xff] %v6927_v54  ;;  %v6936_v30 = vadd.f32 %v3060_v33, %v2780_v34  ;;  %v7413_v54 = vld [vmem:[#allocation35_spill] sm:$0xff]  ;;  %v7415_v33 = vld [vmem:[#allocation36_spill] sm:$0xff] }
 0x210   :  { %v2791_v35 = vpop.f32.mrf.mxu1  ;;  %v3062_v45 = vpop.f32.mrf.mxu0  ;;  %v2788_v42 = vadd.f32 %v2787_v26, %v7413_v54  ;;  %v2790_v40 = vadd.f32 %v2789_v47, %v7415_v33  ;;  %v5368_v54 = vld [vmem:[%s7271_s0 + $0x608] ss:$36 sps:$4 sm:$0xff]   ;;  %v7417_v26 = vld [vmem:[#allocation37_spill] sm:$0xff] }
 0x211   :  { %7410 = vst [vmem:[#allocation33_spill] sm:$0xff] %v6936_v30  ;;  %v6942_v62 = vadd.f32 %v3062_v45, %v2782_v48  ;;  %v5371_v47 = vld [vmem:[%s7271_s0 + $0x694] ss:$36 sps:$4 sm:$0xff]  }
 0x212   :  { %v2795_v55 = vpop.f32.mrf.mxu1  ;;  %v3066_v24 = vpop.f32.mrf.mxu0  ;;  %3346 = vmatmul.mubr.bf16.gmra.mxu1 %v5361_v60  ;;  %3617 = vmatmul.mubr.bf16.gmra.mxu0 %v5364_v46  ;;  %v5365_v60 = vld [vmem:[%s7271_s0 + $0x648] ss:$36 sps:$4 sm:$0xff]   ;;  %v2792_v46 = vadd.f32 %v2791_v35, %v7417_v26 }
 0x213   :  { %7412 = vst [vmem:[#allocation34_spill] sm:$0xff] %v6942_v62  ;;  %v6945_v0 = vadd.f32 %v3066_v24, %v2786_v38  ;;  %3355 = vmatprep.mubr.bf16.mxu1 %v5367_v63  ;;  %3626 = vmatprep.mubr.bf16.mxu0 %v7330_v1  ;;  %v2796_v38 = vadd.f32 %v2795_v55, %v7419_v44  ;;  %v7423_v55 = vld [vmem:[#allocation40_spill] sm:$0xff] }
 0x214   :  { %v2797_v52 = vpop.f32.mrf.mxu1  ;;  %v3068_v34 = vpop.f32.mrf.mxu0 }
 0x215   :  { %7414 = vst [vmem:[#allocation35_spill] sm:$0xff] %v6945_v0  ;;  %v6949_v30 = vadd.f32 %v3068_v34, %v2788_v42 }
 0x216   :  { %v2799_v12 = vpop.f32.mrf.mxu1  ;;  %v3070_v48 = vpop.f32.mrf.mxu0 }
 0x217   :  { %7416 = vst [vmem:[#allocation36_spill] sm:$0xff] %v6949_v30  ;;  %v6958_v63 = vadd.f32 %v3070_v48, %v2790_v40  ;;  %v7421_v30 = vld [vmem:[#allocation39_spill] sm:$0xff]  ;;  %v258_v48 = vld [vmem:[%s7271_s0 + $0x6d8] sm:$0xff]  ;;  %v2800_v26 = vadd.f32 %v2799_v12, %v7423_v55  ;;  %v7427_v12 = vld [vmem:[#allocation42_spill] sm:$0xff] }
 0x218   :  { %v2801_v42 = vpop.f32.mrf.mxu1  ;;  %v3072_v45 = vpop.f32.mrf.mxu0  ;;  %v2798_v0 = vadd.f32 %v2797_v52, %v7421_v30  ;;  %v5369_v30 = vld [vmem:[%s7271_s0 + $0x690] ss:$36 sps:$4 sm:$0xff]  }
 0x219   :  { %7418 = vst [vmem:[#allocation37_spill] sm:$0xff] %v6958_v63  ;;  %v6964_v24 = vadd.f32 %v3072_v45, %v2792_v46  ;;  %v5372_v52 = vld [vmem:[%s7271_s0 + $0x650] ss:$36 sps:$4 sm:$0xff]  }
 0x21a   :  { %v2805_v34 = vpop.f32.mrf.mxu1  ;;  %v3076_v33 = vpop.f32.mrf.mxu0  ;;  %3356 = vmatmul.mubr.bf16.gmra.mxu1 %v5365_v60  ;;  %3627 = vmatmul.mubr.bf16.gmra.mxu0 %v5368_v54  ;;  %v7425_v54 = vld [vmem:[#allocation41_spill] sm:$0xff] }
 0x21b   :  { %7420 = vst [vmem:[#allocation38_spill] sm:$0xff] %v6964_v24  ;;  %v6967_v62 = vadd.f32 %v3076_v33, %v2796_v38  ;;  %3365 = vmatprep.mubr.bf16.mxu1 %v5371_v47  ;;  %3636 = vmatprep.mubr.bf16.mxu0 %v7330_v1  ;;  %v2802_v47 = vadd.f32 %v2801_v42, %v7425_v54  ;;  %v7428_v24 = vld [vmem:[#allocation43_spill] sm:$0xff] }
 0x21c   :  { %v2807_v35 = vpop.f32.mrf.mxu1  ;;  %v3078_v40 = vpop.f32.mrf.mxu0  ;;  %v4563_v38 = vcombine.high %v258_v48, %v258_v48 }
 0x21d   :  { %7422 = vst [vmem:[#allocation39_spill] sm:$0xff] %v6967_v62  ;;  %v6974_v46 = vadd.f32 %v3078_v40, %v2798_v0  ;;  %v2806_v0 = vadd.f32 %v2805_v34, %v7427_v12  ;;  %v2808_v63 = vadd.f32 %v2807_v35, %v7428_v24  ;;  %v7434_v12 = vld [vmem:[#allocation46_spill] sm:$0xff] }
 0x21e   :  { %v2809_v45 = vpop.f32.mrf.mxu1  ;;  %v3080_v60 = vpop.f32.mrf.mxu0 }
 0x21f   :  { %7424 = vst [vmem:[#allocation40_spill] sm:$0xff] %v6974_v46  ;;  %v6983_v44 = vadd.f32 %v3080_v60, %v2800_v26  ;;  %v7430_v60 = vld [vmem:[#allocation44_spill] sm:$0xff] }
 0x220   :  { %v2811_v33 = vpop.f32.mrf.mxu1  ;;  %v3082_v62 = vpop.f32.mrf.mxu0  ;;  %v2810_v54 = vadd.f32 %v2809_v45, %v7430_v60 }
 0x221   :  { %7426 = vst [vmem:[#allocation41_spill] sm:$0xff] %v6983_v44  ;;  %v6986_v40 = vadd.f32 %v3082_v62, %v2802_v47  ;;  %v4562_v47 = vcombine.low %v258_v48, %v258_v48 }
 0x222   :  { %v2815_v55 = vpop.f32.mrf.mxu1  ;;  %v3086_v46 = vpop.f32.mrf.mxu0  ;;  %3366 = vmatmul.mubr.bf16.gmra.mxu1 %v5369_v30  ;;  %3637 = vmatmul.mubr.bf16.gmra.mxu0 %v5372_v52  ;;  %v5375_v30 = vld [vmem:[%s7271_s0 + $0x698] ss:$36 sps:$4 sm:$0xff]  }
 0x223   :  { %v6989_v61 = vadd.f32 %v3086_v46, %v2806_v0  ;;  %3375 = vmatprep.mubr.bf16.mxu1 %v4563_v38  ;;  %3646 = vmatprep.mubr.bf16.mxu0 %v7330_v1  ;;  %v7432_v52 = vld [vmem:[#allocation45_spill] sm:$0xff]  ;;  %v2816_v0 = vadd.f32 %v2815_v55, %v7434_v12  ;;  %v5376_v55 = vld [vmem:[%s7271_s0 + $0x6e0] ss:$0 sps:$4 sm:$0xff]  }
 0x224   :  { %v2817_v42 = vpop.f32.mrf.mxu1  ;;  %v3088_v26 = vpop.f32.mrf.mxu0  ;;  %v2812_v24 = vadd.f32 %v2811_v33, %v7432_v52 }
 0x225   :  { %7429 = vst [vmem:[#allocation42_spill] sm:$0xff] %v6989_v61  ;;  %v6993_v44 = vadd.f32 %v3088_v26, %v2808_v63  ;;  %v7436_v26 = vld [vmem:[#allocation47_spill] sm:$0xff] }
 0x226   :  { %v2819_v34 = vpop.f32.mrf.mxu1  ;;  %v3090_v62 = vpop.f32.mrf.mxu0  ;;  %v2818_v48 = vadd.f32 %v2817_v42, %v7436_v26 }
 0x227   :  { %7431 = vst [vmem:[#allocation43_spill] sm:$0xff] %v6993_v44  ;;  %v6999_v35 = vadd.f32 %v3090_v62, %v2810_v54 }
 0x228   :  { %v2820_v46 = vpop.f32.mrf.mxu1  ;;  %v3092_v38 = vpop.f32.mrf.mxu0 }
 0x229   :  { %7433 = vst [vmem:[#allocation44_spill] sm:$0xff] %v6999_v35  ;;  %v7002_v61 = vadd.f32 %v3092_v38, %v2812_v24 }
 0x22a   :  { %v3096_v45 = vpop.f32.mrf.mxu0  ;;  %v3137_v63 = vpop.f32.mrf.mxu1  ;;  %3376 = vmatmul.mubr.bf16.gmra.mxu1 %v4562_v47  ;;  %3647 = vmatmul.mubr.bf16.gmra.mxu0 %v5375_v30 }
 0x22b   :  { %7435 = vst [vmem:[#allocation45_spill] sm:$0xff] %v7002_v61  ;;  %v7005_v60 = vadd.f32 %v3096_v45, %v2816_v0  ;;  %3656 = vmatprep.mubr.bf16.mxu0 %v7330_v1  ;;  %v3138_v42 = vadd.f32 %v3137_v63, %v6483_v18  ;;  %v7439_v0 = vld [vmem:[#allocation54_spill] sm:$0xff] }
 0x22c   :  { %v3098_v34 = vpop.f32.mrf.mxu0  ;;  %v3139_v33 = vpop.f32.mrf.mxu1 }
 0x22d   :  { %7437 = vst [vmem:[#allocation46_spill] sm:$0xff] %v7005_v60  ;;  %v7008_v54 = vadd.f32 %v3098_v34, %v2818_v48  ;;  %v3140_v38 = vadd.f32 %v3139_v33, %v6487_v58 }
 0x22e   :  { %v3100_v62 = vpop.f32.mrf.mxu0  ;;  %v3141_v52 = vpop.f32.mrf.mxu1 }
 0x22f   :  { %7438 = vst [vmem:[#allocation47_spill] sm:$0xff] %v7008_v54  ;;  %v3142_v45 = vadd.f32 %v3141_v52, %v7439_v0 }
 0x230   :  { %v3101_v24 = vpop.f32.mrf.mxu0  ;;  %v3143_v46 = vpop.f32.mrf.mxu1 }
 0x231   :  { %v3144_v54 = vadd.f32 %v3143_v46, %v6502_v32 }
 0x232   :  { %v3147_v47 = vpop.f32.mrf.mxu1  ;;  %v3418_v30 = vpop.f32.mrf.mxu0  ;;  %3657 = vmatmul.mubr.bf16.gmra.mxu0 %v5376_v55 }
 0x233   :  { %v3419_v26 = vadd.f32 %v3418_v30, %v3138_v42  ;;  %v3148_v33 = vadd.f32 %v3147_v47, %v6505_v6 }
 0x234   :  { %v3149_v1 = vpop.f32.mrf.mxu1  ;;  %v3420_v12 = vpop.f32.mrf.mxu0 }
 0x235   :  { %v3421_v48 = vadd.f32 %v3420_v12, %v3140_v38  ;;  %v4118_v44 = vmul.f32 %v3419_v26, %v3419_v26  ;;  %v3150_v52 = vadd.f32 %v3149_v1, %v6509_v8 }
 0x236   :  { %v3151_v34 = vpop.f32.mrf.mxu1  ;;  %v3422_v62 = vpop.f32.mrf.mxu0 }
 0x237   :  { %v4758_v60 = vpack.c.bf16 %v3421_v48, %v3419_v26  ;;  %v3423_v24 = vadd.f32 %v3422_v62, %v3142_v45  ;;  %v4119_v55 = vmul.f32 %v3421_v48, %v3421_v48  ;;  %v3152_v6 = vadd.f32 %v3151_v34, %v6518_v57 }
 0x238   :  { %v3153_v61 = vpop.f32.mrf.mxu1  ;;  %v3424_v35 = vpop.f32.mrf.mxu0 }
 0x239   :  { %3961 = vst [vmem:[%s7272_s2] sm:$0xff] %v4758_v60  ;;  %v4010_v58 = vadd.f32 %v3423_v24, %v3419_v26  ;;  %v4120_v18 = vmul.f32 %v3423_v24, %v3423_v24  ;;  %v3425_v63 = vadd.f32 %v3424_v35, %v3144_v54 }
 0x23a   :  { %v3157_v30 = vpop.f32.mrf.mxu1  ;;  %v3428_v42 = vpop.f32.mrf.mxu0 }
 0x23b   :  { %v4216_v32 = vadd.f32 %v4120_v18, %v4118_v44  ;;  %v4759_v46 = vpack.c.bf16 %v3425_v63, %v3423_v24  ;;  %v4064_v38 = vadd.f32 %v3425_v63, %v3421_v48  ;;  %v4121_v12 = vmul.f32 %v3425_v63, %v3425_v63 }
 0x23c   :  { %v3429_v0 = vadd.f32 %v3428_v42, %v3148_v33  ;;  %v3159_v45 = vpop.f32.mrf.mxu1  ;;  %v3430_v62 = vpop.f32.mrf.mxu0  ;;  %v3154_v44 = vadd.f32 %v3153_v61, %v6524_v4  ;;  %v3158_v57 = vadd.f32 %v3157_v30, %v6527_v28 }
 0x23d   :  { %3962 = vst [vmem:[%s7272_s2 + $0x8] sm:$0xff] %v4759_v46  ;;  %v4270_v60 = vadd.f32 %v4121_v12, %v4119_v55  ;;  %v3431_v35 = vadd.f32 %v3430_v62, %v3150_v52  ;;  %v3160_v4 = vadd.f32 %v3159_v45, %v6531_v50 }
 0x23e   :  { %v4011_v54 = vadd.f32 %v4010_v58, %v3429_v0  ;;  %v4122_v8 = vmul.f32 %v3429_v0, %v3429_v0  ;;  %v3161_v47 = vpop.f32.mrf.mxu1  ;;  %v3432_v1 = vpop.f32.mrf.mxu0 }
 0x23f   :  { %v4760_v26 = vpack.c.bf16 %v3431_v35, %v3429_v0  ;;  %v4065_v48 = vadd.f32 %v4064_v38, %v3431_v35  ;;  %v4123_v24 = vmul.f32 %v3431_v35, %v3431_v35  ;;  %v3433_v63 = vadd.f32 %v3432_v1, %v3152_v6 }
 0x240   :  { %v4217_v18 = vadd.f32 %v4216_v32, %v4122_v8  ;;  %v3163_v33 = vpop.f32.mrf.mxu1  ;;  %v3434_v42 = vpop.f32.mrf.mxu0  ;;  %v3162_v28 = vadd.f32 %v3161_v47, %v6540_v5 }
 0x241   :  { %3963 = vst [vmem:[%s7272_s2 + $0x10] sm:$0xff] %v4760_v26  ;;  %v4271_v52 = vadd.f32 %v4270_v60, %v4123_v24  ;;  %v3435_v55 = vadd.f32 %v3434_v42, %v3154_v44  ;;  %v4012_v34 = vadd.f32 %v4011_v54, %v3433_v63  ;;  %v4124_v58 = vmul.f32 %v3433_v63, %v3433_v63 }
 0x242   :  { %v3167_v46 = vpop.f32.mrf.mxu1  ;;  %v3438_v12 = vpop.f32.mrf.mxu0  ;;  %v3164_v50 = vadd.f32 %v3163_v33, %v6546_v2 }
 0x243   :  { %v4761_v61 = vpack.c.bf16 %v3435_v55, %v3433_v63  ;;  %v4066_v38 = vadd.f32 %v4065_v48, %v3435_v55  ;;  %v4125_v32 = vmul.f32 %v3435_v55, %v3435_v55  ;;  %v4218_v0 = vadd.f32 %v4217_v18, %v4124_v58 }
 0x244   :  { %v3439_v62 = vadd.f32 %v3438_v12, %v3158_v57  ;;  %v3169_v35 = vpop.f32.mrf.mxu1  ;;  %v3440_v6 = vpop.f32.mrf.mxu0  ;;  %v3168_v5 = vadd.f32 %v3167_v46, %v6549_v56 }
 0x245   :  { %3964 = vst [vmem:[%s7272_s2 + $0x18] sm:$0xff] %v4761_v61  ;;  %v4272_v60 = vadd.f32 %v4271_v52, %v4125_v32  ;;  %v3441_v8 = vadd.f32 %v3440_v6, %v3160_v4  ;;  %v3170_v2 = vadd.f32 %v3169_v35, %v6553_v10 }
 0x246   :  { %v4013_v30 = vadd.f32 %v4012_v34, %v3439_v62  ;;  %v4126_v54 = vmul.f32 %v3439_v62, %v3439_v62  ;;  %v3171_v1 = vpop.f32.mrf.mxu1  ;;  %v3442_v44 = vpop.f32.mrf.mxu0 }
 0x247   :  { %v4762_v45 = vpack.c.bf16 %v3441_v8, %v3439_v62  ;;  %v4067_v26 = vadd.f32 %v4066_v38, %v3441_v8  ;;  %v4127_v48 = vmul.f32 %v3441_v8, %v3441_v8  ;;  %v3443_v18 = vadd.f32 %v3442_v44, %v3162_v28 }
 0x248   :  { %v4219_v24 = vadd.f32 %v4218_v0, %v4126_v54  ;;  %v3173_v63 = vpop.f32.mrf.mxu1  ;;  %v3444_v42 = vpop.f32.mrf.mxu0  ;;  %v3172_v56 = vadd.f32 %v3171_v1, %v6562_v17 }
 0x249   :  { %3965 = vst [vmem:[%s7272_s2 + $0x20] sm:$0xff] %v4762_v45  ;;  %v4273_v52 = vadd.f32 %v4272_v60, %v4127_v48  ;;  %v3445_v55 = vadd.f32 %v3444_v42, %v3164_v50  ;;  %v4014_v47 = vadd.f32 %v4013_v30, %v3443_v18  ;;  %v4128_v57 = vmul.f32 %v3443_v18, %v3443_v18 }
 0x24a   :  { %v3177_v34 = vpop.f32.mrf.mxu1  ;;  %v3448_v58 = vpop.f32.mrf.mxu0  ;;  %v3174_v10 = vadd.f32 %v3173_v63, %v6568_v14 }
 0x24b   :  { %v4763_v33 = vpack.c.bf16 %v3445_v55, %v3443_v18  ;;  %v4068_v12 = vadd.f32 %v4067_v26, %v3445_v55  ;;  %v4129_v4 = vmul.f32 %v3445_v55, %v3445_v55  ;;  %v4220_v61 = vadd.f32 %v4219_v24, %v4128_v57 }
 0x24c   :  { %v3449_v38 = vadd.f32 %v3448_v58, %v3168_v5  ;;  %v3179_v32 = vpop.f32.mrf.mxu1  ;;  %v3450_v0 = vpop.f32.mrf.mxu0  ;;  %v3178_v17 = vadd.f32 %v3177_v34, %v6571_v16 }
 0x24d   :  { %3966 = vst [vmem:[%s7272_s2 + $0x28] sm:$0xff] %v4763_v33  ;;  %v4274_v62 = vadd.f32 %v4273_v52, %v4129_v4  ;;  %v3451_v6 = vadd.f32 %v3450_v0, %v3170_v2  ;;  %v3180_v14 = vadd.f32 %v3179_v32, %v6575_v20 }
 0x24e   :  { %v4015_v46 = vadd.f32 %v4014_v47, %v3449_v38  ;;  %v4130_v60 = vmul.f32 %v3449_v38, %v3449_v38  ;;  %v3181_v8 = vpop.f32.mrf.mxu1  ;;  %v3452_v28 = vpop.f32.mrf.mxu0 }
 0x24f   :  { %v4764_v35 = vpack.c.bf16 %v3451_v6, %v3449_v38  ;;  %v4069_v30 = vadd.f32 %v4068_v12, %v3451_v6  ;;  %v4131_v54 = vmul.f32 %v3451_v6, %v3451_v6  ;;  %v3453_v50 = vadd.f32 %v3452_v28, %v3172_v56 }
 0x250   :  { %v4221_v44 = vadd.f32 %v4220_v61, %v4130_v60  ;;  %v3183_v45 = vpop.f32.mrf.mxu1  ;;  %v3454_v26 = vpop.f32.mrf.mxu0  ;;  %v3182_v16 = vadd.f32 %v3181_v8, %v6584_v29 }
 0x251   :  { %3967 = vst [vmem:[%s7272_s2 + $0x30] sm:$0xff] %v4764_v35  ;;  %v4275_v48 = vadd.f32 %v4274_v62, %v4131_v54  ;;  %v3455_v24 = vadd.f32 %v3454_v26, %v3174_v10  ;;  %v4016_v1 = vadd.f32 %v4015_v46, %v3453_v50  ;;  %v4132_v18 = vmul.f32 %v3453_v50, %v3453_v50 }
 0x252   :  { %v3187_v42 = vpop.f32.mrf.mxu1  ;;  %v3458_v52 = vpop.f32.mrf.mxu0  ;;  %v3184_v20 = vadd.f32 %v3183_v45, %v6590_v36 }
 0x253   :  { %v4765_v63 = vpack.c.bf16 %v3455_v24, %v3453_v50  ;;  %v4070_v55 = vadd.f32 %v4069_v30, %v3455_v24  ;;  %v4133_v5 = vmul.f32 %v3455_v24, %v3455_v24  ;;  %v4222_v47 = vadd.f32 %v4221_v44, %v4132_v18 }
 0x254   :  { %v3459_v57 = vadd.f32 %v3458_v52, %v3178_v17  ;;  %v3189_v58 = vpop.f32.mrf.mxu1  ;;  %v3460_v2 = vpop.f32.mrf.mxu0  ;;  %v3188_v29 = vadd.f32 %v3187_v42, %v6593_v3 }
 0x255   :  { %3968 = vst [vmem:[%s7272_s2 + $0x38] sm:$0xff] %v4765_v63  ;;  %v4276_v33 = vadd.f32 %v4275_v48, %v4133_v5  ;;  %v3461_v12 = vadd.f32 %v3460_v2, %v3180_v14  ;;  %v3190_v36 = vadd.f32 %v3189_v58, %v6597_v59 }
 0x256   :  { %v4017_v34 = vadd.f32 %v4016_v1, %v3459_v57  ;;  %v4134_v4 = vmul.f32 %v3459_v57, %v3459_v57  ;;  %v3191_v61 = vpop.f32.mrf.mxu1  ;;  %v3462_v38 = vpop.f32.mrf.mxu0 }
 0x257   :  { %v4766_v32 = vpack.c.bf16 %v3461_v12, %v3459_v57  ;;  %v4071_v0 = vadd.f32 %v4070_v55, %v3461_v12  ;;  %v4135_v62 = vmul.f32 %v3461_v12, %v3461_v12  ;;  %v3463_v56 = vadd.f32 %v3462_v38, %v3182_v16 }
 0x258   :  { %v4223_v6 = vadd.f32 %v4222_v47, %v4134_v4  ;;  %v3193_v46 = vpop.f32.mrf.mxu1  ;;  %v3464_v60 = vpop.f32.mrf.mxu0  ;;  %v3192_v3 = vadd.f32 %v3191_v61, %v6606_v41 }
 0x259   :  { %3969 = vst [vmem:[%s7272_s2 + $0x40] sm:$0xff] %v4766_v32  ;;  %v4277_v28 = vadd.f32 %v4276_v33, %v4135_v62  ;;  %v3465_v10 = vadd.f32 %v3464_v60, %v3184_v20  ;;  %v4018_v8 = vadd.f32 %v4017_v34, %v3463_v56  ;;  %v4136_v35 = vmul.f32 %v3463_v56, %v3463_v56 }
 0x25a   :  { %v3197_v30 = vpop.f32.mrf.mxu1  ;;  %v3468_v54 = vpop.f32.mrf.mxu0  ;;  %v3194_v59 = vadd.f32 %v3193_v46, %v6612_v13 }
 0x25b   :  { %v4767_v44 = vpack.c.bf16 %v3465_v10, %v3463_v56  ;;  %v4072_v50 = vadd.f32 %v4071_v0, %v3465_v10  ;;  %v4137_v45 = vmul.f32 %v3465_v10, %v3465_v10  ;;  %v4224_v26 = vadd.f32 %v4223_v6, %v4136_v35 }
 0x25c   :  { %v3469_v48 = vadd.f32 %v3468_v54, %v3188_v29  ;;  %v3199_v24 = vpop.f32.mrf.mxu1  ;;  %v3470_v17 = vpop.f32.mrf.mxu0  ;;  %v3198_v41 = vadd.f32 %v3197_v30, %v6615_v15 }
 0x25d   :  { %3970 = vst [vmem:[%s7272_s2 + $0x48] sm:$0xff] %v4767_v44  ;;  %v4278_v1 = vadd.f32 %v4277_v28, %v4137_v45  ;;  %v3471_v18 = vadd.f32 %v3470_v17, %v3190_v36  ;;  %v3200_v13 = vadd.f32 %v3199_v24, %v6619_v7 }
 0x25e   :  { %v4019_v42 = vadd.f32 %v4018_v8, %v3469_v48  ;;  %v4138_v52 = vmul.f32 %v3469_v48, %v3469_v48  ;;  %v3201_v14 = vpop.f32.mrf.mxu1  ;;  %v3472_v63 = vpop.f32.mrf.mxu0 }
 0x25f   :  { %v4768_v55 = vpack.c.bf16 %v3471_v18, %v3469_v48  ;;  %v4073_v5 = vadd.f32 %v4072_v50, %v3471_v18  ;;  %v4139_v47 = vmul.f32 %v3471_v18, %v3471_v18  ;;  %v3473_v58 = vadd.f32 %v3472_v63, %v3192_v3 }
 0x260   :  { %v4225_v57 = vadd.f32 %v4224_v26, %v4138_v52  ;;  %v3203_v2 = vpop.f32.mrf.mxu1  ;;  %v3474_v33 = vpop.f32.mrf.mxu0  ;;  %v3202_v15 = vadd.f32 %v3201_v14, %v6628_v53 }
 0x261   :  { %3971 = vst [vmem:[%s7272_s2 + $0x50] sm:$0xff] %v4768_v55  ;;  %v4279_v12 = vadd.f32 %v4278_v1, %v4139_v47  ;;  %v3475_v16 = vadd.f32 %v3474_v33, %v3194_v59  ;;  %v4020_v34 = vadd.f32 %v4019_v42, %v3473_v58  ;;  %v4140_v4 = vmul.f32 %v3473_v58, %v3473_v58 }
 0x262   :  { %v3207_v61 = vpop.f32.mrf.mxu1  ;;  %v3478_v38 = vpop.f32.mrf.mxu0  ;;  %v3204_v7 = vadd.f32 %v3203_v2, %v6634_v25 }
 0x263   :  { %v4769_v20 = vpack.c.bf16 %v3475_v16, %v3473_v58  ;;  %v4074_v32 = vadd.f32 %v4073_v5, %v3475_v16  ;;  %v4141_v0 = vmul.f32 %v3475_v16, %v3475_v16  ;;  %v4226_v62 = vadd.f32 %v4225_v57, %v4140_v4 }
 0x264   :  { %v3479_v6 = vadd.f32 %v3478_v38, %v3198_v41  ;;  %v3209_v56 = vpop.f32.mrf.mxu1  ;;  %v3480_v46 = vpop.f32.mrf.mxu0  ;;  %v3208_v53 = vadd.f32 %v3207_v61, %v6637_v27 }
 0x265   :  { %3972 = vst [vmem:[%s7272_s2 + $0x58] sm:$0xff] %v4769_v20  ;;  %v4280_v60 = vadd.f32 %v4279_v12, %v4141_v0  ;;  %v3481_v28 = vadd.f32 %v3480_v46, %v3200_v13  ;;  %v3210_v25 = vadd.f32 %v3209_v56, %v6641_v19 }
 0x266   :  { %v4021_v10 = vadd.f32 %v4020_v34, %v3479_v6  ;;  %v4142_v29 = vmul.f32 %v3479_v6, %v3479_v6  ;;  %v3211_v8 = vpop.f32.mrf.mxu1  ;;  %v3482_v35 = vpop.f32.mrf.mxu0 }
 0x267   :  { %v4770_v30 = vpack.c.bf16 %v3481_v28, %v3479_v6  ;;  %v4075_v54 = vadd.f32 %v4074_v32, %v3481_v28  ;;  %v4143_v36 = vmul.f32 %v3481_v28, %v3481_v28  ;;  %v3483_v50 = vadd.f32 %v3482_v35, %v3202_v15 }
 0x268   :  { %v4227_v44 = vadd.f32 %v4226_v62, %v4142_v29  ;;  %v3213_v45 = vpop.f32.mrf.mxu1  ;;  %v3484_v26 = vpop.f32.mrf.mxu0  ;;  %v3212_v27 = vadd.f32 %v3211_v8, %v6650_v23 }
 0x269   :  { %3973 = vst [vmem:[%s7272_s2 + $0x60] sm:$0xff] %v4770_v30  ;;  %v4281_v48 = vadd.f32 %v4280_v60, %v4143_v36  ;;  %v3485_v24 = vadd.f32 %v3484_v26, %v3204_v7  ;;  %v4022_v17 = vadd.f32 %v4021_v10, %v3483_v50  ;;  %v4144_v1 = vmul.f32 %v3483_v50, %v3483_v50 }
 0x26a   :  { %v3217_v18 = vpop.f32.mrf.mxu1  ;;  %v3488_v3 = vpop.f32.mrf.mxu0  ;;  %v3214_v19 = vadd.f32 %v3213_v45, %v6656_v37 }
 0x26b   :  { %v4771_v42 = vpack.c.bf16 %v3485_v24, %v3483_v50  ;;  %v4076_v52 = vadd.f32 %v4075_v54, %v3485_v24  ;;  %v4145_v14 = vmul.f32 %v3485_v24, %v3485_v24  ;;  %v4228_v63 = vadd.f32 %v4227_v44, %v4144_v1 }
 0x26c   :  { %v3489_v59 = vadd.f32 %v3488_v3, %v3208_v53  ;;  %v3219_v55 = vpop.f32.mrf.mxu1  ;;  %v3490_v5 = vpop.f32.mrf.mxu0  ;;  %v3218_v23 = vadd.f32 %v3217_v18, %v6659_v39 }
 0x26d   :  { %3974 = vst [vmem:[%s7272_s2 + $0x68] sm:$0xff] %v4771_v42  ;;  %v4282_v47 = vadd.f32 %v4281_v48, %v4145_v14  ;;  %v3491_v57 = vadd.f32 %v3490_v5, %v3210_v25  ;;  %v3220_v37 = vadd.f32 %v3219_v55, %v6663_v31 }
 0x26e   :  { %v4023_v58 = vadd.f32 %v4022_v17, %v3489_v59  ;;  %v4146_v2 = vmul.f32 %v3489_v59, %v3489_v59  ;;  %v3221_v33 = vpop.f32.mrf.mxu1  ;;  %v3492_v12 = vpop.f32.mrf.mxu0 }
 0x26f   :  { %v4772_v16 = vpack.c.bf16 %v3491_v57, %v3489_v59  ;;  %v4077_v41 = vadd.f32 %v4076_v52, %v3491_v57  ;;  %v4147_v34 = vmul.f32 %v3491_v57, %v3491_v57  ;;  %v3493_v61 = vadd.f32 %v3492_v12, %v3212_v27 }
 0x270   :  { %v4229_v4 = vadd.f32 %v4228_v63, %v4146_v2  ;;  %v3223_v38 = vpop.f32.mrf.mxu1  ;;  %v3494_v13 = vpop.f32.mrf.mxu0  ;;  %v3222_v39 = vadd.f32 %v3221_v33, %v6672_v9 }
 0x271   :  { %3975 = vst [vmem:[%s7272_s2 + $0x70] sm:$0xff] %v4772_v16  ;;  %v4283_v20 = vadd.f32 %v4282_v47, %v4147_v34  ;;  %v3495_v32 = vadd.f32 %v3494_v13, %v3214_v19  ;;  %v4024_v0 = vadd.f32 %v4023_v58, %v3493_v61  ;;  %v4148_v62 = vmul.f32 %v3493_v61, %v3493_v61 }
 0x272   :  { %v3227_v6 = vpop.f32.mrf.mxu1  ;;  %v3498_v56 = vpop.f32.mrf.mxu0  ;;  %v3224_v31 = vadd.f32 %v3223_v38, %v6678_v49 }
 0x273   :  { %v4773_v46 = vpack.c.bf16 %v3495_v32, %v3493_v61  ;;  %v4078_v60 = vadd.f32 %v4077_v41, %v3495_v32  ;;  %v4149_v28 = vmul.f32 %v3495_v32, %v3495_v32  ;;  %v4230_v15 = vadd.f32 %v4229_v4, %v4148_v62 }
 0x274   :  { %v3499_v10 = vadd.f32 %v3498_v56, %v3218_v23  ;;  %v3229_v29 = vpop.f32.mrf.mxu1  ;;  %v3500_v8 = vpop.f32.mrf.mxu0  ;;  %v3228_v9 = vadd.f32 %v3227_v6, %v6681_v51 }
 0x275   :  { %3976 = vst [vmem:[%s7272_s2 + $0x78] sm:$0xff] %v4773_v46  ;;  %v4284_v35 = vadd.f32 %v4283_v20, %v4149_v28  ;;  %v3501_v7 = vadd.f32 %v3500_v8, %v3220_v37  ;;  %v3230_v49 = vadd.f32 %v3229_v29, %v6685_v43 }
 0x276   :  { %v4025_v30 = vadd.f32 %v4024_v0, %v3499_v10  ;;  %v4150_v54 = vmul.f32 %v3499_v10, %v3499_v10  ;;  %v3231_v36 = vpop.f32.mrf.mxu1  ;;  %v3502_v44 = vpop.f32.mrf.mxu0 }
 0x277   :  { %v4774_v50 = vpack.c.bf16 %v3501_v7, %v3499_v10  ;;  %v4079_v45 = vadd.f32 %v4078_v60, %v3501_v7  ;;  %v4151_v26 = vmul.f32 %v3501_v7, %v3501_v7  ;;  %v3503_v24 = vadd.f32 %v3502_v44, %v3222_v39  ;;  %v7442_v44 = vld [vmem:[#allocation57_spill] sm:$0xff] }
 0x278   :  { %v4231_v48 = vadd.f32 %v4230_v15, %v4150_v54  ;;  %v3233_v53 = vpop.f32.mrf.mxu1  ;;  %v3504_v17 = vpop.f32.mrf.mxu0  ;;  %v3232_v51 = vadd.f32 %v3231_v36, %v6694_v22 }
 0x279   :  { %3977 = vst [vmem:[%s7272_s2 + $0x80] sm:$0xff] %v4774_v50  ;;  %v4285_v1 = vadd.f32 %v4284_v35, %v4151_v26  ;;  %v3505_v18 = vadd.f32 %v3504_v17, %v3224_v31  ;;  %v4026_v3 = vadd.f32 %v4025_v30, %v3503_v24  ;;  %v4152_v25 = vmul.f32 %v3503_v24, %v3503_v24 }
 0x27a   :  { %v3237_v42 = vpop.f32.mrf.mxu1  ;;  %v3508_v52 = vpop.f32.mrf.mxu0  ;;  %v3234_v43 = vadd.f32 %v3233_v53, %v6700_v11  ;;  %v7440_v11 = vld [vmem:[#allocation55_spill] sm:$0xff] }
 0x27b   :  { %v4775_v14 = vpack.c.bf16 %v3505_v18, %v3503_v24  ;;  %v4080_v63 = vadd.f32 %v4079_v45, %v3505_v18  ;;  %v4153_v59 = vmul.f32 %v3505_v18, %v3505_v18  ;;  %v4232_v55 = vadd.f32 %v4231_v48, %v4152_v25 }
 0x27c   :  { %v3509_v5 = vadd.f32 %v3508_v52, %v3228_v9  ;;  %v3239_v47 = vpop.f32.mrf.mxu1  ;;  %v3510_v57 = vpop.f32.mrf.mxu0  ;;  %v3238_v22 = vadd.f32 %v3237_v42, %v6703_v21  ;;  %v7441_v21 = vld [vmem:[#allocation56_spill] sm:$0xff]  ;;  %v7443_v9 = vld [vmem:[#allocation58_spill] sm:$0xff] }
 0x27d   :  { %3978 = vst [vmem:[%s7272_s2 + $0x88] sm:$0xff] %v4775_v14  ;;  %v4286_v27 = vadd.f32 %v4285_v1, %v4153_v59  ;;  %v3511_v58 = vadd.f32 %v3510_v57, %v3230_v49  ;;  %v3240_v56 = vadd.f32 %v3239_v47, %v7440_v11  ;;  %v7444_v14 = vld [vmem:[#allocation48_spill] sm:$0xff] }
 0x27e   :  { %v4027_v2 = vadd.f32 %v4026_v3, %v3509_v5  ;;  %v4154_v33 = vmul.f32 %v3509_v5, %v3509_v5  ;;  %v3241_v12 = vpop.f32.mrf.mxu1  ;;  %v3512_v19 = vpop.f32.mrf.mxu0 }
 0x27f   :  { %v4776_v16 = vpack.c.bf16 %v3511_v58, %v3509_v5  ;;  %v4081_v41 = vadd.f32 %v4080_v63, %v3511_v58  ;;  %v4155_v34 = vmul.f32 %v3511_v58, %v3511_v58  ;;  %v3513_v61 = vadd.f32 %v3512_v19, %v3232_v51 }
 0x280   :  { %v4233_v4 = vadd.f32 %v4232_v55, %v4154_v33  ;;  %v3243_v38 = vpop.f32.mrf.mxu1  ;;  %v3514_v13 = vpop.f32.mrf.mxu0  ;;  %v3242_v7 = vadd.f32 %v3241_v12, %v7441_v21  ;;  %v7445_v33 = vld [vmem:[#allocation49_spill] sm:$0xff] }
 0x281   :  { %3979 = vst [vmem:[%s7272_s2 + $0x90] sm:$0xff] %v4776_v16  ;;  %v4287_v20 = vadd.f32 %v4286_v27, %v4155_v34  ;;  %v3515_v32 = vadd.f32 %v3514_v13, %v3234_v43  ;;  %v4028_v23 = vadd.f32 %v4027_v2, %v3513_v61  ;;  %v4156_v0 = vmul.f32 %v3513_v61, %v3513_v61  ;;  %v7446_v34 = vld [vmem:[#allocation50_spill] sm:$0xff] }
 0x282   :  { %v3247_v62 = vpop.f32.mrf.mxu1  ;;  %v3518_v6 = vpop.f32.mrf.mxu0  ;;  %v3244_v31 = vadd.f32 %v3243_v38, %v7442_v44 }
 0x283   :  { %v4777_v37 = vpack.c.bf16 %v3515_v32, %v3513_v61  ;;  %v4082_v46 = vadd.f32 %v4081_v41, %v3515_v32  ;;  %v4157_v60 = vmul.f32 %v3515_v32, %v3515_v32  ;;  %v4234_v28 = vadd.f32 %v4233_v4, %v4156_v0 }
 0x284   :  { %v3519_v15 = vadd.f32 %v3518_v6, %v3238_v22  ;;  %v3249_v10 = vpop.f32.mrf.mxu1  ;;  %v3520_v29 = vpop.f32.mrf.mxu0  ;;  %v3248_v3 = vadd.f32 %v3247_v62, %v7443_v9  ;;  %v7447_v6 = vld [vmem:[#allocation51_spill] sm:$0xff] }
 0x285   :  { %3980 = vst [vmem:[%s7272_s2 + $0x98] sm:$0xff] %v4777_v37  ;;  %v4288_v8 = vadd.f32 %v4287_v20, %v4157_v60  ;;  %v3521_v35 = vadd.f32 %v3520_v29, %v3240_v56  ;;  %v3250_v63 = vadd.f32 %v3249_v10, %v7444_v14 }
 0x286   :  { %v4029_v39 = vadd.f32 %v4028_v23, %v3519_v15  ;;  %v4158_v30 = vmul.f32 %v3519_v15, %v3519_v15  ;;  %v3251_v54 = vpop.f32.mrf.mxu1  ;;  %v3522_v36 = vpop.f32.mrf.mxu0 }
 0x287   :  { %v4778_v50 = vpack.c.bf16 %v3521_v35, %v3519_v15  ;;  %v4083_v45 = vadd.f32 %v4082_v46, %v3521_v35  ;;  %v4159_v26 = vmul.f32 %v3521_v35, %v3521_v35  ;;  %v3523_v24 = vadd.f32 %v3522_v36, %v3242_v7  ;;  %v7449_v36 = vld [vmem:[#allocation53_spill] sm:$0xff] }
 0x288   :  { %v4235_v48 = vadd.f32 %v4234_v28, %v4158_v30  ;;  %v3253_v53 = vpop.f32.mrf.mxu1  ;;  %v3524_v17 = vpop.f32.mrf.mxu0  ;;  %v3252_v12 = vadd.f32 %v3251_v54, %v7445_v33  ;;  %v7448_v28 = vld [vmem:[#allocation52_spill] sm:$0xff] }
 0x289   :  { %3981 = vst [vmem:[%s7272_s2 + $0xa0] sm:$0xff] %v4778_v50  ;;  %v4289_v1 = vadd.f32 %v4288_v8, %v4159_v26  ;;  %v3525_v18 = vadd.f32 %v3524_v17, %v3244_v31  ;;  %v4030_v25 = vadd.f32 %v4029_v39, %v3523_v24  ;;  %v4160_v42 = vmul.f32 %v3523_v24, %v3523_v24 }
 0x28a   :  { %v3257_v52 = vpop.f32.mrf.mxu1  ;;  %v3528_v49 = vpop.f32.mrf.mxu0  ;;  %v3254_v4 = vadd.f32 %v3253_v53, %v7446_v34 }
 0x28b   :  { %v4779_v59 = vpack.c.bf16 %v3525_v18, %v3523_v24  ;;  %v4084_v55 = vadd.f32 %v4083_v45, %v3525_v18  ;;  %v4161_v5 = vmul.f32 %v3525_v18, %v3525_v18  ;;  %v4236_v47 = vadd.f32 %v4235_v48, %v4160_v42  ;;  %v7450_v48 = vld [vmem:[#allocation2_spill] sm:$0xff] }
 0x28c   :  { %v3529_v57 = vadd.f32 %v3528_v49, %v3248_v3  ;;  %v3259_v27 = vpop.f32.mrf.mxu1  ;;  %v3530_v58 = vpop.f32.mrf.mxu0  ;;  %v3258_v11 = vadd.f32 %v3257_v52, %v7447_v6  ;;  %v7451_v49 = vld [vmem:[#allocation3_spill] sm:$0xff] }
 0x28d   :  { %3982 = vst [vmem:[%s7272_s2 + $0xa8] sm:$0xff] %v4779_v59  ;;  %v4290_v51 = vadd.f32 %v4289_v1, %v4161_v5  ;;  %v3531_v2 = vadd.f32 %v3530_v58, %v3250_v63  ;;  %v3260_v15 = vadd.f32 %v3259_v27, %v7448_v28 }
 0x28e   :  { %v4031_v19 = vadd.f32 %v4030_v25, %v3529_v57  ;;  %v4162_v43 = vmul.f32 %v3529_v57, %v3529_v57  ;;  %v3261_v16 = vpop.f32.mrf.mxu1  ;;  %v3532_v41 = vpop.f32.mrf.mxu0 }
 0x28f   :  { %v4780_v61 = vpack.c.bf16 %v3531_v2, %v3529_v57  ;;  %v4085_v38 = vadd.f32 %v4084_v55, %v3531_v2  ;;  %v4163_v13 = vmul.f32 %v3531_v2, %v3531_v2  ;;  %v3533_v32 = vadd.f32 %v3532_v41, %v3252_v12  ;;  %v7453_v41 = vld [vmem:[#allocation5_spill] sm:$0xff] }
 0x290   :  { %v4237_v20 = vadd.f32 %v4236_v47, %v4162_v43  ;;  %v3263_v22 = vpop.f32.mrf.mxu1  ;;  %v3534_v23 = vpop.f32.mrf.mxu0  ;;  %v3262_v44 = vadd.f32 %v3261_v16, %v7449_v36  ;;  %v7452_v47 = vld [vmem:[#allocation4_spill] sm:$0xff] }
 0x291   :  { %3983 = vst [vmem:[%s7272_s2 + $0xb0] sm:$0xff] %v4780_v61  ;;  %v4291_v0 = vadd.f32 %v4290_v51, %v4163_v13  ;;  %v3535_v62 = vadd.f32 %v3534_v23, %v3254_v4  ;;  %v4032_v56 = vadd.f32 %v4031_v19, %v3533_v32  ;;  %v4164_v37 = vmul.f32 %v3533_v32, %v3533_v32 }
 0x292   :  { %v3267_v46 = vpop.f32.mrf.mxu1  ;;  %v3538_v60 = vpop.f32.mrf.mxu0  ;;  %v3264_v24 = vadd.f32 %v3263_v22, %v7450_v48 }
 0x293   :  { %v4781_v10 = vpack.c.bf16 %v3535_v62, %v3533_v32  ;;  %v4086_v29 = vadd.f32 %v4085_v38, %v3535_v62  ;;  %v4165_v8 = vmul.f32 %v3535_v62, %v3535_v62  ;;  %v4238_v35 = vadd.f32 %v4237_v20, %v4164_v37  ;;  %v7454_v20 = vld [vmem:[#allocation6_spill] sm:$0xff] }
 0x294   :  { %v3539_v21 = vadd.f32 %v3538_v60, %v3258_v11  ;;  %v3269_v7 = vpop.f32.mrf.mxu1  ;;  %v3540_v39 = vpop.f32.mrf.mxu0  ;;  %v3268_v14 = vadd.f32 %v3267_v46, %v7451_v49  ;;  %v7455_v60 = vld [vmem:[#allocation7_spill] sm:$0xff] }
 0x295   :  { %3984 = vst [vmem:[%s7272_s2 + $0xb8] sm:$0xff] %v4781_v10  ;;  %v4292_v30 = vadd.f32 %v4291_v0, %v4165_v8  ;;  %v3541_v54 = vadd.f32 %v3540_v39, %v3260_v15  ;;  %v3270_v57 = vadd.f32 %v3269_v7, %v7452_v47 }
 0x296   :  { %v4033_v31 = vadd.f32 %v4032_v56, %v3539_v21  ;;  %v4166_v50 = vmul.f32 %v3539_v21, %v3539_v21  ;;  %v3271_v45 = vpop.f32.mrf.mxu1  ;;  %v3542_v26 = vpop.f32.mrf.mxu0 }
 0x297   :  { %v4782_v53 = vpack.c.bf16 %v3541_v54, %v3539_v21  ;;  %v4087_v17 = vadd.f32 %v4086_v29, %v3541_v54  ;;  %v4167_v1 = vmul.f32 %v3541_v54, %v3541_v54  ;;  %v3543_v9 = vadd.f32 %v3542_v26, %v3262_v44  ;;  %v7457_v26 = vld [vmem:[#allocation9_spill] sm:$0xff] }
 0x298   :  { %v4239_v18 = vadd.f32 %v4238_v35, %v4166_v50  ;;  %v3273_v3 = vpop.f32.mrf.mxu1  ;;  %v3544_v25 = vpop.f32.mrf.mxu0  ;;  %v3272_v34 = vadd.f32 %v3271_v45, %v7453_v41  ;;  %v7456_v35 = vld [vmem:[#allocation8_spill] sm:$0xff] }
 0x299   :  { %3985 = vst [vmem:[%s7272_s2 + $0xc0] sm:$0xff] %v4782_v53  ;;  %v4293_v42 = vadd.f32 %v4292_v30, %v4167_v1  ;;  %v3545_v52 = vadd.f32 %v3544_v25, %v3264_v24  ;;  %v4034_v63 = vadd.f32 %v4033_v31, %v3543_v9  ;;  %v4168_v59 = vmul.f32 %v3543_v9, %v3543_v9 }
 0x29a   :  { %v3277_v55 = vpop.f32.mrf.mxu1  ;;  %v3548_v5 = vpop.f32.mrf.mxu0  ;;  %v3274_v32 = vadd.f32 %v3273_v3, %v7454_v20 }
 0x29b   :  { %v4783_v27 = vpack.c.bf16 %v3545_v52, %v3543_v9  ;;  %v4088_v58 = vadd.f32 %v4087_v17, %v3545_v52  ;;  %v4169_v51 = vmul.f32 %v3545_v52, %v3545_v52  ;;  %v4240_v2 = vadd.f32 %v4239_v18, %v4168_v59  ;;  %v7458_v18 = vld [vmem:[#allocation10_spill] sm:$0xff] }
 0x29c   :  { %v3549_v33 = vadd.f32 %v3548_v5, %v3268_v14  ;;  %v3279_v12 = vpop.f32.mrf.mxu1  ;;  %v3550_v19 = vpop.f32.mrf.mxu0  ;;  %v3278_v28 = vadd.f32 %v3277_v55, %v7455_v60  ;;  %v7459_v5 = vld [vmem:[#allocation11_spill] sm:$0xff] }
 0x29d   :  { %3986 = vst [vmem:[%s7272_s2 + $0xc8] sm:$0xff] %v4783_v27  ;;  %v4294_v43 = vadd.f32 %v4293_v42, %v4169_v51  ;;  %v3551_v16 = vadd.f32 %v3550_v19, %v3270_v57  ;;  %v3280_v21 = vadd.f32 %v3279_v12, %v7456_v35 }
 0x29e   :  { %v4035_v4 = vadd.f32 %v4034_v63, %v3549_v33  ;;  %v4170_v61 = vmul.f32 %v3549_v33, %v3549_v33  ;;  %v3281_v38 = vpop.f32.mrf.mxu1  ;;  %v3552_v13 = vpop.f32.mrf.mxu0 }
 0x29f   :  { %v4784_v22 = vpack.c.bf16 %v3551_v16, %v3549_v33  ;;  %v4089_v23 = vadd.f32 %v4088_v58, %v3551_v16  ;;  %v4171_v0 = vmul.f32 %v3551_v16, %v3551_v16  ;;  %v3553_v6 = vadd.f32 %v3552_v13, %v3272_v34  ;;  %v7461_v13 = vld [vmem:[#allocation13_spill] sm:$0xff] }
 0x2a0   :  { %v4241_v62 = vadd.f32 %v4240_v2, %v4170_v61  ;;  %v3283_v11 = vpop.f32.mrf.mxu1  ;;  %v3554_v56 = vpop.f32.mrf.mxu0  ;;  %v3282_v48 = vadd.f32 %v3281_v38, %v7457_v26  ;;  %v7460_v2 = vld [vmem:[#allocation12_spill] sm:$0xff] }
 0x2a1   :  { %3987 = vst [vmem:[%s7272_s2 + $0xd0] sm:$0xff] %v4784_v22  ;;  %v4295_v37 = vadd.f32 %v4294_v43, %v4171_v0  ;;  %v3555_v46 = vadd.f32 %v3554_v56, %v3274_v32  ;;  %v4036_v15 = vadd.f32 %v4035_v4, %v3553_v6  ;;  %v4172_v10 = vmul.f32 %v3553_v6, %v3553_v6 }
 0x2a2   :  { %v3287_v29 = vpop.f32.mrf.mxu1  ;;  %v3558_v8 = vpop.f32.mrf.mxu0  ;;  %v3284_v9 = vadd.f32 %v3283_v11, %v7458_v18 }
 0x2a3   :  { %v4785_v7 = vpack.c.bf16 %v3555_v46, %v3553_v6  ;;  %v4090_v39 = vadd.f32 %v4089_v23, %v3555_v46  ;;  %v4173_v30 = vmul.f32 %v3555_v46, %v3555_v46  ;;  %v4242_v54 = vadd.f32 %v4241_v62, %v4172_v10  ;;  %v7462_v62 = vld [vmem:[#allocation14_spill] sm:$0xff] }
 0x2a4   :  { %v3559_v36 = vadd.f32 %v3558_v8, %v3278_v28  ;;  %v3289_v44 = vpop.f32.mrf.mxu1  ;;  %v3560_v31 = vpop.f32.mrf.mxu0  ;;  %v3288_v47 = vadd.f32 %v3287_v29, %v7459_v5  ;;  %v7463_v8 = vld [vmem:[#allocation15_spill] sm:$0xff] }
 0x2a5   :  { %3988 = vst [vmem:[%s7272_s2 + $0xd8] sm:$0xff] %v4785_v7  ;;  %v4296_v50 = vadd.f32 %v4295_v37, %v4173_v30  ;;  %v3561_v45 = vadd.f32 %v3560_v31, %v3280_v21  ;;  %v3290_v33 = vadd.f32 %v3289_v44, %v7460_v2 }
 0x2a6   :  { %v4037_v24 = vadd.f32 %v4036_v15, %v3559_v36  ;;  %v4174_v53 = vmul.f32 %v3559_v36, %v3559_v36  ;;  %v3291_v17 = vpop.f32.mrf.mxu1  ;;  %v3562_v1 = vpop.f32.mrf.mxu0 }
 0x2a7   :  { %v4786_v3 = vpack.c.bf16 %v3561_v45, %v3559_v36  ;;  %v4091_v25 = vadd.f32 %v4090_v39, %v3561_v45  ;;  %v4175_v42 = vmul.f32 %v3561_v45, %v3561_v45  ;;  %v3563_v49 = vadd.f32 %v3562_v1, %v3282_v48  ;;  %v7465_v1 = vld [vmem:[#allocation17_spill] sm:$0xff] }
 0x2a8   :  { %v4243_v52 = vadd.f32 %v4242_v54, %v4174_v53  ;;  %v3293_v14 = vpop.f32.mrf.mxu1  ;;  %v3564_v63 = vpop.f32.mrf.mxu0  ;;  %v3292_v20 = vadd.f32 %v3291_v17, %v7461_v13  ;;  %v7464_v54 = vld [vmem:[#allocation16_spill] sm:$0xff] }
 0x2a9   :  { %3989 = vst [vmem:[%s7272_s2 + $0xe0] sm:$0xff] %v4786_v3  ;;  %v4297_v59 = vadd.f32 %v4296_v50, %v4175_v42  ;;  %v3565_v55 = vadd.f32 %v3564_v63, %v3284_v9  ;;  %v4038_v57 = vadd.f32 %v4037_v24, %v3563_v49  ;;  %v4176_v27 = vmul.f32 %v3563_v49, %v3563_v49 }
 0x2aa   :  { %v3297_v58 = vpop.f32.mrf.mxu1  ;;  %v3568_v51 = vpop.f32.mrf.mxu0  ;;  %v3294_v6 = vadd.f32 %v3293_v14, %v7462_v62 }
 0x2ab   :  { %v4787_v12 = vpack.c.bf16 %v3565_v55, %v3563_v49  ;;  %v4092_v19 = vadd.f32 %v4091_v25, %v3565_v55  ;;  %v4177_v43 = vmul.f32 %v3565_v55, %v3565_v55  ;;  %v4244_v16 = vadd.f32 %v4243_v52, %v4176_v27  ;;  %v7466_v52 = vld [vmem:[#allocation18_spill] sm:$0xff] }
 0x2ac   :  { %v3569_v41 = vadd.f32 %v3568_v51, %v3288_v47  ;;  %v3299_v34 = vpop.f32.mrf.mxu1  ;;  %v3570_v4 = vpop.f32.mrf.mxu0  ;;  %v3298_v35 = vadd.f32 %v3297_v58, %v7463_v8  ;;  %v7467_v51 = vld [vmem:[#allocation19_spill] sm:$0xff] }
 0x2ad   :  { %3990 = vst [vmem:[%s7272_s2 + $0xe8] sm:$0xff] %v4787_v12  ;;  %v4298_v61 = vadd.f32 %v4297_v59, %v4177_v43  ;;  %v3571_v38 = vadd.f32 %v3570_v4, %v3290_v33  ;;  %v3300_v36 = vadd.f32 %v3299_v34, %v7464_v54 }
 0x2ae   :  { %v4039_v32 = vadd.f32 %v4038_v57, %v3569_v41  ;;  %v4178_v22 = vmul.f32 %v3569_v41, %v3569_v41  ;;  %v3301_v23 = vpop.f32.mrf.mxu1  ;;  %v3572_v0 = vpop.f32.mrf.mxu0 }
 0x2af   :  { %v4788_v11 = vpack.c.bf16 %v3571_v38, %v3569_v41  ;;  %v4093_v56 = vadd.f32 %v4092_v19, %v3571_v38  ;;  %v4179_v37 = vmul.f32 %v3571_v38, %v3571_v38  ;;  %v3573_v60 = vadd.f32 %v3572_v0, %v3292_v20  ;;  %v7469_v0 = vld [vmem:[#allocation21_spill] sm:$0xff] }
 0x2b0   :  { %v4245_v46 = vadd.f32 %v4244_v16, %v4178_v22  ;;  %v3303_v28 = vpop.f32.mrf.mxu1  ;;  %v3574_v15 = vpop.f32.mrf.mxu0  ;;  %v3302_v18 = vadd.f32 %v3301_v23, %v7465_v1  ;;  %v7468_v16 = vld [vmem:[#allocation20_spill] sm:$0xff] }
 0x2b1   :  { %3991 = vst [vmem:[%s7272_s2 + $0xf0] sm:$0xff] %v4788_v11  ;;  %v4299_v10 = vadd.f32 %v4298_v61, %v4179_v37  ;;  %v3575_v29 = vadd.f32 %v3574_v15, %v3294_v6  ;;  %v4040_v21 = vadd.f32 %v4039_v32, %v3573_v60  ;;  %v4180_v7 = vmul.f32 %v3573_v60, %v3573_v60 }
 0x2b2   :  { %v3307_v39 = vpop.f32.mrf.mxu1  ;;  %v3578_v30 = vpop.f32.mrf.mxu0  ;;  %v3304_v49 = vadd.f32 %v3303_v28, %v7466_v52 }
 0x2b3   :  { %v4789_v44 = vpack.c.bf16 %v3575_v29, %v3573_v60  ;;  %v4094_v31 = vadd.f32 %v4093_v56, %v3575_v29  ;;  %v4181_v50 = vmul.f32 %v3575_v29, %v3575_v29  ;;  %v4246_v45 = vadd.f32 %v4245_v46, %v4180_v7  ;;  %v7470_v46 = vld [vmem:[#allocation22_spill] sm:$0xff] }
 0x2b4   :  { %v3579_v26 = vadd.f32 %v3578_v30, %v3298_v35  ;;  %v3309_v48 = vpop.f32.mrf.mxu1  ;;  %v3580_v24 = vpop.f32.mrf.mxu0  ;;  %v3308_v2 = vadd.f32 %v3307_v39, %v7467_v51  ;;  %v7471_v30 = vld [vmem:[#allocation23_spill] sm:$0xff] }
 0x2b5   :  { %3992 = vst [vmem:[%s7272_s2 + $0xf8] sm:$0xff] %v4789_v44  ;;  %v4300_v53 = vadd.f32 %v4299_v10, %v4181_v50  ;;  %v3581_v17 = vadd.f32 %v3580_v24, %v3300_v36  ;;  %v3310_v41 = vadd.f32 %v3309_v48, %v7468_v16 }
 0x2b6   :  { %v4041_v9 = vadd.f32 %v4040_v21, %v3579_v26  ;;  %v4182_v3 = vmul.f32 %v3579_v26, %v3579_v26  ;;  %v3311_v25 = vpop.f32.mrf.mxu1  ;;  %v3582_v42 = vpop.f32.mrf.mxu0 }
 0x2b7   :  { %v4790_v14 = vpack.c.bf16 %v3581_v17, %v3579_v26  ;;  %v4095_v63 = vadd.f32 %v4094_v31, %v3581_v17  ;;  %v4183_v59 = vmul.f32 %v3581_v17, %v3581_v17  ;;  %v3583_v5 = vadd.f32 %v3582_v42, %v3302_v18  ;;  %v7473_v42 = vld [vmem:[#allocation25_spill] sm:$0xff] }
 0x2b8   :  { %v4247_v55 = vadd.f32 %v4246_v45, %v4182_v3  ;;  %v3313_v47 = vpop.f32.mrf.mxu1  ;;  %v3584_v57 = vpop.f32.mrf.mxu0  ;;  %v3312_v62 = vadd.f32 %v3311_v25, %v7469_v0  ;;  %v7472_v45 = vld [vmem:[#allocation24_spill] sm:$0xff] }
 0x2b9   :  { %3993 = vst [vmem:[%s7272_s2 + $0x100] sm:$0xff] %v4790_v14  ;;  %v4301_v27 = vadd.f32 %v4300_v53, %v4183_v59  ;;  %v3585_v58 = vadd.f32 %v3584_v57, %v3304_v49  ;;  %v4042_v33 = vadd.f32 %v4041_v9, %v3583_v5  ;;  %v4184_v12 = vmul.f32 %v3583_v5, %v3583_v5 }
 0x2ba   :  { %v3317_v19 = vpop.f32.mrf.mxu1  ;;  %v3588_v43 = vpop.f32.mrf.mxu0  ;;  %v3314_v60 = vadd.f32 %v3313_v47, %v7470_v46 }
 0x2bb   :  { %v4791_v34 = vpack.c.bf16 %v3585_v58, %v3583_v5  ;;  %v4096_v4 = vadd.f32 %v4095_v63, %v3585_v58  ;;  %v4185_v61 = vmul.f32 %v3585_v58, %v3585_v58  ;;  %v4248_v38 = vadd.f32 %v4247_v55, %v4184_v12  ;;  %v7474_v55 = vld [vmem:[#allocation26_spill] sm:$0xff] }
 0x2bc   :  { %v3589_v13 = vadd.f32 %v3588_v43, %v3308_v2  ;;  %v3319_v20 = vpop.f32.mrf.mxu1  ;;  %v3590_v32 = vpop.f32.mrf.mxu0  ;;  %v3318_v54 = vadd.f32 %v3317_v19, %v7471_v30  ;;  %v7475_v43 = vld [vmem:[#allocation27_spill] sm:$0xff] }
 0x2bd   :  { %3994 = vst [vmem:[%s7272_s2 + $0x108] sm:$0xff] %v4791_v34  ;;  %v4302_v22 = vadd.f32 %v4301_v27, %v4185_v61  ;;  %v3591_v23 = vadd.f32 %v3590_v32, %v3310_v41  ;;  %v3320_v26 = vadd.f32 %v3319_v20, %v7472_v45 }
 0x2be   :  { %v4043_v6 = vadd.f32 %v4042_v33, %v3589_v13  ;;  %v4186_v11 = vmul.f32 %v3589_v13, %v3589_v13  ;;  %v3321_v56 = vpop.f32.mrf.mxu1  ;;  %v3592_v37 = vpop.f32.mrf.mxu0 }
 0x2bf   :  { %v4792_v28 = vpack.c.bf16 %v3591_v23, %v3589_v13  ;;  %v4097_v15 = vadd.f32 %v4096_v4, %v3591_v23  ;;  %v4187_v10 = vmul.f32 %v3591_v23, %v3591_v23  ;;  %v3593_v8 = vadd.f32 %v3592_v37, %v3312_v62  ;;  %v7477_v37 = vld [vmem:[#allocation29_spill] sm:$0xff] }
 0x2c0   :  { %v4249_v29 = vadd.f32 %v4248_v38, %v4186_v11  ;;  %v3323_v35 = vpop.f32.mrf.mxu1  ;;  %v3594_v21 = vpop.f32.mrf.mxu0  ;;  %v3322_v52 = vadd.f32 %v3321_v56, %v7473_v42  ;;  %v7476_v38 = vld [vmem:[#allocation28_spill] sm:$0xff] }
 0x2c1   :  { %3995 = vst [vmem:[%s7272_s2 + $0x110] sm:$0xff] %v4792_v28  ;;  %v4303_v7 = vadd.f32 %v4302_v22, %v4187_v10  ;;  %v3595_v39 = vadd.f32 %v3594_v21, %v3314_v60  ;;  %v4044_v36 = vadd.f32 %v4043_v6, %v3593_v8  ;;  %v4188_v44 = vmul.f32 %v3593_v8, %v3593_v8 }
 0x2c2   :  { %v3327_v31 = vpop.f32.mrf.mxu1  ;;  %v3598_v50 = vpop.f32.mrf.mxu0  ;;  %v3324_v5 = vadd.f32 %v3323_v35, %v7474_v55 }
 0x2c3   :  { %v4793_v48 = vpack.c.bf16 %v3595_v39, %v3593_v8  ;;  %v4098_v24 = vadd.f32 %v4097_v15, %v3595_v39  ;;  %v4189_v53 = vmul.f32 %v3595_v39, %v3595_v39  ;;  %v4250_v17 = vadd.f32 %v4249_v29, %v4188_v44  ;;  %v7478_v29 = vld [vmem:[#allocation30_spill] sm:$0xff] }
 0x2c4   :  { %v3599_v1 = vadd.f32 %v3598_v50, %v3318_v54  ;;  %v3329_v18 = vpop.f32.mrf.mxu1  ;;  %v3600_v9 = vpop.f32.mrf.mxu0  ;;  %v3328_v16 = vadd.f32 %v3327_v31, %v7475_v43  ;;  %v7479_v50 = vld [vmem:[#allocation31_spill] sm:$0xff] }
 0x2c5   :  { %3996 = vst [vmem:[%s7272_s2 + $0x118] sm:$0xff] %v4793_v48  ;;  %v4304_v3 = vadd.f32 %v4303_v7, %v4189_v53  ;;  %v3601_v25 = vadd.f32 %v3600_v9, %v3320_v26  ;;  %v3330_v13 = vadd.f32 %v3329_v18, %v7476_v38 }
 0x2c6   :  { %v4045_v49 = vadd.f32 %v4044_v36, %v3599_v1  ;;  %v4190_v14 = vmul.f32 %v3599_v1, %v3599_v1  ;;  %v3331_v63 = vpop.f32.mrf.mxu1  ;;  %v3602_v59 = vpop.f32.mrf.mxu0 }
 0x2c7   :  { %v4794_v47 = vpack.c.bf16 %v3601_v25, %v3599_v1  ;;  %v4099_v57 = vadd.f32 %v4098_v24, %v3601_v25  ;;  %v4191_v27 = vmul.f32 %v3601_v25, %v3601_v25  ;;  %v3603_v51 = vadd.f32 %v3602_v59, %v3322_v52  ;;  %v7481_v59 = vld [vmem:[#allocation33_spill] sm:$0xff] }
 0x2c8   :  { %v4251_v58 = vadd.f32 %v4250_v17, %v4190_v14  ;;  %v3333_v2 = vpop.f32.mrf.mxu1  ;;  %v3604_v33 = vpop.f32.mrf.mxu0  ;;  %v3332_v46 = vadd.f32 %v3331_v63, %v7477_v37  ;;  %v7480_v17 = vld [vmem:[#allocation32_spill] sm:$0xff] }
 0x2c9   :  { %3997 = vst [vmem:[%s7272_s2 + $0x120] sm:$0xff] %v4794_v47  ;;  %v4305_v12 = vadd.f32 %v4304_v3, %v4191_v27  ;;  %v3605_v19 = vadd.f32 %v3604_v33, %v3324_v5  ;;  %v4046_v41 = vadd.f32 %v4045_v49, %v3603_v51  ;;  %v4192_v34 = vmul.f32 %v3603_v51, %v3603_v51 }
 0x2ca   :  { %v3337_v4 = vpop.f32.mrf.mxu1  ;;  %v3608_v61 = vpop.f32.mrf.mxu0  ;;  %v3334_v8 = vadd.f32 %v3333_v2, %v7478_v29 }
 0x2cb   :  { %v4795_v20 = vpack.c.bf16 %v3605_v19, %v3603_v51  ;;  %v4100_v32 = vadd.f32 %v4099_v57, %v3605_v19  ;;  %v4193_v22 = vmul.f32 %v3605_v19, %v3605_v19  ;;  %v4252_v23 = vadd.f32 %v4251_v58, %v4192_v34  ;;  %v7482_v58 = vld [vmem:[#allocation34_spill] sm:$0xff] }
 0x2cc   :  { %v3609_v0 = vadd.f32 %v3608_v61, %v3328_v16  ;;  %v3339_v62 = vpop.f32.mrf.mxu1  ;;  %v3610_v6 = vpop.f32.mrf.mxu0  ;;  %v3338_v45 = vadd.f32 %v3337_v4, %v7479_v50  ;;  %v7483_v61 = vld [vmem:[#allocation35_spill] sm:$0xff] }
 0x2cd   :  { %3998 = vst [vmem:[%s7272_s2 + $0x128] sm:$0xff] %v4795_v20  ;;  %v4306_v11 = vadd.f32 %v4305_v12, %v4193_v22  ;;  %v3611_v56 = vadd.f32 %v3610_v6, %v3330_v13  ;;  %v3340_v1 = vadd.f32 %v3339_v62, %v7480_v17 }
 0x2ce   :  { %v4047_v60 = vadd.f32 %v4046_v41, %v3609_v0  ;;  %v4194_v28 = vmul.f32 %v3609_v0, %v3609_v0  ;;  %v3341_v15 = vpop.f32.mrf.mxu1  ;;  %v3612_v10 = vpop.f32.mrf.mxu0 }
 0x2cf   :  { %v4796_v35 = vpack.c.bf16 %v3611_v56, %v3609_v0  ;;  %v4101_v21 = vadd.f32 %v4100_v32, %v3611_v56  ;;  %v4195_v7 = vmul.f32 %v3611_v56, %v3611_v56  ;;  %v3613_v30 = vadd.f32 %v3612_v10, %v3332_v46  ;;  %v7485_v10 = vld [vmem:[#allocation37_spill] sm:$0xff] }
 0x2d0   :  { %v4253_v39 = vadd.f32 %v4252_v23, %v4194_v28  ;;  %v3343_v54 = vpop.f32.mrf.mxu1  ;;  %v3614_v36 = vpop.f32.mrf.mxu0  ;;  %v3342_v55 = vadd.f32 %v3341_v15, %v7481_v59  ;;  %v7484_v23 = vld [vmem:[#allocation36_spill] sm:$0xff] }
 0x2d1   :  { %3999 = vst [vmem:[%s7272_s2 + $0x130] sm:$0xff] %v4796_v35  ;;  %v4307_v44 = vadd.f32 %v4306_v11, %v4195_v7  ;;  %v3615_v31 = vadd.f32 %v3614_v36, %v3334_v8  ;;  %v4048_v26 = vadd.f32 %v4047_v60, %v3613_v30  ;;  %v4196_v48 = vmul.f32 %v3613_v30, %v3613_v30 }
 0x2d2   :  { %v3347_v24 = vpop.f32.mrf.mxu1  ;;  %v3618_v53 = vpop.f32.mrf.mxu0  ;;  %v3344_v51 = vadd.f32 %v3343_v54, %v7482_v58 }
 0x2d3   :  { %v4797_v18 = vpack.c.bf16 %v3615_v31, %v3613_v30  ;;  %v4102_v9 = vadd.f32 %v4101_v21, %v3615_v31  ;;  %v4197_v3 = vmul.f32 %v3615_v31, %v3615_v31  ;;  %v4254_v25 = vadd.f32 %v4253_v39, %v4196_v48  ;;  %v7486_v39 = vld [vmem:[#allocation38_spill] sm:$0xff] }
 0x2d4   :  { %v3619_v42 = vadd.f32 %v3618_v53, %v3338_v45  ;;  %v3349_v52 = vpop.f32.mrf.mxu1  ;;  %v3620_v49 = vpop.f32.mrf.mxu0  ;;  %v3348_v38 = vadd.f32 %v3347_v24, %v7483_v61  ;;  %v7487_v53 = vld [vmem:[#allocation39_spill] sm:$0xff] }
 0x2d5   :  { %4000 = vst [vmem:[%s7272_s2 + $0x138] sm:$0xff] %v4797_v18  ;;  %v4308_v14 = vadd.f32 %v4307_v44, %v4197_v3  ;;  %v3621_v63 = vadd.f32 %v3620_v49, %v3340_v1  ;;  %v3350_v0 = vadd.f32 %v3349_v52, %v7484_v23 }
 0x2d6   :  { %v4049_v5 = vadd.f32 %v4048_v26, %v3619_v42  ;;  %v4198_v47 = vmul.f32 %v3619_v42, %v3619_v42  ;;  %v3351_v57 = vpop.f32.mrf.mxu1  ;;  %v3622_v27 = vpop.f32.mrf.mxu0 }
 0x2d7   :  { %v4798_v2 = vpack.c.bf16 %v3621_v63, %v3619_v42  ;;  %v4103_v33 = vadd.f32 %v4102_v9, %v3621_v63  ;;  %v4199_v12 = vmul.f32 %v3621_v63, %v3621_v63  ;;  %v3623_v43 = vadd.f32 %v3622_v27, %v3342_v55  ;;  %v7489_v27 = vld [vmem:[#allocation41_spill] sm:$0xff] }
 0x2d8   :  { %v4255_v19 = vadd.f32 %v4254_v25, %v4198_v47  ;;  %v3353_v16 = vpop.f32.mrf.mxu1  ;;  %v3624_v41 = vpop.f32.mrf.mxu0  ;;  %v3352_v29 = vadd.f32 %v3351_v57, %v7485_v10  ;;  %v7488_v25 = vld [vmem:[#allocation40_spill] sm:$0xff] }
 0x2d9   :  { %4001 = vst [vmem:[%s7272_s2 + $0x140] sm:$0xff] %v4798_v2  ;;  %v4309_v34 = vadd.f32 %v4308_v14, %v4199_v12  ;;  %v3625_v4 = vadd.f32 %v3624_v41, %v3344_v51  ;;  %v4050_v13 = vadd.f32 %v4049_v5, %v3623_v43  ;;  %v4200_v20 = vmul.f32 %v3623_v43, %v3623_v43 }
 0x2da   :  { %v3357_v32 = vpop.f32.mrf.mxu1  ;;  %v3628_v22 = vpop.f32.mrf.mxu0  ;;  %v3354_v30 = vadd.f32 %v3353_v16, %v7486_v39 }
 0x2db   :  { %v4799_v62 = vpack.c.bf16 %v3625_v4, %v3623_v43  ;;  %v4104_v6 = vadd.f32 %v4103_v33, %v3625_v4  ;;  %v4201_v11 = vmul.f32 %v3625_v4, %v3625_v4  ;;  %v4256_v56 = vadd.f32 %v4255_v19, %v4200_v20 }
 0x2dc   :  { %v3629_v37 = vadd.f32 %v3628_v22, %v3348_v38  ;;  %v3359_v46 = vpop.f32.mrf.mxu1  ;;  %v3630_v60 = vpop.f32.mrf.mxu0  ;;  %v3358_v17 = vadd.f32 %v3357_v32, %v7487_v53  ;;  %v7490_v32 = vld [vmem:[#allocation42_spill] sm:$0xff] }
 0x2dd   :  { %4002 = vst [vmem:[%s7272_s2 + $0x148] sm:$0xff] %v4799_v62  ;;  %v4310_v28 = vadd.f32 %v4309_v34, %v4201_v11  ;;  %v3631_v15 = vadd.f32 %v3630_v60, %v3350_v0  ;;  %v3360_v42 = vadd.f32 %v3359_v46, %v7488_v25 }
 0x2de   :  { %v4051_v8 = vadd.f32 %v4050_v13, %v3629_v37  ;;  %v4202_v35 = vmul.f32 %v3629_v37, %v3629_v37  ;;  %v3361_v21 = vpop.f32.mrf.mxu1  ;;  %v3632_v7 = vpop.f32.mrf.mxu0 }
 0x2df   :  { %v4800_v54 = vpack.c.bf16 %v3631_v15, %v3629_v37  ;;  %v4105_v36 = vadd.f32 %v4104_v6, %v3631_v15  ;;  %v4203_v44 = vmul.f32 %v3631_v15, %v3631_v15  ;;  %v3633_v50 = vadd.f32 %v3632_v7, %v3352_v29  ;;  %v7492_v29 = vld [vmem:[#allocation44_spill] sm:$0xff]  ;;  %v7493_v7 = vld [vmem:[#allocation45_spill] sm:$0xff] }
 0x2e0   :  { %v4257_v31 = vadd.f32 %v4256_v56, %v4202_v35  ;;  %v3363_v45 = vpop.f32.mrf.mxu1  ;;  %v3634_v26 = vpop.f32.mrf.mxu0  ;;  %v3362_v58 = vadd.f32 %v3361_v21, %v7489_v27 }
 0x2e1   :  { %4003 = vst [vmem:[%s7272_s2 + $0x150] sm:$0xff] %v4800_v54  ;;  %v4311_v48 = vadd.f32 %v4310_v28, %v4203_v44  ;;  %v3635_v24 = vadd.f32 %v3634_v26, %v3354_v30  ;;  %v4052_v1 = vadd.f32 %v4051_v8, %v3633_v50  ;;  %v4204_v18 = vmul.f32 %v3633_v50, %v3633_v50 }
 0x2e2   :  { %v3367_v9 = vpop.f32.mrf.mxu1  ;;  %v3638_v3 = vpop.f32.mrf.mxu0  ;;  %v3364_v19 = vadd.f32 %v3363_v45, %v6986_v40  ;;  %v7491_v40 = vld [vmem:[#allocation43_spill] sm:$0xff] }
 0x2e3   :  { %v4801_v52 = vpack.c.bf16 %v3635_v24, %v3633_v50  ;;  %v4106_v49 = vadd.f32 %v4105_v36, %v3635_v24  ;;  %v4205_v14 = vmul.f32 %v3635_v24, %v3635_v24  ;;  %v4258_v63 = vadd.f32 %v4257_v31, %v4204_v18 }
 0x2e4   :  { %v3639_v59 = vadd.f32 %v3638_v3, %v3358_v17  ;;  %v3369_v55 = vpop.f32.mrf.mxu1  ;;  %v3640_v5 = vpop.f32.mrf.mxu0  ;;  %v3368_v22 = vadd.f32 %v3367_v9, %v7490_v32  ;;  %v7494_v3 = vld [vmem:[#allocation46_spill] sm:$0xff] }
 0x2e5   :  { %4004 = vst [vmem:[%s7272_s2 + $0x158] sm:$0xff] %v4801_v52  ;;  %v4312_v47 = vadd.f32 %v4311_v48, %v4205_v14  ;;  %v3641_v57 = vadd.f32 %v3640_v5, %v3360_v42  ;;  %v3370_v11 = vadd.f32 %v3369_v55, %v7491_v40  ;;  %v7495_v42 = vld [vmem:[#allocation47_spill] sm:$0xff] }
 0x2e6   :  { %v4053_v51 = vadd.f32 %v4052_v1, %v3639_v59  ;;  %v4206_v2 = vmul.f32 %v3639_v59, %v3639_v59  ;;  %v3371_v33 = vpop.f32.mrf.mxu1  ;;  %v3642_v12 = vpop.f32.mrf.mxu0 }
 0x2e7   :  { %v4802_v43 = vpack.c.bf16 %v3641_v57, %v3639_v59  ;;  %v4107_v16 = vadd.f32 %v4106_v49, %v3641_v57  ;;  %v4207_v41 = vmul.f32 %v3641_v57, %v3641_v57  ;;  %v3643_v4 = vadd.f32 %v3642_v12, %v3362_v58 }
 0x2e8   :  { %v4259_v34 = vadd.f32 %v4258_v63, %v4206_v2  ;;  %v3373_v61 = vpop.f32.mrf.mxu1  ;;  %v3644_v38 = vpop.f32.mrf.mxu0  ;;  %v3372_v8 = vadd.f32 %v3371_v33, %v7492_v29 }
 0x2e9   :  { %4005 = vst [vmem:[%s7272_s2 + $0x160] sm:$0xff] %v4802_v43  ;;  %v4313_v13 = vadd.f32 %v4312_v47, %v4207_v41  ;;  %v3645_v20 = vadd.f32 %v3644_v38, %v3364_v19  ;;  %v4054_v23 = vadd.f32 %v4053_v51, %v3643_v4  ;;  %v4208_v0 = vmul.f32 %v3643_v4, %v3643_v4 }
 0x2ea   :  { %v3377_v62 = vpop.f32.mrf.mxu1  ;;  %v3648_v6 = vpop.f32.mrf.mxu0  ;;  %v3374_v39 = vadd.f32 %v3373_v61, %v7493_v7 }
 0x2eb   :  { %v4803_v56 = vpack.c.bf16 %v3645_v20, %v3643_v4  ;;  %v4108_v37 = vadd.f32 %v4107_v16, %v3645_v20  ;;  %v4209_v46 = vmul.f32 %v3645_v20, %v3645_v20  ;;  %v4260_v60 = vadd.f32 %v4259_v34, %v4208_v0 }
 0x2ec   :  { %v3649_v28 = vadd.f32 %v3648_v6, %v3368_v22  ;;  %v3379_v15 = vpop.f32.mrf.mxu1  ;;  %v3650_v10 = vpop.f32.mrf.mxu0  ;;  %v3378_v25 = vadd.f32 %v3377_v62, %v7494_v3 }
 0x2ed   :  { %4006 = vst [vmem:[%s7272_s2 + $0x168] sm:$0xff] %v4803_v56  ;;  %v4314_v35 = vadd.f32 %v4313_v13, %v4209_v46  ;;  %v3651_v21 = vadd.f32 %v3650_v10, %v3370_v11  ;;  %v3380_v52 = vadd.f32 %v3379_v15, %v7495_v42 }
 0x2ee   :  { %v4055_v30 = vadd.f32 %v4054_v23, %v3649_v28  ;;  %v4210_v54 = vmul.f32 %v3649_v28, %v3649_v28  ;;  %v3652_v36 = vpop.f32.mrf.mxu0  ;;  %v3381_v44 = vpop.f32.mrf.mxu1 }
 0x2ef   :  { %v4804_v31 = vpack.c.bf16 %v3651_v21, %v3649_v28  ;;  %v4109_v50 = vadd.f32 %v4108_v37, %v3651_v21  ;;  %v4211_v45 = vmul.f32 %v3651_v21, %v3651_v21  ;;  %v3653_v26 = vadd.f32 %v3652_v36, %v3372_v8 }
 0x2f0   :  { %v4261_v48 = vadd.f32 %v4260_v60, %v4210_v54  ;;  %v3654_v24 = vpop.f32.mrf.mxu0  ;;  %v3382_v53 = vpop.f32.mrf.mxu1 }
 0x2f1   :  { %4007 = vst [vmem:[%s7272_s2 + $0x170] sm:$0xff] %v4804_v31  ;;  %v4315_v17 = vadd.f32 %v4314_v35, %v4211_v45  ;;  %v4056_v1 = vadd.f32 %v4055_v30, %v3653_v26  ;;  %v4212_v18 = vmul.f32 %v3653_v26, %v3653_v26  ;;  %v3655_v9 = vadd.f32 %v3654_v24, %v3374_v39 }
 0x2f2   :  { %v3658_v49 = vpop.f32.mrf.mxu0 }
 0x2f3   :  { %v4262_v14 = vadd.f32 %v4261_v48, %v4212_v18  ;;  %v4805_v63 = vpack.c.bf16 %v3655_v9, %v3653_v26  ;;  %v4110_v59 = vadd.f32 %v4109_v50, %v3655_v9  ;;  %v4213_v55 = vmul.f32 %v3655_v9, %v3655_v9 }
 0x2f4   :  { %v3659_v5 = vadd.f32 %v3658_v49, %v3378_v25  ;;  %v3660_v47 = vpop.f32.mrf.mxu0 }
 0x2f5   :  { %4008 = vst [vmem:[%s7272_s2 + $0x178] sm:$0xff] %v4805_v63  ;;  %v4316_v57 = vadd.f32 %v4315_v17, %v4213_v55  ;;  %v3661_v27 = vadd.f32 %v3660_v47, %v3380_v52 }
 0x2f6   :  { %v4057_v58 = vadd.f32 %v4056_v1, %v3659_v5  ;;  %v4214_v51 = vmul.f32 %v3659_v5, %v3659_v5  ;;  %v3662_v2 = vpop.f32.mrf.mxu0 }
 0x2f7   :  { %v4806_v33 = vpack.c.bf16 %v3661_v27, %v3659_v5  ;;  %v4111_v12 = vadd.f32 %v4110_v59, %v3661_v27  ;;  %v4215_v19 = vmul.f32 %v3661_v27, %v3661_v27 }
 0x2f8   :  { %v4058_v43 = vrot.slane %v4057_v58, 4  ;;  %v4263_v16 = vadd.f32 %v4262_v14, %v4214_v51  ;;  %v3663_v41 = vpop.f32.mrf.mxu0 }
 0x2f9   :  { %4009 = vst [vmem:[%s7272_s2 + $0x180] sm:$0xff] %v4806_v33  ;;  %v4112_v34 = vrot.slane %v4111_v12, 4  ;;  %v4317_v4 = vadd.f32 %v4316_v57, %v4215_v19 }
 0x2fa   :  { %v4059_v61 = vadd.f32 %v4058_v43, %v4057_v58  ;;  %v4264_v38 = vrot.slane %v4263_v16, 4 }
 0x2fb   :  { %v4113_v13 = vadd.f32 %v4112_v34, %v4111_v12  ;;  %v4318_v20 = vrot.slane %v4317_v4, 4 }
 0x2fc   :  { %v4060_v32 = vrot.slane %v4059_v61, 2  ;;  %v4265_v22 = vadd.f32 %v4264_v38, %v4263_v16 }
 0x2fd   :  { %v4114_v23 = vrot.slane %v4113_v13, 2  ;;  %v4319_v0 = vadd.f32 %v4318_v20, %v4317_v4 }
 0x2fe   :  { %v4061_v62 = vadd.f32 %v4060_v32, %v4059_v61  ;;  %v4266_v6 = vrot.slane %v4265_v22, 2 }
 0x2ff   :  { %v4115_v40 = vadd.f32 %v4114_v23, %v4113_v13  ;;  %v4320_v11 = vrot.slane %v4319_v0, 2 }
 0x300   :  { %v4062_v56 = vrot.slane %v4061_v62, 1  ;;  %v4267_v37 = vadd.f32 %v4266_v6, %v4265_v22 }
 0x301   :  { %v4116_v46 = vrot.slane %v4115_v40, 1  ;;  %v4321_v60 = vadd.f32 %v4320_v11, %v4319_v0 }
 0x302   :  { %v4063_v28 = vadd.f32 %v4062_v56, %v4061_v62  ;;  %v4268_v15 = vrot.slane %v4267_v37, 1 }
 0x303   :  { %v4117_v10 = vadd.f32 %v4116_v46, %v4115_v40  ;;  %v4322_v29 = vrot.slane %v4321_v60, 1 }
 0x304   :  { %v4269_v8 = vadd.f32 %v4268_v15, %v4267_v37  ;;  %4324 = vst [vmem:[%s7273_s3] sm:$0xff] %v4063_v28 }
 0x305   :  { %v4323_v35 = vadd.f32 %v4322_v29, %v4321_v60  ;;  %4325 = vst [vmem:[%s7273_s3 + $0x8] sm:$0xff] %v4117_v10 }
 0x306   :  { %4326 = vst [vmem:[%s7274_s4] sm:$0xff] %v4269_v8 }
 0x307   :  { %4327 = vst [vmem:[%s7274_s4 + $0x8] sm:$0xff] %v4323_v35 }

</bundles_post_ra>
